<compile_context>
chip_gen: v5e
topology: v5e:2x2
jax: 0.10.0
libtpu: 0.0.40
codegen_flags: <defaults>
</compile_context>

<pallas_src>
import numpy as np
import jax
import jax.numpy as jnp
from jax.experimental import pallas as pl
from jax.experimental.pallas import tpu as pltpu

# ---- constants from the PyTorch module -------------------------------------
DEP_DIM = 5
DIR_DIM = 1
LEMMA_DIM = 50
POS_DIM = 4
LSTM_HIDDEN_DIM = 60
NUM_LAYERS = 2
PATH_INPUT_DIM = LEMMA_DIM + POS_DIM + DEP_DIM + DIR_DIM  # 60
NUM_REL = 2  # num_relations

# padded layouts for the kernel
HID_PAD = 64                  # hidden / feature dim padded 60 -> 64 (lane friendly)
GATES_PAD = 4 * HID_PAD       # 256-wide fused gate output

# small synthetic sizes
NUM_LEMMAS_EN = 20
NUM_LEMMAS_HI = 20
NUM_POS = 8
NUM_DEP = 8
NUM_DIR = 5
NT = 3                        # number of translations
P = 4                         # paths per path-set
T = 6                         # max path length (time steps)
S = 1 + 2 * NT                # path sets: mono + NT en + NT hi = 7
SP = S * P                    # 28 paths total
SPP = 32                      # paths padded to a full sublane multiple

# ---- packed-slab row layouts (all offsets sublane-aligned) ------------------
# LSTM slab (lane = 256): wih0 | whh0 | [wih1;whh1] | b0 | b1
LW_WIH0 = 0
LW_WHH0 = HID_PAD                 # 64
LW_W1CAT = 2 * HID_PAD            # 128 (128 rows: wih1 rows 0:64, whh1 rows 64:128)
LW_B0 = 4 * HID_PAD               # 256
LW_B1 = 4 * HID_PAD + 8           # 264
LW_ROWS = 4 * HID_PAD + 16        # 272

# small-input slab (lane = 128): xy row | x·trans rows | attention-input rows
SI_XY = 0
SI_XT = 8
SI_ATT = 16
SI_ROWS = 24

# fc / attention weight slab (lane = 64)
FCW_WM1XY = 0       # (128, 64)
FCW_WM1P = 128      # (64, 64)
FCW_BM1 = 192       # row
FCW_WM2 = 200       # (64, 64)
FCW_BM2 = 264
FCW_WA1 = 272       # (128, 64)
FCW_BA1 = 400
FCW_WA2 = 408       # (64, 64) (only col 0 used)
FCW_BA2 = 472
FCW_WC1XT = 480     # (128, 64)
FCW_WC1P = 608      # (64, 64)
FCW_BC1 = 672
FCW_WC2 = 680       # (64, 64)
FCW_BC2 = 744
FCW_ROWS = 752

# data slab (lane = 64): T*SPP embedding rows (t-major) then SPP length rows
DATA_EMB_ROWS = T * SPP
DATA_ROWS = T * SPP + SPP


# =============================================================================
# Single fused kernel: 2-layer LSTM over all paths + count-weighted pooling +
# fc_mono MLP + attention-scored softmax pooling + fc_cross MLP
# =============================================================================
def _fused_forward_kernel(data_ref, pool_ref, lw_ref, si_ref, fcw_ref, out_ref):
    f32 = jnp.float32
    HP = HID_PAD

    # ---- static slab slices (free) ------------------------------------------
    wih0 = lw_ref[LW_WIH0:LW_WIH0 + HP, :]             # (64, 256)
    whh0 = lw_ref[LW_WHH0:LW_WHH0 + HP, :]             # (64, 256)
    w1cat = lw_ref[LW_W1CAT:LW_W1CAT + 2 * HP, :]      # (128, 256)
    b0 = lw_ref[LW_B0:LW_B0 + 1, :]                    # (1, 256)
    b1 = lw_ref[LW_B1:LW_B1 + 1, :]                    # (1, 256)

    emb_all = data_ref[0:DATA_EMB_ROWS, :]             # (T*32, 64)
    lengths = data_ref[DATA_EMB_ROWS:DATA_ROWS, :]     # (32, 64) f32 row-broadcast

    # ---- layer-0 input projection hoisted out of the recurrence -------------
    z0_all = jnp.dot(emb_all, wih0, preferred_element_type=f32)   # (T*32, 256)

    def gates(z):
        # gate packing is (i, f, o | g): one sigmoid over 192 lanes, one tanh over 64
        sig = jax.nn.sigmoid(z[:, 0:3 * HP])
        g = jnp.tanh(z[:, 3 * HP:4 * HP])
        return sig[:, 0:HP], sig[:, HP:2 * HP], sig[:, 2 * HP:3 * HP], g

    h0 = c0 = h1 = c1 = jnp.zeros((SPP, HP), f32)
    for t in range(T):                                  # T is static -> fully unrolled
        keep = lengths > t                              # packed-sequence mask (32, 64)
        # layer 0: hoisted input term + recurrent term
        z0 = (z0_all[t * SPP:(t + 1) * SPP, :]
              + jnp.dot(h0, whh0, preferred_element_type=f32) + b0)
        i0, f0, o0, g0 = gates(z0)
        c0n = f0 * c0 + i0 * g0
        h0n = o0 * jnp.tanh(c0n)
        # layer 1: fused input+recurrent matmul, K = 128
        z1 = jnp.dot(jnp.concatenate([h0n, h1], axis=-1), w1cat,
                     preferred_element_type=f32) + b1
        i1, f1, o1, g1 = gates(z1)
        c1n = f1 * c1 + i1 * g1
        h1n = o1 * jnp.tanh(c1n)
        h0 = jnp.where(keep, h0n, h0)
        c0 = jnp.where(keep, c0n, c0)
        h1 = jnp.where(keep, h1n, h1)
        c1 = jnp.where(keep, c1n, c1)

    # ---- count-weighted + normalized pooling: (1+NT, 32) @ (32, 64) ---------
    pooled = jnp.dot(pool_ref[...], h1, preferred_element_type=f32)   # (1+NT, 64)
    path_mono = pooled[0:1, :]                          # (1, 64)
    path_xling = pooled[1:1 + NT, :]                    # (NT, 64)

    xy = si_ref[SI_XY:SI_XY + 1, :]                     # (1, 128) lanes 0:100 valid
    xt = si_ref[SI_XT:SI_XT + NT, :]                    # (NT, 128) lanes 0:100 valid
    att = si_ref[SI_ATT:SI_ATT + NT, :]                 # (NT, 128) lanes 0:125 valid

    def mm(x, row, nrows):
        return jnp.dot(x, fcw_ref[row:row + nrows, :], preferred_element_type=f32)

    def bias(row):
        return fcw_ref[row:row + 1, :]

    # ---- fc_mono: Linear -> Dropout(p=0, identity) -> ReLU -> Linear --------
    hm = jnp.maximum(mm(xy, FCW_WM1XY, 2 * HP) + mm(path_mono, FCW_WM1P, HP)
                     + bias(FCW_BM1), 0.0)
    fc_out = mm(hm, FCW_WM2, HP) + bias(FCW_BM2)        # (1, 64) lanes 0:2 valid

    # ---- att_scores: Linear -> ReLU -> Dropout(identity) -> Linear ----------
    a = jnp.maximum(mm(att, FCW_WA1, 2 * HP) + bias(FCW_BA1), 0.0)
    scores = (mm(a, FCW_WA2, HP) + bias(FCW_BA2))[:, 0:1] * 10.0      # /0.1 -> *10
    m = jnp.max(scores, axis=0, keepdims=True)                         # softmax over dim 0
    e = jnp.exp(scores - m)
    attn = e / jnp.sum(e, axis=0, keepdims=True)                       # (NT, 1)

    # attention-weighted pooling over translations (split: no concat needed)
    pooled_xt = jnp.sum(attn * xt, axis=0, keepdims=True)              # (1, 128)
    pooled_path = jnp.sum(attn * path_xling, axis=0, keepdims=True)    # (1, 64)

    # ---- fc_cross: Linear -> Dropout(identity) -> ReLU -> Linear ------------
    ch = jnp.maximum(mm(pooled_xt, FCW_WC1XT, 2 * HP) + mm(pooled_path, FCW_WC1P, HP)
                     + bias(FCW_BC1), 0.0)
    fc_cross = mm(ch, FCW_WC2, HP) + bias(FCW_BC2)       # (1, 64) lanes 0:2 valid

    # single merged output: row 0 = fc_mono logits, row 1 = fc_cross logits
    out_ref[...] = jnp.concatenate([fc_out, fc_cross], axis=0)


def fused_classifier_call(data, pool, si, kp):
    vmem = pltpu.MemorySpace.VMEM
    out = pl.pallas_call(
        _fused_forward_kernel,
        out_shape=jax.ShapeDtypeStruct((2, HID_PAD), jnp.float32),
        in_specs=[pl.BlockSpec(memory_space=vmem)] * 5,
        out_specs=pl.BlockSpec(memory_space=vmem),
    )(data, pool, kp['lw'], si, kp['fcw'])
    # TODO(synk): for many-example throughput, batch examples into the matmul M dim (v6e)
    # and add a leading "parallel" grid axis (v7x, 2 TensorCores); single example here.
    return out[0:1, :NUM_REL], out[1:2, :NUM_REL]


# =============================================================================
# One-time repack of weights into the fused, lane-padded, slab layout
# =============================================================================
def prepare_kernel_params(params):
    H = LSTM_HIDDEN_DIM
    w_ih = np.asarray(params['w_ih'])
    w_hh = np.asarray(params['w_hh'])
    b_lstm = np.asarray(params['b_lstm'])

    # ---- LSTM slab: gate slots packed as (i, f, o | g) from PyTorch (i, f, g, o)
    lw = np.zeros((LW_ROWS, GATES_PAD), np.float32)
    for slot, g in enumerate((0, 1, 3, 2)):
        col = slot * HID_PAD
        lw[LW_WIH0:LW_WIH0 + PATH_INPUT_DIM, col:col + H] = w_ih[0, g]
        lw[LW_WHH0:LW_WHH0 + H, col:col + H] = w_hh[0, g]
        lw[LW_W1CAT:LW_W1CAT + PATH_INPUT_DIM, col:col + H] = w_ih[1, g]
        lw[LW_W1CAT + HID_PAD:LW_W1CAT + HID_PAD + H, col:col + H] = w_hh[1, g]
        lw[LW_B0, col:col + H] = b_lstm[0, g, 0]
        lw[LW_B1, col:col + H] = b_lstm[1, g, 0]
    # Padded gate columns have zero weights+bias -> padded h/c columns stay exactly 0.

    # ---- fc / attention weight slab (lane = 64) ------------------------------
    two_lem = 2 * LEMMA_DIM
    fcw = np.zeros((FCW_ROWS, HID_PAD), np.float32)
    wm1 = np.asarray(params['wm1'])
    wc1 = np.asarray(params['wc1'])
    fcw[FCW_WM1XY:FCW_WM1XY + two_lem, :50] = wm1[:two_lem]
    fcw[FCW_WM1P:FCW_WM1P + H, :50] = wm1[two_lem:]
    fcw[FCW_BM1, :50] = np.asarray(params['bm1'])[0]
    fcw[FCW_WM2:FCW_WM2 + 50, :NUM_REL] = np.asarray(params['wm2'])
    fcw[FCW_BM2, :NUM_REL] = np.asarray(params['bm2'])[0]
    fcw[FCW_WA1:FCW_WA1 + (two_lem + 25), :50] = np.asarray(params['wa1'])
    fcw[FCW_BA1, :50] = np.asarray(params['ba1'])[0]
    fcw[FCW_WA2:FCW_WA2 + 50, :1] = np.asarray(params['wa2'])
    fcw[FCW_BA2, :1] = np.asarray(params['ba2'])[0]
    fcw[FCW_WC1XT:FCW_WC1XT + two_lem, :50] = wc1[:two_lem]
    fcw[FCW_WC1P:FCW_WC1P + H, :50] = wc1[two_lem:]
    fcw[FCW_BC1, :50] = np.asarray(params['bc1'])[0]
    fcw[FCW_WC2:FCW_WC2 + 50, :NUM_REL] = np.asarray(params['wc2'])
    fcw[FCW_BC2, :NUM_REL] = np.asarray(params['bc2'])[0]

    return {'lw': jnp.asarray(lw), 'fcw': jnp.asarray(fcw)}


# =============================================================================
# Forward-pass glue (faithful to PathLSTMClassifier.forward, training branch)
# =============================================================================
def embed_paths(params, idx, lemma_table):
    # idx: (P, T, 4) int32 columns = [lemma, dep, pos, dir]; concat order as in module.
    lem = lemma_table[idx[..., 0]]
    dep = params['dep'][idx[..., 1]]
    pos = params['pos'][idx[..., 2]]
    dr = params['dir'][idx[..., 3]]
    return jnp.concatenate([lem, dep, pos, dr], axis=-1)   # (P, T, 60)


def forward_pallas(params, kparams, inputs):
    lemma_en, lemma_hi = params['lemma_en'], params['lemma_hi']
    x_idx, y_idx = inputs['x_y']
    x_embed = lemma_en[x_idx]                               # (50,)
    y_embed = lemma_en[y_idx]                               # (50,)
    x_y_embed = jnp.concatenate([x_embed, y_embed])         # (100,)

    # path sets: 0 = mono-en, 1..NT = xling-en, NT+1..2NT = xling-hi
    sets = [embed_paths(params, inputs['mono_en']['paths'], lemma_en)]
    for i in range(NT):
        sets.append(embed_paths(params, inputs['xling_en']['paths'][i], lemma_en))
    for i in range(NT):
        sets.append(embed_paths(params, inputs['xling_hi']['paths'][i], lemma_hi))
    stacked = jnp.stack(sets)                                            # (S, P, T, 60)
    emb = jnp.transpose(stacked, (2, 0, 1, 3)).reshape(T, SP, PATH_INPUT_DIM)
    emb = jnp.pad(emb, ((0, 0), (0, SPP - SP), (0, HID_PAD - PATH_INPUT_DIM)))
    emb_flat = emb.reshape(T * SPP, HID_PAD)                             # (192, 64)

    lengths = jnp.concatenate([inputs['mono_en']['lengths'][None],
                               inputs['xling_en']['lengths'],
                               inputs['xling_hi']['lengths']], axis=0).reshape(SP)
    lengths = jnp.pad(lengths, (0, SPP - SP)).astype(jnp.float32)        # padded rows len 0
    lengths_rows = jnp.broadcast_to(lengths[:, None], (SPP, HID_PAD))    # (32, 64)

    data = jnp.concatenate([emb_flat, lengths_rows], axis=0)             # (224, 64)

    counts = jnp.concatenate([inputs['mono_en']['counts'][None],
                              inputs['xling_en']['counts'],
                              inputs['xling_hi']['counts']], axis=0).astype(jnp.float32)  # (S, P)

    # ---- pooling matrix: folds count weighting + all normalizations --------
    cnt_en = counts[1:1 + NT].sum(axis=1)
    cnt_hi = counts[1 + NT:].sum(axis=1)
    inv_cum = 1.0 / jnp.cumsum(cnt_en + cnt_hi)             # cumulative count across translations
    pool = jnp.zeros((1 + NT, SPP), jnp.float32)            # padded path columns stay 0
    pool = pool.at[0, 0:P].set(counts[0] / counts[0].sum() / 1.0)   # /1 == len(p_mono_en_all)
    for i in range(NT):
        pool = pool.at[1 + i, (1 + i) * P:(2 + i) * P].set(counts[1 + i] * inv_cum[i])
        pool = pool.at[1 + i, (1 + NT + i) * P:(2 + NT + i) * P].set(counts[1 + NT + i] * inv_cum[i])

    trans_embeds = lemma_hi[inputs['trans_lemmas']]                      # (NT, 50)
    x_rep = jnp.broadcast_to(x_embed[None], (NT, LEMMA_DIM))
    xt_cat = jnp.concatenate([x_rep, trans_embeds], axis=1)              # (NT, 100) prepool left half
    label_embed = params['label_att'][inputs['gold']]                    # (1, 25)
    label_rep = jnp.broadcast_to(label_embed, (NT, 25))
    att_in = jnp.concatenate([trans_embeds, x_rep, label_rep], axis=1)   # (NT, 125)

    # small-input slab, lane width 128, zero-padded lanes/rows
    si = jnp.zeros((SI_ROWS, 128), jnp.float32)
    si = si.at[SI_XY, :2 * LEMMA_DIM].set(x_y_embed)
    si = si.at[SI_XT:SI_XT + NT, :2 * LEMMA_DIM].set(xt_cat)
    si = si.at[SI_ATT:SI_ATT + NT, :2 * LEMMA_DIM + 25].set(att_in)

    return fused_classifier_call(data, pool, si, kparams)


# =============================================================================
# Pure-JAX reference (same math, no Pallas) for a correctness check
# =============================================================================
def ref_lstm_pool(path_embeds, lengths, counts, w_ih, w_hh, b_lstm):
    Sn, Tn, Pn, _ = path_embeds.shape
    H = LSTM_HIDDEN_DIM

    def cell(x, h, c, l):
        gs = [x @ w_ih[l, g] + h @ w_hh[l, g] + b_lstm[l, g] for g in range(4)]
        i, f = jax.nn.sigmoid(gs[0]), jax.nn.sigmoid(gs[1])
        gg, o = jnp.tanh(gs[2]), jax.nn.sigmoid(gs[3])
        c_new = f * c + i * gg
        return o * jnp.tanh(c_new), c_new

    outs = []
    for s in range(Sn):
        h0 = c0 = h1 = c1 = jnp.zeros((Pn, H), jnp.float32)
        for t in range(Tn):
            mask = (lengths[s] > t).astype(jnp.float32)
            h0n, c0n = cell(path_embeds[s, t], h0, c0, 0)
            h1n, c1n = cell(h0n, h1, c1, 1)
            h0 = mask * h0n + (1 - mask) * h0
            c0 = mask * c0n + (1 - mask) * c0
            h1 = mask * h1n + (1 - mask) * h1
            c1 = mask * c1n + (1 - mask) * c1
        outs.append(jnp.sum(h1 * counts[s], axis=0))
    return jnp.stack(outs)


def ref_classifier(mono_in, prepool, att_in, params):
    h = jnp.maximum(mono_in @ params['wm1'] + params['bm1'], 0.0)
    fc_out = h @ params['wm2'] + params['bm2']
    a = jnp.maximum(att_in @ params['wa1'] + params['ba1'], 0.0)
    scores = (a @ params['wa2'] + params['ba2']) / 0.1
    attn = jax.nn.softmax(scores, axis=0)
    pooled = jnp.sum(attn * prepool, axis=0, keepdims=True)
    ch = jnp.maximum(pooled @ params['wc1'] + params['bc1'], 0.0)
    fc_cross = ch @ params['wc2'] + params['bc2']
    return fc_out, fc_cross


def forward_ref(params, inputs):
    lemma_en, lemma_hi = params['lemma_en'], params['lemma_hi']
    x_idx, y_idx = inputs['x_y']
    x_embed = lemma_en[x_idx]
    y_embed = lemma_en[y_idx]
    x_y_embed = jnp.concatenate([x_embed, y_embed])

    sets = [embed_paths(params, inputs['mono_en']['paths'], lemma_en)]
    for i in range(NT):
        sets.append(embed_paths(params, inputs['xling_en']['paths'][i], lemma_en))
    for i in range(NT):
        sets.append(embed_paths(params, inputs['xling_hi']['paths'][i], lemma_hi))
    path_embeds = jnp.transpose(jnp.stack(sets), (0, 2, 1, 3))           # (S, T, P, 60)

    lengths = jnp.concatenate([inputs['mono_en']['lengths'][None],
                               inputs['xling_en']['lengths'],
                               inputs['xling_hi']['lengths']], axis=0)[..., None].astype(jnp.int32)
    counts = jnp.concatenate([inputs['mono_en']['counts'][None],
                              inputs['xling_en']['counts'],
                              inputs['xling_hi']['counts']], axis=0)[..., None].astype(jnp.float32)

    pooled = ref_lstm_pool(path_embeds, lengths, counts,
                           params['w_ih'], params['w_hh'], params['b_lstm'])  # (S, 60)

    path_vec_mono = pooled[0] / counts[0].sum() / 1.0
    fc_mono_in = jnp.concatenate([x_y_embed, path_vec_mono])[None]       # (1, 160)

    en_vecs, hi_vecs = pooled[1:1 + NT], pooled[1 + NT:]
    cnt_en = counts[1:1 + NT].sum(axis=(1, 2))
    cnt_hi = counts[1 + NT:].sum(axis=(1, 2))
    cum_count = jnp.cumsum(cnt_en + cnt_hi)                              # (NT,)
    path_vecs_xling = (en_vecs + hi_vecs) / cum_count[:, None]           # (NT, 60)

    trans_embeds = lemma_hi[inputs['trans_lemmas']]                      # (NT, 50)
    x_rep = jnp.broadcast_to(x_embed[None], (NT, LEMMA_DIM))
    prepool = jnp.concatenate([x_rep, trans_embeds, path_vecs_xling], axis=1)   # (NT, 160)

    label_embed = params['label_att'][inputs['gold']]                    # (1, 25)
    label_rep = jnp.broadcast_to(label_embed, (NT, 25))
    att_in = jnp.concatenate([trans_embeds, x_rep, label_rep], axis=1)   # (NT, 125)

    return ref_classifier(fc_mono_in, prepool, att_in, params)


# =============================================================================
# Deterministic parameter / input construction
# =============================================================================
def make_params(key):
    ks = jax.random.split(key, 32)
    n = lambda k, s, sc=0.1: (sc * jax.random.normal(k, s, dtype=jnp.float32))
    params = {}
    lemma_en = n(ks[0], (NUM_LEMMAS_EN + 1, LEMMA_DIM))
    params['lemma_en'] = lemma_en.at[NUM_LEMMAS_EN].set(0.0)            # padding_idx row
    lemma_hi = n(ks[1], (NUM_LEMMAS_HI + 1, LEMMA_DIM))
    params['lemma_hi'] = lemma_hi.at[NUM_LEMMAS_HI].set(0.0)
    params['pos'] = n(ks[2], (NUM_POS, POS_DIM)).at[0].set(0.0)         # padding_idx=0
    params['dep'] = n(ks[3], (NUM_DEP, DEP_DIM)).at[0].set(0.0)
    params['dir'] = n(ks[4], (NUM_DIR, DIR_DIM)).at[0].set(0.0)
    params['label_att'] = n(ks[5], (NUM_REL, 25))
    # LSTM weights stored per-layer, per-gate (i,f,g,o), transposed to (in, H)
    params['w_ih'] = n(ks[6], (NUM_LAYERS, 4, PATH_INPUT_DIM, LSTM_HIDDEN_DIM))
    params['w_hh'] = n(ks[7], (NUM_LAYERS, 4, LSTM_HIDDEN_DIM, LSTM_HIDDEN_DIM))
    params['b_lstm'] = n(ks[8], (NUM_LAYERS, 4, 1, LSTM_HIDDEN_DIM))    # b_ih + b_hh combined
    fc_in = LSTM_HIDDEN_DIM + 2 * LEMMA_DIM                             # 160
    params['wm1'], params['bm1'] = n(ks[9], (fc_in, 50)), n(ks[10], (1, 50))
    params['wm2'], params['bm2'] = n(ks[11], (50, NUM_REL)), n(ks[12], (1, NUM_REL))
    params['wa1'], params['ba1'] = n(ks[13], (2 * LEMMA_DIM + 25, 50)), n(ks[14], (1, 50))
    params['wa2'], params['ba2'] = n(ks[15], (50, 1)), n(ks[16], (1, 1))
    params['wc1'], params['bc1'] = n(ks[17], (fc_in, 50)), n(ks[18], (1, 50))
    params['wc2'], params['bc2'] = n(ks[19], (50, NUM_REL)), n(ks[20], (1, NUM_REL))
    # TODO(synk): en_word_att / hi_word_att Linear layers are declared in __init__ but never
    # used in forward(), so they are not materialized here.
    return params


def make_path_set(key, lemma_vocab):
    k1, k2, k3, k4, k5 = jax.random.split(key, 5)
    lem = jax.random.randint(k1, (P, T, 1), 0, lemma_vocab)
    dep = jax.random.randint(k2, (P, T, 1), 1, NUM_DEP)
    pos = jax.random.randint(k3, (P, T, 1), 1, NUM_POS)
    dr = jax.random.randint(k4, (P, T, 1), 1, NUM_DIR)
    paths = jnp.concatenate([lem, dep, pos, dr], axis=-1).astype(jnp.int32)
    k5a, k5b = jax.random.split(k5)
    lengths = jnp.sort(jax.random.randint(k5a, (P,), 1, T + 1))[::-1].astype(jnp.int32)
    counts = jax.random.uniform(k5b, (P,), minval=0.5, maxval=2.0, dtype=jnp.float32)
    return paths, lengths, counts


def make_inputs(key):
    ks = jax.random.split(key, 4 + 2 * NT)
    inputs = {}
    inputs['x_y'] = (3, 7)
    inputs['gold'] = jnp.array([1], dtype=jnp.int32)
    inputs['trans_lemmas'] = jax.random.randint(ks[0], (NT,), 0, NUM_LEMMAS_HI).astype(jnp.int32)
    mp, ml, mc = make_path_set(ks[1], NUM_LEMMAS_EN)
    inputs['mono_en'] = {'paths': mp, 'lengths': ml, 'counts': mc}
    en_p, en_l, en_c, hi_p, hi_l, hi_c = [], [], [], [], [], []
    for i in range(NT):
        p, l, c = make_path_set(ks[2 + i], NUM_LEMMAS_EN)
        en_p.append(p); en_l.append(l); en_c.append(c)
        p, l, c = make_path_set(ks[2 + NT + i], NUM_LEMMAS_HI)
        hi_p.append(p); hi_l.append(l); hi_c.append(c)
    inputs['xling_en'] = {'paths': jnp.stack(en_p), 'lengths': jnp.stack(en_l),
                          'counts': jnp.stack(en_c)}
    inputs['xling_hi'] = {'paths': jnp.stack(hi_p), 'lengths': jnp.stack(hi_l),
                          'counts': jnp.stack(hi_c)}
    return inputs


if __name__ == "__main__":
    key = jax.random.PRNGKey(0)
    kp_key, ki_key = jax.random.split(key)
    params = make_params(kp_key)
    kparams = prepare_kernel_params(params)   # one-time repack into fused/padded slab layout
    inputs = make_inputs(ki_key)

    fc_out, fc_cross = forward_pallas(params, kparams, inputs)
    fc_out = jax.block_until_ready(fc_out)
    fc_cross = jax.block_until_ready(fc_cross)

    ref_out, ref_cross = forward_ref(params, inputs)
    np.testing.assert_allclose(np.asarray(fc_out), np.asarray(ref_out), atol=5e-3, rtol=5e-3)
    np.testing.assert_allclose(np.asarray(fc_cross), np.asarray(ref_cross), atol=5e-3, rtol=5e-3)

    print("KERNEL_OK")
</pallas_src>

<mosaic_0001>
module attributes {stable_mosaic.version = 11 : i64} {
  func.func @_fused_forward_kernel(%arg0: memref<224x64xf32, #tpu.memory_space<vmem>>, %arg1: memref<4x32xf32, #tpu.memory_space<vmem>>, %arg2: memref<272x256xf32, #tpu.memory_space<vmem>>, %arg3: memref<24x128xf32, #tpu.memory_space<vmem>>, %arg4: memref<752x64xf32, #tpu.memory_space<vmem>>, %arg5: memref<2x64xf32, #tpu.memory_space<vmem>>) attributes {dimension_semantics = [], scalar_prefetch = 0 : i64, scratch_operands = 0 : i64, tpu.core_type = #tpu.core_type<tc>} {
    %c0 = arith.constant 0 : index
    %c0_0 = arith.constant 0 : index
    %0 = vector.load %arg2[%c0, %c0_0] : memref<272x256xf32, #tpu.memory_space<vmem>>, vector<64x256xf32>
    %c64 = arith.constant 64 : index
    %c0_1 = arith.constant 0 : index
    %1 = vector.load %arg2[%c64, %c0_1] : memref<272x256xf32, #tpu.memory_space<vmem>>, vector<64x256xf32>
    %c128 = arith.constant 128 : index
    %c0_2 = arith.constant 0 : index
    %2 = vector.load %arg2[%c128, %c0_2] : memref<272x256xf32, #tpu.memory_space<vmem>>, vector<128x256xf32>
    %c256 = arith.constant 256 : index
    %c0_3 = arith.constant 0 : index
    %3 = vector.load %arg2[%c256, %c0_3] : memref<272x256xf32, #tpu.memory_space<vmem>>, vector<1x256xf32>
    %c264 = arith.constant 264 : index
    %c0_4 = arith.constant 0 : index
    %4 = vector.load %arg2[%c264, %c0_4] : memref<272x256xf32, #tpu.memory_space<vmem>>, vector<1x256xf32>
    %c0_5 = arith.constant 0 : index
    %c0_6 = arith.constant 0 : index
    %5 = vector.load %arg0[%c0_5, %c0_6] : memref<224x64xf32, #tpu.memory_space<vmem>>, vector<192x64xf32>
    %c192 = arith.constant 192 : index
    %c0_7 = arith.constant 0 : index
    %6 = vector.load %arg0[%c192, %c0_7] : memref<224x64xf32, #tpu.memory_space<vmem>>, vector<32x64xf32>
    %cst = arith.constant dense<0.000000e+00> : vector<192x256xf32>
    %7 = tpu.matmul %5, %0, %cst {dimension_numbers = #tpu.dot_dimension_numbers<[1], [0], [0], [1], [0, 0, 1, 1], [], []>} : vector<192x64xf32>, vector<64x256xf32>, vector<192x256xf32> -> vector<192x256xf32>
    %cst_8 = arith.constant 0.000000e+00 : f32
    %8 = vector.broadcast %cst_8 : f32 to vector<32x64xf32>
    %cst_9 = arith.constant 0.000000e+00 : f32
    %9 = vector.broadcast %cst_9 : f32 to vector<32x64xf32>
    %10 = arith.cmpf ogt, %6, %9 : vector<32x64xf32>
    %11 = vector.extract_strided_slice %7 {offsets = [0, 0], sizes = [32, 256], strides = [1, 1]} : vector<192x256xf32> to vector<32x256xf32>
    %cst_10 = arith.constant dense<0.000000e+00> : vector<32x256xf32>
    %12 = tpu.matmul %8, %1, %cst_10 {dimension_numbers = #tpu.dot_dimension_numbers<[1], [0], [0], [1], [0, 0, 1, 1], [], []>} : vector<32x64xf32>, vector<64x256xf32>, vector<32x256xf32> -> vector<32x256xf32>
    %13 = arith.addf %11, %12 : vector<32x256xf32>
    %14 = vector.broadcast %3 : vector<1x256xf32> to vector<32x256xf32>
    %15 = arith.addf %13, %14 : vector<32x256xf32>
    %16 = vector.extract_strided_slice %15 {offsets = [0, 0], sizes = [32, 192], strides = [1, 1]} : vector<32x256xf32> to vector<32x192xf32>
    %17 = arith.negf %16 : vector<32x192xf32>
    %18 = math.exp %17 : vector<32x192xf32>
    %cst_11 = arith.constant 1.000000e+00 : f32
    %19 = vector.broadcast %cst_11 : f32 to vector<32x192xf32>
    %20 = arith.addf %19, %18 : vector<32x192xf32>
    %21 = arith.divf %19, %20 : vector<32x192xf32>
    %22 = vector.extract_strided_slice %15 {offsets = [0, 192], sizes = [32, 64], strides = [1, 1]} : vector<32x256xf32> to vector<32x64xf32>
    %23 = math.tanh %22 : vector<32x64xf32>
    %24 = vector.extract_strided_slice %21 {offsets = [0, 0], sizes = [32, 64], strides = [1, 1]} : vector<32x192xf32> to vector<32x64xf32>
    %25 = vector.extract_strided_slice %21 {offsets = [0, 64], sizes = [32, 64], strides = [1, 1]} : vector<32x192xf32> to vector<32x64xf32>
    %26 = vector.extract_strided_slice %21 {offsets = [0, 128], sizes = [32, 64], strides = [1, 1]} : vector<32x192xf32> to vector<32x64xf32>
    %27 = arith.mulf %25, %8 : vector<32x64xf32>
    %28 = arith.mulf %24, %23 : vector<32x64xf32>
    %29 = arith.addf %27, %28 : vector<32x64xf32>
    %30 = math.tanh %29 : vector<32x64xf32>
    %31 = arith.mulf %26, %30 : vector<32x64xf32>
    %32 = tpu.concatenate %31, %8 in 1 : vector<32x64xf32>, vector<32x64xf32> -> vector<32x128xf32>
    %cst_12 = arith.constant dense<0.000000e+00> : vector<32x256xf32>
    %33 = tpu.matmul %32, %2, %cst_12 {dimension_numbers = #tpu.dot_dimension_numbers<[1], [0], [0], [1], [0, 0, 1, 1], [], []>} : vector<32x128xf32>, vector<128x256xf32>, vector<32x256xf32> -> vector<32x256xf32>
    %34 = vector.broadcast %4 : vector<1x256xf32> to vector<32x256xf32>
    %35 = arith.addf %33, %34 : vector<32x256xf32>
    %36 = vector.extract_strided_slice %35 {offsets = [0, 0], sizes = [32, 192], strides = [1, 1]} : vector<32x256xf32> to vector<32x192xf32>
    %37 = arith.negf %36 : vector<32x192xf32>
    %38 = math.exp %37 : vector<32x192xf32>
    %cst_13 = arith.constant 1.000000e+00 : f32
    %39 = vector.broadcast %cst_13 : f32 to vector<32x192xf32>
    %40 = arith.addf %39, %38 : vector<32x192xf32>
    %41 = arith.divf %39, %40 : vector<32x192xf32>
    %42 = vector.extract_strided_slice %35 {offsets = [0, 192], sizes = [32, 64], strides = [1, 1]} : vector<32x256xf32> to vector<32x64xf32>
    %43 = math.tanh %42 : vector<32x64xf32>
    %44 = vector.extract_strided_slice %41 {offsets = [0, 0], sizes = [32, 64], strides = [1, 1]} : vector<32x192xf32> to vector<32x64xf32>
    %45 = vector.extract_strided_slice %41 {offsets = [0, 64], sizes = [32, 64], strides = [1, 1]} : vector<32x192xf32> to vector<32x64xf32>
    %46 = vector.extract_strided_slice %41 {offsets = [0, 128], sizes = [32, 64], strides = [1, 1]} : vector<32x192xf32> to vector<32x64xf32>
    %47 = arith.mulf %45, %8 : vector<32x64xf32>
    %48 = arith.mulf %44, %43 : vector<32x64xf32>
    %49 = arith.addf %47, %48 : vector<32x64xf32>
    %50 = math.tanh %49 : vector<32x64xf32>
    %51 = arith.mulf %46, %50 : vector<32x64xf32>
    %52 = arith.select %10, %31, %8 : vector<32x64xi1>, vector<32x64xf32>
    %53 = arith.select %10, %29, %8 : vector<32x64xi1>, vector<32x64xf32>
    %54 = arith.select %10, %51, %8 : vector<32x64xi1>, vector<32x64xf32>
    %55 = arith.select %10, %49, %8 : vector<32x64xi1>, vector<32x64xf32>
    %cst_14 = arith.constant 1.000000e+00 : f32
    %56 = vector.broadcast %cst_14 : f32 to vector<32x64xf32>
    %57 = arith.cmpf ogt, %6, %56 : vector<32x64xf32>
    %58 = vector.extract_strided_slice %7 {offsets = [32, 0], sizes = [32, 256], strides = [1, 1]} : vector<192x256xf32> to vector<32x256xf32>
    %cst_15 = arith.constant dense<0.000000e+00> : vector<32x256xf32>
    %59 = tpu.matmul %52, %1, %cst_15 {dimension_numbers = #tpu.dot_dimension_numbers<[1], [0], [0], [1], [0, 0, 1, 1], [], []>} : vector<32x64xf32>, vector<64x256xf32>, vector<32x256xf32> -> vector<32x256xf32>
    %60 = arith.addf %58, %59 : vector<32x256xf32>
    %61 = vector.broadcast %3 : vector<1x256xf32> to vector<32x256xf32>
    %62 = arith.addf %60, %61 : vector<32x256xf32>
    %63 = vector.extract_strided_slice %62 {offsets = [0, 0], sizes = [32, 192], strides = [1, 1]} : vector<32x256xf32> to vector<32x192xf32>
    %64 = arith.negf %63 : vector<32x192xf32>
    %65 = math.exp %64 : vector<32x192xf32>
    %cst_16 = arith.constant 1.000000e+00 : f32
    %66 = vector.broadcast %cst_16 : f32 to vector<32x192xf32>
    %67 = arith.addf %66, %65 : vector<32x192xf32>
    %68 = arith.divf %66, %67 : vector<32x192xf32>
    %69 = vector.extract_strided_slice %62 {offsets = [0, 192], sizes = [32, 64], strides = [1, 1]} : vector<32x256xf32> to vector<32x64xf32>
    %70 = math.tanh %69 : vector<32x64xf32>
    %71 = vector.extract_strided_slice %68 {offsets = [0, 0], sizes = [32, 64], strides = [1, 1]} : vector<32x192xf32> to vector<32x64xf32>
    %72 = vector.extract_strided_slice %68 {offsets = [0, 64], sizes = [32, 64], strides = [1, 1]} : vector<32x192xf32> to vector<32x64xf32>
    %73 = vector.extract_strided_slice %68 {offsets = [0, 128], sizes = [32, 64], strides = [1, 1]} : vector<32x192xf32> to vector<32x64xf32>
    %74 = arith.mulf %72, %53 : vector<32x64xf32>
    %75 = arith.mulf %71, %70 : vector<32x64xf32>
    %76 = arith.addf %74, %75 : vector<32x64xf32>
    %77 = math.tanh %76 : vector<32x64xf32>
    %78 = arith.mulf %73, %77 : vector<32x64xf32>
    %79 = tpu.concatenate %78, %54 in 1 : vector<32x64xf32>, vector<32x64xf32> -> vector<32x128xf32>
    %cst_17 = arith.constant dense<0.000000e+00> : vector<32x256xf32>
    %80 = tpu.matmul %79, %2, %cst_17 {dimension_numbers = #tpu.dot_dimension_numbers<[1], [0], [0], [1], [0, 0, 1, 1], [], []>} : vector<32x128xf32>, vector<128x256xf32>, vector<32x256xf32> -> vector<32x256xf32>
    %81 = vector.broadcast %4 : vector<1x256xf32> to vector<32x256xf32>
    %82 = arith.addf %80, %81 : vector<32x256xf32>
    %83 = vector.extract_strided_slice %82 {offsets = [0, 0], sizes = [32, 192], strides = [1, 1]} : vector<32x256xf32> to vector<32x192xf32>
    %84 = arith.negf %83 : vector<32x192xf32>
    %85 = math.exp %84 : vector<32x192xf32>
    %cst_18 = arith.constant 1.000000e+00 : f32
    %86 = vector.broadcast %cst_18 : f32 to vector<32x192xf32>
    %87 = arith.addf %86, %85 : vector<32x192xf32>
    %88 = arith.divf %86, %87 : vector<32x192xf32>
    %89 = vector.extract_strided_slice %82 {offsets = [0, 192], sizes = [32, 64], strides = [1, 1]} : vector<32x256xf32> to vector<32x64xf32>
    %90 = math.tanh %89 : vector<32x64xf32>
    %91 = vector.extract_strided_slice %88 {offsets = [0, 0], sizes = [32, 64], strides = [1, 1]} : vector<32x192xf32> to vector<32x64xf32>
    %92 = vector.extract_strided_slice %88 {offsets = [0, 64], sizes = [32, 64], strides = [1, 1]} : vector<32x192xf32> to vector<32x64xf32>
    %93 = vector.extract_strided_slice %88 {offsets = [0, 128], sizes = [32, 64], strides = [1, 1]} : vector<32x192xf32> to vector<32x64xf32>
    %94 = arith.mulf %92, %55 : vector<32x64xf32>
    %95 = arith.mulf %91, %90 : vector<32x64xf32>
    %96 = arith.addf %94, %95 : vector<32x64xf32>
    %97 = math.tanh %96 : vector<32x64xf32>
    %98 = arith.mulf %93, %97 : vector<32x64xf32>
    %99 = arith.select %57, %78, %52 : vector<32x64xi1>, vector<32x64xf32>
    %100 = arith.select %57, %76, %53 : vector<32x64xi1>, vector<32x64xf32>
    %101 = arith.select %57, %98, %54 : vector<32x64xi1>, vector<32x64xf32>
    %102 = arith.select %57, %96, %55 : vector<32x64xi1>, vector<32x64xf32>
    %cst_19 = arith.constant 2.000000e+00 : f32
    %103 = vector.broadcast %cst_19 : f32 to vector<32x64xf32>
    %104 = arith.cmpf ogt, %6, %103 : vector<32x64xf32>
    %105 = vector.extract_strided_slice %7 {offsets = [64, 0], sizes = [32, 256], strides = [1, 1]} : vector<192x256xf32> to vector<32x256xf32>
    %cst_20 = arith.constant dense<0.000000e+00> : vector<32x256xf32>
    %106 = tpu.matmul %99, %1, %cst_20 {dimension_numbers = #tpu.dot_dimension_numbers<[1], [0], [0], [1], [0, 0, 1, 1], [], []>} : vector<32x64xf32>, vector<64x256xf32>, vector<32x256xf32> -> vector<32x256xf32>
    %107 = arith.addf %105, %106 : vector<32x256xf32>
    %108 = vector.broadcast %3 : vector<1x256xf32> to vector<32x256xf32>
    %109 = arith.addf %107, %108 : vector<32x256xf32>
    %110 = vector.extract_strided_slice %109 {offsets = [0, 0], sizes = [32, 192], strides = [1, 1]} : vector<32x256xf32> to vector<32x192xf32>
    %111 = arith.negf %110 : vector<32x192xf32>
    %112 = math.exp %111 : vector<32x192xf32>
    %cst_21 = arith.constant 1.000000e+00 : f32
    %113 = vector.broadcast %cst_21 : f32 to vector<32x192xf32>
    %114 = arith.addf %113, %112 : vector<32x192xf32>
    %115 = arith.divf %113, %114 : vector<32x192xf32>
    %116 = vector.extract_strided_slice %109 {offsets = [0, 192], sizes = [32, 64], strides = [1, 1]} : vector<32x256xf32> to vector<32x64xf32>
    %117 = math.tanh %116 : vector<32x64xf32>
    %118 = vector.extract_strided_slice %115 {offsets = [0, 0], sizes = [32, 64], strides = [1, 1]} : vector<32x192xf32> to vector<32x64xf32>
    %119 = vector.extract_strided_slice %115 {offsets = [0, 64], sizes = [32, 64], strides = [1, 1]} : vector<32x192xf32> to vector<32x64xf32>
    %120 = vector.extract_strided_slice %115 {offsets = [0, 128], sizes = [32, 64], strides = [1, 1]} : vector<32x192xf32> to vector<32x64xf32>
    %121 = arith.mulf %119, %100 : vector<32x64xf32>
    %122 = arith.mulf %118, %117 : vector<32x64xf32>
    %123 = arith.addf %121, %122 : vector<32x64xf32>
    %124 = math.tanh %123 : vector<32x64xf32>
    %125 = arith.mulf %120, %124 : vector<32x64xf32>
    %126 = tpu.concatenate %125, %101 in 1 : vector<32x64xf32>, vector<32x64xf32> -> vector<32x128xf32>
    %cst_22 = arith.constant dense<0.000000e+00> : vector<32x256xf32>
    %127 = tpu.matmul %126, %2, %cst_22 {dimension_numbers = #tpu.dot_dimension_numbers<[1], [0], [0], [1], [0, 0, 1, 1], [], []>} : vector<32x128xf32>, vector<128x256xf32>, vector<32x256xf32> -> vector<32x256xf32>
    %128 = vector.broadcast %4 : vector<1x256xf32> to vector<32x256xf32>
    %129 = arith.addf %127, %128 : vector<32x256xf32>
    %130 = vector.extract_strided_slice %129 {offsets = [0, 0], sizes = [32, 192], strides = [1, 1]} : vector<32x256xf32> to vector<32x192xf32>
    %131 = arith.negf %130 : vector<32x192xf32>
    %132 = math.exp %131 : vector<32x192xf32>
    %cst_23 = arith.constant 1.000000e+00 : f32
    %133 = vector.broadcast %cst_23 : f32 to vector<32x192xf32>
    %134 = arith.addf %133, %132 : vector<32x192xf32>
    %135 = arith.divf %133, %134 : vector<32x192xf32>
    %136 = vector.extract_strided_slice %129 {offsets = [0, 192], sizes = [32, 64], strides = [1, 1]} : vector<32x256xf32> to vector<32x64xf32>
    %137 = math.tanh %136 : vector<32x64xf32>
    %138 = vector.extract_strided_slice %135 {offsets = [0, 0], sizes = [32, 64], strides = [1, 1]} : vector<32x192xf32> to vector<32x64xf32>
    %139 = vector.extract_strided_slice %135 {offsets = [0, 64], sizes = [32, 64], strides = [1, 1]} : vector<32x192xf32> to vector<32x64xf32>
    %140 = vector.extract_strided_slice %135 {offsets = [0, 128], sizes = [32, 64], strides = [1, 1]} : vector<32x192xf32> to vector<32x64xf32>
    %141 = arith.mulf %139, %102 : vector<32x64xf32>
    %142 = arith.mulf %138, %137 : vector<32x64xf32>
    %143 = arith.addf %141, %142 : vector<32x64xf32>
    %144 = math.tanh %143 : vector<32x64xf32>
    %145 = arith.mulf %140, %144 : vector<32x64xf32>
    %146 = arith.select %104, %125, %99 : vector<32x64xi1>, vector<32x64xf32>
    %147 = arith.select %104, %123, %100 : vector<32x64xi1>, vector<32x64xf32>
    %148 = arith.select %104, %145, %101 : vector<32x64xi1>, vector<32x64xf32>
    %149 = arith.select %104, %143, %102 : vector<32x64xi1>, vector<32x64xf32>
    %cst_24 = arith.constant 3.000000e+00 : f32
    %150 = vector.broadcast %cst_24 : f32 to vector<32x64xf32>
    %151 = arith.cmpf ogt, %6, %150 : vector<32x64xf32>
    %152 = vector.extract_strided_slice %7 {offsets = [96, 0], sizes = [32, 256], strides = [1, 1]} : vector<192x256xf32> to vector<32x256xf32>
    %cst_25 = arith.constant dense<0.000000e+00> : vector<32x256xf32>
    %153 = tpu.matmul %146, %1, %cst_25 {dimension_numbers = #tpu.dot_dimension_numbers<[1], [0], [0], [1], [0, 0, 1, 1], [], []>} : vector<32x64xf32>, vector<64x256xf32>, vector<32x256xf32> -> vector<32x256xf32>
    %154 = arith.addf %152, %153 : vector<32x256xf32>
    %155 = vector.broadcast %3 : vector<1x256xf32> to vector<32x256xf32>
    %156 = arith.addf %154, %155 : vector<32x256xf32>
    %157 = vector.extract_strided_slice %156 {offsets = [0, 0], sizes = [32, 192], strides = [1, 1]} : vector<32x256xf32> to vector<32x192xf32>
    %158 = arith.negf %157 : vector<32x192xf32>
    %159 = math.exp %158 : vector<32x192xf32>
    %cst_26 = arith.constant 1.000000e+00 : f32
    %160 = vector.broadcast %cst_26 : f32 to vector<32x192xf32>
    %161 = arith.addf %160, %159 : vector<32x192xf32>
    %162 = arith.divf %160, %161 : vector<32x192xf32>
    %163 = vector.extract_strided_slice %156 {offsets = [0, 192], sizes = [32, 64], strides = [1, 1]} : vector<32x256xf32> to vector<32x64xf32>
    %164 = math.tanh %163 : vector<32x64xf32>
    %165 = vector.extract_strided_slice %162 {offsets = [0, 0], sizes = [32, 64], strides = [1, 1]} : vector<32x192xf32> to vector<32x64xf32>
    %166 = vector.extract_strided_slice %162 {offsets = [0, 64], sizes = [32, 64], strides = [1, 1]} : vector<32x192xf32> to vector<32x64xf32>
    %167 = vector.extract_strided_slice %162 {offsets = [0, 128], sizes = [32, 64], strides = [1, 1]} : vector<32x192xf32> to vector<32x64xf32>
    %168 = arith.mulf %166, %147 : vector<32x64xf32>
    %169 = arith.mulf %165, %164 : vector<32x64xf32>
    %170 = arith.addf %168, %169 : vector<32x64xf32>
    %171 = math.tanh %170 : vector<32x64xf32>
    %172 = arith.mulf %167, %171 : vector<32x64xf32>
    %173 = tpu.concatenate %172, %148 in 1 : vector<32x64xf32>, vector<32x64xf32> -> vector<32x128xf32>
    %cst_27 = arith.constant dense<0.000000e+00> : vector<32x256xf32>
    %174 = tpu.matmul %173, %2, %cst_27 {dimension_numbers = #tpu.dot_dimension_numbers<[1], [0], [0], [1], [0, 0, 1, 1], [], []>} : vector<32x128xf32>, vector<128x256xf32>, vector<32x256xf32> -> vector<32x256xf32>
    %175 = vector.broadcast %4 : vector<1x256xf32> to vector<32x256xf32>
    %176 = arith.addf %174, %175 : vector<32x256xf32>
    %177 = vector.extract_strided_slice %176 {offsets = [0, 0], sizes = [32, 192], strides = [1, 1]} : vector<32x256xf32> to vector<32x192xf32>
    %178 = arith.negf %177 : vector<32x192xf32>
    %179 = math.exp %178 : vector<32x192xf32>
    %cst_28 = arith.constant 1.000000e+00 : f32
    %180 = vector.broadcast %cst_28 : f32 to vector<32x192xf32>
    %181 = arith.addf %180, %179 : vector<32x192xf32>
    %182 = arith.divf %180, %181 : vector<32x192xf32>
    %183 = vector.extract_strided_slice %176 {offsets = [0, 192], sizes = [32, 64], strides = [1, 1]} : vector<32x256xf32> to vector<32x64xf32>
    %184 = math.tanh %183 : vector<32x64xf32>
    %185 = vector.extract_strided_slice %182 {offsets = [0, 0], sizes = [32, 64], strides = [1, 1]} : vector<32x192xf32> to vector<32x64xf32>
    %186 = vector.extract_strided_slice %182 {offsets = [0, 64], sizes = [32, 64], strides = [1, 1]} : vector<32x192xf32> to vector<32x64xf32>
    %187 = vector.extract_strided_slice %182 {offsets = [0, 128], sizes = [32, 64], strides = [1, 1]} : vector<32x192xf32> to vector<32x64xf32>
    %188 = arith.mulf %186, %149 : vector<32x64xf32>
    %189 = arith.mulf %185, %184 : vector<32x64xf32>
    %190 = arith.addf %188, %189 : vector<32x64xf32>
    %191 = math.tanh %190 : vector<32x64xf32>
    %192 = arith.mulf %187, %191 : vector<32x64xf32>
    %193 = arith.select %151, %172, %146 : vector<32x64xi1>, vector<32x64xf32>
    %194 = arith.select %151, %170, %147 : vector<32x64xi1>, vector<32x64xf32>
    %195 = arith.select %151, %192, %148 : vector<32x64xi1>, vector<32x64xf32>
    %196 = arith.select %151, %190, %149 : vector<32x64xi1>, vector<32x64xf32>
    %cst_29 = arith.constant 4.000000e+00 : f32
    %197 = vector.broadcast %cst_29 : f32 to vector<32x64xf32>
    %198 = arith.cmpf ogt, %6, %197 : vector<32x64xf32>
    %199 = vector.extract_strided_slice %7 {offsets = [128, 0], sizes = [32, 256], strides = [1, 1]} : vector<192x256xf32> to vector<32x256xf32>
    %cst_30 = arith.constant dense<0.000000e+00> : vector<32x256xf32>
    %200 = tpu.matmul %193, %1, %cst_30 {dimension_numbers = #tpu.dot_dimension_numbers<[1], [0], [0], [1], [0, 0, 1, 1], [], []>} : vector<32x64xf32>, vector<64x256xf32>, vector<32x256xf32> -> vector<32x256xf32>
    %201 = arith.addf %199, %200 : vector<32x256xf32>
    %202 = vector.broadcast %3 : vector<1x256xf32> to vector<32x256xf32>
    %203 = arith.addf %201, %202 : vector<32x256xf32>
    %204 = vector.extract_strided_slice %203 {offsets = [0, 0], sizes = [32, 192], strides = [1, 1]} : vector<32x256xf32> to vector<32x192xf32>
    %205 = arith.negf %204 : vector<32x192xf32>
    %206 = math.exp %205 : vector<32x192xf32>
    %cst_31 = arith.constant 1.000000e+00 : f32
    %207 = vector.broadcast %cst_31 : f32 to vector<32x192xf32>
    %208 = arith.addf %207, %206 : vector<32x192xf32>
    %209 = arith.divf %207, %208 : vector<32x192xf32>
    %210 = vector.extract_strided_slice %203 {offsets = [0, 192], sizes = [32, 64], strides = [1, 1]} : vector<32x256xf32> to vector<32x64xf32>
    %211 = math.tanh %210 : vector<32x64xf32>
    %212 = vector.extract_strided_slice %209 {offsets = [0, 0], sizes = [32, 64], strides = [1, 1]} : vector<32x192xf32> to vector<32x64xf32>
    %213 = vector.extract_strided_slice %209 {offsets = [0, 64], sizes = [32, 64], strides = [1, 1]} : vector<32x192xf32> to vector<32x64xf32>
    %214 = vector.extract_strided_slice %209 {offsets = [0, 128], sizes = [32, 64], strides = [1, 1]} : vector<32x192xf32> to vector<32x64xf32>
    %215 = arith.mulf %213, %194 : vector<32x64xf32>
    %216 = arith.mulf %212, %211 : vector<32x64xf32>
    %217 = arith.addf %215, %216 : vector<32x64xf32>
    %218 = math.tanh %217 : vector<32x64xf32>
    %219 = arith.mulf %214, %218 : vector<32x64xf32>
    %220 = tpu.concatenate %219, %195 in 1 : vector<32x64xf32>, vector<32x64xf32> -> vector<32x128xf32>
    %cst_32 = arith.constant dense<0.000000e+00> : vector<32x256xf32>
    %221 = tpu.matmul %220, %2, %cst_32 {dimension_numbers = #tpu.dot_dimension_numbers<[1], [0], [0], [1], [0, 0, 1, 1], [], []>} : vector<32x128xf32>, vector<128x256xf32>, vector<32x256xf32> -> vector<32x256xf32>
    %222 = vector.broadcast %4 : vector<1x256xf32> to vector<32x256xf32>
    %223 = arith.addf %221, %222 : vector<32x256xf32>
    %224 = vector.extract_strided_slice %223 {offsets = [0, 0], sizes = [32, 192], strides = [1, 1]} : vector<32x256xf32> to vector<32x192xf32>
    %225 = arith.negf %224 : vector<32x192xf32>
    %226 = math.exp %225 : vector<32x192xf32>
    %cst_33 = arith.constant 1.000000e+00 : f32
    %227 = vector.broadcast %cst_33 : f32 to vector<32x192xf32>
    %228 = arith.addf %227, %226 : vector<32x192xf32>
    %229 = arith.divf %227, %228 : vector<32x192xf32>
    %230 = vector.extract_strided_slice %223 {offsets = [0, 192], sizes = [32, 64], strides = [1, 1]} : vector<32x256xf32> to vector<32x64xf32>
    %231 = math.tanh %230 : vector<32x64xf32>
    %232 = vector.extract_strided_slice %229 {offsets = [0, 0], sizes = [32, 64], strides = [1, 1]} : vector<32x192xf32> to vector<32x64xf32>
    %233 = vector.extract_strided_slice %229 {offsets = [0, 64], sizes = [32, 64], strides = [1, 1]} : vector<32x192xf32> to vector<32x64xf32>
    %234 = vector.extract_strided_slice %229 {offsets = [0, 128], sizes = [32, 64], strides = [1, 1]} : vector<32x192xf32> to vector<32x64xf32>
    %235 = arith.mulf %233, %196 : vector<32x64xf32>
    %236 = arith.mulf %232, %231 : vector<32x64xf32>
    %237 = arith.addf %235, %236 : vector<32x64xf32>
    %238 = math.tanh %237 : vector<32x64xf32>
    %239 = arith.mulf %234, %238 : vector<32x64xf32>
    %240 = arith.select %198, %219, %193 : vector<32x64xi1>, vector<32x64xf32>
    %241 = arith.select %198, %217, %194 : vector<32x64xi1>, vector<32x64xf32>
    %242 = arith.select %198, %239, %195 : vector<32x64xi1>, vector<32x64xf32>
    %243 = arith.select %198, %237, %196 : vector<32x64xi1>, vector<32x64xf32>
    %cst_34 = arith.constant 5.000000e+00 : f32
    %244 = vector.broadcast %cst_34 : f32 to vector<32x64xf32>
    %245 = arith.cmpf ogt, %6, %244 : vector<32x64xf32>
    %246 = vector.extract_strided_slice %7 {offsets = [160, 0], sizes = [32, 256], strides = [1, 1]} : vector<192x256xf32> to vector<32x256xf32>
    %cst_35 = arith.constant dense<0.000000e+00> : vector<32x256xf32>
    %247 = tpu.matmul %240, %1, %cst_35 {dimension_numbers = #tpu.dot_dimension_numbers<[1], [0], [0], [1], [0, 0, 1, 1], [], []>} : vector<32x64xf32>, vector<64x256xf32>, vector<32x256xf32> -> vector<32x256xf32>
    %248 = arith.addf %246, %247 : vector<32x256xf32>
    %249 = vector.broadcast %3 : vector<1x256xf32> to vector<32x256xf32>
    %250 = arith.addf %248, %249 : vector<32x256xf32>
    %251 = vector.extract_strided_slice %250 {offsets = [0, 0], sizes = [32, 192], strides = [1, 1]} : vector<32x256xf32> to vector<32x192xf32>
    %252 = arith.negf %251 : vector<32x192xf32>
    %253 = math.exp %252 : vector<32x192xf32>
    %cst_36 = arith.constant 1.000000e+00 : f32
    %254 = vector.broadcast %cst_36 : f32 to vector<32x192xf32>
    %255 = arith.addf %254, %253 : vector<32x192xf32>
    %256 = arith.divf %254, %255 : vector<32x192xf32>
    %257 = vector.extract_strided_slice %250 {offsets = [0, 192], sizes = [32, 64], strides = [1, 1]} : vector<32x256xf32> to vector<32x64xf32>
    %258 = math.tanh %257 : vector<32x64xf32>
    %259 = vector.extract_strided_slice %256 {offsets = [0, 0], sizes = [32, 64], strides = [1, 1]} : vector<32x192xf32> to vector<32x64xf32>
    %260 = vector.extract_strided_slice %256 {offsets = [0, 64], sizes = [32, 64], strides = [1, 1]} : vector<32x192xf32> to vector<32x64xf32>
    %261 = vector.extract_strided_slice %256 {offsets = [0, 128], sizes = [32, 64], strides = [1, 1]} : vector<32x192xf32> to vector<32x64xf32>
    %262 = arith.mulf %260, %241 : vector<32x64xf32>
    %263 = arith.mulf %259, %258 : vector<32x64xf32>
    %264 = arith.addf %262, %263 : vector<32x64xf32>
    %265 = math.tanh %264 : vector<32x64xf32>
    %266 = arith.mulf %261, %265 : vector<32x64xf32>
    %267 = tpu.concatenate %266, %242 in 1 : vector<32x64xf32>, vector<32x64xf32> -> vector<32x128xf32>
    %cst_37 = arith.constant dense<0.000000e+00> : vector<32x256xf32>
    %268 = tpu.matmul %267, %2, %cst_37 {dimension_numbers = #tpu.dot_dimension_numbers<[1], [0], [0], [1], [0, 0, 1, 1], [], []>} : vector<32x128xf32>, vector<128x256xf32>, vector<32x256xf32> -> vector<32x256xf32>
    %269 = vector.broadcast %4 : vector<1x256xf32> to vector<32x256xf32>
    %270 = arith.addf %268, %269 : vector<32x256xf32>
    %271 = vector.extract_strided_slice %270 {offsets = [0, 0], sizes = [32, 192], strides = [1, 1]} : vector<32x256xf32> to vector<32x192xf32>
    %272 = arith.negf %271 : vector<32x192xf32>
    %273 = math.exp %272 : vector<32x192xf32>
    %cst_38 = arith.constant 1.000000e+00 : f32
    %274 = vector.broadcast %cst_38 : f32 to vector<32x192xf32>
    %275 = arith.addf %274, %273 : vector<32x192xf32>
    %276 = arith.divf %274, %275 : vector<32x192xf32>
    %277 = vector.extract_strided_slice %270 {offsets = [0, 192], sizes = [32, 64], strides = [1, 1]} : vector<32x256xf32> to vector<32x64xf32>
    %278 = math.tanh %277 : vector<32x64xf32>
    %279 = vector.extract_strided_slice %276 {offsets = [0, 0], sizes = [32, 64], strides = [1, 1]} : vector<32x192xf32> to vector<32x64xf32>
    %280 = vector.extract_strided_slice %276 {offsets = [0, 64], sizes = [32, 64], strides = [1, 1]} : vector<32x192xf32> to vector<32x64xf32>
    %281 = vector.extract_strided_slice %276 {offsets = [0, 128], sizes = [32, 64], strides = [1, 1]} : vector<32x192xf32> to vector<32x64xf32>
    %282 = arith.mulf %280, %243 : vector<32x64xf32>
    %283 = arith.mulf %279, %278 : vector<32x64xf32>
    %284 = arith.addf %282, %283 : vector<32x64xf32>
    %285 = math.tanh %284 : vector<32x64xf32>
    %286 = arith.mulf %281, %285 : vector<32x64xf32>
    %287 = arith.select %245, %286, %242 : vector<32x64xi1>, vector<32x64xf32>
    %c0_39 = arith.constant 0 : index
    %c0_40 = arith.constant 0 : index
    %288 = vector.load %arg1[%c0_39, %c0_40] : memref<4x32xf32, #tpu.memory_space<vmem>>, vector<4x32xf32>
    %cst_41 = arith.constant dense<0.000000e+00> : vector<4x64xf32>
    %289 = tpu.matmul %288, %287, %cst_41 {dimension_numbers = #tpu.dot_dimension_numbers<[1], [0], [0], [1], [0, 0, 1, 1], [], []>} : vector<4x32xf32>, vector<32x64xf32>, vector<4x64xf32> -> vector<4x64xf32>
    %290 = vector.extract_strided_slice %289 {offsets = [0, 0], sizes = [1, 64], strides = [1, 1]} : vector<4x64xf32> to vector<1x64xf32>
    %291 = vector.extract_strided_slice %289 {offsets = [1, 0], sizes = [3, 64], strides = [1, 1]} : vector<4x64xf32> to vector<3x64xf32>
    %c0_42 = arith.constant 0 : index
    %c0_43 = arith.constant 0 : index
    %292 = vector.load %arg3[%c0_42, %c0_43] : memref<24x128xf32, #tpu.memory_space<vmem>>, vector<1x128xf32>
    %c8 = arith.constant 8 : index
    %c0_44 = arith.constant 0 : index
    %293 = vector.load %arg3[%c8, %c0_44] : memref<24x128xf32, #tpu.memory_space<vmem>>, vector<3x128xf32>
    %c16 = arith.constant 16 : index
    %c0_45 = arith.constant 0 : index
    %294 = vector.load %arg3[%c16, %c0_45] : memref<24x128xf32, #tpu.memory_space<vmem>>, vector<3x128xf32>
    %c0_46 = arith.constant 0 : index
    %c0_47 = arith.constant 0 : index
    %295 = vector.load %arg4[%c0_46, %c0_47] : memref<752x64xf32, #tpu.memory_space<vmem>>, vector<128x64xf32>
    %cst_48 = arith.constant dense<0.000000e+00> : vector<1x64xf32>
    %296 = tpu.matmul %292, %295, %cst_48 {dimension_numbers = #tpu.dot_dimension_numbers<[1], [0], [0], [1], [0, 0, 1, 1], [], []>} : vector<1x128xf32>, vector<128x64xf32>, vector<1x64xf32> -> vector<1x64xf32>
    %c128_49 = arith.constant 128 : index
    %c0_50 = arith.constant 0 : index
    %297 = vector.load %arg4[%c128_49, %c0_50] : memref<752x64xf32, #tpu.memory_space<vmem>>, vector<64x64xf32>
    %cst_51 = arith.constant dense<0.000000e+00> : vector<1x64xf32>
    %298 = tpu.matmul %290, %297, %cst_51 {dimension_numbers = #tpu.dot_dimension_numbers<[1], [0], [0], [1], [0, 0, 1, 1], [], []>} : vector<1x64xf32>, vector<64x64xf32>, vector<1x64xf32> -> vector<1x64xf32>
    %299 = arith.addf %296, %298 : vector<1x64xf32>
    %c192_52 = arith.constant 192 : index
    %c0_53 = arith.constant 0 : index
    %300 = vector.load %arg4[%c192_52, %c0_53] : memref<752x64xf32, #tpu.memory_space<vmem>>, vector<1x64xf32>
    %301 = arith.addf %299, %300 : vector<1x64xf32>
    %cst_54 = arith.constant 0.000000e+00 : f32
    %302 = vector.broadcast %cst_54 : f32 to vector<1x64xf32>
    %303 = arith.maximumf %301, %302 : vector<1x64xf32>
    %c200 = arith.constant 200 : index
    %c0_55 = arith.constant 0 : index
    %304 = vector.load %arg4[%c200, %c0_55] : memref<752x64xf32, #tpu.memory_space<vmem>>, vector<64x64xf32>
    %cst_56 = arith.constant dense<0.000000e+00> : vector<1x64xf32>
    %305 = tpu.matmul %303, %304, %cst_56 {dimension_numbers = #tpu.dot_dimension_numbers<[1], [0], [0], [1], [0, 0, 1, 1], [], []>} : vector<1x64xf32>, vector<64x64xf32>, vector<1x64xf32> -> vector<1x64xf32>
    %c264_57 = arith.constant 264 : index
    %c0_58 = arith.constant 0 : index
    %306 = vector.load %arg4[%c264_57, %c0_58] : memref<752x64xf32, #tpu.memory_space<vmem>>, vector<1x64xf32>
    %307 = arith.addf %305, %306 : vector<1x64xf32>
    %c272 = arith.constant 272 : index
    %c0_59 = arith.constant 0 : index
    %308 = vector.load %arg4[%c272, %c0_59] : memref<752x64xf32, #tpu.memory_space<vmem>>, vector<128x64xf32>
    %cst_60 = arith.constant dense<0.000000e+00> : vector<3x64xf32>
    %309 = tpu.matmul %294, %308, %cst_60 {dimension_numbers = #tpu.dot_dimension_numbers<[1], [0], [0], [1], [0, 0, 1, 1], [], []>} : vector<3x128xf32>, vector<128x64xf32>, vector<3x64xf32> -> vector<3x64xf32>
    %c400 = arith.constant 400 : index
    %c0_61 = arith.constant 0 : index
    %310 = vector.load %arg4[%c400, %c0_61] : memref<752x64xf32, #tpu.memory_space<vmem>>, vector<1x64xf32>
    %311 = vector.broadcast %310 : vector<1x64xf32> to vector<3x64xf32>
    %312 = arith.addf %309, %311 : vector<3x64xf32>
    %cst_62 = arith.constant 0.000000e+00 : f32
    %313 = vector.broadcast %cst_62 : f32 to vector<3x64xf32>
    %314 = arith.maximumf %312, %313 : vector<3x64xf32>
    %c408 = arith.constant 408 : index
    %c0_63 = arith.constant 0 : index
    %315 = vector.load %arg4[%c408, %c0_63] : memref<752x64xf32, #tpu.memory_space<vmem>>, vector<64x64xf32>
    %cst_64 = arith.constant dense<0.000000e+00> : vector<3x64xf32>
    %316 = tpu.matmul %314, %315, %cst_64 {dimension_numbers = #tpu.dot_dimension_numbers<[1], [0], [0], [1], [0, 0, 1, 1], [], []>} : vector<3x64xf32>, vector<64x64xf32>, vector<3x64xf32> -> vector<3x64xf32>
    %c472 = arith.constant 472 : index
    %c0_65 = arith.constant 0 : index
    %317 = vector.load %arg4[%c472, %c0_65] : memref<752x64xf32, #tpu.memory_space<vmem>>, vector<1x64xf32>
    %318 = vector.broadcast %317 : vector<1x64xf32> to vector<3x64xf32>
    %319 = arith.addf %316, %318 : vector<3x64xf32>
    %320 = vector.extract_strided_slice %319 {offsets = [0, 0], sizes = [3, 1], strides = [1, 1]} : vector<3x64xf32> to vector<3x1xf32>
    %cst_66 = arith.constant 1.000000e+01 : f32
    %321 = vector.broadcast %cst_66 : f32 to vector<3x1xf32>
    %322 = arith.mulf %320, %321 : vector<3x1xf32>
    %cst_67 = arith.constant dense<0xFF800000> : vector<1xf32>
    %323 = vector.multi_reduction <maximumf>, %322, %cst_67 [0] : vector<3x1xf32> to vector<1xf32>
    %324 = vector.shape_cast %323 : vector<1xf32> to vector<1x1xf32>
    %325 = vector.broadcast %324 : vector<1x1xf32> to vector<3x1xf32>
    %326 = arith.subf %322, %325 : vector<3x1xf32>
    %327 = math.exp %326 : vector<3x1xf32>
    %cst_68 = arith.constant dense<0.000000e+00> : vector<1xf32>
    %328 = vector.multi_reduction <add>, %327, %cst_68 [0] : vector<3x1xf32> to vector<1xf32>
    %329 = vector.shape_cast %328 : vector<1xf32> to vector<1x1xf32>
    %330 = vector.broadcast %329 : vector<1x1xf32> to vector<3x1xf32>
    %331 = arith.divf %327, %330 : vector<3x1xf32>
    %332 = vector.broadcast %331 : vector<3x1xf32> to vector<3x128xf32>
    %333 = arith.mulf %332, %293 : vector<3x128xf32>
    %cst_69 = arith.constant dense<0.000000e+00> : vector<128xf32>
    %334 = vector.multi_reduction <add>, %333, %cst_69 [0] : vector<3x128xf32> to vector<128xf32>
    %335 = vector.shape_cast %334 : vector<128xf32> to vector<1x128xf32>
    %336 = vector.broadcast %331 : vector<3x1xf32> to vector<3x64xf32>
    %337 = arith.mulf %336, %291 : vector<3x64xf32>
    %cst_70 = arith.constant dense<0.000000e+00> : vector<64xf32>
    %338 = vector.multi_reduction <add>, %337, %cst_70 [0] : vector<3x64xf32> to vector<64xf32>
    %339 = vector.shape_cast %338 : vector<64xf32> to vector<1x64xf32>
    %c480 = arith.constant 480 : index
    %c0_71 = arith.constant 0 : index
    %340 = vector.load %arg4[%c480, %c0_71] : memref<752x64xf32, #tpu.memory_space<vmem>>, vector<128x64xf32>
    %cst_72 = arith.constant dense<0.000000e+00> : vector<1x64xf32>
    %341 = tpu.matmul %335, %340, %cst_72 {dimension_numbers = #tpu.dot_dimension_numbers<[1], [0], [0], [1], [0, 0, 1, 1], [], []>} : vector<1x128xf32>, vector<128x64xf32>, vector<1x64xf32> -> vector<1x64xf32>
    %c608 = arith.constant 608 : index
    %c0_73 = arith.constant 0 : index
    %342 = vector.load %arg4[%c608, %c0_73] : memref<752x64xf32, #tpu.memory_space<vmem>>, vector<64x64xf32>
    %cst_74 = arith.constant dense<0.000000e+00> : vector<1x64xf32>
    %343 = tpu.matmul %339, %342, %cst_74 {dimension_numbers = #tpu.dot_dimension_numbers<[1], [0], [0], [1], [0, 0, 1, 1], [], []>} : vector<1x64xf32>, vector<64x64xf32>, vector<1x64xf32> -> vector<1x64xf32>
    %344 = arith.addf %341, %343 : vector<1x64xf32>
    %c672 = arith.constant 672 : index
    %c0_75 = arith.constant 0 : index
    %345 = vector.load %arg4[%c672, %c0_75] : memref<752x64xf32, #tpu.memory_space<vmem>>, vector<1x64xf32>
    %346 = arith.addf %344, %345 : vector<1x64xf32>
    %cst_76 = arith.constant 0.000000e+00 : f32
    %347 = vector.broadcast %cst_76 : f32 to vector<1x64xf32>
    %348 = arith.maximumf %346, %347 : vector<1x64xf32>
    %c680 = arith.constant 680 : index
    %c0_77 = arith.constant 0 : index
    %349 = vector.load %arg4[%c680, %c0_77] : memref<752x64xf32, #tpu.memory_space<vmem>>, vector<64x64xf32>
    %cst_78 = arith.constant dense<0.000000e+00> : vector<1x64xf32>
    %350 = tpu.matmul %348, %349, %cst_78 {dimension_numbers = #tpu.dot_dimension_numbers<[1], [0], [0], [1], [0, 0, 1, 1], [], []>} : vector<1x64xf32>, vector<64x64xf32>, vector<1x64xf32> -> vector<1x64xf32>
    %c744 = arith.constant 744 : index
    %c0_79 = arith.constant 0 : index
    %351 = vector.load %arg4[%c744, %c0_79] : memref<752x64xf32, #tpu.memory_space<vmem>>, vector<1x64xf32>
    %352 = arith.addf %350, %351 : vector<1x64xf32>
    %353 = tpu.concatenate %307, %352 in 0 : vector<1x64xf32>, vector<1x64xf32> -> vector<2x64xf32>
    %c0_80 = arith.constant 0 : index
    %c0_81 = arith.constant 0 : index
    %354 = vector.load %arg5[%c0_80, %c0_81] : memref<2x64xf32, #tpu.memory_space<vmem>>, vector<2x64xf32>
    tpu.vector_store %arg5[%c0_80, %c0_81], %353 {strides = array<i32>} : memref<2x64xf32, #tpu.memory_space<vmem>>, vector<2x64xf32>,
    return
  }
}

</mosaic_0001>

<bundles_post_ra>
// kernel: tpu_custom_call.1
= control target key start
LH: loop header
LB: loop body
LE: loop exit
PB: predicated region body
PF: predicated region fallthrough
CT: control target
= control target key end

     0   :  { %s8896_s0 = inlined_call_operand.vmem [shape: f32[224,64], index: 0, kind: input, shape index: {}]   ;;  %s8897_s1 = inlined_call_operand.vmem [shape: f32[4,32], index: 1, kind: input, shape index: {}]   ;;  %s8898_s2 = inlined_call_operand.vmem [shape: f32[272,256], index: 2, kind: input, shape index: {}]   ;;  %s8899_s3 = inlined_call_operand.vmem [shape: f32[24,128], index: 3, kind: input, shape index: {}]   ;;  %s8900_s4 = inlined_call_operand.vmem [shape: f32[752,64], index: 4, kind: input, shape index: {}]   ;;  %s8901_s5 = inlined_call_operand.hbm [shape: f32[2,64], index: 5, kind: output, shape index: {}]  }
   0x1   :  { %v5822_v0 = vld [vmem:[%s8898_s2 + $0xf8] sm:$0xff]  ;;  %v5827_v1 = vld [vmem:[%s8898_s2 + $0xe8] sm:$0xff] }
   0x2   :  { %412 = vmatpush.msra.mxu3 %v5822_v0  ;;  %v36_v2 = vld [vmem:[%s8898_s2 + $0x78] sm:$0xff]  ;;  %v34_v3 = vld [vmem:[%s8898_s2 + $0x68] sm:$0xff] }
   0x3   :  { %v5839_v4 = vld [vmem:[%s8898_s2 + $0xd8] sm:$0xff]  ;;  %287 = vmatpush.msra.mxu1 %v36_v2  ;;  %v5848_v6 = vld [vmem:[%s8898_s2 + $0xc8] sm:$0xff] }
   0x4   :  { %413 = vmatpush.msra.mxu3 %v5827_v1  ;;  %v32_v5 = vld [vmem:[%s8898_s2 + $0x58] sm:$0xff]  ;;  %v30_v7 = vld [vmem:[%s8898_s2 + $0x48] sm:$0xff] }
   0x5   :  { %288 = vmatpush.msra.mxu1 %v34_v3  ;;  %v5857_v8 = vld [vmem:[%s8898_s2 + $0xb8] sm:$0xff] }
   0x6   :  { %414 = vmatpush.msra.mxu3 %v5839_v4  ;;  %v28_v9 = vld [vmem:[%s8898_s2 + $0x38] sm:$0xff] }
   0x7   :  { %289 = vmatpush.msra.mxu1 %v32_v5 }
   0x8   :  { %415 = vmatpush.msra.mxu3 %v5848_v6 }
   0x9   :  { %10 = vsyncpa [#allocation3], 0  ;;  %v5866_v10 = vld [vmem:[%s8898_s2 + $0xa8] sm:$0xff]  ;;  %290 = vmatpush.msra.mxu1 %v30_v7  ;;  %v5875_v12 = vld [vmem:[%s8898_s2 + $0xf0] sm:$0xff]  ;;  %vm117_vm0 = vcmask 523264   ;;  %v5785_v25 = vmov 0.0  }
   0xa   :  { %416 = vmatpush.msra.mxu3 %v5857_v8  ;;  %v26_v11 = vld [vmem:[%s8898_s2 + $0x28] sm:$0xff]  ;;  %v5880_v13 = vld [vmem:[%s8898_s2 + $0xe0] sm:$0xff]  ;;  %v5885_v14 = vld [vmem:[%s8898_s2 + $0x98] sm:$0xff]  ;;  %383 = vmatpush.msra.mxu2 %v5875_v12  ;;  %s5786_s17 = smov 64   ;;  %s5788_s8 = smov [#allocation2]  }
   0xb   :  { %8929 = vst [vmem:[#allocation5_spill] sm:$0xff] %v5885_v14  ;;  %291 = vmatpush.msra.mxu1 %v28_v9  ;;  %v35_v15 = vld [vmem:[%s8898_s2 + $0x70] sm:$0xff]  ;;  %v33_v16 = vld [vmem:[%s8898_s2 + $0x60] sm:$0xff]  ;;  %v24_v17 = vld [vmem:[%s8898_s2 + $0x18] sm:$0xff]  ;;  %s4828_s9 = sshll.u32 %s5788_s8, 4  ;;  %s4830_s12 = sshll.u32 %s8901_s5, 4  ;;  %s4829_s9 = int_to_ptr.vmem [resolvable:$true] %s4828_s9  ;;  %s4831_s12 = int_to_ptr.hbm [resolvable:$true] %s4830_s12 }
   0xc   :  { %417 = vmatpush.msra.mxu3 %v5866_v10  ;;  %v5901_v18 = vld [vmem:[%s8898_s2 + $0xd0] sm:$0xff]  ;;  %198 = vmatpush.msra.mxu0 %v35_v15  ;;  %v5906_v19 = vld [vmem:[%s8898_s2 + $0x88] sm:$0xff]  ;;  %v89_v22 = vld [vmem:[%s8896_s0] sm:$0xff] }
   0xd   :  { %292 = vmatpush.msra.mxu1 %v26_v11  ;;  %384 = vmatpush.msra.mxu2 %v5880_v13  ;;  %v31_v20 = vld [vmem:[%s8898_s2 + $0x50] sm:$0xff]  ;;  %v22_v21 = vld [vmem:[%s8898_s2 + $0x8] sm:$0xff]  ;;  %v5923_v23 = vld [vmem:[%s8898_s2 + $0xc0] sm:$0xff] }
   0xe   :  { %418 = vmatpush.msra.mxu3 %v5885_v14  ;;  %199 = vmatpush.msra.mxu0 %v33_v16  ;;  %v29_v24 = vld [vmem:[%s8898_s2 + $0x40] sm:$0xff]  ;;  %v5932_v26 = vld [vmem:[%s8898_s2 + $0xb0] sm:$0xff]  ;;  %v90_v32 = vld [vmem:[%s8896_s0 + $0x8] sm:$0xff] }
   0xf   :  { %293 = vmatpush.msra.mxu1 %v24_v17  ;;  %385 = vmatpush.msra.mxu2 %v5901_v18  ;;  %v27_v27 = vld [vmem:[%s8898_s2 + $0x30] sm:$0xff]  ;;  %v5942_v28 = vld [vmem:[%s8898_s2 + $0xa0] sm:$0xff]  ;;  %v92_v36 = vld [vmem:[%s8896_s0 + $0x18] sm:$0xff] }
  0x10   :  { %419 = vmatpush.msra.mxu3 %v5906_v19  ;;  %200 = vmatpush.msra.mxu0 %v31_v20  ;;  %v25_v29 = vld [vmem:[%s8898_s2 + $0x20] sm:$0xff]  ;;  %v5952_v30 = vld [vmem:[%s8898_s2 + $0x90] sm:$0xff] }
  0x11   :  { %420 = vmatmul.f32.vlgmr.msra.gmra.mxu3 %v5785_v25  ;;  %294 = vmatpush.msra.mxu1 %v22_v21  ;;  %v23_v31 = vld [vmem:[%s8898_s2 + $0x10] sm:$0xff]  ;;  %v5965_v33 = vld [vmem:[%s8898_s2 + $0x80] sm:$0xff] }
  0x12   :  { %4865 = vmatmul.msk.f32.vlgmr.msra.gmra.mxu1 %vm117_vm0, %v89_v22  ;;  %386 = vmatpush.msra.mxu2 %v5923_v23  ;;  %8930 = vst [vmem:[#allocation6_spill] sm:$0xff] %v5965_v33  ;;  %v21_v34 = vld [vmem:[%s8898_s2] sm:$0xff]  ;;  %v91_v35 = vld [vmem:[%s8896_s0 + $0x10] sm:$0xff] }
  0x13   :  { %201 = vmatpush.msra.mxu0 %v29_v24  ;;  %2462 = vmatpush.msrb.mxu1 %v5822_v0  ;;  %v4839_v38 = vld [vmem:[%s8898_s2 + $0x200] ss:$8 sm:$0x3] }
  0x14   :  { %387 = vmatpush.msra.mxu2 %v5932_v26  ;;  %v6018_v39 = vperm.slane %v4839_v38, 1  ;;  %v6040_v62 = vperm.slane %v4839_v38, 0 }
  0x15   :  { %202 = vmatpush.msra.mxu0 %v27_v27  ;;  %2463 = vmatpush.msrb.mxu1 %v5827_v1 }
  0x16   :  { %388 = vmatpush.msra.mxu2 %v5942_v28  ;;  %8931 = vst [vmem:[#allocation7_spill] sm:$0xff] %v6018_v39 }
  0x17   :  { %203 = vmatpush.msra.mxu0 %v25_v29  ;;  %2464 = vmatpush.msrb.mxu1 %v5839_v4  ;;  %8932 = vst [vmem:[#allocation8_spill] sm:$0xff] %v6040_v62 }
  0x18   :  { %389 = vmatpush.msra.mxu2 %v5952_v30 }
  0x19   :  { %423 = vmatmul.f32.gmra.mxu3 %v5785_v25  ;;  %204 = vmatpush.msra.mxu0 %v23_v31 }
  0x1a   :  { %4866 = vmatmul.msk.f32.gmra.mxu1 %vm117_vm0, %v90_v32  ;;  %390 = vmatpush.msra.mxu2 %v5965_v33 }
  0x1b   :  { %391 = vmatmul.f32.vlgmr.msra.gmra.mxu2 %v5785_v25  ;;  %205 = vmatpush.msra.mxu0 %v21_v34 }
  0x1c   :  { %4841 = vmatmul.msk.f32.vlgmr.msra.gmra.mxu0 %vm117_vm0, %v89_v22  ;;  %2465 = vmatpush.msrb.mxu1 %v5848_v6 }
  0x1d   :  { %2433 = vmatpush.msrb.mxu0 %v5875_v12 }
  0x1e   :  { %2466 = vmatpush.msrb.mxu1 %v5857_v8 }
  0x1f   :  { %2434 = vmatpush.msrb.mxu0 %v5880_v13 }
  0x20   :  { %2467 = vmatpush.msrb.mxu1 %v5866_v10 }
  0x21   :  { %426 = vmatmul.f32.gmra.mxu3 %v5785_v25  ;;  %2435 = vmatpush.msrb.mxu0 %v5901_v18 }
  0x22   :  { %4867 = vmatmul.msk.f32.gmra.mxu1 %vm117_vm0, %v91_v35 }
  0x23   :  { %394 = vmatmul.f32.gmra.mxu2 %v5785_v25  ;;  %2436 = vmatpush.msrb.mxu0 %v5923_v23 }
  0x24   :  { %4842 = vmatmul.msk.f32.gmra.mxu0 %vm117_vm0, %v90_v32  ;;  %2468 = vmatpush.msrb.mxu1 %v5885_v14 }
  0x25   :  { %2437 = vmatpush.msrb.mxu0 %v5932_v26 }
  0x26   :  { %2469 = vmatpush.msrb.mxu1 %v5906_v19 }
  0x27   :  { %2438 = vmatpush.msrb.mxu0 %v5942_v28 }
  0x28   :  { %3158 = vmatpush.msra.mxu1 %v5822_v0 }
  0x29   :  { %429 = vmatmul.f32.gmra.mxu3 %v5785_v25  ;;  %2439 = vmatpush.msrb.mxu0 %v5952_v30 }
  0x2a   :  { %4868 = vmatmul.msk.f32.gmra.mxu1 %vm117_vm0, %v92_v36 }
  0x2b   :  { %397 = vmatmul.f32.gmra.mxu2 %v5785_v25  ;;  %2440 = vmatpush.msrb.mxu0 %v5965_v33 }
  0x2c   :  { %4843 = vmatmul.msk.f32.gmra.mxu0 %vm117_vm0, %v91_v35  ;;  %3159 = vmatpush.msra.mxu1 %v5827_v1 }
  0x2d   :  { %3129 = vmatpush.msra.mxu0 %v5875_v12 }
  0x2e   :  { %3160 = vmatpush.msra.mxu1 %v5839_v4 }
  0x2f   :  { %3130 = vmatpush.msra.mxu0 %v5880_v13 }
  0x30   :  { %3161 = vmatpush.msra.mxu1 %v5848_v6 }
  0x31   :  { %3131 = vmatpush.msra.mxu0 %v5901_v18 }
  0x32   :  { %3162 = vmatpush.msra.mxu1 %v5857_v8 }
  0x33   :  { %400 = vmatmul.f32.gmra.mxu2 %v5785_v25  ;;  %3132 = vmatpush.msra.mxu0 %v5923_v23 }
  0x34   :  { %4844 = vmatmul.msk.f32.gmra.mxu0 %vm117_vm0, %v92_v36  ;;  %3163 = vmatpush.msra.mxu1 %v5866_v10 }
  0x35   :  { %3133 = vmatpush.msra.mxu0 %v5932_v26 }
  0x36   :  { %3164 = vmatpush.msra.mxu1 %v5885_v14 }
  0x37   :  { %3134 = vmatpush.msra.mxu0 %v5942_v28 }
  0x38   :  { %3165 = vmatpush.msra.mxu1 %v5906_v19 }
  0x39   :  { %3135 = vmatpush.msra.mxu0 %v5952_v30 }
  0x3b   :  { %3136 = vmatpush.msra.mxu0 %v5965_v33 }
  0x8f   :  { %v296_v37 = vpop.f32.mrf.mxu1 }
  0x94   :  { %v421_v40 = vpop.f32.mrf.mxu3 }
  0x95   :  { %v434_v41 = vadd.f32 %v421_v40, %v296_v37 }
  0x97   :  { %v6021_v42 = vadd.f32 %v6018_v39, %v434_v41  ;;  %v299_v43 = vpop.f32.mrf.mxu1 }
  0x99   :  { %5047 = vtanh.f32 %v6021_v42  ;;  %v207_v59 = vpop.f32.mrf.mxu0 }
  0x9c   :  { %v424_v44 = vpop.f32.mrf.mxu3 }
  0x9d   :  { %v436_v45 = vadd.f32 %v424_v44, %v299_v43 }
  0x9e   :  { %v392_v60 = vpop.f32.mrf.mxu2 }
  0x9f   :  { %v5048_v46 = vpop.eup %5047  ;;  %v6025_v47 = vadd.f32 %v6018_v39, %v436_v45  ;;  %v302_v48 = vpop.f32.mrf.mxu1  ;;  %v433_v61 = vadd.f32 %v392_v60, %v207_v59 }
  0xa0   :  { %618 = vrot.lane.b32.xlu0 %v5048_v46, %s5786_s17 }
  0xa1   :  { %5049 = vtanh.f32 %v6025_v47  ;;  %v210_v63 = vpop.f32.mrf.mxu0  ;;  %v446_v3 = vadd.f32 %v6040_v62, %v433_v61 }
  0xa3   :  { %v4889_v5 = vmul.f32 -1.442695, %v446_v3 }
  0xa4   :  { %v427_v49 = vpop.f32.mrf.mxu3 }
  0xa5   :  { %v438_v50 = vadd.f32 %v427_v49, %v302_v48 }
  0xa6   :  { %v395_v2 = vpop.f32.mrf.mxu2 }
  0xa7   :  { %v5050_v51 = vpop.eup %5049  ;;  %v6030_v52 = vadd.f32 %v6018_v39, %v438_v50  ;;  %v305_v53 = vpop.f32.mrf.mxu1  ;;  %v435_v7 = vadd.f32 %v395_v2, %v210_v63 }
  0xa8   :  { %620 = vrot.lane.b32.xlu0 %v5050_v51, %s5786_s17 }
  0xa9   :  { %5051 = vtanh.f32 %v6030_v52  ;;  %v213_v9 = vpop.f32.mrf.mxu0  ;;  %v448_v15 = vadd.f32 %v6040_v62, %v435_v7 }
  0xab   :  { %v4891_v17 = vmul.f32 -1.442695, %v448_v15 }
  0xac   :  { %v430_v54 = vpop.f32.mrf.mxu3 }
  0xad   :  { %v440_v55 = vadd.f32 %v430_v54, %v305_v53 }
  0xae   :  { %v398_v11 = vpop.f32.mrf.mxu2 }
  0xaf   :  { %v5052_v56 = vpop.eup %5051  ;;  %v6035_v57 = vadd.f32 %v6018_v39, %v440_v55  ;;  %v437_v16 = vadd.f32 %v398_v11, %v213_v9 }
  0xb0   :  { %622 = vrot.lane.b32.xlu1 %v5052_v56, %s5786_s17 }
  0xb1   :  { %5053 = vtanh.f32 %v6035_v57  ;;  %v450_v21 = vadd.f32 %v6040_v62, %v437_v16  ;;  %v216_v22 = vpop.f32.mrf.mxu0 }
  0xb2   :  { %5055 = vpow2.f32 %v4889_v5 }
  0xb3   :  { %5057 = vpow2.f32 %v4891_v17  ;;  %v4893_v27 = vmul.f32 -1.442695, %v450_v21 }
  0xb6   :  { %v401_v24 = vpop.f32.mrf.mxu2 }
  0xb7   :  { %v5054_v58 = vpop.eup %5053  ;;  %v439_v29 = vadd.f32 %v401_v24, %v216_v22 }
  0xb8   :  { %624 = vrot.lane.b32.xlu1 %v5054_v58, %s5786_s17  ;;  %v5056_v20 = vpop.eup %5055 }
  0xb9   :  { %v478_v25 = vadd.f32 1.0, %v5056_v20  ;;  %v5058_v31 = vpop.eup %5057  ;;  %v452_v32 = vadd.f32 %v6040_v62, %v439_v29 }
  0xba   :  { %v480_v34 = vadd.f32 1.0, %v5058_v31 }
  0xbb   :  { %5059 = vrcp.f32 %v478_v25  ;;  %v4895_v35 = vmul.f32 -1.442695, %v452_v32  ;;  %vm491_vm1 = vweird.f32 %v478_v25  ;;  %v497_v50 = vand.u32 2147483648, %v478_v25 }
  0xbc   :  { %5061 = vpow2.f32 %v4893_v27  ;;  %v495_v53 = vand.u32 2147483647, %v478_v25  ;;  %vm521_vm5 = vweird.f32 %v480_v34  ;;  %v527_v3 = vand.u32 2147483648, %v480_v34 }
  0xbd   :  { %5063 = vrcp.f32 %v480_v34  ;;  %v498_v56 = vor.u32 1.1754944e-38, %v497_v50  ;;  %v525_v9 = vand.u32 2147483647, %v480_v34 }
  0xbe   :  { %5065 = vpow2.f32 %v4895_v35  ;;  %vm496_vm4 = vcmp.eq.f32.partialorder %v495_v53, 8.507059e+37  ;;  %v528_v16 = vor.u32 1.1754944e-38, %v527_v3  ;;  %v6091_v3 = vld [vmem:[%s8898_s2 + $0x1d8] sm:$0xff] }
  0xbf   :  { %vm526_vm8 = vcmp.eq.f32.partialorder %v525_v9, 8.507059e+37  ;;  %v6110_v9 = vld [vmem:[%s8898_s2 + $0x1b0] sm:$0xff] }
  0xc1   :  { %v5060_v36 = vpop.eup %5059 }
  0xc2   :  { %v5062_v37 = vpop.eup %5061  ;;  %v487_v38 = vmul.f32 %v5060_v36, %v478_v25  ;;  %vm492_vm2 = vweird.f32 %v5060_v36 }
  0xc3   :  { %v482_v40 = vadd.f32 1.0, %v5062_v37  ;;  %v5064_v43 = vpop.eup %5063  ;;  %vm493_vm3 = vmor %vm491_vm1, %vm492_vm2 }
  0xc4   :  { %v488_v41 = vsub.f32 1.0, %v487_v38  ;;  %v5066_v44 = vpop.eup %5065  ;;  %v517_v46 = vmul.f32 %v5064_v43, %v480_v34  ;;  %vm522_vm6 = vweird.f32 %v5064_v43 }
  0xc5   :  { %5067 = vrcp.f32 %v482_v40  ;;  %v484_v48 = vadd.f32 1.0, %v5066_v44  ;;  %vm523_vm7 = vmor %vm521_vm5, %vm522_vm6  ;;  %vm551_vm9 = vweird.f32 %v482_v40  ;;  %v557_v20 = vand.u32 2147483648, %v482_v40 }
  0xc6   :  { %v489_v45 = vmul.f32 %v5060_v36, %v488_v41  ;;  %v518_v54 = vsub.f32 1.0, %v517_v46  ;;  %v555_v22 = vand.u32 2147483647, %v482_v40 }
  0xc7   :  { %5069 = vrcp.f32 %v484_v48  ;;  %v558_v31 = vor.u32 1.1754944e-38, %v557_v20  ;;  %vm581_vm13 = vweird.f32 %v484_v48  ;;  %v585_v38 = vand.u32 2147483647, %v484_v48  ;;  %v6139_v20 = vld [vmem:[%s8898_s2 + $0x198] sm:$0xff] }
  0xc8   :  { %v490_v51 = vadd.f32 %v5060_v36, %v489_v45  ;;  %v519_v59 = vmul.f32 %v5064_v43, %v518_v54  ;;  %vm556_vm12 = vcmp.eq.f32.partialorder %v555_v22, 8.507059e+37  ;;  %v6151_v22 = vld [vmem:[%s8898_s2 + $0x188] sm:$0xff] }
  0xc9   :  { %vm586_vm1 = vcmp.eq.f32.partialorder %v585_v38, 8.507059e+37  ;;  %v6202_v38 = vld [vmem:[%s8898_s2 + $0x148] sm:$0xff] }
  0xca   :  { %v494_v58 = vsel %vm493_vm3, %v5060_v36, %v490_v51  ;;  %v520_v7 = vadd.f32 %v5064_v43, %v519_v59  ;;  %v587_v36 = vand.u32 2147483648, %v484_v48  ;;  %v6064_v59 = vld [vmem:[%s8898_s2 + $0x1f0] sm:$0xff] }
  0xcb   :  { %v5068_v49 = vpop.eup %5067  ;;  %v499_v2 = vsel %vm496_vm4, %v498_v56, %v494_v58  ;;  %687 = vmatpush.msrb.mxu2 %v6064_v59 }
  0xcc   :  { %v547_v55 = vmul.f32 %v5068_v49, %v482_v40  ;;  %v524_v17 = vsel %vm523_vm7, %v5064_v43, %v520_v7  ;;  %vm552_vm10 = vweird.f32 %v5068_v49  ;;  %v588_v43 = vor.u32 1.1754944e-38, %v587_v36  ;;  %v6103_v7 = vld [vmem:[%s8898_s2 + $0x1c8] sm:$0xff]  ;;  %v6190_v36 = vld [vmem:[%s8898_s2 + $0x158] sm:$0xff] }
  0xcd   :  { %v5070_v61 = vpop.eup %5069  ;;  %v529_v27 = vsel %vm526_vm8, %v528_v16, %v524_v17  ;;  %vm553_vm11 = vmor %vm551_vm9, %vm552_vm10  ;;  %v610_v50 = vmul.f32 0.0, %v499_v2  ;;  %v6127_v16 = vld [vmem:[%s8898_s2 + $0x1a8] sm:$0xff]  ;;  %v6134_v17 = vld [vmem:[%s8898_s2 + $0x190] sm:$0xff] }
  0xce   :  { %v548_v60 = vsub.f32 1.0, %v547_v55  ;;  %v577_v15 = vmul.f32 %v5070_v61, %v484_v48  ;;  %vm582_vm14 = vweird.f32 %v5070_v61  ;;  %v611_v48 = vmul.f32 0.0, %v529_v27 }
  0xcf   :  { %vm583_vm15 = vmor %vm581_vm13, %vm582_vm14 }
  0xd0   :  { %v549_v11 = vmul.f32 %v5068_v49, %v548_v60  ;;  %v578_v24 = vsub.f32 1.0, %v577_v15  ;;  %v6069_v60 = vld [vmem:[%s8898_s2 + $0x1f8] sm:$0xff]  ;;  %v6122_v15 = vld [vmem:[%s8898_s2 + $0x1a0] sm:$0xff] }
  0xd1   :  { %716 = vmatpush.msrb.mxu3 %v6069_v60 }
  0xd2   :  { %v550_v21 = vadd.f32 %v5068_v49, %v549_v11  ;;  %v579_v34 = vmul.f32 %v5070_v61, %v578_v24  ;;  %v6115_v11 = vld [vmem:[%s8898_s2 + $0x1b8] sm:$0xff] }
  0xd4   :  { %v554_v32 = vsel %vm553_vm11, %v5068_v49, %v550_v21  ;;  %v580_v37 = vadd.f32 %v5070_v61, %v579_v34  ;;  %v6146_v21 = vld [vmem:[%s8898_s2 + $0x180] sm:$0xff]  ;;  %v6177_v34 = vld [vmem:[%s8898_s2 + $0x168] sm:$0xff] }
  0xd5   :  { %v559_v35 = vsel %vm556_vm12, %v558_v31, %v554_v32  ;;  %v6172_v32 = vld [vmem:[%s8898_s2 + $0x160] sm:$0xff] }
  0xd6   :  { %v584_v44 = vsel %vm583_vm15, %v5070_v61, %v580_v37  ;;  %v6074_v61 = vld [vmem:[%s8898_s2 + $0x1e0] sm:$0xff]  ;;  %v612_v24 = vmul.f32 0.0, %v559_v35 }
  0xd7   :  { %v6049_v45 = vsel %vm586_vm1, %v588_v43, %v584_v44  ;;  %688 = vmatpush.msrb.mxu2 %v6074_v61  ;;  %v6197_v37 = vld [vmem:[%s8898_s2 + $0x140] sm:$0xff]  ;;  %v6210_v43 = vld [vmem:[%s8898_s2 + $0x130] sm:$0xff]  ;;  %v6215_v44 = vld [vmem:[%s8898_s2 + $0x138] sm:$0xff] }
 0x112   :  { %v619_v63 = vpop.permute.xlu0 %618 }
 0x113   :  { %v630_v5 = vmul.f32 %v619_v63, %v499_v2  ;;  %v6081_v63 = vld [vmem:[%s8898_s2 + $0x1e8] sm:$0xff]  ;;  %v6086_v2 = vld [vmem:[%s8898_s2 + $0x1d0] sm:$0xff] }
 0x114   :  { %717 = vmatpush.msrb.mxu3 %v6081_v63  ;;  %689 = vmatpush.msrb.mxu2 %v6086_v2 }
 0x115   :  { %638 = vrot.lane.b32.xlu2 %v630_v5, %s5786_s17  ;;  %v6098_v5 = vld [vmem:[%s8898_s2 + $0x1c0] sm:$0xff] }
 0x116   :  { %718 = vmatpush.msrb.mxu3 %v6091_v3  ;;  %690 = vmatpush.msrb.mxu2 %v6098_v5 }
 0x118   :  { %719 = vmatpush.msrb.mxu3 %v6103_v7  ;;  %691 = vmatpush.msrb.mxu2 %v6110_v9 }
 0x11a   :  { %v621_v25 = vpop.permute.xlu0 %620  ;;  %720 = vmatpush.msrb.mxu3 %v6115_v11  ;;  %692 = vmatpush.msrb.mxu2 %v6122_v15 }
 0x11b   :  { %v631_v29 = vmul.f32 %v621_v25, %v529_v27  ;;  %v6158_v27 = vld [vmem:[%s8898_s2 + $0x170] sm:$0xff] }
 0x11c   :  { %721 = vmatpush.msrb.mxu3 %v6127_v16  ;;  %693 = vmatpush.msrb.mxu2 %v6134_v17 }
 0x11d   :  { %640 = vrot.lane.b32.xlu2 %v631_v29, %s5786_s17  ;;  %v6163_v29 = vld [vmem:[%s8898_s2 + $0x178] sm:$0xff] }
 0x11e   :  { %722 = vmatpush.msrb.mxu3 %v6139_v20  ;;  %694 = vmatpush.msrb.mxu2 %v6146_v21 }
 0x120   :  { %723 = vmatpush.msrb.mxu3 %v6151_v22  ;;  %695 = vmatpush.msrb.mxu2 %v6158_v27 }
 0x122   :  { %v623_v41 = vpop.permute.xlu1 %622  ;;  %724 = vmatpush.msrb.mxu3 %v6163_v29  ;;  %696 = vmatpush.msrb.mxu2 %v6172_v32 }
 0x123   :  { %v632_v40 = vmul.f32 %v623_v41, %v559_v35  ;;  %v6185_v35 = vld [vmem:[%s8898_s2 + $0x150] sm:$0xff]  ;;  %v613_v41 = vmul.f32 0.0, %v6049_v45 }
 0x124   :  { %725 = vmatpush.msrb.mxu3 %v6177_v34  ;;  %697 = vmatpush.msrb.mxu2 %v6185_v35 }
 0x125   :  { %642 = vrot.lane.b32.xlu0 %v632_v40, %s5786_s17 }
 0x126   :  { %726 = vmatpush.msrb.mxu3 %v6190_v36  ;;  %698 = vmatpush.msrb.mxu2 %v6197_v37 }
 0x128   :  { %727 = vmatpush.msrb.mxu3 %v6202_v38  ;;  %699 = vmatpush.msrb.mxu2 %v6210_v43 }
 0x12a   :  { %v625_v46 = vpop.permute.xlu1 %624  ;;  %728 = vmatpush.msrb.mxu3 %v6215_v44 }
 0x12b   :  { %v633_v49 = vmul.f32 %v625_v46, %v6049_v45  ;;  %v6225_v45 = vld [vmem:[%s8898_s2 + $0x120] sm:$0xff] }
 0x12c   :  { %700 = vmatpush.msrb.mxu2 %v6225_v45 }
 0x12d   :  { %644 = vrot.lane.b32.xlu1 %v633_v49, %s5786_s17 }
 0x16f   :  { %v639_v51 = vpop.permute.xlu2 %638 }
 0x170   :  { %v6053_v53 = vadd.f32 %v639_v51, %v610_v50  ;;  %v6230_v50 = vld [vmem:[%s8898_s2 + $0x128] sm:$0xff]  ;;  %v6238_v51 = vld [vmem:[%s8898_s2 + $0x110] sm:$0xff] }
 0x171   :  { %729 = vmatpush.msrb.mxu3 %v6230_v50  ;;  %701 = vmatpush.msrb.mxu2 %v6238_v51 }
 0x172   :  { %8933 = vst [vmem:[#allocation9_spill] sm:$0xff] %v6053_v53  ;;  %5071 = vtanh.f32 %v6053_v53 }
 0x177   :  { %v641_v54 = vpop.permute.xlu2 %640 }
 0x178   :  { %v5072_v55 = vpop.eup %5071  ;;  %v6056_v56 = vadd.f32 %v641_v54, %v611_v48  ;;  %v6243_v48 = vld [vmem:[%s8898_s2 + $0x118] sm:$0xff]  ;;  %v4890_v54 = vmul.f32 -1.442695, %v6021_v42 }
 0x179   :  { %662 = vrot.lane.b32.xlu2 %v5072_v55, %s5786_s17  ;;  %730 = vmatpush.msrb.mxu3 %v6243_v48 }
 0x17a   :  { %8934 = vst [vmem:[#allocation10_spill] sm:$0xff] %v6056_v56  ;;  %5073 = vtanh.f32 %v6056_v56 }
 0x180   :  { %v5074_v58 = vpop.eup %5073 }
 0x181   :  { %664 = vrot.lane.b32.xlu0 %v5074_v58, %s5786_s17 }
 0x197   :  { %v643_v25 = vpop.permute.xlu0 %642 }
 0x198   :  { %v6165_v31 = vadd.f32 %v643_v25, %v612_v24  ;;  %v6254_v25 = vld [vmem:[%s8898_s2 + $0x100] sm:$0xff] }
 0x199   :  { %702 = vmatpush.msrb.mxu2 %v6254_v25 }
 0x19a   :  { %8935 = vst [vmem:[#allocation11_spill] sm:$0xff] %v6165_v31  ;;  %5075 = vtanh.f32 %v6165_v31 }
 0x19b   :  { %1041 = vmatpush.msra.mxu2 %v5875_v12 }
 0x19d   :  { %1042 = vmatpush.msra.mxu2 %v5880_v13 }
 0x19f   :  { %v645_v40 = vpop.permute.xlu1 %644  ;;  %1043 = vmatpush.msra.mxu2 %v5901_v18 }
 0x1a0   :  { %v5076_v46 = vpop.eup %5075  ;;  %v6217_v49 = vadd.f32 %v645_v40, %v613_v41  ;;  %v6259_v41 = vld [vmem:[%s8898_s2 + $0x108] sm:$0xff] }
 0x1a1   :  { %666 = vrot.lane.b32.xlu1 %v5076_v46, %s5786_s17  ;;  %731 = vmatpush.msrb.mxu3 %v6259_v41 }
 0x1a2   :  { %8936 = vst [vmem:[#allocation12_spill] sm:$0xff] %v6217_v49  ;;  %5077 = vtanh.f32 %v6217_v49  ;;  %1044 = vmatpush.msra.mxu2 %v5923_v23 }
 0x1a3   :  { %5079 = vpow2.f32 %v4890_v54  ;;  %1070 = vmatpush.msra.mxu3 %v5822_v0  ;;  %v4892_v54 = vmul.f32 -1.442695, %v6025_v47 }
 0x1a4   :  { %1045 = vmatpush.msra.mxu2 %v5932_v26 }
 0x1a5   :  { %1071 = vmatpush.msra.mxu3 %v5827_v1 }
 0x1a6   :  { %1046 = vmatpush.msra.mxu2 %v5942_v28 }
 0x1a7   :  { %1072 = vmatpush.msra.mxu3 %v5839_v4 }
 0x1a8   :  { %v5078_v55 = vpop.eup %5077  ;;  %1047 = vmatpush.msra.mxu2 %v5952_v30 }
 0x1a9   :  { %668 = vrot.lane.b32.xlu2 %v5078_v55, %s5786_s17  ;;  %v5080_v58 = vpop.eup %5079  ;;  %1073 = vmatpush.msra.mxu3 %v5848_v6 }
 0x1aa   :  { %v479_v24 = vadd.f32 1.0, %v5080_v58  ;;  %1048 = vmatpush.msra.mxu2 %v5965_v33 }
 0x1ab   :  { %1074 = vmatpush.msra.mxu3 %v5857_v8 }
 0x1ac   :  { %5081 = vrcp.f32 %v479_v24  ;;  %v512_v62 = vand.u32 2147483648, %v479_v24  ;;  %vm506_vm3 = vweird.f32 %v479_v24  ;;  %v510_v39 = vand.u32 2147483647, %v479_v24 }
 0x1ad   :  { %1075 = vmatpush.msra.mxu3 %v5866_v10  ;;  %5083 = vpow2.f32 %v4892_v54  ;;  %v96_v54 = vld [vmem:[%s8896_s0 + $0x38] sm:$0xff] }
 0x1ae   :  { %v513_v56 = vor.u32 1.1754944e-38, %v512_v62  ;;  %vm511_vm5 = vcmp.eq.f32.partialorder %v510_v39, 8.507059e+37  ;;  %v4894_v62 = vmul.f32 -1.442695, %v6030_v52  ;;  %v4896_v52 = vmul.f32 -1.442695, %v6035_v57 }
 0x1af   :  { %1076 = vmatpush.msra.mxu3 %v5885_v14 }
 0x1b1   :  { %1077 = vmatpush.msra.mxu3 %v5906_v19 }
 0x1b2   :  { %v5082_v42 = vpop.eup %5081 }
 0x1b3   :  { %v502_v40 = vmul.f32 %v5082_v42, %v479_v24  ;;  %vm507_vm2 = vweird.f32 %v5082_v42  ;;  %v5084_v49 = vpop.eup %5083 }
 0x1b4   :  { %vm508_vm4 = vmor %vm506_vm3, %vm507_vm2  ;;  %v481_v53 = vadd.f32 1.0, %v5084_v49 }
 0x1b5   :  { %v503_v46 = vsub.f32 1.0, %v502_v40 }
 0x1b6   :  { %5085 = vrcp.f32 %v481_v53  ;;  %vm536_vm7 = vweird.f32 %v481_v53 }
 0x1b7   :  { %v504_v55 = vmul.f32 %v5082_v42, %v503_v46  ;;  %5087 = vpow2.f32 %v4894_v62 }
 0x1b8   :  { %5089 = vpow2.f32 %v4896_v52 }
 0x1b9   :  { %v505_v58 = vadd.f32 %v5082_v42, %v504_v55  ;;  %v6351_v55 = vld [vmem:[%s8896_s0 + $0xc0] sm:$0xff] }
 0x1ba   :  { %vm368_vm3 = vcmp.gt.f32.partialorder %v6351_v55, 0.0 }
 0x1bb   :  { %v509_v31 = vsel %vm508_vm4, %v5082_v42, %v505_v58 }
 0x1bc   :  { %v514_v40 = vsel %vm511_vm5, %v513_v56, %v509_v31 }
 0x1d3   :  { %v663_v14 = vpop.permute.xlu2 %662 }
 0x1d4   :  { %v6280_v33 = vmul.f32 %v663_v14, %v514_v40  ;;  %v5086_v14 = vpop.eup %5085  ;;  %v6368_v40 = vld [vmem:[%s8896_s0 + $0xc8] sm:$0xff] }
 0x1d5   :  { %v532_v39 = vmul.f32 %v5086_v14, %v481_v53  ;;  %vm537_vm6 = vweird.f32 %v5086_v14  ;;  %8937 = vst [vmem:[#allocation13_spill] sm:$0xff] %v6368_v40  ;;  %vm369_vm4 = vcmp.gt.f32.partialorder %v6368_v40, 0.0 }
 0x1d6   :  { %4897 = vmatmul.msk.f32.vlgmr.msrb.gmra.mxu2 %vm117_vm0, %v6280_v33  ;;  %4901 = vmatmul.msk.f32.vlgmr.msrb.gmra.mxu3 %vm117_vm0, %v6280_v33  ;;  %vm538_vm8 = vmor %vm536_vm7, %vm537_vm6  ;;  %v6359_v58 = vsel %vm368_vm3, %v6280_v33, 0.0 }
 0x1d7   :  { %1367 = vmatpush.msrb.mxu2 %v6064_v59  ;;  %1396 = vmatpush.msrb.mxu3 %v6069_v60  ;;  %v533_v47 = vsub.f32 1.0, %v532_v39  ;;  %v542_v60 = vand.u32 2147483648, %v481_v53  ;;  %v8943_v39 = vld [vmem:[#allocation10_spill] sm:$0xff] }
 0x1d9   :  { %1368 = vmatpush.msrb.mxu2 %v6074_v61  ;;  %1397 = vmatpush.msrb.mxu3 %v6081_v63  ;;  %v534_v56 = vmul.f32 %v5086_v14, %v533_v47  ;;  %v540_v61 = vand.u32 2147483647, %v481_v53  ;;  %v5088_v63 = vpop.eup %5087 }
 0x1da   :  { %v5090_v53 = vpop.eup %5089 }
 0x1db   :  { %1369 = vmatpush.msrb.mxu2 %v6086_v2  ;;  %1398 = vmatpush.msrb.mxu3 %v6091_v3  ;;  %v535_v59 = vadd.f32 %v5086_v14, %v534_v56  ;;  %v543_v3 = vor.u32 1.1754944e-38, %v542_v60  ;;  %vm541_vm9 = vcmp.eq.f32.partialorder %v540_v61, 8.507059e+37  ;;  %v8944_v56 = vld [vmem:[#allocation11_spill] sm:$0xff] }
 0x1dd   :  { %1370 = vmatpush.msrb.mxu2 %v6098_v5  ;;  %1399 = vmatpush.msrb.mxu3 %v6103_v7  ;;  %v539_v2 = vsel %vm538_vm8, %v5086_v14, %v535_v59  ;;  %v483_v5 = vadd.f32 1.0, %v5088_v63  ;;  %v8942_v14 = vld [vmem:[#allocation9_spill] sm:$0xff] }
 0x1de   :  { %v544_v7 = vsel %vm541_vm9, %v543_v3, %v539_v2  ;;  %v8945_v3 = vld [vmem:[#allocation12_spill] sm:$0xff] }
 0x1df   :  { %1371 = vmatpush.msrb.mxu2 %v6110_v9  ;;  %1400 = vmatpush.msrb.mxu3 %v6115_v11  ;;  %5091 = vrcp.f32 %v483_v5  ;;  %v485_v11 = vadd.f32 1.0, %v5090_v53  ;;  %vm566_vm10 = vweird.f32 %v483_v5 }
 0x1e1   :  { %1372 = vmatpush.msrb.mxu2 %v6122_v15  ;;  %1401 = vmatpush.msrb.mxu3 %v6127_v16  ;;  %5093 = vrcp.f32 %v485_v11  ;;  %vm596_vm14 = vweird.f32 %v485_v11 }
 0x1e3   :  { %1373 = vmatpush.msrb.mxu2 %v6134_v17  ;;  %1402 = vmatpush.msrb.mxu3 %v6139_v20 }
 0x1e5   :  { %1374 = vmatpush.msrb.mxu2 %v6146_v21  ;;  %1403 = vmatpush.msrb.mxu3 %v6151_v22  ;;  %v5092_v15 = vpop.eup %5091  ;;  %v93_v21 = vld [vmem:[%s8896_s0 + $0x20] sm:$0xff] }
 0x1e6   :  { %v562_v16 = vmul.f32 %v5092_v15, %v483_v5  ;;  %4845 = vmatmul.msk.f32.gmra.mxu0 %vm117_vm0, %v93_v21  ;;  %4869 = vmatmul.msk.f32.gmra.mxu1 %vm117_vm0, %v93_v21  ;;  %vm567_vm11 = vweird.f32 %v5092_v15 }
 0x1e7   :  { %1375 = vmatpush.msrb.mxu2 %v6158_v27  ;;  %1404 = vmatpush.msrb.mxu3 %v6163_v29  ;;  %v5094_v20 = vpop.eup %5093  ;;  %v572_v29 = vand.u32 2147483648, %v483_v5  ;;  %vm568_vm12 = vmor %vm566_vm10, %vm567_vm11 }
 0x1e8   :  { %v563_v17 = vsub.f32 1.0, %v562_v16  ;;  %v592_v22 = vmul.f32 %v5094_v20, %v485_v11  ;;  %vm597_vm15 = vweird.f32 %v5094_v20 }
 0x1e9   :  { %1376 = vmatpush.msrb.mxu2 %v6172_v32  ;;  %1405 = vmatpush.msrb.mxu3 %v6177_v34  ;;  %v570_v34 = vand.u32 2147483647, %v483_v5  ;;  %vm598_vm1 = vmor %vm596_vm14, %vm597_vm15 }
 0x1ea   :  { %v564_v27 = vmul.f32 %v5092_v15, %v563_v17  ;;  %v593_v31 = vsub.f32 1.0, %v592_v22 }
 0x1eb   :  { %1377 = vmatpush.msrb.mxu2 %v6185_v35  ;;  %1406 = vmatpush.msrb.mxu3 %v6190_v36  ;;  %v94_v35 = vld [vmem:[%s8896_s0 + $0x28] sm:$0xff]  ;;  %v573_v36 = vor.u32 1.1754944e-38, %v572_v29  ;;  %vm571_vm13 = vcmp.eq.f32.partialorder %v570_v34, 8.507059e+37 }
 0x1ec   :  { %v565_v32 = vadd.f32 %v5092_v15, %v564_v27 }
 0x1ed   :  { %1378 = vmatpush.msrb.mxu2 %v6197_v37  ;;  %1407 = vmatpush.msrb.mxu3 %v6202_v38  ;;  %v594_v37 = vmul.f32 %v5094_v20, %v593_v31 }
 0x1ee   :  { %4846 = vmatmul.msk.f32.gmra.mxu0 %vm117_vm0, %v94_v35  ;;  %4870 = vmatmul.msk.f32.gmra.mxu1 %vm117_vm0, %v94_v35  ;;  %v569_v38 = vsel %vm568_vm12, %v5092_v15, %v565_v32  ;;  %v8946_v15 = vld [vmem:[#allocation7_spill] sm:$0xff] }
 0x1ef   :  { %1379 = vmatpush.msrb.mxu2 %v6210_v43  ;;  %1408 = vmatpush.msrb.mxu3 %v6215_v44  ;;  %v602_v43 = vand.u32 2147483648, %v485_v11  ;;  %v574_v44 = vsel %vm571_vm13, %v573_v36, %v569_v38 }
 0x1f1   :  { %1380 = vmatpush.msrb.mxu2 %v6225_v45  ;;  %1409 = vmatpush.msrb.mxu3 %v6230_v50  ;;  %v595_v45 = vadd.f32 %v5094_v20, %v594_v37  ;;  %v600_v50 = vand.u32 2147483647, %v485_v11  ;;  %v603_v24 = vor.u32 1.1754944e-38, %v602_v43 }
 0x1f3   :  { %v665_v9 = vpop.permute.xlu0 %664  ;;  %1381 = vmatpush.msrb.mxu2 %v6238_v51  ;;  %1410 = vmatpush.msrb.mxu3 %v6243_v48  ;;  %v95_v48 = vld [vmem:[%s8896_s0 + $0x30] sm:$0xff]  ;;  %vm601_vm2 = vcmp.eq.f32.partialorder %v600_v50, 8.507059e+37 }
 0x1f4   :  { %v6318_v57 = vmul.f32 %v665_v9, %v544_v7 }
 0x1f5   :  { %1382 = vmatpush.msrb.mxu2 %v6254_v25  ;;  %1411 = vmatpush.msrb.mxu3 %v6259_v41  ;;  %v599_v25 = vsel %vm598_vm1, %v5094_v20, %v595_v45 }
 0x1f6   :  { %4898 = vmatmul.msk.f32.gmra.mxu2 %vm117_vm0, %v6318_v57  ;;  %4902 = vmatmul.msk.f32.gmra.mxu3 %vm117_vm0, %v6318_v57  ;;  %v604_v42 = vsel %vm601_vm2, %v603_v24, %v599_v25  ;;  %v6380_v33 = vsel %vm369_vm4, %v6318_v57, 0.0 }
 0x1f7   :  { %4847 = vmatmul.msk.f32.gmra.mxu0 %vm117_vm0, %v95_v48  ;;  %4871 = vmatmul.msk.f32.gmra.mxu1 %vm117_vm0, %v95_v48 }
 0x1ff   :  { %4848 = vmatmul.msk.f32.gmra.mxu0 %vm117_vm0, %v96_v54  ;;  %4872 = vmatmul.msk.f32.gmra.mxu1 %vm117_vm0, %v96_v54 }
 0x203   :  { %v669_v41 = vpop.permute.xlu2 %668 }
 0x204   :  { %v677_v46 = vmul.f32 %v669_v41, %v604_v42 }
 0x213   :  { %v667_v49 = vpop.permute.xlu1 %666 }
 0x214   :  { %v676_v51 = vmul.f32 %v667_v49, %v574_v44 }
 0x216   :  { %4899 = vmatmul.msk.f32.gmra.mxu2 %vm117_vm0, %v676_v51  ;;  %4903 = vmatmul.msk.f32.gmra.mxu3 %vm117_vm0, %v676_v51 }
 0x21e   :  { %4900 = vmatmul.msk.f32.gmra.mxu2 %vm117_vm0, %v677_v46  ;;  %4904 = vmatmul.msk.f32.gmra.mxu3 %vm117_vm0, %v677_v46 }
 0x226   :  { %4913 = vmatmul.msk.f32.vlgmr.msra.gmra.mxu2 %vm117_vm0, %v6359_v58  ;;  %4917 = vmatmul.msk.f32.vlgmr.msra.gmra.mxu3 %vm117_vm0, %v6359_v58 }
 0x227   :  { %1737 = vmatpush.msra.mxu2 %v5875_v12  ;;  %1766 = vmatpush.msra.mxu3 %v5822_v0  ;;  %v6391_v0 = vld [vmem:[%s8896_s0 + $0xd0] sm:$0xff] }
 0x228   :  { %8938 = vst [vmem:[#allocation14_spill] sm:$0xff] %v6391_v0  ;;  %vm370_vm5 = vcmp.gt.f32.partialorder %v6391_v0, 0.0  ;;  %v4840_v12 = vld [vmem:[%s8898_s2 + $0x210] ss:$8 sm:$0x3] }
 0x229   :  { %1738 = vmatpush.msra.mxu2 %v5880_v13  ;;  %1767 = vmatpush.msra.mxu3 %v5827_v1  ;;  %v8939_v1 = vld [vmem:[#allocation5_spill] sm:$0xff]  ;;  %v6427_v13 = vperm.slane %v4840_v12, 1  ;;  %v6449_v59 = vperm.slane %v4840_v12, 0 }
 0x22b   :  { %1739 = vmatpush.msra.mxu2 %v5901_v18  ;;  %1768 = vmatpush.msra.mxu3 %v5839_v4  ;;  %v6402_v4 = vsel %vm370_vm5, %v676_v51, 0.0 }
 0x22d   :  { %1740 = vmatpush.msra.mxu2 %v5923_v23  ;;  %1769 = vmatpush.msra.mxu3 %v5848_v6  ;;  %v8940_v6 = vld [vmem:[#allocation6_spill] sm:$0xff] }
 0x22e   :  { %4914 = vmatmul.msk.f32.gmra.mxu2 %vm117_vm0, %v6380_v33  ;;  %4918 = vmatmul.msk.f32.gmra.mxu3 %vm117_vm0, %v6380_v33 }
 0x22f   :  { %1741 = vmatpush.msra.mxu2 %v5932_v26  ;;  %1770 = vmatpush.msra.mxu3 %v5857_v8  ;;  %v6413_v8 = vld [vmem:[%s8896_s0 + $0xd8] sm:$0xff] }
 0x230   :  { %8941 = vst [vmem:[#allocation5_spill] sm:$0xff] %v6413_v8  ;;  %vm371_vm6 = vcmp.gt.f32.partialorder %v6413_v8, 0.0 }
 0x231   :  { %1742 = vmatpush.msra.mxu2 %v5942_v28  ;;  %1771 = vmatpush.msra.mxu3 %v5866_v10  ;;  %v6418_v10 = vsel %vm371_vm6, %v677_v46, 0.0 }
 0x233   :  { %1743 = vmatpush.msra.mxu2 %v5952_v30  ;;  %1772 = vmatpush.msra.mxu3 %v8939_v1 }
 0x235   :  { %1744 = vmatpush.msra.mxu2 %v8940_v6  ;;  %1773 = vmatpush.msra.mxu3 %v5906_v19 }
 0x236   :  { %4915 = vmatmul.msk.f32.gmra.mxu2 %vm117_vm0, %v6402_v4  ;;  %4919 = vmatmul.msk.f32.gmra.mxu3 %vm117_vm0, %v6402_v4 }
 0x23e   :  { %4916 = vmatmul.msk.f32.gmra.mxu2 %vm117_vm0, %v6418_v10  ;;  %4920 = vmatmul.msk.f32.gmra.mxu3 %vm117_vm0, %v6418_v10 }
 0x259   :  { %v733_v18 = vpop.f32.mrf.mxu3  ;;  %v704_v60 = vpop.f32.mrf.mxu2 }
 0x25a   :  { %v6430_v19 = vadd.f32 %v733_v18, %v6427_v13  ;;  %v705_v5 = vadd.f32 %v704_v60, %v6449_v59 }
 0x25c   :  { %5095 = vtanh.f32 %v6430_v19  ;;  %v4905_v7 = vmul.f32 -1.442695, %v705_v5 }
 0x262   :  { %v5096_v23 = vpop.eup %5095 }
 0x263   :  { %909 = vrot.lane.b32.xlu0 %v5096_v23, %s5786_s17  ;;  %v308_v61 = vpop.f32.mrf.mxu1 }
 0x26b   :  { %v311_v11 = vpop.f32.mrf.mxu1 }
 0x274   :  { %v314_v32 = vpop.f32.mrf.mxu1 }
 0x279   :  { %v736_v26 = vpop.f32.mrf.mxu3  ;;  %v707_v31 = vpop.f32.mrf.mxu2 }
 0x27a   :  { %v6435_v28 = vadd.f32 %v736_v26, %v6427_v13  ;;  %v708_v48 = vadd.f32 %v707_v31, %v6449_v59  ;;  %v219_v26 = vpop.f32.mrf.mxu0 }
 0x27c   :  { %5097 = vtanh.f32 %v6435_v28  ;;  %v317_v44 = vpop.f32.mrf.mxu1  ;;  %v4907_v42 = vmul.f32 -1.442695, %v708_v48 }
 0x282   :  { %v5098_v30 = vpop.eup %5097  ;;  %v222_v5 = vpop.f32.mrf.mxu0 }
 0x283   :  { %911 = vrot.lane.b32.xlu1 %v5098_v30, %s5786_s17 }
 0x28b   :  { %977 = vrot.lane.b32.xlu1 %v8942_v14, %s5786_s17 }
 0x293   :  { %979 = vrot.lane.b32.xlu1 %v8943_v39, %s5786_s17 }
 0x299   :  { %v739_v47 = vpop.f32.mrf.mxu3  ;;  %v710_v38 = vpop.f32.mrf.mxu2 }
 0x29a   :  { %v6444_v62 = vadd.f32 %v739_v47, %v6427_v13  ;;  %v711_v1 = vadd.f32 %v710_v38, %v6449_v59 }
 0x29b   :  { %981 = vrot.lane.b32.xlu1 %v8944_v56, %s5786_s17 }
 0x29c   :  { %5099 = vtanh.f32 %v6444_v62  ;;  %v4909_v18 = vmul.f32 -1.442695, %v711_v1 }
 0x2a1   :  { %v742_v52 = vpop.f32.mrf.mxu3  ;;  %v713_v41 = vpop.f32.mrf.mxu2 }
 0x2a2   :  { %v5100_v63 = vpop.eup %5099  ;;  %v6452_v2 = vadd.f32 %v742_v52, %v6427_v13 }
 0x2a3   :  { %983 = vrot.lane.b32.xlu1 %v8945_v3, %s5786_s17  ;;  %913 = vrot.lane.b32.xlu2 %v5100_v63, %s5786_s17 }
 0x2a4   :  { %5101 = vtanh.f32 %v6452_v2 }
 0x2a5   :  { %5103 = vpow2.f32 %v4905_v7 }
 0x2a9   :  { %v1079_v9 = vpop.f32.mrf.mxu3  ;;  %v1050_v30 = vpop.f32.mrf.mxu2 }
 0x2aa   :  { %v5102_v57 = vpop.eup %5101  ;;  %v1092_v53 = vadd.f32 %v1079_v9, %v308_v61  ;;  %v1091_v3 = vadd.f32 %v1050_v30, %v219_v26 }
 0x2ab   :  { %915 = vrot.lane.b32.xlu0 %v5102_v57, %s5786_s17  ;;  %v5104_v20 = vpop.eup %5103  ;;  %v8947_v57 = vld [vmem:[#allocation8_spill] sm:$0xff] }
 0x2ac   :  { %v6461_v16 = vadd.f32 %v1092_v53, %v8946_v15  ;;  %v769_v29 = vadd.f32 1.0, %v5104_v20  ;;  %v1099_v53 = vadd.f32 %v1091_v3, %v8947_v57 }
 0x2ae   :  { %5105 = vtanh.f32 %v6461_v16  ;;  %v788_v12 = vand.u32 2147483648, %v769_v29  ;;  %vm782_vm8 = vweird.f32 %v769_v29  ;;  %v786_v23 = vand.u32 2147483647, %v769_v29 }
 0x2b0   :  { %v789_v47 = vor.u32 1.1754944e-38, %v788_v12  ;;  %vm787_vm10 = vcmp.eq.f32.partialorder %v786_v23, 8.507059e+37 }
 0x2b1   :  { %v1082_v17 = vpop.f32.mrf.mxu3  ;;  %v1053_v7 = vpop.f32.mrf.mxu2 }
 0x2b2   :  { %v1094_v21 = vadd.f32 %v1082_v17, %v311_v11  ;;  %v4921_v17 = vmul.f32 -1.442695, %v1099_v53  ;;  %v1093_v20 = vadd.f32 %v1053_v7, %v222_v5 }
 0x2b4   :  { %v5106_v22 = vpop.eup %5105  ;;  %v6465_v27 = vadd.f32 %v1094_v21, %v8946_v15  ;;  %v1101_v31 = vadd.f32 %v1093_v20, %v8947_v57 }
 0x2b5   :  { %1287 = vrot.lane.b32.xlu2 %v5106_v22, %s5786_s17  ;;  %v225_v22 = vpop.f32.mrf.mxu0 }
 0x2b6   :  { %5107 = vtanh.f32 %v6465_v27 }
 0x2b7   :  { %5109 = vrcp.f32 %v769_v29 }
 0x2b9   :  { %v1085_v34 = vpop.f32.mrf.mxu3 }
 0x2ba   :  { %v1096_v35 = vadd.f32 %v1085_v34, %v314_v32 }
 0x2bc   :  { %v5108_v36 = vpop.eup %5107  ;;  %v6470_v37 = vadd.f32 %v1096_v35, %v8946_v15  ;;  %v4923_v35 = vmul.f32 -1.442695, %v1101_v31 }
 0x2bd   :  { %1289 = vrot.lane.b32.xlu2 %v5108_v36, %s5786_s17  ;;  %v5110_v43 = vpop.eup %5109 }
 0x2be   :  { %5111 = vtanh.f32 %v6470_v37  ;;  %v778_v50 = vmul.f32 %v5110_v43, %v769_v29  ;;  %vm783_vm7 = vweird.f32 %v5110_v43  ;;  %v1056_v29 = vpop.f32.mrf.mxu2 }
 0x2bf   :  { %vm784_vm9 = vmor %vm782_vm8, %vm783_vm7  ;;  %v1095_v36 = vadd.f32 %v1056_v29, %v225_v22 }
 0x2c0   :  { %v779_v25 = vsub.f32 1.0, %v778_v50 }
 0x2c1   :  { %v1088_v49 = vpop.f32.mrf.mxu3 }
 0x2c2   :  { %v1098_v45 = vadd.f32 %v1088_v49, %v317_v44  ;;  %v780_v46 = vmul.f32 %v5110_v43, %v779_v25  ;;  %v714_v49 = vadd.f32 %v713_v41, %v6449_v59  ;;  %v228_v25 = vpop.f32.mrf.mxu0 }
 0x2c4   :  { %v5112_v51 = vpop.eup %5111  ;;  %v6476_v24 = vadd.f32 %v1098_v45, %v8946_v15  ;;  %v781_v6 = vadd.f32 %v5110_v43, %v780_v46  ;;  %v1103_v45 = vadd.f32 %v1095_v36, %v8947_v57 }
 0x2c5   :  { %1291 = vrot.lane.b32.xlu2 %v5112_v51, %s5786_s17 }
 0x2c6   :  { %5113 = vtanh.f32 %v6476_v24  ;;  %v785_v39 = vsel %vm784_vm9, %v5110_v43, %v781_v6  ;;  %v4925_v6 = vmul.f32 -1.442695, %v1103_v45 }
 0x2c7   :  { %5115 = vpow2.f32 %v4907_v42  ;;  %v6482_v60 = vsel %vm787_vm10, %v789_v47, %v785_v39  ;;  %v1059_v42 = vpop.f32.mrf.mxu2 }
 0x2c8   :  { %5117 = vpow2.f32 %v4909_v18  ;;  %v1097_v12 = vadd.f32 %v1059_v42, %v228_v25 }
 0x2ca   :  { %v1105_v39 = vadd.f32 %v1097_v12, %v8947_v57  ;;  %v97_v57 = vld [vmem:[%s8896_s0 + $0x40] sm:$0xff] }
 0x2cb   :  { %4849 = vmatmul.msk.f32.gmra.mxu0 %vm117_vm0, %v97_v57  ;;  %4873 = vmatmul.msk.f32.gmra.mxu1 %vm117_vm0, %v97_v57  ;;  %v98_v57 = vld [vmem:[%s8896_s0 + $0x48] sm:$0xff] }
 0x2cc   :  { %v5114_v54 = vpop.eup %5113  ;;  %v4927_v7 = vmul.f32 -1.442695, %v1105_v39 }
 0x2cd   :  { %1293 = vrot.lane.b32.xlu2 %v5114_v54, %s5786_s17  ;;  %v5116_v14 = vpop.eup %5115  ;;  %v4911_v54 = vmul.f32 -1.442695, %v714_v49 }
 0x2ce   :  { %v771_v56 = vadd.f32 1.0, %v5116_v14  ;;  %v5118_v63 = vpop.eup %5117 }
 0x2cf   :  { %v773_v9 = vadd.f32 1.0, %v5118_v63 }
 0x2d0   :  { %5119 = vrcp.f32 %v771_v56  ;;  %v818_v46 = vand.u32 2147483648, %v771_v56  ;;  %vm812_vm12 = vweird.f32 %v771_v56  ;;  %v816_v1 = vand.u32 2147483647, %v771_v56 }
 0x2d1   :  { %5121 = vrcp.f32 %v773_v9  ;;  %vm842_vm1 = vweird.f32 %v773_v9  ;;  %v846_v63 = vand.u32 2147483647, %v773_v9 }
 0x2d2   :  { %5123 = vpow2.f32 %v4921_v17  ;;  %v819_v41 = vor.u32 1.1754944e-38, %v818_v46  ;;  %vm817_vm14 = vcmp.eq.f32.partialorder %v816_v1, 8.507059e+37 }
 0x2d3   :  { %5125 = vpow2.f32 %v4923_v35  ;;  %vm847_vm7 = vcmp.eq.f32.partialorder %v846_v63, 8.507059e+37  ;;  %4850 = vmatmul.msk.f32.gmra.mxu0 %vm117_vm0, %v98_v57  ;;  %4874 = vmatmul.msk.f32.gmra.mxu1 %vm117_vm0, %v98_v57  ;;  %v100_v57 = vld [vmem:[%s8896_s0 + $0x58] sm:$0xff] }
 0x2d5   :  { %v910_v52 = vpop.permute.xlu0 %909 }
 0x2d6   :  { %v921_v61 = vmul.f32 %v910_v52, %v6482_v60  ;;  %v5120_v11 = vpop.eup %5119 }
 0x2d7   :  { %v808_v21 = vmul.f32 %v5120_v11, %v771_v56  ;;  %v5122_v34 = vpop.eup %5121  ;;  %vm813_vm11 = vweird.f32 %v5120_v11 }
 0x2d8   :  { %929 = vrot.lane.b32.xlu0 %v921_v61, %s5786_s17  ;;  %v838_v43 = vmul.f32 %v5122_v34, %v773_v9  ;;  %v5124_v44 = vpop.eup %5123  ;;  %vm814_vm13 = vmor %vm812_vm12, %vm813_vm11  ;;  %vm843_vm15 = vweird.f32 %v5122_v34  ;;  %v848_v61 = vand.u32 2147483648, %v773_v9 }
 0x2d9   :  { %v809_v32 = vsub.f32 1.0, %v808_v21  ;;  %v6490_v48 = vadd.f32 1.0, %v5124_v44  ;;  %v5126_v26 = vpop.eup %5125  ;;  %vm844_vm2 = vmor %vm842_vm1, %vm843_vm15 }
 0x2da   :  { %v839_v51 = vsub.f32 1.0, %v838_v43  ;;  %v6497_v52 = vadd.f32 1.0, %v5126_v26 }
 0x2db   :  { %v810_v38 = vmul.f32 %v5120_v11, %v809_v32  ;;  %5127 = vrcp.f32 %v6490_v48  ;;  %v1150_v42 = vand.u32 2147483648, %v6490_v48  ;;  %vm1144_vm9 = vweird.f32 %v6490_v48 }
 0x2dc   :  { %v840_v23 = vmul.f32 %v5122_v34, %v839_v51  ;;  %5129 = vpow2.f32 %v4911_v54  ;;  %v1148_v46 = vand.u32 2147483647, %v6490_v48 }
 0x2dd   :  { %v811_v50 = vadd.f32 %v5120_v11, %v810_v38  ;;  %5131 = vpow2.f32 %v4925_v6 }
 0x2de   :  { %v841_v56 = vadd.f32 %v5122_v34, %v840_v23  ;;  %5133 = vrcp.f32 %v6497_v52  ;;  %vm1149_vm11 = vcmp.eq.f32.partialorder %v1148_v46, 8.507059e+37 }
 0x2df   :  { %v815_v18 = vsel %vm814_vm13, %v5120_v11, %v811_v50  ;;  %v849_v11 = vor.u32 1.1754944e-38, %v848_v61  ;;  %5135 = vpow2.f32 %v4927_v7  ;;  %vm1174_vm13 = vweird.f32 %v6497_v52 }
 0x2e0   :  { %v6493_v30 = vsel %vm817_vm14, %v819_v41, %v815_v18  ;;  %v845_v53 = vsel %vm844_vm2, %v5122_v34, %v841_v56  ;;  %v1151_v18 = vor.u32 1.1754944e-38, %v1150_v42  ;;  %v1180_v56 = vand.u32 2147483648, %v6497_v52 }
 0x2e1   :  { %v5128_v3 = vpop.eup %5127  ;;  %v6504_v29 = vsel %vm847_vm7, %v849_v11, %v845_v53  ;;  %v1178_v61 = vand.u32 2147483647, %v6497_v52 }
 0x2e2   :  { %v5130_v5 = vpop.eup %5129  ;;  %v1140_v20 = vmul.f32 %v5128_v3, %v6490_v48  ;;  %vm1145_vm8 = vweird.f32 %v5128_v3  ;;  %v1181_v53 = vor.u32 1.1754944e-38, %v1180_v56 }
 0x2e3   :  { %v5132_v17 = vpop.eup %5131  ;;  %v6502_v21 = vadd.f32 1.0, %v5130_v5  ;;  %vm1146_vm10 = vmor %vm1144_vm9, %vm1145_vm8  ;;  %vm1179_vm15 = vcmp.eq.f32.partialorder %v1178_v61, 8.507059e+37 }
 0x2e4   :  { %v6511_v34 = vadd.f32 1.0, %v5132_v17  ;;  %v1141_v35 = vsub.f32 1.0, %v1140_v20  ;;  %v5134_v36 = vpop.eup %5133 }
 0x2e5   :  { %5137 = vrcp.f32 %v6502_v21  ;;  %v5136_v38 = vpop.eup %5135  ;;  %v1170_v44 = vmul.f32 %v5134_v36, %v6497_v52  ;;  %vm1175_vm12 = vweird.f32 %v5134_v36  ;;  %vm872_vm2 = vweird.f32 %v6502_v21 }
 0x2e6   :  { %5139 = vrcp.f32 %v6511_v34  ;;  %v1142_v43 = vmul.f32 %v5128_v3, %v1141_v35  ;;  %v6519_v45 = vadd.f32 1.0, %v5136_v38  ;;  %vm1176_vm14 = vmor %vm1174_vm13, %vm1175_vm12  ;;  %vm1204_vm9 = vweird.f32 %v6511_v34 }
 0x2e7   :  { %v1171_v51 = vsub.f32 1.0, %v1170_v44 }
 0x2e8   :  { %v1143_v50 = vadd.f32 %v5128_v3, %v1142_v43  ;;  %5141 = vrcp.f32 %v6519_v45  ;;  %v1208_v43 = vand.u32 2147483647, %v6511_v34 }
 0x2e9   :  { %v1172_v6 = vmul.f32 %v5134_v36, %v1171_v51 }
 0x2ea   :  { %v1147_v1 = vsel %vm1146_vm10, %v5128_v3, %v1143_v50  ;;  %vm1209_vm12 = vcmp.eq.f32.partialorder %v1208_v43, 8.507059e+37 }
 0x2eb   :  { %v5138_v49 = vpop.eup %5137  ;;  %v6527_v26 = vsel %vm1149_vm11, %v1151_v18, %v1147_v1  ;;  %v1173_v39 = vadd.f32 %v5134_v36, %v1172_v6 }
 0x2ec   :  { %v5140_v25 = vpop.eup %5139  ;;  %v868_v54 = vmul.f32 %v5138_v49, %v6502_v21  ;;  %vm873_vm1 = vweird.f32 %v5138_v49 }
 0x2ed   :  { %v1200_v12 = vmul.f32 %v5140_v25, %v6511_v34  ;;  %v1177_v3 = vsel %vm1176_vm14, %v5134_v36, %v1173_v39  ;;  %vm1205_vm7 = vweird.f32 %v5140_v25  ;;  %vm874_vm8 = vmor %vm872_vm2, %vm873_vm1  ;;  %v1210_v36 = vand.u32 2147483648, %v6511_v34 }
 0x2ee   :  { %v869_v23 = vsub.f32 1.0, %v868_v54  ;;  %v6535_v20 = vsel %vm1179_vm15, %v1181_v53, %v1177_v3  ;;  %vm1206_vm10 = vmor %vm1204_vm9, %vm1205_vm7  ;;  %v1240_v34 = vand.u32 2147483648, %v6519_v45  ;;  %vm1234_vm14 = vweird.f32 %v6519_v45 }
 0x2ef   :  { %v1201_v48 = vsub.f32 1.0, %v1200_v12  ;;  %v1211_v46 = vor.u32 1.1754944e-38, %v1210_v36  ;;  %v901_v3 = vmul.f32 0.0, %v6482_v60 }
 0x2f0   :  { %v870_v63 = vmul.f32 %v5138_v49, %v869_v23 }
 0x2f1   :  { %v1202_v5 = vmul.f32 %v5140_v25, %v1201_v48 }
 0x2f2   :  { %v871_v11 = vadd.f32 %v5138_v49, %v870_v63 }
 0x2f4   :  { %v875_v38 = vsel %vm874_vm8, %v5138_v49, %v871_v11  ;;  %v902_v11 = vmul.f32 0.0, %v6493_v30 }
 0x2f5   :  { %v912_v14 = vpop.permute.xlu1 %911 }
 0x2f6   :  { %v922_v47 = vmul.f32 %v912_v14, %v6493_v30 }
 0x2f8   :  { %931 = vrot.lane.b32.xlu0 %v922_v47, %s5786_s17  ;;  %v5142_v47 = vpop.eup %5141 }
 0x2f9   :  { %v1230_v7 = vmul.f32 %v5142_v47, %v6519_v45  ;;  %vm1235_vm13 = vweird.f32 %v5142_v47 }
 0x2fa   :  { %vm1236_vm15 = vmor %vm1234_vm14, %vm1235_vm13 }
 0x2fb   :  { %v1231_v35 = vsub.f32 1.0, %v1230_v7 }
 0x2fd   :  { %v978_v22 = vpop.permute.xlu1 %977  ;;  %v914_v31 = vpop.permute.xlu2 %913 }
 0x2fe   :  { %v923_v9 = vmul.f32 %v914_v31, %v6504_v29  ;;  %v6509_v32 = vsel %vm368_vm3, %v978_v22, 0.0  ;;  %v876_v22 = vand.u32 2147483647, %v6502_v21  ;;  %v878_v31 = vand.u32 2147483648, %v6502_v21 }
 0x2ff   :  { %8948 = vst [vmem:[#allocation6_spill] sm:$0xff] %v6509_v32  ;;  %1267 = vrot.lane.b32.xlu1 %v6509_v32, %s5786_s17  ;;  %v1232_v21 = vmul.f32 %v5142_v47, %v1231_v35 }
 0x300   :  { %933 = vrot.lane.b32.xlu0 %v923_v9, %s5786_s17  ;;  %v1203_v9 = vadd.f32 %v5140_v25, %v1202_v5  ;;  %v879_v44 = vor.u32 1.1754944e-38, %v878_v31  ;;  %vm877_vm11 = vcmp.eq.f32.partialorder %v876_v22, 8.507059e+37  ;;  %v903_v31 = vmul.f32 0.0, %v6504_v29 }
 0x301   :  { %v1233_v18 = vadd.f32 %v5142_v47, %v1232_v21 }
 0x302   :  { %v1207_v50 = vsel %vm1206_vm10, %v5140_v25, %v1203_v9  ;;  %v880_v42 = vsel %vm877_vm11, %v879_v44, %v875_v38  ;;  %v1238_v25 = vand.u32 2147483647, %v6519_v45 }
 0x303   :  { %v6545_v6 = vsel %vm1209_vm12, %v1211_v46, %v1207_v50  ;;  %v1237_v23 = vsel %vm1236_vm15, %v5142_v47, %v1233_v18  ;;  %v904_v44 = vmul.f32 0.0, %v880_v42 }
 0x304   :  { %vm1239_vm1 = vcmp.eq.f32.partialorder %v1238_v25, 8.507059e+37 }
 0x305   :  { %v980_v12 = vpop.permute.xlu1 %979 }
 0x306   :  { %v6557_v48 = vsel %vm369_vm4, %v980_v12, 0.0 }
 0x307   :  { %8949 = vst [vmem:[#allocation9_spill] sm:$0xff] %v6557_v48 }
 0x30d   :  { %v982_v61 = vpop.permute.xlu1 %981 }
 0x30e   :  { %v6565_v45 = vsel %vm370_vm5, %v982_v61, 0.0  ;;  %v4910_v61 = vmul.f32 -1.442695, %v6444_v62 }
 0x30f   :  { %v1288_v41 = vpop.permute.xlu2 %1287  ;;  %8950 = vst [vmem:[#allocation10_spill] sm:$0xff] %v6565_v45 }
 0x310   :  { %v1299_v14 = vmul.f32 %v1288_v41, %v6527_v26  ;;  %v1241_v41 = vor.u32 1.1754944e-38, %v1240_v34 }
 0x312   :  { %1307 = vrot.lane.b32.xlu2 %v1299_v14, %s5786_s17  ;;  %v6553_v39 = vsel %vm1239_vm1, %v1241_v41, %v1237_v23  ;;  %v4908_v23 = vmul.f32 -1.442695, %v6435_v28 }
 0x315   :  { %v984_v47 = vpop.permute.xlu1 %983 }
 0x316   :  { %v6571_v63 = vsel %vm371_vm6, %v984_v47, 0.0 }
 0x317   :  { %v1290_v17 = vpop.permute.xlu2 %1289  ;;  %8951 = vst [vmem:[#allocation11_spill] sm:$0xff] %v6571_v63 }
 0x318   :  { %v1300_v52 = vmul.f32 %v1290_v17, %v6535_v20 }
 0x31a   :  { %1309 = vrot.lane.b32.xlu2 %v1300_v52, %s5786_s17 }
 0x31d   :  { %v916_v51 = vpop.permute.xlu0 %915 }
 0x31e   :  { %v924_v54 = vmul.f32 %v916_v51, %v880_v42 }
 0x31f   :  { %v1292_v1 = vpop.permute.xlu2 %1291 }
 0x320   :  { %v1301_v49 = vmul.f32 %v1292_v1, %v6545_v6  ;;  %935 = vrot.lane.b32.xlu0 %v924_v54, %s5786_s17 }
 0x322   :  { %1311 = vrot.lane.b32.xlu2 %v1301_v49, %s5786_s17 }
 0x327   :  { %v1294_v14 = vpop.permute.xlu2 %1293 }
 0x328   :  { %v1302_v56 = vmul.f32 %v1294_v14, %v6553_v39  ;;  %1269 = vrot.lane.b32.xlu0 %v6557_v48, %s5786_s17 }
 0x32a   :  { %1313 = vrot.lane.b32.xlu2 %v1302_v56, %s5786_s17 }
 0x330   :  { %1271 = vrot.lane.b32.xlu0 %v6565_v45, %s5786_s17 }
 0x338   :  { %1273 = vrot.lane.b32.xlu0 %v6571_v63, %s5786_s17 }
 0x34a   :  { %v930_v5 = vpop.permute.xlu0 %929 }
 0x34b   :  { %v6576_v7 = vadd.f32 %v930_v5, %v901_v3 }
 0x34d   :  { %5143 = vtanh.f32 %v6576_v7 }
 0x353   :  { %v5144_v53 = vpop.eup %5143 }
 0x354   :  { %953 = vrot.lane.b32.xlu1 %v5144_v53, %s5786_s17 }
 0x36a   :  { %v932_v17 = vpop.permute.xlu0 %931 }
 0x36b   :  { %v6581_v22 = vadd.f32 %v932_v17, %v902_v11 }
 0x36c   :  { %v1308_v38 = vpop.permute.xlu2 %1307 }
 0x36d   :  { %5145 = vtanh.f32 %v6581_v22 }
 0x371   :  { %v1268_v52 = vpop.permute.xlu1 %1267 }
 0x372   :  { %v934_v9 = vpop.permute.xlu0 %933  ;;  %v1279_v36 = vmul.f32 %v1268_v52, %v6527_v26  ;;  %v4906_v26 = vmul.f32 -1.442695, %v6430_v19 }
 0x373   :  { %v5146_v60 = vpop.eup %5145  ;;  %v6585_v35 = vadd.f32 %v934_v9, %v903_v31 }
 0x374   :  { %955 = vrot.lane.b32.xlu1 %v5146_v60, %s5786_s17  ;;  %v6590_v30 = vadd.f32 %v1308_v38, %v1279_v36  ;;  %v1310_v1 = vpop.permute.xlu2 %1309 }
 0x375   :  { %5147 = vtanh.f32 %v6585_v35 }
 0x376   :  { %8952 = vst [vmem:[#allocation12_spill] sm:$0xff] %v6590_v30  ;;  %5149 = vtanh.f32 %v6590_v30 }
 0x37b   :  { %v5148_v43 = vpop.eup %5147 }
 0x37c   :  { %957 = vrot.lane.b32.xlu1 %v5148_v43, %s5786_s17  ;;  %v5150_v29 = vpop.eup %5149  ;;  %v1312_v28 = vpop.permute.xlu2 %1311 }
 0x384   :  { %1331 = vrot.lane.b32.xlu1 %v5150_v29, %s5786_s17 }
 0x392   :  { %v936_v50 = vpop.permute.xlu0 %935 }
 0x393   :  { %v6595_v21 = vadd.f32 %v936_v50, %v904_v44 }
 0x395   :  { %5151 = vtanh.f32 %v6595_v21 }
 0x396   :  { %5153 = vpow2.f32 %v4906_v26 }
 0x39a   :  { %v1270_v51 = vpop.permute.xlu0 %1269 }
 0x39b   :  { %v5152_v46 = vpop.eup %5151  ;;  %v1280_v54 = vmul.f32 %v1270_v51, %v6535_v20 }
 0x39c   :  { %959 = vrot.lane.b32.xlu0 %v5152_v46, %s5786_s17  ;;  %v5154_v42 = vpop.eup %5153 }
 0x39d   :  { %v6601_v12 = vadd.f32 %v1310_v1, %v1280_v54  ;;  %v770_v18 = vadd.f32 1.0, %v5154_v42 }
 0x39f   :  { %8953 = vst [vmem:[#allocation15_spill] sm:$0xff] %v6601_v12  ;;  %5155 = vtanh.f32 %v6601_v12  ;;  %v803_v56 = vand.u32 2147483648, %v770_v18  ;;  %vm797_vm7 = vweird.f32 %v770_v18  ;;  %v801_v47 = vand.u32 2147483647, %v770_v18 }
 0x3a0   :  { %5157 = vrcp.f32 %v770_v18 }
 0x3a1   :  { %5159 = vpow2.f32 %v4908_v23  ;;  %v804_v11 = vor.u32 1.1754944e-38, %v803_v56  ;;  %vm802_vm9 = vcmp.eq.f32.partialorder %v801_v47, 8.507059e+37 }
 0x3a2   :  { %v1272_v14 = vpop.permute.xlu0 %1271  ;;  %5161 = vpow2.f32 %v4910_v61 }
 0x3a3   :  { %v1281_v5 = vmul.f32 %v1272_v14, %v6545_v6 }
 0x3a5   :  { %v5156_v49 = vpop.eup %5155  ;;  %v6608_v9 = vadd.f32 %v1312_v28, %v1281_v5 }
 0x3a6   :  { %1333 = vrot.lane.b32.xlu0 %v5156_v49, %s5786_s17  ;;  %v5158_v34 = vpop.eup %5157  ;;  %v4912_v49 = vmul.f32 -1.442695, %v6452_v2 }
 0x3a7   :  { %v793_v19 = vmul.f32 %v5158_v34, %v770_v18  ;;  %vm798_vm2 = vweird.f32 %v5158_v34  ;;  %v5160_v3 = vpop.eup %5159  ;;  %8954 = vst [vmem:[#allocation16_spill] sm:$0xff] %v6608_v9 }
 0x3a8   :  { %vm799_vm8 = vmor %vm797_vm7, %vm798_vm2  ;;  %v772_v17 = vadd.f32 1.0, %v5160_v3  ;;  %v5162_v6 = vpop.eup %5161 }
 0x3a9   :  { %v794_v25 = vsub.f32 1.0, %v793_v19  ;;  %v774_v36 = vadd.f32 1.0, %v5162_v6 }
 0x3aa   :  { %5163 = vrcp.f32 %v772_v17  ;;  %v1274_v1 = vpop.permute.xlu0 %1273  ;;  %v833_v42 = vand.u32 2147483648, %v772_v17  ;;  %vm827_vm11 = vweird.f32 %v772_v17  ;;  %v831_v18 = vand.u32 2147483647, %v772_v17 }
 0x3ab   :  { %v795_v20 = vmul.f32 %v5158_v34, %v794_v25  ;;  %5165 = vtanh.f32 %v6608_v9  ;;  %v863_v3 = vand.u32 2147483648, %v774_v36  ;;  %vm857_vm15 = vweird.f32 %v774_v36 }
 0x3ac   :  { %5167 = vrcp.f32 %v774_v36  ;;  %v834_v23 = vor.u32 1.1754944e-38, %v833_v42  ;;  %vm832_vm13 = vcmp.eq.f32.partialorder %v831_v18, 8.507059e+37 }
 0x3ad   :  { %v796_v41 = vadd.f32 %v5158_v34, %v795_v20  ;;  %5169 = vpow2.f32 %v4912_v49  ;;  %v1314_v20 = vpop.permute.xlu2 %1313 }
 0x3af   :  { %v800_v53 = vsel %vm799_vm8, %v5158_v34, %v796_v41  ;;  %v1282_v34 = vmul.f32 %v1274_v1, %v6553_v39  ;;  %v861_v39 = vand.u32 2147483647, %v774_v36 }
 0x3b0   :  { %v805_v31 = vsel %vm802_vm9, %v804_v11, %v800_v53  ;;  %v5164_v38 = vpop.eup %5163  ;;  %v864_v11 = vor.u32 1.1754944e-38, %v863_v3 }
 0x3b1   :  { %v5166_v43 = vpop.eup %5165  ;;  %v823_v29 = vmul.f32 %v5164_v38, %v772_v17  ;;  %vm828_vm10 = vweird.f32 %v5164_v38  ;;  %v6620_v56 = vadd.f32 %v1314_v20, %v1282_v34  ;;  %vm862_vm2 = vcmp.eq.f32.partialorder %v861_v39, 8.507059e+37 }
 0x3b2   :  { %v5168_v50 = vpop.eup %5167  ;;  %vm829_vm12 = vmor %vm827_vm11, %vm828_vm10 }
 0x3b3   :  { %v824_v44 = vsub.f32 1.0, %v823_v29  ;;  %v853_v51 = vmul.f32 %v5168_v50, %v774_v36  ;;  %8956 = vst [vmem:[#allocation18_spill] sm:$0xff] %v6620_v56  ;;  %vm858_vm14 = vweird.f32 %v5168_v50  ;;  %v5170_v5 = vpop.eup %5169  ;;  %5171 = vtanh.f32 %v6620_v56 }
 0x3b4   :  { %vm859_vm1 = vmor %vm857_vm15, %vm858_vm14  ;;  %v776_v17 = vadd.f32 1.0, %v5170_v5  ;;  %v4922_v36 = vmul.f32 -1.442695, %v6461_v16 }
 0x3b5   :  { %v825_v26 = vmul.f32 %v5164_v38, %v824_v44  ;;  %v854_v54 = vsub.f32 1.0, %v853_v51 }
 0x3b6   :  { %5173 = vrcp.f32 %v776_v17  ;;  %vm887_vm8 = vweird.f32 %v776_v17 }
 0x3b7   :  { %v826_v46 = vadd.f32 %v5164_v38, %v825_v26  ;;  %v855_v25 = vmul.f32 %v5168_v50, %v854_v54  ;;  %5175 = vpow2.f32 %v4922_v36  ;;  %v891_v54 = vand.u32 2147483647, %v776_v17 }
 0x3b8   :  { %v4924_v36 = vmul.f32 -1.442695, %v6465_v27  ;;  %v6709_v27 = vld [vmem:[%s8898_s2 + $0x1b8] sm:$0xff] }
 0x3b9   :  { %v830_v19 = vsel %vm829_vm12, %v5164_v38, %v826_v46  ;;  %v856_v47 = vadd.f32 %v5168_v50, %v855_v25  ;;  %v893_v46 = vand.u32 2147483648, %v776_v17  ;;  %vm892_vm10 = vcmp.eq.f32.partialorder %v891_v54, 8.507059e+37  ;;  %v6740_v54 = vld [vmem:[%s8898_s2 + $0x180] sm:$0xff] }
 0x3ba   :  { %v835_v41 = vsel %vm832_vm13, %v834_v23, %v830_v19 }
 0x3bb   :  { %v860_v53 = vsel %vm859_vm1, %v5168_v50, %v856_v47  ;;  %v894_v16 = vor.u32 1.1754944e-38, %v893_v46  ;;  %v4926_v46 = vmul.f32 -1.442695, %v6470_v37  ;;  %v6758_v37 = vld [vmem:[%s8898_s2 + $0x178] sm:$0xff] }
 0x3bc   :  { %v865_v28 = vsel %vm862_vm2, %v864_v11, %v860_v53 }
 0x3c6   :  { %v954_v52 = vpop.permute.xlu1 %953 }
 0x3c7   :  { %v965_v60 = vmul.f32 %v954_v52, %v805_v31 }
 0x3c9   :  { %v6612_v62 = vsel %vm368_vm3, %v965_v60, 0.0  ;;  %v5172_v60 = vpop.eup %5171 }
 0x3ca   :  { %8955 = vst [vmem:[#allocation17_spill] sm:$0xff] %v6612_v62  ;;  %1351 = vrot.lane.b32.xlu2 %v6612_v62, %s5786_s17  ;;  %v5174_v38 = vpop.eup %5173 }
 0x3cb   :  { %v5176_v29 = vpop.eup %5175  ;;  %vm888_vm7 = vweird.f32 %v5174_v38 }
 0x3cc   :  { %v1132_v50 = vadd.f32 1.0, %v5176_v29  ;;  %vm889_vm9 = vmor %vm887_vm8, %vm888_vm7  ;;  %v6703_v29 = vld [vmem:[%s8898_s2 + $0x1b0] sm:$0xff] }
 0x3ce   :  { %5177 = vrcp.f32 %v1132_v50  ;;  %vm1159_vm12 = vweird.f32 %v1132_v50 }
 0x3cf   :  { %5179 = vpow2.f32 %v4924_v36 }
 0x3d0   :  { %5181 = vpow2.f32 %v4926_v46  ;;  %v6837_v46 = vld [vmem:[%s8898_s2 + $0x100] sm:$0xff] }
 0x3d2   :  { %1335 = vrot.lane.b32.xlu2 %v5166_v43, %s5786_s17  ;;  %v883_v43 = vmul.f32 %v5174_v38, %v776_v17  ;;  %v6660_v17 = vld [vmem:[%s8898_s2 + $0x1f8] sm:$0xff] }
 0x3d4   :  { %v884_v44 = vsub.f32 1.0, %v883_v43  ;;  %v5178_v42 = vpop.eup %5177  ;;  %v6697_v43 = vld [vmem:[%s8898_s2 + $0x1c8] sm:$0xff] }
 0x3d5   :  { %v1155_v34 = vmul.f32 %v5178_v42, %v1132_v50  ;;  %vm1160_vm11 = vweird.f32 %v5178_v42 }
 0x3d6   :  { %v885_v26 = vmul.f32 %v5174_v38, %v884_v44  ;;  %vm1161_vm13 = vmor %vm1159_vm12, %vm1160_vm11  ;;  %v6715_v44 = vld [vmem:[%s8898_s2 + $0x1a0] sm:$0xff] }
 0x3d7   :  { %v1156_v25 = vsub.f32 1.0, %v1155_v34 }
 0x3d8   :  { %v886_v51 = vadd.f32 %v5174_v38, %v885_v26  ;;  %v6727_v26 = vld [vmem:[%s8898_s2 + $0x190] sm:$0xff] }
 0x3d9   :  { %v1157_v23 = vmul.f32 %v5178_v42, %v1156_v25  ;;  %v6782_v25 = vld [vmem:[%s8898_s2 + $0x158] sm:$0xff] }
 0x3da   :  { %v890_v1 = vsel %vm889_vm9, %v5174_v38, %v886_v51  ;;  %v6691_v38 = vld [vmem:[%s8898_s2 + $0x1c0] sm:$0xff]  ;;  %v6733_v51 = vld [vmem:[%s8898_s2 + $0x198] sm:$0xff] }
 0x3db   :  { %v895_v49 = vsel %vm892_vm10, %v894_v16, %v890_v1  ;;  %v1158_v20 = vadd.f32 %v5178_v42, %v1157_v23  ;;  %v6746_v1 = vld [vmem:[%s8898_s2 + $0x188] sm:$0xff]  ;;  %v6752_v16 = vld [vmem:[%s8898_s2 + $0x170] sm:$0xff]  ;;  %v4928_v23 = vmul.f32 -1.442695, %v6476_v24 }
 0x3dc   :  { %v6801_v24 = vld [vmem:[%s8898_s2 + $0x130] sm:$0xff] }
 0x3e6   :  { %v956_v14 = vpop.permute.xlu1 %955 }
 0x3e7   :  { %v966_v61 = vmul.f32 %v956_v14, %v835_v41  ;;  %v1165_v41 = vand.u32 2147483648, %v1132_v50  ;;  %v1163_v14 = vand.u32 2147483647, %v1132_v50  ;;  %v6721_v50 = vld [vmem:[%s8898_s2 + $0x1a8] sm:$0xff] }
 0x3e9   :  { %v6624_v2 = vsel %vm369_vm4, %v966_v61, 0.0  ;;  %v1162_v61 = vsel %vm1161_vm13, %v5178_v42, %v1158_v20  ;;  %v1166_v47 = vor.u32 1.1754944e-38, %v1165_v41  ;;  %vm1164_vm14 = vcmp.eq.f32.partialorder %v1163_v14, 8.507059e+37  ;;  %v5180_v42 = vpop.eup %5179  ;;  %v6789_v20 = vld [vmem:[%s8898_s2 + $0x140] sm:$0xff]  ;;  %v6795_v41 = vld [vmem:[%s8898_s2 + $0x148] sm:$0xff] }
 0x3ea   :  { %8957 = vst [vmem:[#allocation19_spill] sm:$0xff] %v6624_v2  ;;  %1353 = vrot.lane.b32.xlu1 %v6624_v2, %s5786_s17  ;;  %v1134_v34 = vadd.f32 1.0, %v5180_v42  ;;  %v5182_v14 = vpop.eup %5181  ;;  %v6843_v42 = vld [vmem:[%s8898_s2 + $0x108] sm:$0xff] }
 0x3eb   :  { %v1167_v39 = vsel %vm1164_vm14, %v1166_v47, %v1162_v61  ;;  %v6807_v61 = vld [vmem:[%s8898_s2 + $0x138] sm:$0xff]  ;;  %v6813_v47 = vld [vmem:[%s8898_s2 + $0x120] sm:$0xff] }
 0x3ec   :  { %5183 = vrcp.f32 %v1134_v34  ;;  %v1195_v56 = vand.u32 2147483648, %v1134_v34  ;;  %vm1189_vm1 = vweird.f32 %v1134_v34  ;;  %v1193_v8 = vand.u32 2147483647, %v1134_v34 }
 0x3ed   :  { %5185 = vpow2.f32 %v4928_v23 }
 0x3ee   :  { %v958_v31 = vpop.permute.xlu1 %957  ;;  %vm1194_vm7 = vcmp.eq.f32.partialorder %v1193_v8, 8.507059e+37 }
 0x3ef   :  { %v967_v52 = vmul.f32 %v958_v31, %v865_v28  ;;  %v6666_v28 = vld [vmem:[%s8898_s2 + $0x1e0] sm:$0xff]  ;;  %v6672_v31 = vld [vmem:[%s8898_s2 + $0x1e8] sm:$0xff] }
 0x3f1   :  { %v6631_v6 = vsel %vm370_vm5, %v967_v52, 0.0  ;;  %v6678_v52 = vld [vmem:[%s8898_s2 + $0x1d0] sm:$0xff] }
 0x3f2   :  { %8958 = vst [vmem:[#allocation20_spill] sm:$0xff] %v6631_v6  ;;  %1355 = vrot.lane.b32.xlu0 %v6631_v6, %s5786_s17  ;;  %1337 = vrot.lane.b32.xlu1 %v5172_v60, %s5786_s17  ;;  %v6684_v60 = vld [vmem:[%s8898_s2 + $0x1d8] sm:$0xff]  ;;  %v5184_v36 = vpop.eup %5183 }
 0x3f3   :  { %v5186_v23 = vpop.eup %5185  ;;  %vm1190_vm15 = vweird.f32 %v5184_v36 }
 0x3f4   :  { %vm1191_vm2 = vmor %vm1189_vm1, %vm1190_vm15 }
 0x3f6   :  { %v1332_v3 = vpop.permute.xlu1 %1331 }
 0x3f7   :  { %v6647_v5 = vmul.f32 %v1332_v3, %v1167_v39  ;;  %v6819_v3 = vld [vmem:[%s8898_s2 + $0x128] sm:$0xff]  ;;  %v1136_v39 = vadd.f32 1.0, %v5182_v14  ;;  %v1185_v14 = vmul.f32 %v5184_v36, %v1134_v34 }
 0x3f9   :  { %5187 = vrcp.f32 %v1136_v39  ;;  %v1186_v6 = vsub.f32 1.0, %v1185_v14  ;;  %v1225_v40 = vand.u32 2147483648, %v1136_v39  ;;  %vm1219_vm9 = vweird.f32 %v1136_v39 }
 0x3fa   :  { %1001 = vrot.lane.b32.xlu0 %v6576_v7, %s5786_s17  ;;  %v1223_v30 = vand.u32 2147483647, %v1136_v39 }
 0x3fb   :  { %v1187_v62 = vmul.f32 %v5184_v36, %v1186_v6  ;;  %v1196_v6 = vor.u32 1.1754944e-38, %v1195_v56 }
 0x3fc   :  { %vm1224_vm11 = vcmp.eq.f32.partialorder %v1223_v30, 8.507059e+37 }
 0x3fd   :  { %v1188_v45 = vadd.f32 %v5184_v36, %v1187_v62 }
 0x3ff   :  { %v5188_v2 = vpop.eup %5187  ;;  %v1192_v9 = vsel %vm1191_vm2, %v5184_v36, %v1188_v45 }
 0x400   :  { %v1215_v63 = vmul.f32 %v5188_v2, %v1136_v39  ;;  %vm1220_vm8 = vweird.f32 %v5188_v2 }
 0x401   :  { %vm1221_vm10 = vmor %vm1219_vm9, %vm1220_vm8 }
 0x402   :  { %v1216_v48 = vsub.f32 1.0, %v1215_v63  ;;  %v1197_v63 = vsel %vm1194_vm7, %v1196_v6, %v1192_v9 }
 0x404   :  { %v1217_v0 = vmul.f32 %v5188_v2, %v1216_v48 }
 0x406   :  { %v1218_v12 = vadd.f32 %v5188_v2, %v1217_v0  ;;  %v1226_v0 = vor.u32 1.1754944e-38, %v1225_v40 }
 0x408   :  { %v1222_v48 = vsel %vm1221_vm10, %v5188_v2, %v1218_v12  ;;  %v99_v12 = vld [vmem:[%s8896_s0 + $0x50] sm:$0xff] }
 0x409   :  { %v1227_v56 = vsel %vm1224_vm11, %v1226_v0, %v1222_v48  ;;  %4851 = vmatmul.msk.f32.gmra.mxu0 %vm117_vm0, %v99_v12  ;;  %4875 = vmatmul.msk.f32.gmra.mxu1 %vm117_vm0, %v99_v12 }
 0x40e   :  { %v960_v18 = vpop.permute.xlu0 %959 }
 0x40f   :  { %v968_v7 = vmul.f32 %v960_v18, %v895_v49  ;;  %v6764_v49 = vld [vmem:[%s8898_s2 + $0x160] sm:$0xff]  ;;  %v6770_v18 = vld [vmem:[%s8898_s2 + $0x168] sm:$0xff] }
 0x411   :  { %v6641_v19 = vsel %vm371_vm6, %v968_v7, 0.0  ;;  %v6776_v7 = vld [vmem:[%s8898_s2 + $0x150] sm:$0xff]  ;;  %4852 = vmatmul.msk.f32.gmra.mxu0 %vm117_vm0, %v100_v57  ;;  %4876 = vmatmul.msk.f32.gmra.mxu1 %vm117_vm0, %v100_v57 }
 0x412   :  { %8959 = vst [vmem:[#allocation21_spill] sm:$0xff] %v6641_v19  ;;  %1357 = vrot.lane.b32.xlu2 %v6641_v19, %s5786_s17  ;;  %v1138_v19 = vadd.f32 1.0, %v5186_v23 }
 0x414   :  { %5189 = vrcp.f32 %v1138_v19  ;;  %vm1249_vm13 = vweird.f32 %v1138_v19  ;;  %v1253_v6 = vand.u32 2147483647, %v1138_v19 }
 0x416   :  { %vm1254_vm15 = vcmp.eq.f32.partialorder %v1253_v6, 8.507059e+37 }
 0x418   :  { %v1334_v62 = vpop.permute.xlu0 %1333 }
 0x419   :  { %v1344_v14 = vmul.f32 %v1334_v62, %v1197_v63 }
 0x41a   :  { %1003 = vrot.lane.b32.xlu2 %v6581_v22, %s5786_s17  ;;  %v6654_v22 = vld [vmem:[%s8898_s2 + $0x1f0] sm:$0xff]  ;;  %v5190_v32 = vpop.eup %5189 }
 0x41b   :  { %v1245_v23 = vmul.f32 %v5190_v32, %v1138_v19  ;;  %vm1250_vm12 = vweird.f32 %v5190_v32 }
 0x41c   :  { %vm1251_vm14 = vmor %vm1249_vm13, %vm1250_vm12 }
 0x41d   :  { %v1246_v34 = vsub.f32 1.0, %v1245_v23  ;;  %v1255_v23 = vand.u32 2147483648, %v1138_v19 }
 0x41f   :  { %v1247_v8 = vmul.f32 %v5190_v32, %v1246_v34  ;;  %v1256_v30 = vor.u32 1.1754944e-38, %v1255_v23 }
 0x421   :  { %v1248_v36 = vadd.f32 %v5190_v32, %v1247_v8  ;;  %v6892_v8 = vld [vmem:[%s8896_s0 + $0xc8] sm:$0xff] }
 0x422   :  { %vm1018_vm2 = vcmp.gt.f32.partialorder %v6892_v8, 1.0 }
 0x423   :  { %v1252_v40 = vsel %vm1251_vm14, %v5190_v32, %v1248_v36  ;;  %v6872_v32 = vld [vmem:[%s8896_s0 + $0xc0] sm:$0xff] }
 0x424   :  { %v1352_v53 = vpop.permute.xlu2 %1351  ;;  %v1257_v63 = vsel %vm1254_vm15, %v1256_v30, %v1252_v40  ;;  %vm1017_vm1 = vcmp.gt.f32.partialorder %v6872_v32, 1.0 }
 0x425   :  { %v1363_v11 = vsel %vm117_vm0, %v6647_v5, %v1352_v53  ;;  %v6825_v53 = vld [vmem:[%s8898_s2 + $0x110] sm:$0xff]  ;;  %v6879_v48 = vsel %vm1017_vm1, %v6647_v5, %v6359_v58  ;;  %v6900_v58 = vsel %vm1018_vm2, %v1344_v14, %v6380_v33 }
 0x426   :  { %1383 = vmatmul.f32.vlgmr.msrb.gmra.mxu2 %v1363_v11  ;;  %1412 = vmatmul.f32.vlgmr.msrb.gmra.mxu3 %v1363_v11  ;;  %v6831_v11 = vld [vmem:[%s8898_s2 + $0x118] sm:$0xff]  ;;  %v6915_v33 = vld [vmem:[%s8896_s0 + $0xd0] sm:$0xff] }
 0x427   :  { %2063 = vmatpush.msrb.mxu2 %v6654_v22  ;;  %2092 = vmatpush.msrb.mxu3 %v6660_v17  ;;  %vm1019_vm7 = vcmp.gt.f32.partialorder %v6915_v33, 1.0 }
 0x429   :  { %2064 = vmatpush.msrb.mxu2 %v6666_v28  ;;  %2093 = vmatpush.msrb.mxu3 %v6672_v31 }
 0x42b   :  { %2065 = vmatpush.msrb.mxu2 %v6678_v52  ;;  %2094 = vmatpush.msrb.mxu3 %v6684_v60 }
 0x42c   :  { %v1336_v9 = vpop.permute.xlu2 %1335 }
 0x42d   :  { %2066 = vmatpush.msrb.mxu2 %v6691_v38  ;;  %2095 = vmatpush.msrb.mxu3 %v6697_v43  ;;  %v1345_v39 = vmul.f32 %v1336_v9, %v1227_v56 }
 0x42f   :  { %2067 = vmatpush.msrb.mxu2 %v6703_v29  ;;  %2096 = vmatpush.msrb.mxu3 %v6709_v27  ;;  %v6923_v5 = vsel %vm1019_vm7, %v1345_v39, %v6402_v4  ;;  %v6938_v4 = vld [vmem:[%s8896_s0 + $0xd8] sm:$0xff] }
 0x430   :  { %vm1020_vm8 = vcmp.gt.f32.partialorder %v6938_v4, 1.0 }
 0x431   :  { %2068 = vmatpush.msrb.mxu2 %v6715_v44  ;;  %2097 = vmatpush.msrb.mxu3 %v6721_v50 }
 0x433   :  { %2069 = vmatpush.msrb.mxu2 %v6727_v26  ;;  %2098 = vmatpush.msrb.mxu3 %v6733_v51 }
 0x435   :  { %2070 = vmatpush.msrb.mxu2 %v6740_v54  ;;  %2099 = vmatpush.msrb.mxu3 %v6746_v1 }
 0x437   :  { %2071 = vmatpush.msrb.mxu2 %v6752_v16  ;;  %2100 = vmatpush.msrb.mxu3 %v6758_v37 }
 0x439   :  { %2072 = vmatpush.msrb.mxu2 %v6764_v49  ;;  %2101 = vmatpush.msrb.mxu3 %v6770_v18 }
 0x43b   :  { %2073 = vmatpush.msrb.mxu2 %v6776_v7  ;;  %2102 = vmatpush.msrb.mxu3 %v6782_v25 }
 0x43d   :  { %2074 = vmatpush.msrb.mxu2 %v6789_v20  ;;  %2103 = vmatpush.msrb.mxu3 %v6795_v41 }
 0x43f   :  { %2075 = vmatpush.msrb.mxu2 %v6801_v24  ;;  %2104 = vmatpush.msrb.mxu3 %v6807_v61 }
 0x441   :  { %2076 = vmatpush.msrb.mxu2 %v6813_v47  ;;  %2105 = vmatpush.msrb.mxu3 %v6819_v3 }
 0x443   :  { %2077 = vmatpush.msrb.mxu2 %v6825_v53  ;;  %2106 = vmatpush.msrb.mxu3 %v6831_v11 }
 0x445   :  { %2078 = vmatpush.msrb.mxu2 %v6837_v46  ;;  %2107 = vmatpush.msrb.mxu3 %v6843_v42 }
 0x45c   :  { %v1354_v15 = vpop.permute.xlu1 %1353 }
 0x45d   :  { %v1364_v45 = vsel %vm117_vm0, %v1344_v14, %v1354_v15 }
 0x45e   :  { %1386 = vmatmul.f32.gmra.mxu2 %v1364_v45  ;;  %1415 = vmatmul.f32.gmra.mxu3 %v1364_v45 }
 0x464   :  { %v1356_v15 = vpop.permute.xlu0 %1355  ;;  %v1338_v2 = vpop.permute.xlu1 %1337 }
 0x465   :  { %v1365_v62 = vsel %vm117_vm0, %v1345_v39, %v1356_v15  ;;  %v1346_v34 = vmul.f32 %v1338_v2, %v1257_v63 }
 0x466   :  { %1389 = vmatmul.f32.gmra.mxu2 %v1365_v62  ;;  %1418 = vmatmul.f32.gmra.mxu3 %v1365_v62 }
 0x46c   :  { %v1358_v19 = vpop.permute.xlu2 %1357 }
 0x46d   :  { %v1366_v45 = vsel %vm117_vm0, %v1346_v34, %v1358_v19 }
 0x46e   :  { %1392 = vmatmul.f32.gmra.mxu2 %v1366_v45  ;;  %1421 = vmatmul.f32.gmra.mxu3 %v1366_v45 }
 0x476   :  { %4937 = vmatmul.msk.f32.vlgmr.msra.gmra.mxu2 %vm117_vm0, %v6879_v48  ;;  %4941 = vmatmul.msk.f32.vlgmr.msra.gmra.mxu3 %vm117_vm0, %v6879_v48 }
 0x477   :  { %2759 = vmatpush.msra.mxu2 %v6654_v22  ;;  %2788 = vmatpush.msra.mxu3 %v6660_v17  ;;  %v6946_v22 = vsel %vm1020_vm8, %v1346_v34, %v6418_v10 }
 0x479   :  { %2760 = vmatpush.msra.mxu2 %v6666_v28  ;;  %2789 = vmatpush.msra.mxu3 %v6672_v31 }
 0x47b   :  { %2761 = vmatpush.msra.mxu2 %v6678_v52  ;;  %2790 = vmatpush.msra.mxu3 %v6684_v60 }
 0x47d   :  { %2762 = vmatpush.msra.mxu2 %v6691_v38  ;;  %2791 = vmatpush.msra.mxu3 %v6697_v43 }
 0x47e   :  { %4938 = vmatmul.msk.f32.gmra.mxu2 %vm117_vm0, %v6900_v58  ;;  %4942 = vmatmul.msk.f32.gmra.mxu3 %vm117_vm0, %v6900_v58 }
 0x47f   :  { %2763 = vmatpush.msra.mxu2 %v6703_v29  ;;  %2792 = vmatpush.msra.mxu3 %v6709_v27 }
 0x481   :  { %2764 = vmatpush.msra.mxu2 %v6715_v44  ;;  %2793 = vmatpush.msra.mxu3 %v6721_v50 }
 0x483   :  { %2765 = vmatpush.msra.mxu2 %v6727_v26  ;;  %2794 = vmatpush.msra.mxu3 %v6733_v51  ;;  %v320_v26 = vpop.f32.mrf.mxu1  ;;  %v1002_v51 = vpop.permute.xlu0 %1001 }
 0x485   :  { %2766 = vmatpush.msra.mxu2 %v6740_v54  ;;  %2795 = vmatpush.msra.mxu3 %v6746_v1 }
 0x486   :  { %4939 = vmatmul.msk.f32.gmra.mxu2 %vm117_vm0, %v6923_v5  ;;  %4943 = vmatmul.msk.f32.gmra.mxu3 %vm117_vm0, %v6923_v5 }
 0x487   :  { %2767 = vmatpush.msra.mxu2 %v6752_v16  ;;  %2796 = vmatpush.msra.mxu3 %v6758_v37  ;;  %v6988_v37 = vsel %vm368_vm3, %v1002_v51, 0.0 }
 0x489   :  { %2768 = vmatpush.msra.mxu2 %v6764_v49  ;;  %2797 = vmatpush.msra.mxu3 %v6770_v18  ;;  %v8960_v49 = vld [vmem:[#allocation12_spill] sm:$0xff]  ;;  %v1004_v18 = vpop.permute.xlu2 %1003 }
 0x48b   :  { %2769 = vmatpush.msra.mxu2 %v6776_v7  ;;  %2798 = vmatpush.msra.mxu3 %v6782_v25  ;;  %v323_v7 = vpop.f32.mrf.mxu1  ;;  %v8961_v25 = vld [vmem:[#allocation7_spill] sm:$0xff] }
 0x48d   :  { %2770 = vmatpush.msra.mxu2 %v6789_v20  ;;  %2799 = vmatpush.msra.mxu3 %v6795_v41 }
 0x48e   :  { %4940 = vmatmul.msk.f32.gmra.mxu2 %vm117_vm0, %v6946_v22  ;;  %4944 = vmatmul.msk.f32.gmra.mxu3 %vm117_vm0, %v6946_v22 }
 0x48f   :  { %2771 = vmatpush.msra.mxu2 %v6801_v24  ;;  %2800 = vmatpush.msra.mxu3 %v6807_v61 }
 0x491   :  { %2772 = vmatpush.msra.mxu2 %v6813_v47  ;;  %2801 = vmatpush.msra.mxu3 %v6819_v3  ;;  %v7000_v47 = vsel %vm369_vm4, %v1004_v18, 0.0  ;;  %v231_v18 = vpop.f32.mrf.mxu0 }
 0x493   :  { %2773 = vmatpush.msra.mxu2 %v6825_v53  ;;  %2802 = vmatpush.msra.mxu3 %v6831_v11  ;;  %v8963_v53 = vld [vmem:[#allocation15_spill] sm:$0xff] }
 0x495   :  { %2774 = vmatpush.msra.mxu2 %v6837_v46  ;;  %2803 = vmatpush.msra.mxu3 %v6843_v42 }
 0x4a9   :  { %v1413_v10 = vpop.f32.mrf.mxu3  ;;  %v1384_v29 = vpop.f32.mrf.mxu2 }
 0x4aa   :  { %v6963_v17 = vadd.f32 %v1413_v10, %v6427_v13  ;;  %v1385_v50 = vadd.f32 %v1384_v29, %v6449_v59 }
 0x4ac   :  { %5191 = vtanh.f32 %v6963_v17  ;;  %v4929_v54 = vmul.f32 -1.442695, %v1385_v50 }
 0x4b2   :  { %v5192_v28 = vpop.eup %5191 }
 0x4b3   :  { %1605 = vrot.lane.b32.xlu1 %v5192_v28, %s5786_s17 }
 0x4bb   :  { %1005 = vrot.lane.b32.xlu1 %v6585_v35, %s5786_s17 }
 0x4e1   :  { %v1416_v31 = vpop.f32.mrf.mxu3  ;;  %v1387_v0 = vpop.f32.mrf.mxu2 }
 0x4e2   :  { %v6970_v52 = vadd.f32 %v1416_v31, %v6427_v13  ;;  %v1388_v45 = vadd.f32 %v1387_v0, %v6449_v59 }
 0x4e4   :  { %5193 = vtanh.f32 %v6970_v52 }
 0x4e9   :  { %v1419_v60 = vpop.f32.mrf.mxu3  ;;  %v1390_v39 = vpop.f32.mrf.mxu2 }
 0x4ea   :  { %v5194_v38 = vpop.eup %5193  ;;  %v6974_v43 = vadd.f32 %v1419_v60, %v6427_v13  ;;  %v1391_v15 = vadd.f32 %v1390_v39, %v6449_v59  ;;  %v4931_v60 = vmul.f32 -1.442695, %v1388_v45  ;;  %v8966_v39 = vld [vmem:[#allocation8_spill] sm:$0xff] }
 0x4eb   :  { %1607 = vrot.lane.b32.xlu0 %v5194_v38, %s5786_s17  ;;  %v8965_v38 = vld [vmem:[#allocation16_spill] sm:$0xff] }
 0x4ec   :  { %5195 = vtanh.f32 %v6974_v43  ;;  %v4933_v62 = vmul.f32 -1.442695, %v1391_v15 }
 0x4f1   :  { %v1422_v27 = vpop.f32.mrf.mxu3 }
 0x4f2   :  { %v5196_v44 = vpop.eup %5195  ;;  %v6979_v35 = vadd.f32 %v1422_v27, %v6427_v13 }
 0x4f3   :  { %1007 = vrot.lane.b32.xlu0 %v6595_v21, %s5786_s17  ;;  %1609 = vrot.lane.b32.xlu2 %v5196_v44, %s5786_s17  ;;  %v1393_v44 = vpop.f32.mrf.mxu2 }
 0x4f4   :  { %5197 = vtanh.f32 %v6979_v35 }
 0x4f5   :  { %5199 = vpow2.f32 %v4929_v54 }
 0x4f9   :  { %v1775_v1 = vpop.f32.mrf.mxu3 }
 0x4fa   :  { %v5198_v16 = vpop.eup %5197  ;;  %v1788_v21 = vadd.f32 %v1775_v1, %v320_v26  ;;  %v326_v26 = vpop.f32.mrf.mxu1  ;;  %v1394_v1 = vadd.f32 %v1393_v44, %v6449_v59 }
 0x4fb   :  { %1673 = vrot.lane.b32.xlu0 %v8960_v49, %s5786_s17  ;;  %1585 = vrot.lane.b32.xlu2 %v6988_v37, %s5786_s17  ;;  %v5200_v24 = vpop.eup %5199 }
 0x4fc   :  { %1611 = vrot.lane.b32.xlu1 %v5198_v16, %s5786_s17  ;;  %v6996_v20 = vadd.f32 %v1788_v21, %v8961_v25  ;;  %v1449_v11 = vadd.f32 1.0, %v5200_v24  ;;  %v4935_v49 = vmul.f32 -1.442695, %v1394_v1 }
 0x4fe   :  { %5201 = vtanh.f32 %v6996_v20  ;;  %v1468_v6 = vand.u32 2147483648, %v1449_v11  ;;  %vm1462_vm4 = vweird.f32 %v1449_v11  ;;  %v1466_v12 = vand.u32 2147483647, %v1449_v11 }
 0x500   :  { %v1469_v30 = vor.u32 1.1754944e-38, %v1468_v6  ;;  %vm1467_vm10 = vcmp.eq.f32.partialorder %v1466_v12, 8.507059e+37  ;;  %v234_v12 = vpop.f32.mrf.mxu0 }
 0x501   :  { %v1778_v41 = vpop.f32.mrf.mxu3 }
 0x502   :  { %v1790_v55 = vadd.f32 %v1778_v41, %v323_v7  ;;  %v1746_v7 = vpop.f32.mrf.mxu2  ;;  %v329_v41 = vpop.f32.mrf.mxu1 }
 0x503   :  { %1587 = vrot.lane.b32.xlu0 %v7000_v47, %s5786_s17 }
 0x504   :  { %v7005_v3 = vadd.f32 %v1790_v55, %v8961_v25  ;;  %1675 = vrot.lane.b32.xlu1 %v8963_v53, %s5786_s17  ;;  %v5202_v46 = vpop.eup %5201 }
 0x506   :  { %5203 = vtanh.f32 %v7005_v3 }
 0x507   :  { %5205 = vrcp.f32 %v1449_v11 }
 0x508   :  { %5207 = vpow2.f32 %v4933_v62 }
 0x509   :  { %v1781_v51 = vpop.f32.mrf.mxu3 }
 0x50a   :  { %v1792_v44 = vadd.f32 %v1781_v51, %v326_v26 }
 0x50c   :  { %v5204_v42 = vpop.eup %5203  ;;  %1983 = vrot.lane.b32.xlu1 %v5202_v46, %s5786_s17  ;;  %v1787_v46 = vadd.f32 %v1746_v7, %v231_v18 }
 0x50d   :  { %1985 = vrot.lane.b32.xlu2 %v5204_v42, %s5786_s17  ;;  %v5206_v14 = vpop.eup %5205 }
 0x50e   :  { %v1458_v9 = vmul.f32 %v5206_v14, %v1449_v11  ;;  %vm1463_vm3 = vweird.f32 %v5206_v14  ;;  %v5208_v19 = vpop.eup %5207 }
 0x50f   :  { %vm1464_vm9 = vmor %vm1462_vm4, %vm1463_vm3  ;;  %v1453_v57 = vadd.f32 1.0, %v5208_v19 }
 0x510   :  { %v1459_v56 = vsub.f32 1.0, %v1458_v9 }
 0x511   :  { %5209 = vrcp.f32 %v1453_v57  ;;  %v1784_v24 = vpop.f32.mrf.mxu3  ;;  %v1528_v53 = vand.u32 2147483648, %v1453_v57  ;;  %vm1522_vm11 = vweird.f32 %v1453_v57  ;;  %v1526_v11 = vand.u32 2147483647, %v1453_v57 }
 0x512   :  { %v1460_v36 = vmul.f32 %v5206_v14, %v1459_v56  ;;  %5211 = vpow2.f32 %v4931_v60  ;;  %v1794_v42 = vadd.f32 %v1784_v24, %v329_v41 }
 0x513   :  { %v1529_v56 = vor.u32 1.1754944e-38, %v1528_v53  ;;  %vm1527_vm13 = vcmp.eq.f32.partialorder %v1526_v11, 8.507059e+37 }
 0x514   :  { %v1461_v23 = vadd.f32 %v5206_v14, %v1460_v36  ;;  %v1795_v36 = vadd.f32 %v1787_v46, %v8966_v39  ;;  %v7030_v15 = vadd.f32 %v1794_v42, %v8961_v25 }
 0x516   :  { %v1465_v40 = vsel %vm1464_vm9, %v5206_v14, %v1461_v23 }
 0x517   :  { %v7014_v2 = vsel %vm1467_vm10, %v1469_v30, %v1465_v40  ;;  %v5210_v29 = vpop.eup %5209  ;;  %v1749_v40 = vpop.f32.mrf.mxu2 }
 0x518   :  { %v5212_v27 = vpop.eup %5211  ;;  %v1518_v50 = vmul.f32 %v5210_v29, %v1453_v57  ;;  %v1789_v19 = vadd.f32 %v1749_v40, %v234_v12 }
 0x519   :  { %v1451_v54 = vadd.f32 1.0, %v5212_v27 }
 0x51a   :  { %v1519_v16 = vsub.f32 1.0, %v1518_v50  ;;  %v1797_v57 = vadd.f32 %v1789_v19, %v8966_v39  ;;  %v8968_v19 = vld [vmem:[#allocation18_spill] sm:$0xff] }
 0x51b   :  { %5213 = vrcp.f32 %v1451_v54  ;;  %v1498_v60 = vand.u32 2147483648, %v1451_v54  ;;  %vm1492_vm15 = vweird.f32 %v1451_v54 }
 0x51c   :  { %v1520_v21 = vmul.f32 %v5210_v29, %v1519_v16  ;;  %5215 = vpow2.f32 %v4935_v49  ;;  %v4947_v27 = vmul.f32 -1.442695, %v1797_v57 }
 0x51d   :  { %5217 = vtanh.f32 %v7030_v15  ;;  %v1499_v16 = vor.u32 1.1754944e-38, %v1498_v60 }
 0x51e   :  { %v1521_v55 = vadd.f32 %v5210_v29, %v1520_v21  ;;  %v7040_v21 = vadd.f32 %v1792_v44, %v8961_v25 }
 0x521   :  { %v5214_v61 = vpop.eup %5213 }
 0x522   :  { %v1488_v0 = vmul.f32 %v5214_v61, %v1451_v54  ;;  %v5216_v9 = vpop.eup %5215  ;;  %vm1493_vm14 = vweird.f32 %v5214_v61 }
 0x523   :  { %v1455_v62 = vadd.f32 1.0, %v5216_v9  ;;  %v5218_v28 = vpop.eup %5217  ;;  %vm1494_vm3 = vmor %vm1492_vm15, %vm1493_vm14 }
 0x525   :  { %v1606_v63 = vpop.permute.xlu1 %1605  ;;  %5219 = vrcp.f32 %v1455_v62  ;;  %vm1552_vm10 = vweird.f32 %v1455_v62  ;;  %v1556_v9 = vand.u32 2147483647, %v1455_v62 }
 0x526   :  { %v1617_v34 = vmul.f32 %v1606_v63, %v7014_v2  ;;  %v1489_v63 = vsub.f32 1.0, %v1488_v0  ;;  %v1558_v0 = vand.u32 2147483648, %v1455_v62 }
 0x528   :  { %1625 = vrot.lane.b32.xlu2 %v1617_v34, %s5786_s17  ;;  %v4945_v34 = vmul.f32 -1.442695, %v1795_v36  ;;  %v1490_v45 = vmul.f32 %v5214_v61, %v1489_v63 }
 0x52a   :  { %5221 = vpow2.f32 %v4945_v34 }
 0x52b   :  { %5223 = vpow2.f32 %v4947_v27  ;;  %v8970_v27 = vld [vmem:[#allocation9_spill] sm:$0xff] }
 0x52c   :  { %5225 = vtanh.f32 %v7040_v21 }
 0x52d   :  { %v1006_v10 = vpop.permute.xlu1 %1005 }
 0x52e   :  { %v7021_v31 = vsel %vm370_vm5, %v1006_v10, 0.0  ;;  %vm1523_vm5 = vweird.f32 %v5210_v29  ;;  %v1491_v10 = vadd.f32 %v5214_v61, %v1490_v45 }
 0x52f   :  { %1589 = vrot.lane.b32.xlu1 %v7021_v31, %s5786_s17  ;;  %vm1524_vm12 = vmor %vm1522_vm11, %vm1523_vm5  ;;  %vm1557_vm11 = vcmp.eq.f32.partialorder %v1556_v9, 8.507059e+37 }
 0x530   :  { %1677 = vrot.lane.b32.xlu2 %v8965_v38, %s5786_s17  ;;  %v1525_v14 = vsel %vm1524_vm12, %v5210_v29, %v1521_v55  ;;  %v5220_v38 = vpop.eup %5219  ;;  %v1496_v29 = vand.u32 2147483647, %v1451_v54  ;;  %v1495_v50 = vsel %vm1494_vm3, %v5214_v61, %v1491_v10 }
 0x531   :  { %v7032_v23 = vsel %vm1527_vm13, %v1529_v56, %v1525_v14  ;;  %v5222_v1 = vpop.eup %5221  ;;  %v1548_v49 = vmul.f32 %v5220_v38, %v1455_v62  ;;  %vm1553_vm9 = vweird.f32 %v5220_v38 }
 0x532   :  { %vm1497_vm4 = vcmp.eq.f32.partialorder %v1496_v29, 8.507059e+37  ;;  %v1827_v41 = vadd.f32 1.0, %v5222_v1  ;;  %v5224_v26 = vpop.eup %5223  ;;  %vm1554_vm5 = vmor %vm1552_vm10, %vm1553_vm9 }
 0x533   :  { %v7042_v7 = vsel %vm1497_vm4, %v1499_v16, %v1495_v50  ;;  %v1549_v55 = vsub.f32 1.0, %v1548_v49  ;;  %v1829_v61 = vadd.f32 1.0, %v5224_v26  ;;  %v5226_v46 = vpop.eup %5225 }
 0x534   :  { %5227 = vrcp.f32 %v1827_v41  ;;  %v1846_v1 = vand.u32 2147483648, %v1827_v41  ;;  %vm1840_vm12 = vweird.f32 %v1827_v41  ;;  %v1844_v16 = vand.u32 2147483647, %v1827_v41 }
 0x535   :  { %v1550_v51 = vmul.f32 %v5220_v38, %v1549_v55  ;;  %5229 = vrcp.f32 %v1829_v61  ;;  %vm1870_vm3 = vweird.f32 %v1829_v61 }
 0x536   :  { %v1847_v55 = vor.u32 1.1754944e-38, %v1846_v1  ;;  %vm1845_vm14 = vcmp.eq.f32.partialorder %v1844_v16, 8.507059e+37 }
 0x537   :  { %v1551_v42 = vadd.f32 %v5220_v38, %v1550_v51 }
 0x539   :  { %v1555_v56 = vsel %vm1554_vm5, %v5220_v38, %v1551_v42  ;;  %v8969_v38 = vld [vmem:[#allocation6_spill] sm:$0xff] }
 0x53a   :  { %v5228_v14 = vpop.eup %5227 }
 0x53b   :  { %v1836_v36 = vmul.f32 %v5228_v14, %v1827_v41  ;;  %v5230_v34 = vpop.eup %5229 }
 0x53c   :  { %v1866_v62 = vmul.f32 %v5230_v34, %v1829_v61  ;;  %vm1871_vm15 = vweird.f32 %v5230_v34 }
 0x53d   :  { %v1837_v63 = vsub.f32 1.0, %v1836_v36  ;;  %vm1872_vm4 = vmor %vm1870_vm3, %vm1871_vm15 }
 0x53e   :  { %v1867_v60 = vsub.f32 1.0, %v1866_v62 }
 0x53f   :  { %v1838_v57 = vmul.f32 %v5228_v14, %v1837_v63  ;;  %v237_v63 = vpop.f32.mrf.mxu0 }
 0x541   :  { %v1839_v50 = vadd.f32 %v5228_v14, %v1838_v57 }
 0x547   :  { %v240_v62 = vpop.f32.mrf.mxu0 }
 0x54d   :  { %v1610_v6 = vpop.permute.xlu2 %1609 }
 0x54e   :  { %v1619_v30 = vmul.f32 %v1610_v6, %v7032_v23  ;;  %v1559_v6 = vor.u32 1.1754944e-38, %v1558_v0  ;;  %v1874_v0 = vand.u32 2147483647, %v1829_v61 }
 0x550   :  { %1629 = vrot.lane.b32.xlu1 %v1619_v30, %s5786_s17  ;;  %v7054_v12 = vsel %vm1557_vm11, %v1559_v6, %v1555_v56  ;;  %vm1875_vm9 = vcmp.eq.f32.partialorder %v1874_v0, 8.507059e+37 }
 0x555   :  { %v1586_v45 = vpop.permute.xlu2 %1585 }
 0x556   :  { %v1597_v42 = vmul.f32 %v1586_v45, %v7014_v2 }
 0x558   :  { %1989 = vrot.lane.b32.xlu1 %v5218_v28, %s5786_s17 }
 0x55d   :  { %v1608_v18 = vpop.permute.xlu0 %1607 }
 0x55e   :  { %v1618_v24 = vmul.f32 %v1608_v18, %v7042_v7  ;;  %v1868_v18 = vmul.f32 %v5230_v34, %v1867_v60 }
 0x560   :  { %1627 = vrot.lane.b32.xlu0 %v1618_v24, %s5786_s17 }
 0x565   :  { %v1008_v54 = vpop.permute.xlu0 %1007 }
 0x566   :  { %v7049_v11 = vsel %vm371_vm6, %v1008_v54, 0.0  ;;  %vm1841_vm6 = vweird.f32 %v5228_v14  ;;  %v1869_v54 = vadd.f32 %v5230_v34, %v1868_v18 }
 0x567   :  { %1591 = vrot.lane.b32.xlu2 %v7049_v11, %s5786_s17  ;;  %v1986_v49 = vpop.permute.xlu2 %1985  ;;  %vm1842_vm13 = vmor %vm1840_vm12, %vm1841_vm6 }
 0x568   :  { %1987 = vrot.lane.b32.xlu0 %v5226_v46, %s5786_s17  ;;  %v1843_v24 = vsel %vm1842_vm13, %v5228_v14, %v1839_v50  ;;  %v1876_v46 = vand.u32 2147483648, %v1829_v61  ;;  %v1873_v9 = vsel %vm1872_vm4, %v5230_v34, %v1869_v54  ;;  %v8971_v61 = vld [vmem:[#allocation10_spill] sm:$0xff]  ;;  %v1752_v34 = vpop.f32.mrf.mxu2 }
 0x569   :  { %v7074_v51 = vsel %vm1845_vm14, %v1847_v55, %v1843_v24 }
 0x56a   :  { %v1877_v56 = vor.u32 1.1754944e-38, %v1876_v46 }
 0x56c   :  { %v7082_v36 = vsel %vm1875_vm9, %v1877_v56, %v1873_v9 }
 0x56d   :  { %v1674_v10 = vpop.permute.xlu0 %1673  ;;  %v1996_v6 = vmul.f32 %v1986_v49, %v7082_v36 }
 0x56e   :  { %v1612_v40 = vpop.permute.xlu1 %1611  ;;  %v7063_v29 = vsel %vm1017_vm1, %v1674_v10, %v8969_v38 }
 0x56f   :  { %v1620_v30 = vmul.f32 %v1612_v40, %v7054_v12 }
 0x570   :  { %1679 = vrot.lane.b32.xlu0 %v8968_v19, %s5786_s17  ;;  %v1791_v19 = vadd.f32 %v1752_v34, %v237_v63  ;;  %v1755_v57 = vpop.f32.mrf.mxu2 }
 0x571   :  { %1631 = vrot.lane.b32.xlu2 %v1620_v30, %s5786_s17 }
 0x572   :  { %v1799_v45 = vadd.f32 %v1791_v19, %v8966_v39 }
 0x574   :  { %v4949_v10 = vmul.f32 -1.442695, %v1799_v45 }
 0x575   :  { %v1588_v24 = vpop.permute.xlu0 %1587 }
 0x576   :  { %v1676_v28 = vpop.permute.xlu1 %1675  ;;  %v1598_v0 = vmul.f32 %v1588_v24, %v7042_v7 }
 0x577   :  { %v7068_v44 = vsel %vm1018_vm2, %v1676_v28, %v8970_v27  ;;  %v1793_v28 = vadd.f32 %v1755_v57, %v240_v62 }
 0x578   :  { %1963 = vrot.lane.b32.xlu0 %v7063_v29, %s5786_s17 }
 0x579   :  { %1965 = vrot.lane.b32.xlu2 %v7068_v44, %s5786_s17  ;;  %v1801_v60 = vadd.f32 %v1793_v28, %v8966_v39 }
 0x57b   :  { %v4951_v38 = vmul.f32 -1.442695, %v1801_v60 }
 0x57e   :  { %v1984_v26 = vpop.permute.xlu1 %1983 }
 0x57f   :  { %v1995_v53 = vmul.f32 %v1984_v26, %v7074_v51 }
 0x581   :  { %2003 = vrot.lane.b32.xlu1 %v1995_v53, %s5786_s17 }
 0x582   :  { %v1626_v41 = vpop.permute.xlu2 %1625 }
 0x583   :  { %v7079_v14 = vadd.f32 %v1626_v41, %v1597_v42  ;;  %v4930_v42 = vmul.f32 -1.442695, %v6963_v17 }
 0x585   :  { %5231 = vtanh.f32 %v7079_v14 }
 0x586   :  { %5233 = vpow2.f32 %v4949_v10 }
 0x587   :  { %5235 = vpow2.f32 %v4951_v38 }
 0x589   :  { %2005 = vrot.lane.b32.xlu1 %v1996_v6, %s5786_s17 }
 0x58a   :  { %v1678_v2 = vpop.permute.xlu2 %1677 }
 0x58b   :  { %v5232_v40 = vpop.eup %5231  ;;  %v7089_v30 = vsel %vm1019_vm7, %v1678_v2, %v8971_v61 }
 0x58c   :  { %1649 = vrot.lane.b32.xlu0 %v5232_v40, %s5786_s17  ;;  %1967 = vrot.lane.b32.xlu2 %v7089_v30, %s5786_s17  ;;  %v5234_v27 = vpop.eup %5233 }
 0x58d   :  { %v1831_v50 = vadd.f32 1.0, %v5234_v27  ;;  %v5236_v1 = vpop.eup %5235 }
 0x58e   :  { %v1833_v16 = vadd.f32 1.0, %v5236_v1 }
 0x58f   :  { %5237 = vrcp.f32 %v1831_v50  ;;  %v1906_v40 = vand.u32 2147483648, %v1831_v50  ;;  %vm1900_vm5 = vweird.f32 %v1831_v50  ;;  %v1904_v61 = vand.u32 2147483647, %v1831_v50 }
 0x590   :  { %5239 = vrcp.f32 %v1833_v16  ;;  %v1936_v27 = vand.u32 2147483648, %v1833_v16  ;;  %vm1930_vm13 = vweird.f32 %v1833_v16 }
 0x591   :  { %5241 = vpow2.f32 %v4930_v42  ;;  %v1907_v7 = vor.u32 1.1754944e-38, %v1906_v40  ;;  %vm1905_vm6 = vcmp.eq.f32.partialorder %v1904_v61, 8.507059e+37 }
 0x595   :  { %v5238_v49 = vpop.eup %5237 }
 0x596   :  { %v1896_v18 = vmul.f32 %v5238_v49, %v1831_v50  ;;  %v5240_v26 = vpop.eup %5239  ;;  %vm1901_vm10 = vweird.f32 %v5238_v49 }
 0x597   :  { %v1926_v53 = vmul.f32 %v5240_v26, %v1833_v16  ;;  %vm1902_vm11 = vmor %vm1900_vm5, %vm1901_vm10  ;;  %v5242_v62 = vpop.eup %5241  ;;  %vm1931_vm12 = vweird.f32 %v5240_v26 }
 0x598   :  { %v1897_v55 = vsub.f32 1.0, %v1896_v18  ;;  %v1450_v50 = vadd.f32 1.0, %v5242_v62  ;;  %vm1932_vm14 = vmor %vm1930_vm13, %vm1931_vm12 }
 0x599   :  { %v1927_v9 = vsub.f32 1.0, %v1926_v53 }
 0x59a   :  { %v1898_v46 = vmul.f32 %v5238_v49, %v1897_v55  ;;  %v1937_v55 = vor.u32 1.1754944e-38, %v1936_v27  ;;  %vm1477_vm4 = vweird.f32 %v1450_v50 }
 0x59b   :  { %v1928_v17 = vmul.f32 %v5240_v26, %v1927_v9 }
 0x59c   :  { %v1899_v6 = vadd.f32 %v5238_v49, %v1898_v46 }
 0x59d   :  { %v1929_v60 = vadd.f32 %v5240_v26, %v1928_v17 }
 0x59e   :  { %v1903_v19 = vsel %vm1902_vm11, %v5238_v49, %v1899_v6 }
 0x59f   :  { %v7104_v10 = vsel %vm1905_vm6, %v1907_v7, %v1903_v19  ;;  %v1933_v18 = vsel %vm1932_vm14, %v5240_v26, %v1929_v60  ;;  %v103_v19 = vld [vmem:[%s8896_s0 + $0x70] sm:$0xff] }
 0x5a1   :  { %v1590_v54 = vpop.permute.xlu1 %1589 }
 0x5a2   :  { %v1599_v34 = vmul.f32 %v1590_v54, %v7032_v23  ;;  %v1934_v23 = vand.u32 2147483647, %v1833_v16 }
 0x5a4   :  { %vm1935_vm15 = vcmp.eq.f32.partialorder %v1934_v23, 8.507059e+37  ;;  %v104_v23 = vld [vmem:[%s8896_s0 + $0x78] sm:$0xff] }
 0x5a5   :  { %v7113_v53 = vsel %vm1935_vm15, %v1937_v55, %v1933_v18  ;;  %v8973_v55 = vld [vmem:[#allocation17_spill] sm:$0xff] }
 0x5c1   :  { %v1592_v2 = vpop.permute.xlu2 %1591 }
 0x5c2   :  { %v1630_v63 = vpop.permute.xlu1 %1629  ;;  %v1600_v49 = vmul.f32 %v1592_v2, %v7054_v12  ;;  %v101_v12 = vld [vmem:[%s8896_s0 + $0x60] sm:$0xff]  ;;  %v102_v2 = vld [vmem:[%s8896_s0 + $0x68] sm:$0xff] }
 0x5c3   :  { %v7102_v45 = vadd.f32 %v1630_v63, %v1599_v34  ;;  %4853 = vmatmul.msk.f32.gmra.mxu0 %vm117_vm0, %v101_v12  ;;  %4877 = vmatmul.msk.f32.gmra.mxu1 %vm117_vm0, %v101_v12  ;;  %v107_v12 = vld [vmem:[%s8896_s0 + $0x90] sm:$0xff] }
 0x5ca   :  { %v1990_v24 = vpop.permute.xlu1 %1989 }
 0x5cb   :  { %v1632_v1 = vpop.permute.xlu2 %1631  ;;  %v1998_v16 = vmul.f32 %v1990_v24, %v7113_v53  ;;  %4854 = vmatmul.msk.f32.gmra.mxu0 %vm117_vm0, %v102_v2  ;;  %4878 = vmatmul.msk.f32.gmra.mxu1 %vm117_vm0, %v102_v2 }
 0x5cc   :  { %v7111_v54 = vadd.f32 %v1632_v1, %v1600_v49 }
 0x5d2   :  { %v1628_v41 = vpop.permute.xlu0 %1627 }
 0x5d3   :  { %v7098_v56 = vadd.f32 %v1628_v41, %v1598_v0  ;;  %v8972_v0 = vld [vmem:[#allocation11_spill] sm:$0xff]  ;;  %4855 = vmatmul.msk.f32.gmra.mxu0 %vm117_vm0, %v103_v19  ;;  %4879 = vmatmul.msk.f32.gmra.mxu1 %vm117_vm0, %v103_v19  ;;  %v1966_v62 = vpop.permute.xlu2 %1965 }
 0x5d4   :  { %v1976_v60 = vmul.f32 %v1966_v62, %v7082_v36 }
 0x5d5   :  { %5243 = vtanh.f32 %v7098_v56 }
 0x5d6   :  { %5245 = vtanh.f32 %v7102_v45 }
 0x5d7   :  { %5247 = vrcp.f32 %v1450_v50 }
 0x5d8   :  { %5249 = vtanh.f32 %v7111_v54 }
 0x5da   :  { %v1988_v57 = vpop.permute.xlu0 %1987 }
 0x5db   :  { %v5244_v28 = vpop.eup %5243  ;;  %v1997_v38 = vmul.f32 %v1988_v57, %v7104_v10  ;;  %4856 = vmatmul.msk.f32.gmra.mxu0 %vm117_vm0, %v104_v23  ;;  %4880 = vmatmul.msk.f32.gmra.mxu1 %vm117_vm0, %v104_v23 }
 0x5dc   :  { %1651 = vrot.lane.b32.xlu0 %v5244_v28, %s5786_s17  ;;  %v5246_v42 = vpop.eup %5245  ;;  %v1483_v28 = vand.u32 2147483648, %v1450_v50 }
 0x5dd   :  { %2007 = vrot.lane.b32.xlu1 %v1997_v38, %s5786_s17  ;;  %v5248_v26 = vpop.eup %5247 }
 0x5de   :  { %v5250_v9 = vpop.eup %5249  ;;  %v1473_v6 = vmul.f32 %v5248_v26, %v1450_v50  ;;  %vm1478_vm3 = vweird.f32 %v5248_v26  ;;  %v1484_v18 = vor.u32 1.1754944e-38, %v1483_v28 }
 0x5df   :  { %vm1479_vm9 = vmor %vm1477_vm4, %vm1478_vm3 }
 0x5e0   :  { %v1474_v61 = vsub.f32 1.0, %v1473_v6  ;;  %v4934_v6 = vmul.f32 -1.442695, %v6974_v43 }
 0x5e2   :  { %v1680_v46 = vpop.permute.xlu0 %1679  ;;  %v1475_v17 = vmul.f32 %v5248_v26, %v1474_v61  ;;  %v109_v61 = vld [vmem:[%s8896_s0 + $0xa0] sm:$0xff] }
 0x5e3   :  { %v7119_v41 = vsel %vm1020_vm8, %v1680_v46, %v8972_v0  ;;  %v106_v0 = vld [vmem:[%s8896_s0 + $0x88] sm:$0xff] }
 0x5e4   :  { %1969 = vrot.lane.b32.xlu2 %v7119_v41, %s5786_s17  ;;  %1653 = vrot.lane.b32.xlu0 %v5246_v42, %s5786_s17  ;;  %v1476_v57 = vadd.f32 %v5248_v26, %v1475_v17  ;;  %v105_v42 = vld [vmem:[%s8896_s0 + $0x80] sm:$0xff] }
 0x5e5   :  { %2009 = vrot.lane.b32.xlu1 %v1998_v16, %s5786_s17  ;;  %4857 = vmatmul.msk.f32.gmra.mxu0 %vm117_vm0, %v105_v42 }
 0x5e6   :  { %v1480_v27 = vsel %vm1479_vm9, %v5248_v26, %v1476_v57  ;;  %4881 = vmatmul.msk.f32.gmra.mxu1 %vm117_vm0, %v105_v42  ;;  %v4932_v26 = vmul.f32 -1.442695, %v6970_v52  ;;  %v4936_v52 = vmul.f32 -1.442695, %v6979_v35  ;;  %v110_v35 = vld [vmem:[%s8896_s0 + $0xa8] sm:$0xff]  ;;  %v112_v42 = vld [vmem:[%s8896_s0 + $0xb8] sm:$0xff] }
 0x5ea   :  { %v1964_v40 = vpop.permute.xlu0 %1963 }
 0x5eb   :  { %v1975_v63 = vmul.f32 %v1964_v40, %v7074_v51  ;;  %v1481_v51 = vand.u32 2147483647, %v1450_v50 }
 0x5ec   :  { %1655 = vrot.lane.b32.xlu2 %v5250_v9, %s5786_s17  ;;  %v108_v9 = vld [vmem:[%s8896_s0 + $0x98] sm:$0xff] }
 0x5ed   :  { %vm1482_vm10 = vcmp.eq.f32.partialorder %v1481_v51, 8.507059e+37  ;;  %4858 = vmatmul.msk.f32.gmra.mxu0 %vm117_vm0, %v106_v0  ;;  %v111_v51 = vld [vmem:[%s8896_s0 + $0xb0] sm:$0xff] }
 0x5ee   :  { %v1485_v24 = vsel %vm1482_vm10, %v1484_v18, %v1480_v27  ;;  %4882 = vmatmul.msk.f32.gmra.mxu1 %vm117_vm0, %v106_v0 }
 0x5f3   :  { %v2004_v34 = vpop.permute.xlu1 %2003 }
 0x5f4   :  { %v7141_v7 = vadd.f32 %v2004_v34, %v1975_v63 }
 0x5f5   :  { %4859 = vmatmul.msk.f32.gmra.mxu0 %vm117_vm0, %v107_v12 }
 0x5f6   :  { %5251 = vtanh.f32 %v7141_v7  ;;  %4883 = vmatmul.msk.f32.gmra.mxu1 %vm117_vm0, %v107_v12 }
 0x5fb   :  { %v2006_v38 = vpop.permute.xlu1 %2005 }
 0x5fc   :  { %v5252_v1 = vpop.eup %5251  ;;  %v7150_v49 = vadd.f32 %v2006_v38, %v1976_v60  ;;  %v4946_v60 = vmul.f32 -1.442695, %v6996_v20 }
 0x5fd   :  { %2027 = vrot.lane.b32.xlu0 %v5252_v1, %s5786_s17  ;;  %4860 = vmatmul.msk.f32.gmra.mxu0 %vm117_vm0, %v108_v9  ;;  %v1968_v1 = vpop.permute.xlu2 %1967 }
 0x5fe   :  { %5253 = vtanh.f32 %v7150_v49  ;;  %v1650_v50 = vpop.permute.xlu0 %1649  ;;  %4884 = vmatmul.msk.f32.gmra.mxu1 %vm117_vm0, %v108_v9  ;;  %v1977_v9 = vmul.f32 %v1968_v1, %v7104_v10 }
 0x5ff   :  { %v1661_v36 = vmul.f32 %v1650_v50, %v1485_v24  ;;  %5255 = vpow2.f32 %v4932_v26  ;;  %v4948_v50 = vmul.f32 -1.442695, %v7005_v3 }
 0x600   :  { %5257 = vpow2.f32 %v4934_v6 }
 0x601   :  { %v7159_v46 = vsel %vm1017_vm1, %v1661_v36, %v8973_v55 }
 0x602   :  { %2047 = vrot.lane.b32.xlu1 %v7159_v46, %s5786_s17 }
 0x604   :  { %v5254_v16 = vpop.eup %5253 }
 0x605   :  { %2029 = vrot.lane.b32.xlu2 %v5254_v16, %s5786_s17  ;;  %v5256_v2 = vpop.eup %5255  ;;  %4861 = vmatmul.msk.f32.gmra.mxu0 %vm117_vm0, %v109_v61 }
 0x606   :  { %v1452_v40 = vadd.f32 1.0, %v5256_v2  ;;  %v5258_v63 = vpop.eup %5257  ;;  %4885 = vmatmul.msk.f32.gmra.mxu1 %vm117_vm0, %v109_v61 }
 0x607   :  { %v7192_v34 = vadd.f32 1.0, %v5258_v63 }
 0x608   :  { %5259 = vrcp.f32 %v1452_v40  ;;  %v1513_v20 = vand.u32 2147483648, %v1452_v40  ;;  %vm1507_vm11 = vweird.f32 %v1452_v40  ;;  %v1511_v55 = vand.u32 2147483647, %v1452_v40 }
 0x609   :  { %5261 = vpow2.f32 %v4936_v52  ;;  %vm1537_vm14 = vweird.f32 %v7192_v34  ;;  %v1541_v10 = vand.u32 2147483647, %v7192_v34 }
 0x60a   :  { %5263 = vrcp.f32 %v7192_v34  ;;  %v1514_v26 = vor.u32 1.1754944e-38, %v1513_v20  ;;  %vm1512_vm12 = vcmp.eq.f32.partialorder %v1511_v55, 8.507059e+37 }
 0x60b   :  { %vm1542_vm4 = vcmp.eq.f32.partialorder %v1541_v10, 8.507059e+37 }
 0x60d   :  { %4862 = vmatmul.msk.f32.gmra.mxu0 %vm117_vm0, %v110_v35 }
 0x60e   :  { %v5260_v17 = vpop.eup %5259  ;;  %4886 = vmatmul.msk.f32.gmra.mxu1 %vm117_vm0, %v110_v35 }
 0x60f   :  { %v5262_v43 = vpop.eup %5261  ;;  %v1503_v62 = vmul.f32 %v5260_v17, %v1452_v40  ;;  %vm1508_vm5 = vweird.f32 %v5260_v17 }
 0x610   :  { %v7198_v19 = vadd.f32 1.0, %v5262_v43  ;;  %v5264_v28 = vpop.eup %5263  ;;  %vm1509_vm6 = vmor %vm1507_vm11, %vm1508_vm5 }
 0x611   :  { %v1504_v57 = vsub.f32 1.0, %v1503_v62  ;;  %v1533_v27 = vmul.f32 %v5264_v28, %v7192_v34  ;;  %vm1538_vm13 = vweird.f32 %v5264_v28  ;;  %v1543_v62 = vand.u32 2147483648, %v7192_v34 }
 0x612   :  { %5265 = vrcp.f32 %v7198_v19  ;;  %vm1539_vm15 = vmor %vm1537_vm14, %vm1538_vm13  ;;  %vm1567_vm9 = vweird.f32 %v7198_v19 }
 0x613   :  { %v1505_v38 = vmul.f32 %v5260_v17, %v1504_v57  ;;  %5267 = vpow2.f32 %v4946_v60  ;;  %v1534_v24 = vsub.f32 1.0, %v1533_v27  ;;  %v8974_v57 = vld [vmem:[#allocation19_spill] sm:$0xff]  ;;  %v1544_v1 = vor.u32 1.1754944e-38, %v1543_v62 }
 0x614   :  { %5269 = vpow2.f32 %v4948_v50  ;;  %v1571_v50 = vand.u32 2147483647, %v7198_v19 }
 0x615   :  { %4863 = vmatmul.msk.f32.gmra.mxu0 %vm117_vm0, %v111_v51  ;;  %v1506_v18 = vadd.f32 %v5260_v17, %v1505_v38  ;;  %v1535_v0 = vmul.f32 %v5264_v28, %v1534_v24  ;;  %v1573_v24 = vand.u32 2147483648, %v7198_v19 }
 0x616   :  { %4887 = vmatmul.msk.f32.gmra.mxu1 %vm117_vm0, %v111_v51  ;;  %vm1572_vm5 = vcmp.eq.f32.partialorder %v1571_v50, 8.507059e+37 }
 0x617   :  { %v1510_v16 = vsel %vm1509_vm6, %v5260_v17, %v1506_v18  ;;  %v1536_v17 = vadd.f32 %v5264_v28, %v1535_v0 }
 0x618   :  { %v7210_v23 = vpop.eup %5265  ;;  %v1515_v6 = vsel %vm1512_vm12, %v1514_v26, %v1510_v16  ;;  %v8977_v26 = vld [vmem:[#allocation20_spill] sm:$0xff] }
 0x619   :  { %v1563_v36 = vmul.f32 %v7210_v23, %v7198_v19  ;;  %v5268_v12 = vpop.eup %5267  ;;  %v1540_v38 = vsel %vm1539_vm15, %v5264_v28, %v1536_v17  ;;  %vm1568_vm3 = vweird.f32 %v7210_v23 }
 0x61a   :  { %v7221_v40 = vadd.f32 1.0, %v5268_v12  ;;  %v5270_v60 = vpop.eup %5269  ;;  %vm7246_vm10 = vmor %vm1567_vm9, %vm1568_vm3 }
 0x61b   :  { %v1564_v3 = vsub.f32 1.0, %v1563_v36  ;;  %v7240_v18 = vadd.f32 1.0, %v5270_v60  ;;  %v1545_v36 = vsel %vm1542_vm4, %v1544_v1, %v1540_v38 }
 0x61c   :  { %v1861_v38 = vand.u32 2147483648, %v7221_v40  ;;  %vm1855_vm6 = vweird.f32 %v7221_v40  ;;  %v1859_v1 = vand.u32 2147483647, %v7221_v40 }
 0x61d   :  { %4864 = vmatmul.msk.f32.gmra.mxu0 %vm117_vm0, %v112_v42  ;;  %v1565_v43 = vmul.f32 %v7210_v23, %v1564_v3  ;;  %v1574_v3 = vor.u32 1.1754944e-38, %v1573_v24  ;;  %vm1885_vm3 = vweird.f32 %v7240_v18 }
 0x61e   :  { %4888 = vmatmul.msk.f32.gmra.mxu1 %vm117_vm0, %v112_v42  ;;  %vm1860_vm14 = vcmp.eq.f32.partialorder %v1859_v1, 8.507059e+37  ;;  %v5679_v1 = vld [vmem:[%s8898_s2 + $0x1c0] sm:$0xff] }
 0x61f   :  { %v1566_v27 = vadd.f32 %v7210_v23, %v1565_v43 }
 0x621   :  { %v1570_v0 = vsel %vm7246_vm10, %v7210_v23, %v1566_v27 }
 0x622   :  { %v1575_v23 = vsel %vm1572_vm5, %v1574_v3, %v1570_v0 }
 0x63e   :  { %v1970_v52 = vpop.permute.xlu2 %1969 }
 0x63f   :  { %v1978_v34 = vmul.f32 %v1970_v52, %v7113_v53 }
 0x646   :  { %v1656_v19 = vpop.permute.xlu2 %1655 }
 0x64e   :  { %v1652_v2 = vpop.permute.xlu0 %1651 }
 0x64f   :  { %v1662_v61 = vmul.f32 %v1652_v2, %v1515_v6  ;;  %v2008_v63 = vpop.permute.xlu1 %2007  ;;  %v1664_v6 = vmul.f32 %v1656_v19, %v1575_v23  ;;  %v7312_v23 = vld [vmem:[%s8896_s0 + $0xc8] sm:$0xff] }
 0x650   :  { %v7224_v35 = vadd.f32 %v2008_v63, %v1977_v9  ;;  %v8978_v63 = vld [vmem:[#allocation21_spill] sm:$0xff]  ;;  %vm1714_vm10 = vcmp.gt.f32.partialorder %v7312_v23, 2.0 }
 0x651   :  { %v7230_v51 = vsel %vm1018_vm2, %v1662_v61, %v8974_v57  ;;  %v7269_v17 = vsel %vm1020_vm8, %v1664_v6, %v8978_v63  ;;  %v5667_v6 = vld [vmem:[%s8898_s2 + $0x1f0] sm:$0xff]  ;;  %v5671_v63 = vld [vmem:[%s8898_s2 + $0x1e0] sm:$0xff] }
 0x652   :  { %5271 = vtanh.f32 %v7224_v35  ;;  %2049 = vrot.lane.b32.xlu0 %v7230_v51, %s5786_s17 }
 0x653   :  { %5273 = vrcp.f32 %v7221_v40 }
 0x654   :  { %5275 = vrcp.f32 %v7240_v18 }
 0x656   :  { %v1654_v20 = vpop.permute.xlu0 %1653 }
 0x657   :  { %v1663_v55 = vmul.f32 %v1654_v20, %v1545_v36  ;;  %v2010_v42 = vpop.permute.xlu1 %2009 }
 0x658   :  { %v5272_v16 = vpop.eup %5271  ;;  %v7253_v12 = vadd.f32 %v2010_v42, %v1978_v34  ;;  %v1862_v34 = vor.u32 1.1754944e-38, %v1861_v38  ;;  %v5677_v38 = vld [vmem:[%s8898_s2 + $0xc0] sm:$0xff] }
 0x659   :  { %v5274_v53 = vpop.eup %5273  ;;  %2031 = vrot.lane.b32.xlu1 %v5272_v16, %s5786_s17  ;;  %v7260_v9 = vsel %vm1019_vm7, %v1663_v55, %v8977_v26 }
 0x65a   :  { %5277 = vtanh.f32 %v7253_v12  ;;  %2051 = vrot.lane.b32.xlu2 %v7260_v9, %s5786_s17  ;;  %v1851_v2 = vmul.f32 %v5274_v53, %v7221_v40  ;;  %v5276_v52 = vpop.eup %5275  ;;  %vm1856_vm11 = vweird.f32 %v5274_v53  ;;  %v1889_v40 = vand.u32 2147483647, %v7240_v18 }
 0x65b   :  { %v1881_v62 = vmul.f32 %v5276_v52, %v7240_v18  ;;  %vm1857_vm12 = vmor %vm1855_vm6, %vm1856_vm11  ;;  %vm1886_vm13 = vweird.f32 %v5276_v52 }
 0x65c   :  { %v1852_v43 = vsub.f32 1.0, %v1851_v2  ;;  %vm1887_vm4 = vmor %vm1885_vm3, %vm1886_vm13  ;;  %vm1890_vm9 = vcmp.eq.f32.partialorder %v1889_v40, 8.507059e+37  ;;  %v5668_v2 = vld [vmem:[%s8898_s2 + $0x1f8] sm:$0xff]  ;;  %v5686_v40 = vld [vmem:[%s8898_s2 + $0xa8] sm:$0xff] }
 0x65d   :  { %v1882_v10 = vsub.f32 1.0, %v1881_v62 }
 0x65e   :  { %v1853_v57 = vmul.f32 %v5274_v53, %v1852_v43  ;;  %v5672_v43 = vld [vmem:[%s8898_s2 + $0x1e8] sm:$0xff] }
 0x65f   :  { %v1883_v27 = vmul.f32 %v5276_v52, %v1882_v10  ;;  %v2030_v0 = vpop.permute.xlu2 %2029  ;;  %v5674_v10 = vld [vmem:[%s8898_s2 + $0xd8] sm:$0xff] }
 0x660   :  { %v5278_v61 = vpop.eup %5277  ;;  %v1854_v60 = vadd.f32 %v5274_v53, %v1853_v57  ;;  %v5673_v57 = vld [vmem:[%s8898_s2 + $0xd0] sm:$0xff] }
 0x661   :  { %2053 = vrot.lane.b32.xlu1 %v7269_v17, %s5786_s17  ;;  %2033 = vrot.lane.b32.xlu0 %v5278_v61, %s5786_s17  ;;  %v1884_v50 = vadd.f32 %v5276_v52, %v1883_v27  ;;  %v5670_v61 = vld [vmem:[%s8898_s2 + $0xe8] sm:$0xff] }
 0x662   :  { %1697 = vrot.lane.b32.xlu2 %v7079_v14, %s5786_s17  ;;  %v1858_v24 = vsel %vm1857_vm12, %v5274_v53, %v1854_v60  ;;  %v1891_v14 = vand.u32 2147483648, %v7240_v18  ;;  %v5664_v18 = vld [vmem:[%s8898_s2 + $0xf0] sm:$0xff]  ;;  %v5676_v60 = vld [vmem:[%s8898_s2 + $0x1d8] sm:$0xff]  ;;  %v5678_v27 = vld [vmem:[%s8898_s2 + $0xc8] sm:$0xff] }
 0x663   :  { %v1863_v36 = vsel %vm1860_vm14, %v1862_v34, %v1858_v24  ;;  %v1888_v55 = vsel %vm1887_vm4, %v5276_v52, %v1884_v50  ;;  %v5669_v52 = vld [vmem:[%s8898_s2 + $0xe0] sm:$0xff]  ;;  %v5680_v24 = vld [vmem:[%s8898_s2 + $0x1c8] sm:$0xff]  ;;  %v5681_v34 = vld [vmem:[%s8898_s2 + $0xb0] sm:$0xff] }
 0x664   :  { %v1892_v16 = vor.u32 1.1754944e-38, %v1891_v14  ;;  %v5682_v50 = vld [vmem:[%s8898_s2 + $0xb8] sm:$0xff]  ;;  %v5683_v14 = vld [vmem:[%s8898_s2 + $0x1b0] sm:$0xff] }
 0x666   :  { %v1893_v3 = vsel %vm1890_vm9, %v1892_v16, %v1888_v55  ;;  %v5688_v55 = vld [vmem:[%s8898_s2 + $0x1a8] sm:$0xff]  ;;  %v5689_v16 = vld [vmem:[%s8898_s2 + $0x90] sm:$0xff] }
 0x667   :  { %v7307_v26 = vmul.f32 %v2030_v0, %v1893_v3  ;;  %v5690_v0 = vld [vmem:[%s8898_s2 + $0x98] sm:$0xff]  ;;  %v5694_v3 = vld [vmem:[%s8898_s2 + $0x88] sm:$0xff] }
 0x669   :  { %1699 = vrot.lane.b32.xlu1 %v7098_v56, %s5786_s17  ;;  %v7286_v56 = vld [vmem:[%s8896_s0 + $0xc0] sm:$0xff]  ;;  %v7337_v62 = vsel %vm1714_vm10, %v7307_v26, %v6900_v58  ;;  %v5675_v58 = vld [vmem:[%s8898_s2 + $0x1d0] sm:$0xff] }
 0x66a   :  { %vm1713_vm15 = vcmp.gt.f32.partialorder %v7286_v56, 2.0 }
 0x66f   :  { %v2028_v20 = vpop.permute.xlu0 %2027 }
 0x670   :  { %v2039_v28 = vmul.f32 %v2028_v20, %v1863_v36  ;;  %v5684_v36 = vld [vmem:[%s8898_s2 + $0x1b8] sm:$0xff]  ;;  %v5685_v20 = vld [vmem:[%s8898_s2 + $0xa0] sm:$0xff] }
 0x672   :  { %v7294_v42 = vsel %vm1713_vm15, %v2039_v28, %v6879_v48  ;;  %v5665_v48 = vld [vmem:[%s8898_s2 + $0xf8] sm:$0xff] }
 0x673   :  { %4961 = vmatmul.msk.f32.vlgmr.msrb.gmra.mxu0 %vm117_vm0, %v7294_v42  ;;  %4965 = vmatmul.msk.f32.vlgmr.msrb.gmra.mxu1 %vm117_vm0, %v7294_v42 }
 0x674   :  { %v2048_v53 = vpop.permute.xlu1 %2047  ;;  %3825 = vmatpush.msrb.mxu0 %v5664_v18  ;;  %3854 = vmatpush.msrb.mxu1 %v5665_v48  ;;  %v5692_v18 = vld [vmem:[%s8898_s2 + $0x198] sm:$0xff]  ;;  %v5693_v48 = vld [vmem:[%s8898_s2 + $0x80] sm:$0xff] }
 0x675   :  { %v2059_v19 = vsel %vm117_vm0, %v2039_v28, %v2048_v53  ;;  %v5687_v28 = vld [vmem:[%s8898_s2 + $0x1a0] sm:$0xff]  ;;  %v5691_v53 = vld [vmem:[%s8898_s2 + $0x190] sm:$0xff] }
 0x676   :  { %2079 = vmatmul.f32.vlgmr.msrb.gmra.mxu2 %v2059_v19  ;;  %2108 = vmatmul.f32.vlgmr.msrb.gmra.mxu3 %v2059_v19  ;;  %v5695_v19 = vld [vmem:[%s8898_s2 + $0x180] sm:$0xff] }
 0x677   :  { %3455 = vmatpush.msrb.mxu2 %v5667_v6  ;;  %3484 = vmatpush.msrb.mxu3 %v5668_v2  ;;  %v5696_v6 = vld [vmem:[%s8898_s2 + $0x188] sm:$0xff]  ;;  %v5697_v2 = vld [vmem:[%s8898_s2 + $0x170] sm:$0xff] }
 0x678   :  { %3826 = vmatpush.msrb.mxu0 %v5669_v52  ;;  %3855 = vmatpush.msrb.mxu1 %v5670_v61  ;;  %v5698_v52 = vld [vmem:[%s8898_s2 + $0x178] sm:$0xff]  ;;  %v5699_v61 = vld [vmem:[%s8898_s2 + $0x160] sm:$0xff] }
 0x679   :  { %3456 = vmatpush.msrb.mxu2 %v5671_v63  ;;  %3485 = vmatpush.msrb.mxu3 %v5672_v43  ;;  %v5700_v63 = vld [vmem:[%s8898_s2 + $0x168] sm:$0xff]  ;;  %v5701_v43 = vld [vmem:[%s8898_s2 + $0x150] sm:$0xff] }
 0x67a   :  { %3827 = vmatpush.msrb.mxu0 %v5673_v57  ;;  %3856 = vmatpush.msrb.mxu1 %v5674_v10  ;;  %v5702_v57 = vld [vmem:[%s8898_s2 + $0x158] sm:$0xff]  ;;  %v5703_v10 = vld [vmem:[%s8898_s2 + $0x140] sm:$0xff] }
 0x67b   :  { %4962 = vmatmul.msk.f32.gmra.mxu0 %vm117_vm0, %v7337_v62  ;;  %4966 = vmatmul.msk.f32.gmra.mxu1 %vm117_vm0, %v7337_v62 }
 0x67c   :  { %3457 = vmatpush.msrb.mxu2 %v5675_v58  ;;  %3486 = vmatpush.msrb.mxu3 %v5676_v60  ;;  %v5704_v58 = vld [vmem:[%s8898_s2 + $0x148] sm:$0xff]  ;;  %v5705_v60 = vld [vmem:[%s8898_s2 + $0x130] sm:$0xff] }
 0x67d   :  { %3828 = vmatpush.msrb.mxu0 %v5677_v38  ;;  %3857 = vmatpush.msrb.mxu1 %v5678_v27  ;;  %v5706_v38 = vld [vmem:[%s8898_s2 + $0x138] sm:$0xff]  ;;  %v5707_v27 = vld [vmem:[%s8898_s2 + $0x120] sm:$0xff] }
 0x67e   :  { %3458 = vmatpush.msrb.mxu2 %v5679_v1  ;;  %3487 = vmatpush.msrb.mxu3 %v5680_v24  ;;  %v5708_v1 = vld [vmem:[%s8898_s2 + $0x128] sm:$0xff]  ;;  %v5709_v24 = vld [vmem:[%s8898_s2 + $0x110] sm:$0xff] }
 0x67f   :  { %3829 = vmatpush.msrb.mxu0 %v5681_v34  ;;  %3858 = vmatpush.msrb.mxu1 %v5682_v50  ;;  %v5710_v34 = vld [vmem:[%s8898_s2 + $0x118] sm:$0xff]  ;;  %v5711_v50 = vld [vmem:[%s8898_s2 + $0x100] sm:$0xff] }
 0x680   :  { %3459 = vmatpush.msrb.mxu2 %v5683_v14  ;;  %3488 = vmatpush.msrb.mxu3 %v5684_v36  ;;  %v5712_v14 = vld [vmem:[%s8898_s2 + $0x108] sm:$0xff]  ;;  %v4950_v36 = vmul.f32 -1.442695, %v7040_v21 }
 0x681   :  { %3830 = vmatpush.msrb.mxu0 %v5685_v20  ;;  %3859 = vmatpush.msrb.mxu1 %v5686_v40  ;;  %v4952_v20 = vmul.f32 -1.442695, %v7030_v15 }
 0x682   :  { %3460 = vmatpush.msrb.mxu2 %v5687_v28  ;;  %3489 = vmatpush.msrb.mxu3 %v5688_v55  ;;  %5279 = vpow2.f32 %v4950_v36 }
 0x683   :  { %3831 = vmatpush.msrb.mxu0 %v5689_v16  ;;  %3860 = vmatpush.msrb.mxu1 %v5690_v0  ;;  %5281 = vpow2.f32 %v4952_v20 }
 0x684   :  { %3461 = vmatpush.msrb.mxu2 %v5691_v53  ;;  %3490 = vmatpush.msrb.mxu3 %v5692_v18 }
 0x685   :  { %3832 = vmatpush.msrb.mxu0 %v5693_v48  ;;  %3861 = vmatpush.msrb.mxu1 %v5694_v3 }
 0x686   :  { %3462 = vmatpush.msrb.mxu2 %v5695_v19  ;;  %3491 = vmatpush.msrb.mxu3 %v5696_v6 }
 0x688   :  { %3463 = vmatpush.msrb.mxu2 %v5697_v2  ;;  %3492 = vmatpush.msrb.mxu3 %v5698_v52  ;;  %v5280_v40 = vpop.eup %5279 }
 0x689   :  { %v1832_v28 = vadd.f32 1.0, %v5280_v40  ;;  %v5282_v55 = vpop.eup %5281 }
 0x68a   :  { %3464 = vmatpush.msrb.mxu2 %v5699_v61  ;;  %3493 = vmatpush.msrb.mxu3 %v5700_v63  ;;  %v1834_v16 = vadd.f32 1.0, %v5282_v55 }
 0x68b   :  { %5283 = vrcp.f32 %v1832_v28  ;;  %v1921_v52 = vand.u32 2147483648, %v1832_v28  ;;  %vm1915_vm11 = vweird.f32 %v1832_v28  ;;  %v1919_v61 = vand.u32 2147483647, %v1832_v28 }
 0x68c   :  { %3465 = vmatpush.msrb.mxu2 %v5701_v43  ;;  %3494 = vmatpush.msrb.mxu3 %v5702_v57  ;;  %5285 = vrcp.f32 %v1834_v16  ;;  %vm1945_vm3 = vweird.f32 %v1834_v16 }
 0x68d   :  { %v1922_v57 = vor.u32 1.1754944e-38, %v1921_v52  ;;  %vm1920_vm12 = vcmp.eq.f32.partialorder %v1919_v61, 8.507059e+37 }
 0x68e   :  { %3466 = vmatpush.msrb.mxu2 %v5703_v10  ;;  %3495 = vmatpush.msrb.mxu3 %v5704_v58 }
 0x690   :  { %3467 = vmatpush.msrb.mxu2 %v5705_v60  ;;  %3496 = vmatpush.msrb.mxu3 %v5706_v38  ;;  %v7470_v60 = vld [vmem:[%s8896_s0 + $0xd0] sm:$0xff] }
 0x691   :  { %v5284_v0 = vpop.eup %5283  ;;  %vm1715_vm13 = vcmp.gt.f32.partialorder %v7470_v60, 2.0 }
 0x692   :  { %3468 = vmatpush.msrb.mxu2 %v5707_v27  ;;  %3497 = vmatpush.msrb.mxu3 %v5708_v1  ;;  %v1911_v53 = vmul.f32 %v5284_v0, %v1832_v28  ;;  %v5286_v48 = vpop.eup %5285  ;;  %vm1916_vm5 = vweird.f32 %v5284_v0  ;;  %v1951_v1 = vand.u32 2147483648, %v1834_v16 }
 0x693   :  { %v1941_v19 = vmul.f32 %v5286_v48, %v1834_v16  ;;  %vm1917_vm6 = vmor %vm1915_vm11, %vm1916_vm5  ;;  %vm1946_vm14 = vweird.f32 %v5286_v48 }
 0x694   :  { %3469 = vmatpush.msrb.mxu2 %v5709_v24  ;;  %3498 = vmatpush.msrb.mxu3 %v5710_v34  ;;  %v1912_v18 = vsub.f32 1.0, %v1911_v53  ;;  %vm1947_vm4 = vmor %vm1945_vm3, %vm1946_vm14  ;;  %v1952_v36 = vor.u32 1.1754944e-38, %v1951_v1  ;;  %v332_v53 = vpop.f32.mrf.mxu1 }
 0x695   :  { %v1942_v21 = vsub.f32 1.0, %v1941_v19 }
 0x696   :  { %3470 = vmatpush.msrb.mxu2 %v5711_v50  ;;  %3499 = vmatpush.msrb.mxu3 %v5712_v14  ;;  %v1913_v3 = vmul.f32 %v5284_v0, %v1912_v18  ;;  %v1949_v50 = vand.u32 2147483647, %v1834_v16 }
 0x697   :  { %v1943_v43 = vmul.f32 %v5286_v48, %v1942_v21 }
 0x698   :  { %v1914_v2 = vadd.f32 %v5284_v0, %v1913_v3  ;;  %vm1950_vm9 = vcmp.eq.f32.partialorder %v1949_v50, 8.507059e+37 }
 0x699   :  { %v1944_v38 = vadd.f32 %v5286_v48, %v1943_v43 }
 0x69a   :  { %v1918_v63 = vsel %vm1917_vm6, %v5284_v0, %v1914_v2 }
 0x69b   :  { %v1923_v10 = vsel %vm1920_vm12, %v1922_v57, %v1918_v63  ;;  %v1948_v14 = vsel %vm1947_vm4, %v5286_v48, %v1944_v38  ;;  %v7520_v63 = vpop.f32.mrf.mxu0 }
 0x69c   :  { %v1953_v20 = vsel %vm1950_vm9, %v1952_v36, %v1948_v14  ;;  %v335_v18 = vpop.f32.mrf.mxu1 }
 0x6a3   :  { %v7524_v57 = vpop.f32.mrf.mxu0 }
 0x6a4   :  { %v7499_v48 = vpop.f32.mrf.mxu1 }
 0x6ab   :  { %v7529_v38 = vpop.f32.mrf.mxu0 }
 0x6ac   :  { %v7501_v3 = vpop.f32.mrf.mxu1 }
 0x6b3   :  { %v7537_v14 = vpop.f32.mrf.mxu0 }
 0x6b4   :  { %v2052_v27 = vpop.permute.xlu2 %2051 }
 0x6c4   :  { %v2050_v6 = vpop.permute.xlu0 %2049 }
 0x6c5   :  { %v2060_v15 = vsel %vm117_vm0, %v7307_v26, %v2050_v6 }
 0x6c6   :  { %2082 = vmatmul.f32.gmra.mxu2 %v2060_v15  ;;  %2111 = vmatmul.f32.gmra.mxu3 %v2060_v15 }
 0x6cb   :  { %v2032_v58 = vpop.permute.xlu1 %2031 }
 0x6cc   :  { %v2041_v26 = vmul.f32 %v2032_v58, %v1923_v10 }
 0x6ce   :  { %v2061_v24 = vsel %vm117_vm0, %v2041_v26, %v2052_v27  ;;  %v7477_v34 = vsel %vm1715_vm13, %v2041_v26, %v6923_v5  ;;  %v7486_v5 = vld [vmem:[%s8896_s0 + $0xd8] sm:$0xff] }
 0x6cf   :  { %2085 = vmatmul.f32.gmra.mxu2 %v2061_v24  ;;  %2114 = vmatmul.f32.gmra.mxu3 %v2061_v24  ;;  %vm1716_vm5 = vcmp.gt.f32.partialorder %v7486_v5, 2.0 }
 0x6d0   :  { %4963 = vmatmul.msk.f32.gmra.mxu0 %vm117_vm0, %v7477_v34  ;;  %4967 = vmatmul.msk.f32.gmra.mxu1 %vm117_vm0, %v7477_v34 }
 0x6d3   :  { %v2034_v40 = vpop.permute.xlu0 %2033  ;;  %v2054_v55 = vpop.permute.xlu1 %2053 }
 0x6d4   :  { %v2042_v28 = vmul.f32 %v2034_v40, %v1953_v20 }
 0x6d6   :  { %v2062_v16 = vsel %vm117_vm0, %v2042_v28, %v2054_v55  ;;  %v7493_v0 = vsel %vm1716_vm5, %v2042_v28, %v6946_v22  ;;  %v7507_v22 = vpop.f32.mrf.mxu1 }
 0x6d7   :  { %2088 = vmatmul.f32.gmra.mxu2 %v2062_v16  ;;  %2117 = vmatmul.f32.gmra.mxu3 %v2062_v16  ;;  %v7544_v16 = vpop.f32.mrf.mxu0 }
 0x6d8   :  { %4964 = vmatmul.msk.f32.gmra.mxu0 %vm117_vm0, %v7493_v0  ;;  %4968 = vmatmul.msk.f32.gmra.mxu1 %vm117_vm0, %v7493_v0 }
 0x6de   :  { %v7510_v21 = vpop.f32.mrf.mxu1 }
 0x6e6   :  { %v7514_v15 = vpop.f32.mrf.mxu1 }
 0x6ee   :  { %v7516_v52 = vpop.f32.mrf.mxu1 }
 0x6ef   :  { %8979 = vst [vmem:[#allocation12_spill] sm:$0xff] %v7516_v52 }
 0x6f6   :  { %v7518_v61 = vpop.f32.mrf.mxu1 }
 0x6f7   :  { %8980 = vst [vmem:[#allocation7_spill] sm:$0xff] %v7518_v61 }
 0x6f9   :  { %v2109_v19 = vpop.f32.mrf.mxu3  ;;  %v2080_v58 = vpop.f32.mrf.mxu2 }
 0x6fa   :  { %v7504_v6 = vadd.f32 %v2109_v19, %v6427_v13  ;;  %v2081_v26 = vadd.f32 %v2080_v58, %v6449_v59 }
 0x6fc   :  { %5287 = vtanh.f32 %v7504_v6  ;;  %v4953_v27 = vmul.f32 -1.442695, %v2081_v26 }
 0x6fe   :  { %v7522_v43 = vpop.f32.mrf.mxu1  ;;  %5289 = vpow2.f32 %v4953_v27 }
 0x6ff   :  { %8981 = vst [vmem:[#allocation13_spill] sm:$0xff] %v7522_v43 }
 0x702   :  { %v5288_v2 = vpop.eup %5287 }
 0x703   :  { %2301 = vrot.lane.b32.xlu0 %v5288_v2, %s5786_s17 }
 0x704   :  { %v5290_v50 = vpop.eup %5289 }
 0x705   :  { %v2145_v55 = vadd.f32 1.0, %v5290_v50 }
 0x706   :  { %v7526_v10 = vpop.f32.mrf.mxu1 }
 0x707   :  { %8982 = vst [vmem:[#allocation15_spill] sm:$0xff] %v7526_v10  ;;  %vm2158_vm11 = vweird.f32 %v2145_v55  ;;  %v2162_v8 = vand.u32 2147483647, %v2145_v55 }
 0x709   :  { %vm2163_vm6 = vcmp.eq.f32.partialorder %v2162_v8, 8.507059e+37 }
 0x70b   :  { %1701 = vrot.lane.b32.xlu0 %v7102_v45, %s5786_s17 }
 0x70e   :  { %v7531_v45 = vpop.f32.mrf.mxu1 }
 0x70f   :  { %8983 = vst [vmem:[#allocation14_spill] sm:$0xff] %v7531_v45 }
 0x716   :  { %v2471_v36 = vpop.f32.mrf.mxu1 }
 0x717   :  { %v2484_v45 = vadd.f32 %v2471_v36, %v332_v53 }
 0x71e   :  { %v2474_v19 = vpop.f32.mrf.mxu1 }
 0x71f   :  { %v2486_v26 = vadd.f32 %v2474_v19, %v335_v18  ;;  %v7563_v18 = vpop.f32.mrf.mxu0 }
 0x720   :  { %8984 = vst [vmem:[#allocation16_spill] sm:$0xff] %v7563_v18 }
 0x721   :  { %v7553_v50 = vadd.f32 %v2486_v26, %v8961_v25  ;;  %v2164_v26 = vand.u32 2147483648, %v2145_v55 }
 0x749   :  { %v2112_v1 = vpop.f32.mrf.mxu3 }
 0x74a   :  { %v7534_v24 = vadd.f32 %v2112_v1, %v6427_v13 }
 0x74c   :  { %5291 = vtanh.f32 %v7534_v24 }
 0x752   :  { %v5292_v20 = vpop.eup %5291  ;;  %v2115_v40 = vpop.f32.mrf.mxu3 }
 0x753   :  { %v7540_v28 = vadd.f32 %v2115_v40, %v6427_v13  ;;  %2303 = vrot.lane.b32.xlu2 %v5292_v20, %s5786_s17  ;;  %v1698_v20 = vpop.permute.xlu2 %1697 }
 0x755   :  { %5293 = vtanh.f32 %v7540_v28 }
 0x756   :  { %5295 = vrcp.f32 %v2145_v55 }
 0x75a   :  { %v2118_v58 = vpop.f32.mrf.mxu3 }
 0x75b   :  { %1703 = vrot.lane.b32.xlu2 %v7111_v54, %s5786_s17  ;;  %v5294_v2 = vpop.eup %5293  ;;  %v7550_v1 = vadd.f32 %v2118_v58, %v6427_v13  ;;  %v7561_v54 = vsel %vm1017_vm1, %v1698_v20, %v6988_v37  ;;  %v7569_v58 = vadd.f32 %v2484_v45, %v8961_v25  ;;  %v7581_v45 = vpop.f32.mrf.mxu0 }
 0x75c   :  { %2305 = vrot.lane.b32.xlu1 %v5294_v2, %s5786_s17  ;;  %v5296_v27 = vpop.eup %5295  ;;  %v1700_v2 = vpop.permute.xlu1 %1699  ;;  %8985 = vst [vmem:[#allocation8_spill] sm:$0xff] %v7581_v45 }
 0x75d   :  { %v2154_v40 = vmul.f32 %v5296_v27, %v2145_v55  ;;  %5297 = vtanh.f32 %v7550_v1  ;;  %v7574_v53 = vsel %vm1018_vm2, %v1700_v2, %v7000_v47  ;;  %vm2159_vm1 = vweird.f32 %v5296_v27 }
 0x75e   :  { %5299 = vtanh.f32 %v7553_v50  ;;  %vm2160_vm2 = vmor %vm2158_vm11, %vm2159_vm1 }
 0x75f   :  { %v2155_v19 = vsub.f32 1.0, %v2154_v40  ;;  %5301 = vtanh.f32 %v7569_v58  ;;  %v2165_v40 = vor.u32 1.1754944e-38, %v2164_v26 }
 0x761   :  { %v2156_v32 = vmul.f32 %v5296_v27, %v2155_v19 }
 0x763   :  { %2369 = vrot.lane.b32.xlu2 %v7141_v7, %s5786_s17  ;;  %v5298_v7 = vpop.eup %5297  ;;  %v2157_v36 = vadd.f32 %v5296_v27, %v2156_v32  ;;  %v7588_v32 = vpop.f32.mrf.mxu0 }
 0x764   :  { %2281 = vrot.lane.b32.xlu1 %v7561_v54, %s5786_s17  ;;  %2307 = vrot.lane.b32.xlu0 %v5298_v7, %s5786_s17  ;;  %v5300_v37 = vpop.eup %5299  ;;  %8986 = vst [vmem:[#allocation5_spill] sm:$0xff] %v7588_v32 }
 0x765   :  { %v5302_v47 = vpop.eup %5301  ;;  %v2161_v20 = vsel %vm2160_vm2, %v5296_v27, %v2157_v36 }
 0x766   :  { %v7584_v19 = vsel %vm2163_vm6, %v2165_v40, %v2161_v20 }
 0x76b   :  { %2283 = vrot.lane.b32.xlu2 %v7574_v53, %s5786_s17  ;;  %v7600_v8 = vpop.f32.mrf.mxu0 }
 0x76c   :  { %2681 = vrot.lane.b32.xlu1 %v5300_v37, %s5786_s17  ;;  %2679 = vrot.lane.b32.xlu0 %v5302_v47, %s5786_s17  ;;  %v2083_v37 = vpop.f32.mrf.mxu2  ;;  %8987 = vst [vmem:[#allocation18_spill] sm:$0xff] %v7600_v8  ;;  %v2477_v8 = vpop.f32.mrf.mxu1 }
 0x76d   :  { %v2084_v55 = vadd.f32 %v2083_v37, %v6449_v59 }
 0x76f   :  { %v4955_v36 = vmul.f32 -1.442695, %v2084_v55 }
 0x771   :  { %5303 = vpow2.f32 %v4955_v36 }
 0x774   :  { %2371 = vrot.lane.b32.xlu0 %v7150_v49, %s5786_s17  ;;  %v7604_v49 = vpop.f32.mrf.mxu0 }
 0x775   :  { %v2302_v2 = vpop.permute.xlu0 %2301  ;;  %8988 = vst [vmem:[#allocation6_spill] sm:$0xff] %v7604_v49  ;;  %v2488_v49 = vadd.f32 %v2477_v8, %v7499_v48 }
 0x776   :  { %v2313_v7 = vmul.f32 %v2302_v2, %v7584_v19 }
 0x777   :  { %v5304_v47 = vpop.eup %5303 }
 0x778   :  { %2321 = vrot.lane.b32.xlu1 %v2313_v7, %s5786_s17  ;;  %v2147_v20 = vadd.f32 1.0, %v5304_v47 }
 0x77a   :  { %5305 = vrcp.f32 %v2147_v20  ;;  %v2194_v10 = vand.u32 2147483648, %v2147_v20  ;;  %vm2188_vm12 = vweird.f32 %v2147_v20  ;;  %v2192_v47 = vand.u32 2147483647, %v2147_v20 }
 0x77c   :  { %v7606_v2 = vpop.f32.mrf.mxu0  ;;  %v2195_v32 = vor.u32 1.1754944e-38, %v2194_v10  ;;  %vm2193_vm3 = vcmp.eq.f32.partialorder %v2192_v47, 8.507059e+37 }
 0x77d   :  { %v1702_v27 = vpop.permute.xlu0 %1701  ;;  %8989 = vst [vmem:[#allocation9_spill] sm:$0xff] %v7606_v2 }
 0x77e   :  { %v7596_v26 = vsel %vm1019_vm7, %v1702_v27, %v7021_v31  ;;  %v2086_v31 = vpop.f32.mrf.mxu2 }
 0x77f   :  { %2285 = vrot.lane.b32.xlu0 %v7596_v26, %s5786_s17  ;;  %v2087_v7 = vadd.f32 %v2086_v31, %v6449_v59 }
 0x780   :  { %2373 = vrot.lane.b32.xlu1 %v7224_v35, %s5786_s17  ;;  %v5306_v40 = vpop.eup %5305 }
 0x781   :  { %v2184_v33 = vmul.f32 %v5306_v40, %v2147_v20  ;;  %v4957_v55 = vmul.f32 -1.442695, %v2087_v7  ;;  %vm2189_vm7 = vweird.f32 %v5306_v40  ;;  %v7614_v7 = vadd.f32 %v2488_v49, %v8961_v25 }
 0x782   :  { %vm2190_vm14 = vmor %vm2188_vm12, %vm2189_vm7 }
 0x783   :  { %v2185_v37 = vsub.f32 1.0, %v2184_v33  ;;  %5307 = vpow2.f32 %v4957_v55 }
 0x784   :  { %v7609_v35 = vpop.f32.mrf.mxu0  ;;  %5309 = vtanh.f32 %v7614_v7 }
 0x785   :  { %8990 = vst [vmem:[#allocation10_spill] sm:$0xff] %v7609_v35  ;;  %v2186_v27 = vmul.f32 %v5306_v40, %v2185_v37 }
 0x786   :  { %v2089_v61 = vpop.f32.mrf.mxu2 }
 0x787   :  { %v2187_v36 = vadd.f32 %v5306_v40, %v2186_v27  ;;  %v2090_v33 = vadd.f32 %v2089_v61, %v6449_v59 }
 0x789   :  { %v2191_v2 = vsel %vm2190_vm14, %v5306_v40, %v2187_v36  ;;  %v5308_v31 = vpop.eup %5307  ;;  %v4959_v8 = vmul.f32 -1.442695, %v2090_v33 }
 0x78a   :  { %v7616_v55 = vsel %vm2193_vm3, %v2195_v32, %v2191_v2  ;;  %v2149_v20 = vadd.f32 1.0, %v5308_v31  ;;  %v5310_v40 = vpop.eup %5309 }
 0x78c   :  { %v2442_v43 = vpop.f32.mrf.mxu0  ;;  %5311 = vrcp.f32 %v2149_v20  ;;  %vm2218_vm4 = vweird.f32 %v2149_v20 }
 0x78d   :  { %v2483_v48 = vadd.f32 %v2442_v43, %v7520_v63  ;;  %5313 = vpow2.f32 %v4959_v8 }
 0x78f   :  { %v2491_v61 = vadd.f32 %v2483_v48, %v8966_v39 }
 0x791   :  { %v4969_v63 = vmul.f32 -1.442695, %v2491_v61 }
 0x792   :  { %v5312_v2 = vpop.eup %5311 }
 0x793   :  { %v5314_v36 = vpop.eup %5313  ;;  %5315 = vpow2.f32 %v4969_v63  ;;  %v2214_v31 = vmul.f32 %v5312_v2, %v2149_v20  ;;  %v2222_v63 = vand.u32 2147483647, %v2149_v20 }
 0x794   :  { %v2445_v10 = vpop.f32.mrf.mxu0  ;;  %v2151_v33 = vadd.f32 1.0, %v5314_v36 }
 0x795   :  { %v2485_v43 = vadd.f32 %v2445_v10, %v7524_v57  ;;  %v2215_v4 = vsub.f32 1.0, %v2214_v31  ;;  %v2480_v10 = vpop.f32.mrf.mxu1  ;;  %vm2223_vm1 = vcmp.eq.f32.partialorder %v2222_v63, 8.507059e+37 }
 0x796   :  { %5317 = vrcp.f32 %v2151_v33  ;;  %v2490_v36 = vadd.f32 %v2480_v10, %v7501_v3  ;;  %vm2248_vm2 = vweird.f32 %v2151_v33  ;;  %v2252_v63 = vand.u32 2147483647, %v2151_v33 }
 0x797   :  { %v2493_v47 = vadd.f32 %v2485_v43, %v8966_v39  ;;  %v2216_v48 = vmul.f32 %v5312_v2, %v2215_v4 }
 0x798   :  { %vm2253_vm7 = vcmp.eq.f32.partialorder %v2252_v63, 8.507059e+37 }
 0x7ad   :  { %v2304_v37 = vpop.permute.xlu2 %2303 }
 0x7ae   :  { %v2314_v27 = vmul.f32 %v2304_v37, %v7616_v55  ;;  %v4971_v37 = vmul.f32 -1.442695, %v2493_v47 }
 0x7b0   :  { %2323 = vrot.lane.b32.xlu2 %v2314_v27, %s5786_s17  ;;  %5319 = vpow2.f32 %v4971_v37 }
 0x7b5   :  { %v1704_v49 = vpop.permute.xlu2 %1703 }
 0x7b6   :  { %v7626_v32 = vsel %vm1020_vm8, %v1704_v49, %v7049_v11  ;;  %v5316_v11 = vpop.eup %5315  ;;  %v2217_v49 = vadd.f32 %v5312_v2, %v2216_v48  ;;  %vm2219_vm8 = vweird.f32 %v5312_v2 }
 0x7b7   :  { %2287 = vrot.lane.b32.xlu1 %v7626_v32, %s5786_s17  ;;  %v7635_v57 = vadd.f32 1.0, %v5316_v11  ;;  %v5318_v8 = vpop.eup %5317  ;;  %vm2220_vm9 = vmor %vm2218_vm4, %vm2219_vm8  ;;  %v7649_v11 = vadd.f32 %v2490_v36, %v8961_v25  ;;  %v2448_v36 = vpop.f32.mrf.mxu0 }
 0x7b8   :  { %2683 = vrot.lane.b32.xlu2 %v5310_v40, %s5786_s17  ;;  %v5320_v40 = vpop.eup %5319  ;;  %v2244_v43 = vmul.f32 %v5318_v8, %v2151_v33  ;;  %v2221_v47 = vsel %vm2220_vm9, %v5312_v2, %v2217_v49  ;;  %vm2249_vm11 = vweird.f32 %v5318_v8 }
 0x7b9   :  { %5321 = vrcp.f32 %v7635_v57  ;;  %v7646_v31 = vadd.f32 1.0, %v5320_v40  ;;  %vm2250_vm6 = vmor %vm2248_vm2, %vm2249_vm11  ;;  %v2542_v18 = vand.u32 2147483648, %v7635_v57  ;;  %vm2536_vm14 = vweird.f32 %v7635_v57 }
 0x7ba   :  { %v2245_v37 = vsub.f32 1.0, %v2244_v43 }
 0x7bb   :  { %5323 = vrcp.f32 %v7646_v31  ;;  %v2543_v63 = vor.u32 1.1754944e-38, %v2542_v18  ;;  %vm2566_vm9 = vweird.f32 %v7646_v31 }
 0x7bc   :  { %v2246_v3 = vmul.f32 %v5318_v8, %v2245_v37  ;;  %5325 = vtanh.f32 %v7649_v11 }
 0x7bd   :  { %v2370_v27 = vpop.permute.xlu2 %2369 }
 0x7be   :  { %v7640_v61 = vsel %vm1713_vm15, %v2370_v27, %v7063_v29  ;;  %v2247_v2 = vadd.f32 %v5318_v8, %v2246_v3 }
 0x7bf   :  { %v5322_v4 = vpop.eup %5321 }
 0x7c0   :  { %2375 = vrot.lane.b32.xlu2 %v7253_v12, %s5786_s17  ;;  %v2224_v12 = vand.u32 2147483648, %v2149_v20  ;;  %v2532_v20 = vmul.f32 %v5322_v4, %v7635_v57  ;;  %vm2537_vm12 = vweird.f32 %v5322_v4 }
 0x7c1   :  { %v5324_v49 = vpop.eup %5323  ;;  %vm2538_vm3 = vmor %vm2536_vm14, %vm2537_vm12 }
 0x7c2   :  { %v2225_v29 = vor.u32 1.1754944e-38, %v2224_v12  ;;  %v2533_v10 = vsub.f32 1.0, %v2532_v20  ;;  %v2254_v12 = vand.u32 2147483648, %v2151_v33  ;;  %v5326_v43 = vpop.eup %5325  ;;  %vm2567_vm4 = vweird.f32 %v5324_v49 }
 0x7c4   :  { %v7651_v27 = vsel %vm2223_vm1, %v2225_v29, %v2221_v47  ;;  %v2251_v47 = vsel %vm2250_vm6, %v5318_v8, %v2247_v2  ;;  %v2534_v29 = vmul.f32 %v5322_v4, %v2533_v10  ;;  %v2255_v37 = vor.u32 1.1754944e-38, %v2254_v12  ;;  %vm2568_vm1 = vmor %vm2566_vm9, %vm2567_vm4 }
 0x7c5   :  { %v2540_v8 = vand.u32 2147483647, %v7635_v57  ;;  %v2570_v57 = vand.u32 2147483647, %v7646_v31 }
 0x7c6   :  { %v7661_v3 = vsel %vm2253_vm7, %v2255_v37, %v2251_v47  ;;  %v2535_v33 = vadd.f32 %v5322_v4, %v2534_v29  ;;  %v2572_v29 = vand.u32 2147483648, %v7646_v31 }
 0x7c7   :  { %vm2541_vm8 = vcmp.eq.f32.partialorder %v2540_v8, 8.507059e+37  ;;  %vm2571_vm11 = vcmp.eq.f32.partialorder %v2570_v57, 8.507059e+37 }
 0x7c8   :  { %2659 = vrot.lane.b32.xlu2 %v7640_v61, %s5786_s17  ;;  %v2539_v12 = vsel %vm2538_vm3, %v5322_v4, %v2535_v33  ;;  %v2573_v37 = vor.u32 1.1754944e-38, %v2572_v29 }
 0x7c9   :  { %v7669_v47 = vsel %vm2541_vm8, %v2543_v63, %v2539_v12  ;;  %v2284_v12 = vpop.permute.xlu2 %2283 }
 0x7ce   :  { %v2306_v48 = vpop.permute.xlu1 %2305 }
 0x7cf   :  { %v2315_v35 = vmul.f32 %v2306_v48, %v7651_v27  ;;  %v2487_v48 = vadd.f32 %v2448_v36, %v7529_v38 }
 0x7d1   :  { %2325 = vrot.lane.b32.xlu0 %v2315_v35, %s5786_s17  ;;  %v2562_v35 = vmul.f32 %v5324_v49, %v7646_v31  ;;  %v2495_v2 = vadd.f32 %v2487_v48, %v8966_v39 }
 0x7d3   :  { %v2563_v52 = vsub.f32 1.0, %v2562_v35 }
 0x7d5   :  { %v2564_v10 = vmul.f32 %v5324_v49, %v2563_v52 }
 0x7d6   :  { %v2282_v40 = vpop.permute.xlu1 %2281  ;;  %v2308_v20 = vpop.permute.xlu0 %2307 }
 0x7d7   :  { %v2316_v45 = vmul.f32 %v2308_v20, %v7661_v3  ;;  %v2565_v35 = vadd.f32 %v5324_v49, %v2564_v10  ;;  %v2293_v52 = vmul.f32 %v2282_v40, %v7584_v19 }
 0x7d9   :  { %2685 = vrot.lane.b32.xlu0 %v5326_v43, %s5786_s17  ;;  %2327 = vrot.lane.b32.xlu1 %v2316_v45, %s5786_s17  ;;  %v4973_v43 = vmul.f32 -1.442695, %v2495_v2  ;;  %v2569_v18 = vsel %vm2568_vm1, %v5324_v49, %v2565_v35 }
 0x7da   :  { %v7679_v20 = vsel %vm2571_vm11, %v2573_v37, %v2569_v18 }
 0x7db   :  { %5327 = vpow2.f32 %v4973_v43 }
 0x7de   :  { %v2682_v38 = vpop.permute.xlu1 %2681  ;;  %v2680_v36 = vpop.permute.xlu0 %2679 }
 0x7df   :  { %v2691_v45 = vmul.f32 %v2680_v36, %v7669_v47  ;;  %v2692_v8 = vmul.f32 %v2682_v38, %v7679_v20  ;;  %v2294_v36 = vmul.f32 %v2284_v12, %v7616_v55 }
 0x7e1   :  { %2699 = vrot.lane.b32.xlu0 %v2691_v45, %s5786_s17  ;;  %v5328_v19 = vpop.eup %5327 }
 0x7e2   :  { %v2527_v49 = vadd.f32 1.0, %v5328_v19 }
 0x7e4   :  { %v2602_v57 = vand.u32 2147483648, %v2527_v49  ;;  %vm2596_vm6 = vweird.f32 %v2527_v49 }
 0x7e6   :  { %v2372_v33 = vpop.permute.xlu0 %2371  ;;  %v2603_v18 = vor.u32 1.1754944e-38, %v2602_v57 }
 0x7e7   :  { %v7686_v31 = vsel %vm1714_vm10, %v2372_v33, %v7068_v44 }
 0x7e8   :  { %2661 = vrot.lane.b32.xlu1 %v7686_v31, %s5786_s17 }
 0x7e9   :  { %2701 = vrot.lane.b32.xlu0 %v2692_v8, %s5786_s17  ;;  %v2451_v8 = vpop.f32.mrf.mxu0 }
 0x7ea   :  { %v2322_v4 = vpop.permute.xlu1 %2321  ;;  %v2489_v19 = vadd.f32 %v2451_v8, %v7537_v14 }
 0x7eb   :  { %v7677_v48 = vadd.f32 %v2322_v4, %v2293_v52 }
 0x7ed   :  { %5329 = vtanh.f32 %v7677_v48 }
 0x7ee   :  { %5331 = vrcp.f32 %v2527_v49 }
 0x7f1   :  { %v2286_v57 = vpop.permute.xlu0 %2285 }
 0x7f2   :  { %v2374_v40 = vpop.permute.xlu1 %2373 }
 0x7f3   :  { %v5330_v2 = vpop.eup %5329  ;;  %v7695_v38 = vsel %vm1715_vm13, %v2374_v40, %v7089_v30  ;;  %v2600_v30 = vand.u32 2147483647, %v2527_v49 }
 0x7f4   :  { %2345 = vrot.lane.b32.xlu2 %v5330_v2, %s5786_s17  ;;  %2663 = vrot.lane.b32.xlu1 %v7695_v38, %s5786_s17  ;;  %v5332_v44 = vpop.eup %5331 }
 0x7f5   :  { %v2592_v10 = vmul.f32 %v5332_v44, %v2527_v49  ;;  %vm2597_vm2 = vweird.f32 %v5332_v44  ;;  %vm2601_vm12 = vcmp.eq.f32.partialorder %v2600_v30, 8.507059e+37  ;;  %v2497_v49 = vadd.f32 %v2489_v19, %v8966_v39 }
 0x7f6   :  { %vm2598_vm7 = vmor %vm2596_vm6, %vm2597_vm2 }
 0x7f7   :  { %v2593_v63 = vsub.f32 1.0, %v2592_v10  ;;  %v4954_v10 = vmul.f32 -1.442695, %v7504_v6 }
 0x7f9   :  { %v2594_v43 = vmul.f32 %v5332_v44, %v2593_v63 }
 0x7fb   :  { %v2595_v29 = vadd.f32 %v5332_v44, %v2594_v43 }
 0x7fd   :  { %v2599_v52 = vsel %vm2598_vm7, %v5332_v44, %v2595_v29  ;;  %v4975_v44 = vmul.f32 -1.442695, %v2497_v49 }
 0x7fe   :  { %v7703_v37 = vsel %vm2601_vm12, %v2603_v18, %v2599_v52  ;;  %v4956_v52 = vmul.f32 -1.442695, %v7534_v24 }
 0x80a   :  { %v2324_v35 = vpop.permute.xlu2 %2323 }
 0x80b   :  { %v7700_v45 = vadd.f32 %v2324_v35, %v2294_v36 }
 0x80d   :  { %5333 = vtanh.f32 %v7700_v45 }
 0x80e   :  { %5335 = vpow2.f32 %v4975_v44 }
 0x80f   :  { %5337 = vpow2.f32 %v4954_v10 }
 0x812   :  { %v2684_v4 = vpop.permute.xlu2 %2683 }
 0x813   :  { %v5334_v33 = vpop.eup %5333  ;;  %v2693_v55 = vmul.f32 %v2684_v4, %v7703_v37 }
 0x814   :  { %2347 = vrot.lane.b32.xlu2 %v5334_v33, %s5786_s17  ;;  %v5336_v12 = vpop.eup %5335  ;;  %v2295_v33 = vmul.f32 %v2286_v57, %v7651_v27 }
 0x815   :  { %2703 = vrot.lane.b32.xlu0 %v2693_v55, %s5786_s17  ;;  %v2529_v63 = vadd.f32 1.0, %v5336_v12  ;;  %v5338_v43 = vpop.eup %5337 }
 0x816   :  { %v2146_v14 = vadd.f32 1.0, %v5338_v43 }
 0x817   :  { %5339 = vrcp.f32 %v2529_v63  ;;  %v2632_v19 = vand.u32 2147483648, %v2529_v63  ;;  %vm2626_vm3 = vweird.f32 %v2529_v63  ;;  %v2630_v44 = vand.u32 2147483647, %v2529_v63 }
 0x818   :  { %5341 = vrcp.f32 %v2146_v14  ;;  %vm2173_vm1 = vweird.f32 %v2146_v14 }
 0x819   :  { %5343 = vpow2.f32 %v4956_v52  ;;  %v2633_v12 = vor.u32 1.1754944e-38, %v2632_v19  ;;  %vm2631_vm9 = vcmp.eq.f32.partialorder %v2630_v44, 8.507059e+37 }
 0x81a   :  { %v2376_v40 = vpop.permute.xlu2 %2375 }
 0x81b   :  { %v7713_v2 = vsel %vm1716_vm5, %v2376_v40, %v7119_v41 }
 0x81c   :  { %2665 = vrot.lane.b32.xlu1 %v7713_v2, %s5786_s17 }
 0x81d   :  { %v5340_v36 = vpop.eup %5339 }
 0x81e   :  { %v2622_v35 = vmul.f32 %v5340_v36, %v2529_v63  ;;  %v5342_v29 = vpop.eup %5341  ;;  %vm2627_vm14 = vweird.f32 %v5340_v36 }
 0x81f   :  { %v2169_v30 = vmul.f32 %v5342_v29, %v2146_v14  ;;  %vm2628_vm8 = vmor %vm2626_vm3, %vm2627_vm14  ;;  %vm2174_vm4 = vweird.f32 %v5342_v29  ;;  %v5344_v27 = vpop.eup %5343 }
 0x820   :  { %v2623_v41 = vsub.f32 1.0, %v2622_v35  ;;  %v2179_v35 = vand.u32 2147483648, %v2146_v14  ;;  %vm2175_vm11 = vmor %vm2173_vm1, %vm2174_vm4 }
 0x821   :  { %v2170_v4 = vsub.f32 1.0, %v2169_v30  ;;  %v2177_v30 = vand.u32 2147483647, %v2146_v14 }
 0x822   :  { %v2624_v18 = vmul.f32 %v5340_v36, %v2623_v41  ;;  %v2660_v49 = vpop.permute.xlu2 %2659 }
 0x823   :  { %v2171_v40 = vmul.f32 %v5342_v29, %v2170_v4  ;;  %v2148_v4 = vadd.f32 1.0, %v5344_v27  ;;  %vm2178_vm2 = vcmp.eq.f32.partialorder %v2177_v30, 8.507059e+37 }
 0x824   :  { %v2625_v8 = vadd.f32 %v5340_v36, %v2624_v18 }
 0x825   :  { %v2172_v43 = vadd.f32 %v5342_v29, %v2171_v40  ;;  %vm2203_vm7 = vweird.f32 %v2148_v4 }
 0x826   :  { %v2629_v10 = vsel %vm2628_vm8, %v5340_v36, %v2625_v8  ;;  %v2180_v36 = vor.u32 1.1754944e-38, %v2179_v35 }
 0x827   :  { %v7723_v41 = vsel %vm2631_vm9, %v2633_v12, %v2629_v10  ;;  %v2176_v63 = vsel %vm2175_vm11, %v5342_v29, %v2172_v43  ;;  %v2671_v10 = vmul.f32 %v2660_v49, %v7669_v47  ;;  %v2209_v49 = vand.u32 2147483648, %v2148_v4 }
 0x828   :  { %v2181_v8 = vsel %vm2178_vm2, %v2180_v36, %v2176_v63  ;;  %v2207_v63 = vand.u32 2147483647, %v2148_v4 }
 0x829   :  { %v2288_v24 = vpop.permute.xlu1 %2287 }
 0x82a   :  { %vm2208_vm14 = vcmp.eq.f32.partialorder %v2207_v63, 8.507059e+37 }
 0x843   :  { %v2326_v6 = vpop.permute.xlu0 %2325 }
 0x844   :  { %v7720_v55 = vadd.f32 %v2326_v6, %v2295_v33  ;;  %v2296_v6 = vmul.f32 %v2288_v24, %v7661_v3 }
 0x846   :  { %5345 = vtanh.f32 %v7720_v55 }
 0x847   :  { %5347 = vrcp.f32 %v2148_v4 }
 0x84b   :  { %v2686_v57 = vpop.permute.xlu0 %2685  ;;  %v2328_v19 = vpop.permute.xlu1 %2327 }
 0x84c   :  { %v5346_v52 = vpop.eup %5345  ;;  %v2694_v18 = vmul.f32 %v2686_v57, %v7723_v41  ;;  %v7729_v14 = vadd.f32 %v2328_v19, %v2296_v6  ;;  %v2210_v6 = vor.u32 1.1754944e-38, %v2209_v49 }
 0x84d   :  { %2349 = vrot.lane.b32.xlu2 %v5346_v52, %s5786_s17  ;;  %v5348_v29 = vpop.eup %5347 }
 0x84e   :  { %v2346_v33 = vpop.permute.xlu2 %2345  ;;  %2705 = vrot.lane.b32.xlu0 %v2694_v18, %s5786_s17  ;;  %5349 = vtanh.f32 %v7729_v14  ;;  %v2199_v43 = vmul.f32 %v5348_v29, %v2148_v4  ;;  %vm2204_vm6 = vweird.f32 %v5348_v29  ;;  %v4958_v4 = vmul.f32 -1.442695, %v7540_v28 }
 0x84f   :  { %v2357_v40 = vmul.f32 %v2346_v33, %v2181_v8  ;;  %vm2205_vm12 = vmor %vm2203_vm7, %vm2204_vm6 }
 0x850   :  { %v2200_v27 = vsub.f32 1.0, %v2199_v43 }
 0x851   :  { %v7735_v44 = vsel %vm1713_vm15, %v2357_v40, %v7159_v46 }
 0x852   :  { %v2201_v52 = vmul.f32 %v5348_v29, %v2200_v27 }
 0x853   :  { %v2700_v3 = vpop.permute.xlu0 %2699 }
 0x854   :  { %v5350_v24 = vpop.eup %5349  ;;  %v7740_v12 = vadd.f32 %v2700_v3, %v2671_v10  ;;  %v2202_v47 = vadd.f32 %v5348_v29, %v2201_v52 }
 0x855   :  { %2351 = vrot.lane.b32.xlu1 %v5350_v24, %s5786_s17 }
 0x856   :  { %2743 = vrot.lane.b32.xlu0 %v7735_v44, %s5786_s17  ;;  %5351 = vtanh.f32 %v7740_v12  ;;  %v2206_v36 = vsel %vm2205_vm12, %v5348_v29, %v2202_v47 }
 0x85a   :  { %v2662_v35 = vpop.permute.xlu1 %2661 }
 0x85b   :  { %v2672_v46 = vmul.f32 %v2662_v35, %v7679_v20  ;;  %v2702_v57 = vpop.permute.xlu0 %2701  ;;  %v2211_v20 = vsel %vm2208_vm14, %v2210_v6, %v2206_v36 }
 0x85c   :  { %v5352_v30 = vpop.eup %5351 }
 0x85d   :  { %v7745_v18 = vadd.f32 %v2702_v57, %v2672_v46  ;;  %2723 = vrot.lane.b32.xlu2 %v5352_v30, %s5786_s17 }
 0x85f   :  { %5353 = vtanh.f32 %v7745_v18 }
 0x860   :  { %5355 = vpow2.f32 %v4958_v4 }
 0x865   :  { %v5354_v33 = vpop.eup %5353 }
 0x866   :  { %2725 = vrot.lane.b32.xlu1 %v5354_v33, %s5786_s17  ;;  %v2664_v29 = vpop.permute.xlu1 %2663  ;;  %v5356_v10 = vpop.eup %5355 }
 0x867   :  { %v2673_v3 = vmul.f32 %v2664_v29, %v7703_v37  ;;  %v2150_v43 = vadd.f32 1.0, %v5356_v10  ;;  %v4960_v37 = vmul.f32 -1.442695, %v7550_v1 }
 0x869   :  { %v2239_v63 = vand.u32 2147483648, %v2150_v43  ;;  %vm2233_vm8 = vweird.f32 %v2150_v43  ;;  %v2237_v36 = vand.u32 2147483647, %v2150_v43 }
 0x86b   :  { %v2240_v33 = vor.u32 1.1754944e-38, %v2239_v63  ;;  %vm2238_vm9 = vcmp.eq.f32.partialorder %v2237_v36, 8.507059e+37 }
 0x86e   :  { %v2348_v8 = vpop.permute.xlu2 %2347 }
 0x86f   :  { %v2358_v19 = vmul.f32 %v2348_v8, %v2211_v20 }
 0x871   :  { %v7753_v40 = vsel %vm1714_vm10, %v2358_v19, %v7230_v51  ;;  %v4970_v51 = vmul.f32 -1.442695, %v7569_v58 }
 0x872   :  { %2745 = vrot.lane.b32.xlu2 %v7753_v40, %s5786_s17 }
 0x887   :  { %v2704_v24 = vpop.permute.xlu0 %2703 }
 0x888   :  { %v7759_v27 = vadd.f32 %v2704_v24, %v2673_v3  ;;  %v4972_v24 = vmul.f32 -1.442695, %v7553_v50  ;;  %v7778_v50 = vld [vmem:[%s8896_s0 + $0xc0] sm:$0xff] }
 0x889   :  { %vm2409_vm7 = vcmp.gt.f32.partialorder %v7778_v50, 3.0 }
 0x88a   :  { %5357 = vtanh.f32 %v7759_v27 }
 0x88b   :  { %5359 = vrcp.f32 %v2150_v43 }
 0x88c   :  { %5361 = vpow2.f32 %v4970_v51 }
 0x890   :  { %v5358_v35 = vpop.eup %5357 }
 0x891   :  { %2727 = vrot.lane.b32.xlu0 %v5358_v35, %s5786_s17  ;;  %v5360_v46 = vpop.eup %5359 }
 0x892   :  { %v2229_v28 = vmul.f32 %v5360_v46, %v2150_v43  ;;  %v5362_v30 = vpop.eup %5361  ;;  %vm2234_vm3 = vweird.f32 %v5360_v46 }
 0x893   :  { %v2524_v47 = vadd.f32 1.0, %v5362_v30  ;;  %vm2235_vm4 = vmor %vm2233_vm8, %vm2234_vm3 }
 0x894   :  { %v2230_v57 = vsub.f32 1.0, %v2229_v28 }
 0x895   :  { %5363 = vrcp.f32 %v2524_v47  ;;  %vm2551_vm11 = vweird.f32 %v2524_v47 }
 0x896   :  { %v2231_v52 = vmul.f32 %v5360_v46, %v2230_v57  ;;  %5365 = vpow2.f32 %v4960_v37  ;;  %v2666_v37 = vpop.permute.xlu1 %2665 }
 0x898   :  { %v2232_v49 = vadd.f32 %v5360_v46, %v2231_v52 }
 0x89a   :  { %v2236_v58 = vsel %vm2235_vm4, %v5360_v46, %v2232_v49  ;;  %v2557_v46 = vand.u32 2147483648, %v2524_v47 }
 0x89b   :  { %v5364_v6 = vpop.eup %5363  ;;  %v2241_v20 = vsel %vm2238_vm9, %v2240_v33, %v2236_v58  ;;  %v2674_v58 = vmul.f32 %v2666_v37, %v7723_v41 }
 0x89c   :  { %v5366_v4 = vpop.eup %5365  ;;  %v2547_v29 = vmul.f32 %v5364_v6, %v2524_v47  ;;  %vm2552_vm1 = vweird.f32 %v5364_v6  ;;  %v2558_v52 = vor.u32 1.1754944e-38, %v2557_v46 }
 0x89d   :  { %v2152_v10 = vadd.f32 1.0, %v5366_v4  ;;  %vm2553_vm2 = vmor %vm2551_vm11, %vm2552_vm1 }
 0x89e   :  { %v2548_v3 = vsub.f32 1.0, %v2547_v29 }
 0x89f   :  { %5367 = vrcp.f32 %v2152_v10  ;;  %vm2263_vm14 = vweird.f32 %v2152_v10 }
 0x8a0   :  { %v2549_v43 = vmul.f32 %v5364_v6, %v2548_v3  ;;  %5369 = vpow2.f32 %v4972_v24 }
 0x8a2   :  { %v2550_v35 = vadd.f32 %v5364_v6, %v2549_v43 }
 0x8a4   :  { %v2554_v28 = vsel %vm2553_vm2, %v5364_v6, %v2550_v35 }
 0x8a5   :  { %v5368_v51 = vpop.eup %5367 }
 0x8a6   :  { %v2259_v57 = vmul.f32 %v5368_v51, %v2152_v10  ;;  %v5370_v30 = vpop.eup %5369  ;;  %vm2264_vm12 = vweird.f32 %v5368_v51 }
 0x8a7   :  { %v2350_v8 = vpop.permute.xlu2 %2349  ;;  %v7781_v63 = vadd.f32 1.0, %v5370_v30  ;;  %vm2265_vm3 = vmor %vm2263_vm14, %vm2264_vm12 }
 0x8a8   :  { %v2359_v19 = vmul.f32 %v2350_v8, %v2241_v20 }
 0x8a9   :  { %5371 = vrcp.f32 %v7781_v63  ;;  %vm2581_vm9 = vweird.f32 %v7781_v63 }
 0x8aa   :  { %v7768_v1 = vsel %vm1715_vm13, %v2359_v19, %v7260_v9  ;;  %v2555_v9 = vand.u32 2147483647, %v2524_v47  ;;  %v2260_v47 = vsub.f32 1.0, %v2259_v57  ;;  %v2269_v19 = vand.u32 2147483648, %v2152_v10  ;;  %v5718_v57 = vld [vmem:[%s8898_s2 + $0x1e0] sm:$0xff] }
 0x8ab   :  { %2747 = vrot.lane.b32.xlu1 %v7768_v1, %s5786_s17 }
 0x8ac   :  { %vm2556_vm6 = vcmp.eq.f32.partialorder %v2555_v9, 8.507059e+37  ;;  %v2261_v8 = vmul.f32 %v5368_v51, %v2260_v47  ;;  %v2270_v35 = vor.u32 1.1754944e-38, %v2269_v19  ;;  %v5716_v9 = vld [vmem:[%s8898_s2 + $0x1f0] sm:$0xff]  ;;  %v5722_v47 = vld [vmem:[%s8898_s2 + $0x1c0] sm:$0xff] }
 0x8ad   :  { %v5726_v19 = vld [vmem:[%s8898_s2 + $0x1a0] sm:$0xff] }
 0x8ae   :  { %v2262_v41 = vadd.f32 %v5368_v51, %v2261_v8  ;;  %v5725_v8 = vld [vmem:[%s8898_s2 + $0x1b8] sm:$0xff] }
 0x8af   :  { %v7797_v4 = vpop.eup %5371 }
 0x8b0   :  { %v2266_v43 = vsel %vm2265_vm3, %v5368_v51, %v2262_v41  ;;  %v2577_v46 = vmul.f32 %v7797_v4, %v7781_v63  ;;  %v4974_v41 = vmul.f32 -1.442695, %v7614_v7  ;;  %vm2582_vm4 = vweird.f32 %v7797_v4 }
 0x8b1   :  { %v2587_v7 = vand.u32 2147483648, %v7781_v63  ;;  %vm2583_vm1 = vmor %vm2581_vm9, %vm2582_vm4 }
 0x8b2   :  { %v2578_v37 = vsub.f32 1.0, %v2577_v46  ;;  %v5731_v46 = vld [vmem:[%s8898_s2 + $0x188] sm:$0xff] }
 0x8b3   :  { %2393 = vrot.lane.b32.xlu1 %v7677_v48, %s5786_s17  ;;  %v2559_v48 = vsel %vm2556_vm6, %v2558_v52, %v2554_v28  ;;  %v5719_v52 = vld [vmem:[%s8898_s2 + $0x1e8] sm:$0xff] }
 0x8b7   :  { %v2724_v49 = vpop.permute.xlu2 %2723 }
 0x8b8   :  { %v2735_v36 = vmul.f32 %v2724_v49, %v2559_v48  ;;  %v5720_v48 = vld [vmem:[%s8898_s2 + $0x1d0] sm:$0xff] }
 0x8ba   :  { %v7787_v33 = vsel %vm2409_vm7, %v2735_v36, %v7294_v42  ;;  %v2267_v42 = vand.u32 2147483647, %v2152_v10  ;;  %v5717_v10 = vld [vmem:[%s8898_s2 + $0x1f8] sm:$0xff] }
 0x8bb   :  { %4985 = vmatmul.msk.f32.vlgmr.msra.gmra.mxu0 %vm117_vm0, %v7787_v33  ;;  %4989 = vmatmul.msk.f32.vlgmr.msra.gmra.mxu1 %vm117_vm0, %v7787_v33 }
 0x8bc   :  { %vm2268_vm8 = vcmp.eq.f32.partialorder %v2267_v42, 8.507059e+37  ;;  %v5727_v42 = vld [vmem:[%s8898_s2 + $0x1a8] sm:$0xff] }
 0x8bd   :  { %v2271_v51 = vsel %vm2268_vm8, %v2270_v35, %v2266_v43  ;;  %v2585_v43 = vand.u32 2147483647, %v7781_v63  ;;  %v5730_v35 = vld [vmem:[%s8898_s2 + $0x180] sm:$0xff]  ;;  %v5733_v63 = vld [vmem:[%s8898_s2 + $0x178] sm:$0xff] }
 0x8bf   :  { %vm2586_vm11 = vcmp.eq.f32.partialorder %v2585_v43, 8.507059e+37 }
 0x8c0   :  { %v2706_v6 = vpop.permute.xlu0 %2705 }
 0x8c1   :  { %v7793_v20 = vadd.f32 %v2706_v6, %v2674_v58  ;;  %v5723_v58 = vld [vmem:[%s8898_s2 + $0x1c8] sm:$0xff]  ;;  %v5724_v6 = vld [vmem:[%s8898_s2 + $0x1b0] sm:$0xff] }
 0x8c3   :  { %5373 = vtanh.f32 %v7793_v20 }
 0x8c4   :  { %5375 = vpow2.f32 %v4974_v41  ;;  %v5740_v41 = vld [vmem:[%s8898_s2 + $0x148] sm:$0xff] }
 0x8c7   :  { %v2352_v28 = vpop.permute.xlu1 %2351 }
 0x8c8   :  { %v2744_v29 = vpop.permute.xlu0 %2743  ;;  %v2360_v30 = vmul.f32 %v2352_v28, %v2271_v51  ;;  %v5734_v51 = vld [vmem:[%s8898_s2 + $0x160] sm:$0xff] }
 0x8c9   :  { %v5374_v3 = vpop.eup %5373  ;;  %v2755_v24 = vsel %vm117_vm0, %v2735_v36, %v2744_v29  ;;  %v5721_v36 = vld [vmem:[%s8898_s2 + $0x1d8] sm:$0xff] }
 0x8ca   :  { %2775 = vmatmul.f32.vlgmr.msra.gmra.mxu2 %v2755_v24  ;;  %2804 = vmatmul.f32.vlgmr.msra.gmra.mxu3 %v2755_v24  ;;  %v7821_v49 = vsel %vm1716_vm5, %v2360_v30, %v7269_v17  ;;  %v2579_v17 = vmul.f32 %v7797_v4, %v2578_v37  ;;  %v5729_v24 = vld [vmem:[%s8898_s2 + $0x198] sm:$0xff]  ;;  %v5736_v30 = vld [vmem:[%s8898_s2 + $0x168] sm:$0xff] }
 0x8cb   :  { %2729 = vrot.lane.b32.xlu2 %v5374_v3, %s5786_s17  ;;  %4151 = vmatpush.msra.mxu2 %v5716_v9  ;;  %v5728_v3 = vld [vmem:[%s8898_s2 + $0x190] sm:$0xff] }
 0x8cc   :  { %4180 = vmatpush.msra.mxu3 %v5717_v10  ;;  %2749 = vrot.lane.b32.xlu0 %v7821_v49, %s5786_s17  ;;  %v2580_v29 = vadd.f32 %v7797_v4, %v2579_v17  ;;  %v2588_v10 = vor.u32 1.1754944e-38, %v2587_v7  ;;  %v5746_v7 = vld [vmem:[%s8898_s2 + $0x118] sm:$0xff] }
 0x8cd   :  { %4152 = vmatpush.msra.mxu2 %v5718_v57 }
 0x8ce   :  { %4181 = vmatpush.msra.mxu3 %v5719_v52  ;;  %v2584_v9 = vsel %vm2583_vm1, %v7797_v4, %v2580_v29  ;;  %v7880_v4 = vld [vmem:[%s8896_s0 + $0xc8] sm:$0xff]  ;;  %v5376_v52 = vpop.eup %5375 }
 0x8cf   :  { %4153 = vmatpush.msra.mxu2 %v5720_v48  ;;  %v2589_v28 = vsel %vm2586_vm11, %v2588_v10, %v2584_v9  ;;  %vm2410_vm2 = vcmp.gt.f32.partialorder %v7880_v4, 3.0  ;;  %v5737_v48 = vld [vmem:[%s8898_s2 + $0x150] sm:$0xff]  ;;  %v5744_v29 = vld [vmem:[%s8898_s2 + $0x128] sm:$0xff]  ;;  %v4976_v10 = vmul.f32 -1.442695, %v7649_v11 }
 0x8d0   :  { %4182 = vmatpush.msra.mxu3 %v5721_v36  ;;  %v2746_v36 = vpop.permute.xlu2 %2745  ;;  %v8995_v4 = vld [vmem:[#allocation13_spill] sm:$0xff] }
 0x8d1   :  { %4154 = vmatpush.msra.mxu2 %v5722_v47  ;;  %v5738_v47 = vld [vmem:[%s8898_s2 + $0x158] sm:$0xff] }
 0x8d2   :  { %4183 = vmatpush.msra.mxu3 %v5723_v58 }
 0x8d3   :  { %4155 = vmatpush.msra.mxu2 %v5724_v6  ;;  %v5739_v6 = vld [vmem:[%s8898_s2 + $0x140] sm:$0xff] }
 0x8d4   :  { %4184 = vmatpush.msra.mxu3 %v5725_v8  ;;  %2395 = vrot.lane.b32.xlu0 %v7700_v45, %s5786_s17  ;;  %v5732_v45 = vld [vmem:[%s8898_s2 + $0x170] sm:$0xff]  ;;  %v2528_v8 = vadd.f32 1.0, %v5376_v52 }
 0x8d5   :  { %4156 = vmatpush.msra.mxu2 %v5726_v19  ;;  %v5742_v19 = vld [vmem:[%s8898_s2 + $0x138] sm:$0xff] }
 0x8d6   :  { %4185 = vmatpush.msra.mxu3 %v5727_v42  ;;  %5377 = vrcp.f32 %v2528_v8  ;;  %v5743_v42 = vld [vmem:[%s8898_s2 + $0x120] sm:$0xff]  ;;  %vm2611_vm12 = vweird.f32 %v2528_v8 }
 0x8d7   :  { %4157 = vmatpush.msra.mxu2 %v5728_v3  ;;  %v5745_v3 = vld [vmem:[%s8898_s2 + $0x110] sm:$0xff]  ;;  %5379 = vpow2.f32 %v4976_v10 }
 0x8d8   :  { %4186 = vmatpush.msra.mxu3 %v5729_v24  ;;  %v2726_v57 = vpop.permute.xlu1 %2725  ;;  %v5747_v24 = vld [vmem:[%s8898_s2 + $0x100] sm:$0xff] }
 0x8d9   :  { %4158 = vmatpush.msra.mxu2 %v5730_v35  ;;  %v2736_v37 = vmul.f32 %v2726_v57, %v2589_v28  ;;  %v5748_v35 = vld [vmem:[%s8898_s2 + $0x108] sm:$0xff]  ;;  %v2615_v28 = vand.u32 2147483647, %v2528_v8 }
 0x8da   :  { %4187 = vmatpush.msra.mxu3 %v5731_v46 }
 0x8db   :  { %4159 = vmatpush.msra.mxu2 %v5732_v45  ;;  %v2756_v58 = vsel %vm117_vm0, %v2736_v37, %v2746_v36  ;;  %v7896_v17 = vsel %vm2410_vm2, %v2736_v37, %v7337_v62  ;;  %v5741_v62 = vld [vmem:[%s8898_s2 + $0x130] sm:$0xff]  ;;  %vm2616_vm3 = vcmp.eq.f32.partialorder %v2615_v28, 8.507059e+37 }
 0x8dc   :  { %4188 = vmatpush.msra.mxu3 %v5733_v63  ;;  %2778 = vmatmul.f32.gmra.mxu2 %v2756_v58  ;;  %v5378_v43 = vpop.eup %5377  ;;  %v7936_v36 = vld [vmem:[%s8896_s0 + $0xd0] sm:$0xff] }
 0x8dd   :  { %4160 = vmatpush.msra.mxu2 %v5734_v51  ;;  %2807 = vmatmul.f32.gmra.mxu3 %v2756_v58  ;;  %v2607_v46 = vmul.f32 %v5378_v43, %v2528_v8  ;;  %vm2612_vm6 = vweird.f32 %v5378_v43  ;;  %v2617_v51 = vand.u32 2147483648, %v2528_v8  ;;  %v5380_v52 = vpop.eup %5379  ;;  %vm2411_vm8 = vcmp.gt.f32.partialorder %v7936_v36, 3.0 }
 0x8de   :  { %4189 = vmatpush.msra.mxu3 %v5736_v30  ;;  %4986 = vmatmul.msk.f32.gmra.mxu0 %vm117_vm0, %v7896_v17  ;;  %vm2613_vm14 = vmor %vm2611_vm12, %vm2612_vm6 }
 0x8df   :  { %4161 = vmatpush.msra.mxu2 %v5737_v48  ;;  %4990 = vmatmul.msk.f32.gmra.mxu1 %vm117_vm0, %v7896_v17  ;;  %v2608_v9 = vsub.f32 1.0, %v2607_v46  ;;  %v2618_v30 = vor.u32 1.1754944e-38, %v2617_v51  ;;  %v7952_v46 = vld [vmem:[%s8896_s0 + $0xd8] sm:$0xff] }
 0x8e0   :  { %4190 = vmatpush.msra.mxu3 %v5738_v47  ;;  %v2530_v47 = vadd.f32 1.0, %v5380_v52  ;;  %vm2412_vm6 = vcmp.gt.f32.partialorder %v7952_v46, 3.0  ;;  %v9000_v46 = vld [vmem:[#allocation6_spill] sm:$0xff] }
 0x8e1   :  { %4162 = vmatpush.msra.mxu2 %v5739_v6  ;;  %v2609_v45 = vmul.f32 %v5378_v43, %v2608_v9 }
 0x8e2   :  { %4191 = vmatpush.msra.mxu3 %v5740_v41  ;;  %5381 = vrcp.f32 %v2530_v47  ;;  %vm2641_vm9 = vweird.f32 %v2530_v47 }
 0x8e3   :  { %4163 = vmatpush.msra.mxu2 %v5741_v62  ;;  %v2610_v63 = vadd.f32 %v5378_v43, %v2609_v45 }
 0x8e4   :  { %4192 = vmatpush.msra.mxu3 %v5742_v19 }
 0x8e5   :  { %4164 = vmatpush.msra.mxu2 %v5743_v42  ;;  %v2614_v57 = vsel %vm2613_vm14, %v5378_v43, %v2610_v63 }
 0x8e6   :  { %4193 = vmatpush.msra.mxu3 %v5744_v29  ;;  %v2619_v37 = vsel %vm2616_vm3, %v2618_v30, %v2614_v57 }
 0x8e7   :  { %4165 = vmatpush.msra.mxu2 %v5745_v3  ;;  %v2645_v3 = vand.u32 2147483647, %v2530_v47 }
 0x8e8   :  { %4194 = vmatpush.msra.mxu3 %v5746_v7  ;;  %v5382_v6 = vpop.eup %5381 }
 0x8e9   :  { %4166 = vmatpush.msra.mxu2 %v5747_v24  ;;  %v2637_v8 = vmul.f32 %v5382_v6, %v2530_v47  ;;  %vm2642_vm4 = vweird.f32 %v5382_v6  ;;  %vm2646_vm11 = vcmp.eq.f32.partialorder %v2645_v3, 8.507059e+37 }
 0x8ea   :  { %4195 = vmatpush.msra.mxu3 %v5748_v35  ;;  %vm2643_vm1 = vmor %vm2641_vm9, %vm2642_vm4 }
 0x8eb   :  { %v2638_v41 = vsub.f32 1.0, %v2637_v8 }
 0x8ed   :  { %v2639_v62 = vmul.f32 %v5382_v6, %v2638_v41 }
 0x8ef   :  { %v2640_v29 = vadd.f32 %v5382_v6, %v2639_v62 }
 0x8f1   :  { %v2644_v7 = vsel %vm2643_vm1, %v5382_v6, %v2640_v29 }
 0x903   :  { %v2728_v48 = vpop.permute.xlu0 %2727 }
 0x904   :  { %v2737_v11 = vmul.f32 %v2728_v48, %v2619_v37 }
 0x906   :  { %v7942_v58 = vsel %vm2411_vm8, %v2737_v11, %v7477_v34  ;;  %v2647_v34 = vand.u32 2147483648, %v2530_v47 }
 0x907   :  { %4987 = vmatmul.msk.f32.gmra.mxu0 %vm117_vm0, %v7942_v58  ;;  %4991 = vmatmul.msk.f32.gmra.mxu1 %vm117_vm0, %v7942_v58 }
 0x908   :  { %v2648_v24 = vor.u32 1.1754944e-38, %v2647_v34 }
 0x90a   :  { %v2649_v43 = vsel %vm2646_vm11, %v2648_v24, %v2644_v7 }
 0x91d   :  { %v2748_v19 = vpop.permute.xlu1 %2747 }
 0x91e   :  { %v2757_v42 = vsel %vm117_vm0, %v2737_v11, %v2748_v19 }
 0x91f   :  { %2781 = vmatmul.f32.gmra.mxu2 %v2757_v42  ;;  %2810 = vmatmul.f32.gmra.mxu3 %v2757_v42 }
 0x925   :  { %v2730_v35 = vpop.permute.xlu2 %2729  ;;  %v2394_v34 = vpop.permute.xlu1 %2393 }
 0x926   :  { %v2738_v9 = vmul.f32 %v2730_v35, %v2649_v43  ;;  %v8002_v43 = vsel %vm1713_vm15, %v2394_v34, %v7561_v54 }
 0x928   :  { %v7958_v45 = vsel %vm2412_vm6, %v2738_v9, %v7493_v0 }
 0x929   :  { %4988 = vmatmul.msk.f32.gmra.mxu0 %vm117_vm0, %v7958_v45  ;;  %4992 = vmatmul.msk.f32.gmra.mxu1 %vm117_vm0, %v7958_v45 }
 0x93e   :  { %v2750_v10 = vpop.permute.xlu0 %2749 }
 0x93f   :  { %v2758_v63 = vsel %vm117_vm0, %v2738_v9, %v2750_v10 }
 0x940   :  { %2784 = vmatmul.f32.gmra.mxu2 %v2758_v63  ;;  %2813 = vmatmul.f32.gmra.mxu3 %v2758_v63 }
 0x946   :  { %v2396_v37 = vpop.permute.xlu0 %2395 }
 0x94d   :  { %v2805_v51 = vpop.f32.mrf.mxu3  ;;  %v2776_v48 = vpop.f32.mrf.mxu2 }
 0x94e   :  { %v7966_v28 = vadd.f32 %v2805_v51, %v6427_v13  ;;  %v2777_v11 = vadd.f32 %v2776_v48, %v6449_v59 }
 0x950   :  { %5383 = vtanh.f32 %v7966_v28  ;;  %v4977_v47 = vmul.f32 -1.442695, %v2777_v11 }
 0x956   :  { %v5384_v57 = vpop.eup %5383 }
 0x957   :  { %2997 = vrot.lane.b32.xlu2 %v5384_v57, %s5786_s17 }
 0x95f   :  { %2397 = vrot.lane.b32.xlu2 %v7720_v55, %s5786_s17  ;;  %v7984_v55 = vsel %vm1714_vm10, %v2396_v37, %v7574_v53  ;;  %v2779_v42 = vpop.f32.mrf.mxu2 }
 0x960   :  { %v2808_v0 = vpop.f32.mrf.mxu3  ;;  %v2780_v7 = vadd.f32 %v2779_v42, %v6449_v59 }
 0x961   :  { %v7973_v30 = vadd.f32 %v2808_v0, %v6427_v13 }
 0x963   :  { %5385 = vtanh.f32 %v7973_v30 }
 0x964   :  { %5387 = vpow2.f32 %v4977_v47 }
 0x969   :  { %v5386_v52 = vpop.eup %5385 }
 0x96a   :  { %2999 = vrot.lane.b32.xlu1 %v5386_v52, %s5786_s17  ;;  %v5388_v6 = vpop.eup %5387 }
 0x96b   :  { %v2841_v8 = vadd.f32 1.0, %v5388_v6 }
 0x96d   :  { %5389 = vrcp.f32 %v2841_v8  ;;  %v2860_v63 = vand.u32 2147483648, %v2841_v8  ;;  %vm2854_vm12 = vweird.f32 %v2841_v8  ;;  %v2858_v51 = vand.u32 2147483647, %v2841_v8 }
 0x96f   :  { %v2861_v57 = vor.u32 1.1754944e-38, %v2860_v63  ;;  %vm2859_vm15 = vcmp.eq.f32.partialorder %v2858_v51, 8.507059e+37 }
 0x972   :  { %2399 = vrot.lane.b32.xlu1 %v7729_v14, %s5786_s17  ;;  %v3167_v14 = vpop.f32.mrf.mxu1 }
 0x973   :  { %v5390_v23 = vpop.eup %5389  ;;  %v3180_v6 = vadd.f32 %v3167_v14, %v7507_v22 }
 0x974   :  { %v2850_v29 = vmul.f32 %v5390_v23, %v2841_v8  ;;  %vm2855_vm10 = vweird.f32 %v5390_v23 }
 0x975   :  { %vm2856_vm14 = vmor %vm2854_vm12, %vm2855_vm10 }
 0x976   :  { %v2851_v24 = vsub.f32 1.0, %v2850_v29 }
 0x978   :  { %v2852_v35 = vmul.f32 %v5390_v23, %v2851_v24 }
 0x97a   :  { %3065 = vrot.lane.b32.xlu1 %v7740_v12, %s5786_s17  ;;  %v3170_v53 = vpop.f32.mrf.mxu1  ;;  %v2853_v9 = vadd.f32 %v5390_v23, %v2852_v35 }
 0x97b   :  { %v3182_v19 = vadd.f32 %v3170_v53, %v7510_v21  ;;  %v4979_v21 = vmul.f32 -1.442695, %v2780_v7 }
 0x97c   :  { %v2857_v56 = vsel %vm2856_vm14, %v5390_v23, %v2853_v9 }
 0x97d   :  { %v7996_v3 = vadd.f32 %v3182_v19, %v8961_v25  ;;  %v8008_v52 = vsel %vm2859_vm15, %v2861_v57, %v2857_v56 }
 0x982   :  { %2979 = vrot.lane.b32.xlu1 %v7984_v55, %s5786_s17 }
 0x984   :  { %v3173_v22 = vpop.f32.mrf.mxu1 }
 0x985   :  { %v3184_v34 = vadd.f32 %v3173_v22, %v7514_v15 }
 0x9a2   :  { %v2811_v41 = vpop.f32.mrf.mxu3  ;;  %v2782_v51 = vpop.f32.mrf.mxu2 }
 0x9a3   :  { %v7990_v12 = vadd.f32 %v2811_v41, %v6427_v13  ;;  %v8020_v41 = vadd.f32 %v3180_v6, %v8961_v25  ;;  %v2783_v57 = vadd.f32 %v2782_v51, %v6449_v59 }
 0x9a5   :  { %5391 = vtanh.f32 %v7990_v12  ;;  %v4981_v60 = vmul.f32 -1.442695, %v2783_v57 }
 0x9a6   :  { %5393 = vtanh.f32 %v7996_v3 }
 0x9a7   :  { %5395 = vpow2.f32 %v4979_v21  ;;  %v8027_v21 = vadd.f32 %v3184_v34, %v8961_v25 }
 0x9ab   :  { %v5392_v62 = vpop.eup %5391 }
 0x9ac   :  { %3001 = vrot.lane.b32.xlu0 %v5392_v62, %s5786_s17  ;;  %v5394_v10 = vpop.eup %5393 }
 0x9ad   :  { %v5396_v54 = vpop.eup %5395 }
 0x9ae   :  { %v2843_v37 = vadd.f32 1.0, %v5396_v54 }
 0x9b0   :  { %5397 = vrcp.f32 %v2843_v37  ;;  %v2890_v29 = vand.u32 2147483648, %v2843_v37  ;;  %vm2884_vm4 = vweird.f32 %v2843_v37 }
 0x9b1   :  { %v2998_v0 = vpop.permute.xlu2 %2997 }
 0x9b2   :  { %v3009_v48 = vmul.f32 %v2998_v0, %v8008_v52  ;;  %v2891_v24 = vor.u32 1.1754944e-38, %v2890_v29 }
 0x9b4   :  { %2977 = vrot.lane.b32.xlu0 %v8002_v43, %s5786_s17 }
 0x9b6   :  { %v5398_v8 = vpop.eup %5397 }
 0x9b7   :  { %v2880_v23 = vmul.f32 %v5398_v8, %v2843_v37  ;;  %vm2885_vm3 = vweird.f32 %v5398_v8 }
 0x9b8   :  { %vm2886_vm9 = vmor %vm2884_vm4, %vm2885_vm3 }
 0x9b9   :  { %v2881_v62 = vsub.f32 1.0, %v2880_v23  ;;  %v2398_v15 = vpop.permute.xlu2 %2397 }
 0x9ba   :  { %v8039_v63 = vsel %vm1715_vm13, %v2398_v15, %v7596_v26 }
 0x9bb   :  { %v2882_v19 = vmul.f32 %v5398_v8, %v2881_v62  ;;  %v8991_v62 = vld [vmem:[#allocation16_spill] sm:$0xff] }
 0x9bc   :  { %3377 = vrot.lane.b32.xlu0 %v5394_v10, %s5786_s17 }
 0x9bd   :  { %v2883_v14 = vadd.f32 %v5398_v8, %v2882_v19 }
 0x9bf   :  { %v2887_v7 = vsel %vm2886_vm9, %v5398_v8, %v2883_v14 }
 0x9c3   :  { %v2814_v11 = vpop.f32.mrf.mxu3  ;;  %v2785_v26 = vpop.f32.mrf.mxu2 }
 0x9c4   :  { %3017 = vrot.lane.b32.xlu0 %v3009_v48, %s5786_s17  ;;  %v8013_v47 = vadd.f32 %v2814_v11, %v6427_v13  ;;  %v2786_v5 = vadd.f32 %v2785_v26, %v6449_v59 }
 0x9c6   :  { %5399 = vtanh.f32 %v8013_v47  ;;  %v4983_v8 = vmul.f32 -1.442695, %v2786_v5 }
 0x9c7   :  { %5401 = vtanh.f32 %v8020_v41 }
 0x9c8   :  { %5403 = vtanh.f32 %v8027_v21 }
 0x9c9   :  { %5405 = vpow2.f32 %v4981_v60  ;;  %v8992_v60 = vld [vmem:[#allocation12_spill] sm:$0xff] }
 0x9cc   :  { %3069 = vrot.lane.b32.xlu0 %v7759_v27, %s5786_s17  ;;  %v5400_v53 = vpop.eup %5399  ;;  %v2888_v27 = vand.u32 2147483647, %v2843_v37 }
 0x9cd   :  { %3003 = vrot.lane.b32.xlu2 %v5400_v53, %s5786_s17  ;;  %v5402_v42 = vpop.eup %5401 }
 0x9ce   :  { %vm2889_vm1 = vcmp.eq.f32.partialorder %v2888_v27, 8.507059e+37  ;;  %v5404_v54 = vpop.eup %5403 }
 0x9cf   :  { %v8029_v9 = vsel %vm2889_vm1, %v2891_v24, %v2887_v7  ;;  %v5406_v37 = vpop.eup %5405 }
 0x9d0   :  { %v2845_v11 = vadd.f32 1.0, %v5406_v37 }
 0x9d2   :  { %5407 = vrcp.f32 %v2845_v11  ;;  %v2920_v51 = vand.u32 2147483648, %v2845_v11 }
 0x9d3   :  { %5409 = vpow2.f32 %v4983_v8 }
 0x9d4   :  { %v2921_v5 = vor.u32 1.1754944e-38, %v2920_v51  ;;  %v8993_v51 = vld [vmem:[#allocation8_spill] sm:$0xff] }
 0x9d5   :  { %3375 = vrot.lane.b32.xlu2 %v5402_v42, %s5786_s17 }
 0x9d8   :  { %v5408_v42 = vpop.eup %5407 }
 0x9d9   :  { %v5410_v22 = vpop.eup %5409  ;;  %v2910_v14 = vmul.f32 %v5408_v42, %v2845_v11  ;;  %vm2915_vm13 = vweird.f32 %v5408_v42 }
 0x9da   :  { %v2847_v29 = vadd.f32 1.0, %v5410_v22 }
 0x9db   :  { %v2911_v34 = vsub.f32 1.0, %v2910_v14 }
 0x9dc   :  { %v3000_v35 = vpop.permute.xlu1 %2999  ;;  %v2950_v14 = vand.u32 2147483648, %v2847_v29  ;;  %vm2944_vm14 = vweird.f32 %v2847_v29 }
 0x9dd   :  { %3067 = vrot.lane.b32.xlu2 %v7745_v18, %s5786_s17  ;;  %v3010_v10 = vmul.f32 %v3000_v35, %v8029_v9  ;;  %v2912_v7 = vmul.f32 %v5408_v42, %v2911_v34  ;;  %v2948_v34 = vand.u32 2147483647, %v2847_v29 }
 0x9df   :  { %3019 = vrot.lane.b32.xlu1 %v3010_v10, %s5786_s17  ;;  %v3176_v10 = vpop.f32.mrf.mxu1  ;;  %v2913_v15 = vadd.f32 %v5408_v42, %v2912_v7  ;;  %vm2949_vm3 = vcmp.eq.f32.partialorder %v2948_v34, 8.507059e+37 }
 0x9e0   :  { %v3186_v26 = vadd.f32 %v3176_v10, %v8992_v60 }
 0x9e2   :  { %v8073_v8 = vadd.f32 %v3186_v26, %v8961_v25 }
 0x9e4   :  { %v2400_v56 = vpop.permute.xlu1 %2399 }
 0x9e5   :  { %2981 = vrot.lane.b32.xlu2 %v8039_v63, %s5786_s17  ;;  %v8046_v18 = vsel %vm1716_vm5, %v2400_v56, %v7626_v32  ;;  %v3138_v32 = vpop.f32.mrf.mxu0  ;;  %vm2914_vm5 = vweird.f32 %v2845_v11 }
 0x9e6   :  { %2983 = vrot.lane.b32.xlu0 %v8046_v18, %s5786_s17  ;;  %v3179_v6 = vadd.f32 %v3138_v32, %v7544_v16  ;;  %vm2916_vm11 = vmor %vm2914_vm5, %vm2915_vm13 }
 0x9e7   :  { %3379 = vrot.lane.b32.xlu1 %v5404_v54, %s5786_s17  ;;  %v2918_v54 = vand.u32 2147483647, %v2845_v11 }
 0x9e9   :  { %vm2919_vm10 = vcmp.eq.f32.partialorder %v2918_v54, 8.507059e+37  ;;  %v2951_v54 = vor.u32 1.1754944e-38, %v2950_v14 }
 0x9ec   :  { %v3066_v0 = vpop.permute.xlu1 %3065 }
 0x9ed   :  { %v8058_v48 = vsel %vm2409_vm7, %v3066_v0, %v7640_v61  ;;  %v3141_v23 = vpop.f32.mrf.mxu0  ;;  %v2917_v0 = vsel %vm2916_vm11, %v5408_v42, %v2913_v15 }
 0x9ee   :  { %v3181_v19 = vadd.f32 %v3141_v23, %v8991_v62 }
 0x9ef   :  { %3071 = vrot.lane.b32.xlu1 %v7793_v20, %s5786_s17  ;;  %v3187_v20 = vadd.f32 %v3179_v6, %v8966_v39 }
 0x9f0   :  { %v3189_v61 = vadd.f32 %v3181_v19, %v8966_v39 }
 0x9f1   :  { %v4993_v53 = vmul.f32 -1.442695, %v3187_v20  ;;  %v8075_v20 = vsel %vm2919_vm10, %v2921_v5, %v2917_v0 }
 0x9f2   :  { %v4995_v27 = vmul.f32 -1.442695, %v3189_v61 }
 0x9f3   :  { %5411 = vpow2.f32 %v4993_v53 }
 0x9f4   :  { %5413 = vrcp.f32 %v2847_v29 }
 0x9f5   :  { %5415 = vpow2.f32 %v4995_v27  ;;  %v3144_v27 = vpop.f32.mrf.mxu0 }
 0x9f7   :  { %3355 = vrot.lane.b32.xlu1 %v8058_v48, %s5786_s17 }
 0x9f9   :  { %v5412_v16 = vpop.eup %5411 }
 0x9fa   :  { %v8066_v24 = vadd.f32 1.0, %v5412_v16  ;;  %v5414_v35 = vpop.eup %5413 }
 0x9fb   :  { %v5416_v56 = vpop.eup %5415  ;;  %v2940_v57 = vmul.f32 %v5414_v35, %v2847_v29  ;;  %vm2945_vm12 = vweird.f32 %v5414_v35 }
 0x9fc   :  { %5417 = vrcp.f32 %v8066_v24  ;;  %v8070_v37 = vadd.f32 1.0, %v5416_v56  ;;  %vm2946_vm15 = vmor %vm2944_vm14, %vm2945_vm12  ;;  %v3183_v56 = vadd.f32 %v3144_v27, %v8993_v51  ;;  %vm3232_vm9 = vweird.f32 %v8066_v24 }
 0x9fd   :  { %v2941_v32 = vsub.f32 1.0, %v2940_v57 }
 0x9fe   :  { %5419 = vrcp.f32 %v8070_v37  ;;  %v3191_v29 = vadd.f32 %v3183_v56, %v8966_v39  ;;  %vm3262_vm11 = vweird.f32 %v8070_v37 }
 0x9ff   :  { %v2942_v11 = vmul.f32 %v5414_v35, %v2941_v32  ;;  %5421 = vtanh.f32 %v8073_v8  ;;  %v3238_v32 = vand.u32 2147483648, %v8066_v24 }
 0xa01   :  { %v2943_v19 = vadd.f32 %v5414_v35, %v2942_v11 }
 0xa02   :  { %v5418_v6 = vpop.eup %5417 }
 0xa03   :  { %v3228_v62 = vmul.f32 %v5418_v6, %v8066_v24  ;;  %v2947_v7 = vsel %vm2946_vm15, %v5414_v35, %v2943_v19  ;;  %vm3233_vm4 = vweird.f32 %v5418_v6  ;;  %v3239_v19 = vor.u32 1.1754944e-38, %v3238_v32 }
 0xa04   :  { %v5420_v22 = vpop.eup %5419  ;;  %v8085_v57 = vsel %vm2949_vm3, %v2951_v54, %v2947_v7  ;;  %vm3234_vm1 = vmor %vm3232_vm9, %vm3233_vm4  ;;  %v3268_v7 = vand.u32 2147483648, %v8070_v37 }
 0xa05   :  { %v3229_v42 = vsub.f32 1.0, %v3228_v62  ;;  %v5422_v16 = vpop.eup %5421  ;;  %v3258_v10 = vmul.f32 %v5420_v22, %v8070_v37  ;;  %v4997_v62 = vmul.f32 -1.442695, %v3191_v29  ;;  %vm3263_vm5 = vweird.f32 %v5420_v22 }
 0xa06   :  { %vm3264_vm10 = vmor %vm3262_vm11, %vm3263_vm5 }
 0xa07   :  { %v3230_v15 = vmul.f32 %v5418_v6, %v3229_v42  ;;  %v3259_v0 = vsub.f32 1.0, %v3258_v10  ;;  %5423 = vpow2.f32 %v4997_v62 }
 0xa09   :  { %v3231_v5 = vadd.f32 %v5418_v6, %v3230_v15 }
 0xa0b   :  { %v3235_v11 = vsel %vm3234_vm1, %v5418_v6, %v3231_v5  ;;  %v3147_v5 = vpop.f32.mrf.mxu0 }
 0xa1e   :  { %v3002_v23 = vpop.permute.xlu0 %3001 }
 0xa1f   :  { %v3011_v53 = vmul.f32 %v3002_v23, %v8075_v20  ;;  %v3236_v23 = vand.u32 2147483647, %v8066_v24  ;;  %v3266_v24 = vand.u32 2147483647, %v8070_v37 }
 0xa21   :  { %3021 = vrot.lane.b32.xlu2 %v3011_v53, %s5786_s17  ;;  %v3260_v53 = vmul.f32 %v5420_v22, %v3259_v0  ;;  %vm3237_vm13 = vcmp.eq.f32.partialorder %v3236_v23, 8.507059e+37  ;;  %vm3267_vm12 = vcmp.eq.f32.partialorder %v3266_v24, 8.507059e+37  ;;  %v2980_v23 = vpop.permute.xlu1 %2979 }
 0xa22   :  { %v8093_v42 = vsel %vm3237_vm13, %v3239_v19, %v3235_v11 }
 0xa23   :  { %v3261_v34 = vadd.f32 %v5420_v22, %v3260_v53 }
 0xa25   :  { %v3265_v15 = vsel %vm3264_vm10, %v5420_v22, %v3261_v34 }
 0xa26   :  { %v2978_v61 = vpop.permute.xlu0 %2977 }
 0xa27   :  { %v3004_v60 = vpop.permute.xlu2 %3003  ;;  %v2989_v27 = vmul.f32 %v2978_v61, %v8008_v52  ;;  %v3269_v52 = vor.u32 1.1754944e-38, %v3268_v7  ;;  %v5424_v61 = vpop.eup %5423 }
 0xa28   :  { %v3012_v26 = vmul.f32 %v3004_v60, %v8085_v57  ;;  %v3223_v22 = vadd.f32 1.0, %v5424_v61 }
 0xa29   :  { %3381 = vrot.lane.b32.xlu2 %v5422_v16, %s5786_s17  ;;  %v8104_v51 = vsel %vm3267_vm12, %v3269_v52, %v3265_v15 }
 0xa2a   :  { %3023 = vrot.lane.b32.xlu0 %v3012_v26, %s5786_s17  ;;  %vm3292_vm15 = vweird.f32 %v3223_v22  ;;  %v3296_v7 = vand.u32 2147483647, %v3223_v22 }
 0xa2c   :  { %vm3297_vm4 = vcmp.eq.f32.partialorder %v3296_v7, 8.507059e+37  ;;  %v4978_v7 = vmul.f32 -1.442695, %v7966_v28 }
 0xa2e   :  { %v3378_v35 = vpop.permute.xlu0 %3377 }
 0xa2f   :  { %v3376_v14 = vpop.permute.xlu2 %3375  ;;  %v3388_v54 = vmul.f32 %v3378_v35, %v8104_v51  ;;  %v8994_v35 = vld [vmem:[#allocation5_spill] sm:$0xff] }
 0xa30   :  { %v3387_v16 = vmul.f32 %v3376_v14, %v8093_v42  ;;  %v3185_v32 = vadd.f32 %v3147_v5, %v8994_v35  ;;  %v2990_v14 = vmul.f32 %v2980_v23, %v8029_v9 }
 0xa32   :  { %3395 = vrot.lane.b32.xlu2 %v3387_v16, %s5786_s17  ;;  %v3193_v11 = vadd.f32 %v3185_v32, %v8966_v39  ;;  %v3298_v16 = vand.u32 2147483648, %v3223_v22 }
 0xa34   :  { %v4999_v19 = vmul.f32 -1.442695, %v3193_v11  ;;  %v3299_v24 = vor.u32 1.1754944e-38, %v3298_v16 }
 0xa36   :  { %v3018_v10 = vpop.permute.xlu0 %3017 }
 0xa37   :  { %v8101_v6 = vadd.f32 %v3018_v10, %v2989_v27  ;;  %v3068_v56 = vpop.permute.xlu2 %3067 }
 0xa38   :  { %v8110_v37 = vsel %vm2410_vm2, %v3068_v56, %v7686_v31 }
 0xa39   :  { %5425 = vtanh.f32 %v8101_v6  ;;  %3357 = vrot.lane.b32.xlu0 %v8110_v37, %s5786_s17 }
 0xa3a   :  { %3397 = vrot.lane.b32.xlu2 %v3388_v54, %s5786_s17  ;;  %5427 = vrcp.f32 %v3223_v22 }
 0xa3b   :  { %5429 = vpow2.f32 %v4999_v19 }
 0xa3e   :  { %v3070_v26 = vpop.permute.xlu0 %3069 }
 0xa3f   :  { %v5426_v60 = vpop.eup %5425  ;;  %v8119_v0 = vsel %vm2411_vm8, %v3070_v26, %v7695_v38  ;;  %v2982_v5 = vpop.permute.xlu2 %2981 }
 0xa40   :  { %3041 = vrot.lane.b32.xlu1 %v5426_v60, %s5786_s17  ;;  %v5428_v31 = vpop.eup %5427  ;;  %v2991_v32 = vmul.f32 %v2982_v5, %v8075_v20 }
 0xa41   :  { %3359 = vrot.lane.b32.xlu0 %v8119_v0, %s5786_s17  ;;  %v3288_v29 = vmul.f32 %v5428_v31, %v3223_v22  ;;  %vm3293_vm14 = vweird.f32 %v5428_v31  ;;  %v5430_v15 = vpop.eup %5429 }
 0xa42   :  { %vm3294_vm3 = vmor %vm3292_vm15, %vm3293_vm14  ;;  %v3225_v54 = vadd.f32 1.0, %v5430_v15 }
 0xa43   :  { %v3289_v53 = vsub.f32 1.0, %v3288_v29 }
 0xa44   :  { %vm3322_vm1 = vweird.f32 %v3225_v54 }
 0xa45   :  { %v3290_v62 = vmul.f32 %v5428_v31, %v3289_v53 }
 0xa47   :  { %v3291_v38 = vadd.f32 %v5428_v31, %v3290_v62  ;;  %v3328_v62 = vand.u32 2147483648, %v3225_v54 }
 0xa49   :  { %v3295_v10 = vsel %vm3294_vm3, %v5428_v31, %v3291_v38 }
 0xa4a   :  { %v8129_v52 = vsel %vm3297_vm4, %v3299_v24, %v3295_v10 }
 0xa51   :  { %v3020_v27 = vpop.permute.xlu1 %3019 }
 0xa52   :  { %v8126_v34 = vadd.f32 %v3020_v27, %v2990_v14  ;;  %v3329_v14 = vor.u32 1.1754944e-38, %v3328_v62 }
 0xa54   :  { %5431 = vtanh.f32 %v8126_v34 }
 0xa55   :  { %5433 = vrcp.f32 %v3225_v54 }
 0xa59   :  { %v3380_v61 = vpop.permute.xlu1 %3379 }
 0xa5a   :  { %v5432_v9 = vpop.eup %5431  ;;  %v3389_v56 = vmul.f32 %v3380_v61, %v8129_v52 }
 0xa5b   :  { %3043 = vrot.lane.b32.xlu1 %v5432_v9, %s5786_s17  ;;  %v5434_v26 = vpop.eup %5433 }
 0xa5c   :  { %3399 = vrot.lane.b32.xlu2 %v3389_v56, %s5786_s17  ;;  %v3318_v31 = vmul.f32 %v5434_v26, %v3225_v54  ;;  %vm3323_vm9 = vweird.f32 %v5434_v26 }
 0xa5d   :  { %vm3324_vm13 = vmor %vm3322_vm1, %vm3323_vm9 }
 0xa5e   :  { %v3319_v29 = vsub.f32 1.0, %v3318_v31 }
 0xa60   :  { %v3320_v35 = vmul.f32 %v5434_v26, %v3319_v29 }
 0xa61   :  { %v3072_v60 = vpop.permute.xlu1 %3071 }
 0xa62   :  { %v8137_v22 = vsel %vm2412_vm6, %v3072_v60, %v7713_v2  ;;  %v3321_v11 = vadd.f32 %v5434_v26, %v3320_v35  ;;  %v3326_v2 = vand.u32 2147483647, %v3225_v54  ;;  %v2984_v54 = vpop.permute.xlu0 %2983 }
 0xa63   :  { %3361 = vrot.lane.b32.xlu0 %v8137_v22, %s5786_s17  ;;  %v2992_v31 = vmul.f32 %v2984_v54, %v8085_v57 }
 0xa64   :  { %v3325_v19 = vsel %vm3324_vm13, %v5434_v26, %v3321_v11  ;;  %vm3327_vm5 = vcmp.eq.f32.partialorder %v3326_v2, 8.507059e+37 }
 0xa65   :  { %v8145_v27 = vsel %vm3327_vm5, %v3329_v14, %v3325_v19 }
 0xa69   :  { %v3356_v10 = vpop.permute.xlu1 %3355 }
 0xa6a   :  { %v3367_v15 = vmul.f32 %v3356_v10, %v8093_v42  ;;  %v4980_v42 = vmul.f32 -1.442695, %v7973_v30 }
 0xa7b   :  { %v3022_v23 = vpop.permute.xlu2 %3021 }
 0xa7c   :  { %v8142_v53 = vadd.f32 %v3022_v23, %v2991_v32 }
 0xa7e   :  { %5435 = vtanh.f32 %v8142_v53 }
 0xa7f   :  { %5437 = vpow2.f32 %v4978_v7 }
 0xa83   :  { %v3382_v38 = vpop.permute.xlu2 %3381 }
 0xa84   :  { %v5436_v16 = vpop.eup %5435  ;;  %v3390_v20 = vmul.f32 %v3382_v38, %v8145_v27 }
 0xa85   :  { %3045 = vrot.lane.b32.xlu1 %v5436_v16, %s5786_s17  ;;  %v5438_v24 = vpop.eup %5437 }
 0xa86   :  { %3401 = vrot.lane.b32.xlu2 %v3390_v20, %s5786_s17  ;;  %v2842_v9 = vadd.f32 1.0, %v5438_v24 }
 0xa88   :  { %v2875_v62 = vand.u32 2147483648, %v2842_v9  ;;  %vm2869_vm10 = vweird.f32 %v2842_v9  ;;  %v2873_v2 = vand.u32 2147483647, %v2842_v9 }
 0xa8a   :  { %v2876_v38 = vor.u32 1.1754944e-38, %v2875_v62  ;;  %vm2874_vm14 = vcmp.eq.f32.partialorder %v2873_v2, 8.507059e+37 }
 0xa8c   :  { %v3396_v61 = vpop.permute.xlu2 %3395 }
 0xa8d   :  { %v8152_v56 = vadd.f32 %v3396_v61, %v3367_v15 }
 0xa8f   :  { %5439 = vtanh.f32 %v8152_v56 }
 0xa90   :  { %5441 = vrcp.f32 %v2842_v9 }
 0xa94   :  { %v3398_v20 = vpop.permute.xlu2 %3397 }
 0xa95   :  { %v5440_v60 = vpop.eup %5439 }
 0xa96   :  { %3419 = vrot.lane.b32.xlu1 %v5440_v60, %s5786_s17  ;;  %v5442_v28 = vpop.eup %5441 }
 0xa97   :  { %v2865_v26 = vmul.f32 %v5442_v28, %v2842_v9  ;;  %vm2870_vm11 = vweird.f32 %v5442_v28 }
 0xa98   :  { %vm2871_vm12 = vmor %vm2869_vm10, %vm2870_vm11 }
 0xa99   :  { %v2866_v35 = vsub.f32 1.0, %v2865_v26 }
 0xa9b   :  { %v2867_v32 = vmul.f32 %v5442_v28, %v2866_v35 }
 0xa9c   :  { %v3024_v5 = vpop.permute.xlu0 %3023 }
 0xa9d   :  { %v8157_v29 = vadd.f32 %v3024_v5, %v2992_v31  ;;  %v2868_v11 = vadd.f32 %v5442_v28, %v2867_v32 }
 0xa9f   :  { %5443 = vtanh.f32 %v8157_v29  ;;  %v2872_v57 = vsel %vm2871_vm12, %v5442_v28, %v2868_v11 }
 0xaa0   :  { %5445 = vpow2.f32 %v4980_v42  ;;  %v2877_v30 = vsel %vm2874_vm14, %v2876_v38, %v2872_v57  ;;  %v4982_v42 = vmul.f32 -1.442695, %v7990_v12 }
 0xaa5   :  { %v5444_v23 = vpop.eup %5443 }
 0xaa6   :  { %3047 = vrot.lane.b32.xlu0 %v5444_v23, %s5786_s17  ;;  %v5446_v19 = vpop.eup %5445 }
 0xaa7   :  { %v2844_v10 = vadd.f32 1.0, %v5446_v19 }
 0xaa9   :  { %vm2899_vm3 = vweird.f32 %v2844_v10  ;;  %v2903_v23 = vand.u32 2147483647, %v2844_v10 }
 0xaab   :  { %v3358_v14 = vpop.permute.xlu0 %3357  ;;  %vm2904_vm9 = vcmp.eq.f32.partialorder %v2903_v23, 8.507059e+37 }
 0xaac   :  { %v3368_v16 = vmul.f32 %v3358_v14, %v8104_v51 }
 0xaae   :  { %v8163_v24 = vadd.f32 %v3398_v20, %v3368_v16 }
 0xab0   :  { %5447 = vtanh.f32 %v8163_v24 }
 0xab1   :  { %5449 = vrcp.f32 %v2844_v10 }
 0xab2   :  { %v3042_v7 = vpop.permute.xlu1 %3041 }
 0xab3   :  { %v3053_v15 = vmul.f32 %v3042_v7, %v2877_v30  ;;  %v3360_v51 = vpop.permute.xlu0 %3359  ;;  %v4994_v30 = vmul.f32 -1.442695, %v8020_v41 }
 0xab4   :  { %v3369_v9 = vmul.f32 %v3360_v51, %v8129_v52  ;;  %v2905_v52 = vand.u32 2147483648, %v2844_v10 }
 0xab5   :  { %v8169_v61 = vsel %vm2409_vm7, %v3053_v15, %v7735_v44 }
 0xab6   :  { %3439 = vrot.lane.b32.xlu2 %v8169_v61, %s5786_s17  ;;  %v5448_v54 = vpop.eup %5447  ;;  %v3400_v60 = vpop.permute.xlu2 %3399  ;;  %v2906_v62 = vor.u32 1.1754944e-38, %v2905_v52 }
 0xab7   :  { %3421 = vrot.lane.b32.xlu0 %v5448_v54, %s5786_s17  ;;  %v5450_v28 = vpop.eup %5449  ;;  %v8175_v26 = vadd.f32 %v3400_v60, %v3369_v9 }
 0xab8   :  { %v2895_v31 = vmul.f32 %v5450_v28, %v2844_v10  ;;  %vm2900_vm15 = vweird.f32 %v5450_v28 }
 0xab9   :  { %5451 = vtanh.f32 %v8175_v26  ;;  %vm2901_vm4 = vmor %vm2899_vm3, %vm2900_vm15 }
 0xaba   :  { %v2896_v5 = vsub.f32 1.0, %v2895_v31  ;;  %5453 = vpow2.f32 %v4982_v42  ;;  %v4984_v31 = vmul.f32 -1.442695, %v8013_v47 }
 0xabc   :  { %v2897_v35 = vmul.f32 %v5450_v28, %v2896_v5 }
 0xabe   :  { %v2898_v32 = vadd.f32 %v5450_v28, %v2897_v35 }
 0xabf   :  { %v5452_v44 = vpop.eup %5451 }
 0xac0   :  { %3423 = vrot.lane.b32.xlu2 %v5452_v44, %s5786_s17  ;;  %v2902_v11 = vsel %vm2901_vm4, %v5450_v28, %v2898_v32  ;;  %v5454_v19 = vpop.eup %5453 }
 0xac1   :  { %v2907_v2 = vsel %vm2904_vm9, %v2906_v62, %v2902_v11  ;;  %v2846_v12 = vadd.f32 1.0, %v5454_v19  ;;  %v4996_v19 = vmul.f32 -1.442695, %v7996_v3 }
 0xac3   :  { %5455 = vrcp.f32 %v2846_v12  ;;  %v2935_v41 = vand.u32 2147483648, %v2846_v12  ;;  %vm2929_vm13 = vweird.f32 %v2846_v12  ;;  %v2933_v5 = vand.u32 2147483647, %v2846_v12 }
 0xac5   :  { %v2936_v35 = vor.u32 1.1754944e-38, %v2935_v41  ;;  %vm2934_vm11 = vcmp.eq.f32.partialorder %v2933_v5, 8.507059e+37 }
 0xac9   :  { %v5456_v10 = vpop.eup %5455 }
 0xaca   :  { %v2925_v51 = vmul.f32 %v5456_v10, %v2846_v12  ;;  %vm2930_vm1 = vweird.f32 %v5456_v10 }
 0xacb   :  { %vm2931_vm5 = vmor %vm2929_vm13, %vm2930_vm1 }
 0xacd   :  { %v3044_v57 = vpop.permute.xlu1 %3043 }
 0xace   :  { %v3054_v14 = vmul.f32 %v3044_v57, %v2907_v2 }
 0xad0   :  { %v8183_v38 = vsel %vm2410_vm2, %v3054_v14, %v7753_v40  ;;  %v2926_v40 = vsub.f32 1.0, %v2925_v51 }
 0xad1   :  { %3441 = vrot.lane.b32.xlu1 %v8183_v38, %s5786_s17 }
 0xad2   :  { %v2927_v60 = vmul.f32 %v5456_v10, %v2926_v40 }
 0xad5   :  { %v3362_v16 = vpop.permute.xlu0 %3361 }
 0xad6   :  { %v3370_v20 = vmul.f32 %v3362_v16, %v8145_v27  ;;  %v2928_v27 = vadd.f32 %v5456_v10, %v2927_v60 }
 0xad8   :  { %v2932_v44 = vsel %vm2931_vm5, %v5456_v10, %v2928_v27 }
 0xad9   :  { %v2937_v32 = vsel %vm2934_vm11, %v2936_v35, %v2932_v44 }
 0xae0   :  { %v3402_v7 = vpop.permute.xlu2 %3401 }
 0xae1   :  { %v8189_v15 = vadd.f32 %v3402_v7, %v3370_v20 }
 0xae3   :  { %5457 = vtanh.f32 %v8189_v15 }
 0xae4   :  { %5459 = vpow2.f32 %v4994_v30 }
 0xae9   :  { %v5458_v9 = vpop.eup %5457 }
 0xaea   :  { %v5460_v54 = vpop.eup %5459  ;;  %3425 = vrot.lane.b32.xlu1 %v5458_v9, %s5786_s17 }
 0xaeb   :  { %v3220_v28 = vadd.f32 1.0, %v5460_v54 }
 0xaed   :  { %5461 = vrcp.f32 %v3220_v28  ;;  %v3253_v20 = vand.u32 2147483648, %v3220_v28  ;;  %vm3247_vm12 = vweird.f32 %v3220_v28  ;;  %v3251_v30 = vand.u32 2147483647, %v3220_v28 }
 0xaee   :  { %5463 = vpow2.f32 %v4984_v31 }
 0xaef   :  { %v3254_v3 = vor.u32 1.1754944e-38, %v3253_v20  ;;  %vm3252_vm15 = vcmp.eq.f32.partialorder %v3251_v30, 8.507059e+37 }
 0xaf3   :  { %v5462_v42 = vpop.eup %5461 }
 0xaf4   :  { %v5464_v11 = vpop.eup %5463  ;;  %v3243_v62 = vmul.f32 %v5462_v42, %v3220_v28  ;;  %vm3248_vm10 = vweird.f32 %v5462_v42 }
 0xaf5   :  { %v2848_v2 = vadd.f32 1.0, %v5464_v11  ;;  %vm3249_vm14 = vmor %vm3247_vm12, %vm3248_vm10 }
 0xaf6   :  { %v3244_v57 = vsub.f32 1.0, %v3243_v62 }
 0xaf7   :  { %v3046_v52 = vpop.permute.xlu1 %3045  ;;  %5465 = vrcp.f32 %v2848_v2  ;;  %vm2959_vm9 = vweird.f32 %v2848_v2 }
 0xaf8   :  { %v3055_v23 = vmul.f32 %v3046_v52, %v2937_v32  ;;  %v3245_v14 = vmul.f32 %v5462_v42, %v3244_v57  ;;  %5467 = vpow2.f32 %v4996_v19 }
 0xafa   :  { %v8197_v47 = vsel %vm2411_vm8, %v3055_v23, %v7768_v1  ;;  %v3246_v12 = vadd.f32 %v5462_v42, %v3245_v14  ;;  %v4998_v1 = vmul.f32 -1.442695, %v8027_v21 }
 0xafb   :  { %3443 = vrot.lane.b32.xlu0 %v8197_v47, %s5786_s17 }
 0xafc   :  { %v3250_v7 = vsel %vm3249_vm14, %v5462_v42, %v3246_v12  ;;  %5469 = vpow2.f32 %v4998_v1  ;;  %v2965_v42 = vand.u32 2147483648, %v2848_v2 }
 0xafd   :  { %v5466_v16 = vpop.eup %5465  ;;  %v3255_v40 = vsel %vm3252_vm15, %v3254_v3, %v3250_v7 }
 0xafe   :  { %v2955_v10 = vmul.f32 %v5466_v16, %v2848_v2  ;;  %v5468_v51 = vpop.eup %5467  ;;  %vm2960_vm4 = vweird.f32 %v5466_v16  ;;  %v2966_v23 = vor.u32 1.1754944e-38, %v2965_v42 }
 0xaff   :  { %v3222_v21 = vadd.f32 1.0, %v5468_v51  ;;  %vm2961_vm1 = vmor %vm2959_vm9, %vm2960_vm4 }
 0xb00   :  { %v2956_v60 = vsub.f32 1.0, %v2955_v10 }
 0xb01   :  { %5471 = vrcp.f32 %v3222_v21  ;;  %v3283_v7 = vand.u32 2147483648, %v3222_v21  ;;  %vm3277_vm11 = vweird.f32 %v3222_v21  ;;  %v3281_v51 = vand.u32 2147483647, %v3222_v21 }
 0xb02   :  { %v5470_v27 = vpop.eup %5469  ;;  %v2957_v5 = vmul.f32 %v5466_v16, %v2956_v60 }
 0xb03   :  { %3089 = vrot.lane.b32.xlu0 %v8101_v6, %s5786_s17  ;;  %v8208_v6 = vld [vmem:[%s8896_s0 + $0xc0] sm:$0xff]  ;;  %v3224_v44 = vadd.f32 1.0, %v5470_v27  ;;  %vm3282_vm14 = vcmp.eq.f32.partialorder %v3281_v51, 8.507059e+37 }
 0xb04   :  { %vm3105_vm3 = vcmp.gt.f32.partialorder %v8208_v6, 4.0  ;;  %v2958_v35 = vadd.f32 %v5466_v16, %v2957_v5 }
 0xb05   :  { %5473 = vrcp.f32 %v3224_v44  ;;  %vm3307_vm4 = vweird.f32 %v3224_v44 }
 0xb06   :  { %v2962_v52 = vsel %vm2961_vm1, %v5466_v16, %v2958_v35 }
 0xb07   :  { %v5472_v32 = vpop.eup %5471 }
 0xb08   :  { %v3420_v9 = vpop.permute.xlu1 %3419  ;;  %v3273_v11 = vmul.f32 %v5472_v32, %v3222_v21  ;;  %vm3278_vm5 = vweird.f32 %v5472_v32  ;;  %v3311_v21 = vand.u32 2147483647, %v3224_v44 }
 0xb09   :  { %v3431_v54 = vmul.f32 %v3420_v9, %v3255_v40  ;;  %vm3279_vm10 = vmor %vm3277_vm11, %vm3278_vm5  ;;  %v3284_v40 = vor.u32 1.1754944e-38, %v3283_v7  ;;  %v3313_v9 = vand.u32 2147483648, %v3224_v44  ;;  %v8253_v7 = vld [vmem:[%s8896_s0 + $0xd8] sm:$0xff] }
 0xb0a   :  { %v3274_v12 = vsub.f32 1.0, %v3273_v11  ;;  %vm3312_vm1 = vcmp.eq.f32.partialorder %v3311_v21, 8.507059e+37 }
 0xb0b   :  { %v3753_v28 = vsel %vm3105_vm3, %v3431_v54, %v7787_v33  ;;  %v2963_v33 = vand.u32 2147483647, %v2848_v2  ;;  %v5474_v19 = vpop.eup %5473  ;;  %v3314_v5 = vor.u32 1.1754944e-38, %v3313_v9 }
 0xb0c   :  { %5009 = vmatmul.msk.f32.vlgmr.msrb.gmra.mxu0 %vm117_vm0, %v3753_v28  ;;  %5013 = vmatmul.msk.f32.vlgmr.msrb.gmra.mxu1 %vm117_vm0, %v3753_v28  ;;  %v3303_v20 = vmul.f32 %v5474_v19, %v3224_v44  ;;  %v3275_v2 = vmul.f32 %v5472_v32, %v3274_v12  ;;  %vm3308_vm12 = vweird.f32 %v5474_v19  ;;  %v8229_v28 = vld [vmem:[%s8896_s0 + $0xc8] sm:$0xff] }
 0xb0d   :  { %vm2964_vm13 = vcmp.eq.f32.partialorder %v2963_v33, 8.507059e+37  ;;  %vm3106_vm15 = vcmp.gt.f32.partialorder %v8229_v28, 4.0  ;;  %vm3309_vm9 = vmor %vm3307_vm4, %vm3308_vm12 }
 0xb0e   :  { %v2967_v62 = vsel %vm2964_vm13, %v2966_v23, %v2962_v52  ;;  %v3304_v30 = vsub.f32 1.0, %v3303_v20  ;;  %v3276_v16 = vadd.f32 %v5472_v32, %v3275_v2 }
 0xb10   :  { %v3440_v31 = vpop.permute.xlu2 %3439  ;;  %v3305_v10 = vmul.f32 %v5474_v19, %v3304_v30  ;;  %v3280_v3 = vsel %vm3279_vm10, %v5472_v32, %v3276_v16 }
 0xb11   :  { %v3451_v41 = vsel %vm117_vm0, %v3431_v54, %v3440_v31  ;;  %v3285_v54 = vsel %vm3282_vm14, %v3284_v40, %v3280_v3  ;;  %vm3108_vm14 = vcmp.gt.f32.partialorder %v8253_v7, 4.0 }
 0xb12   :  { %3471 = vmatmul.f32.vlgmr.msrb.gmra.mxu2 %v3451_v41  ;;  %3500 = vmatmul.f32.vlgmr.msrb.gmra.mxu3 %v3451_v41 }
 0xb18   :  { %v3048_v57 = vpop.permute.xlu0 %3047 }
 0xb19   :  { %v3056_v14 = vmul.f32 %v3048_v57, %v2967_v62 }
 0xb1a   :  { %v3424_v35 = vpop.permute.xlu2 %3423 }
 0xb1b   :  { %v8220_v1 = vsel %vm2412_vm6, %v3056_v14, %v7821_v49  ;;  %v3306_v49 = vadd.f32 %v5474_v19, %v3305_v10 }
 0xb1c   :  { %3445 = vrot.lane.b32.xlu2 %v8220_v1, %s5786_s17 }
 0xb1d   :  { %v3310_v27 = vsel %vm3309_vm9, %v5474_v19, %v3306_v49 }
 0xb1e   :  { %v3315_v42 = vsel %vm3312_vm1, %v3314_v5, %v3310_v27 }
 0xb1f   :  { %v3433_v32 = vmul.f32 %v3424_v35, %v3315_v42 }
 0xb24   :  { %3091 = vrot.lane.b32.xlu2 %v8126_v34, %s5786_s17  ;;  %v5000_v34 = vmul.f32 -1.442695, %v8073_v8  ;;  %v8241_v8 = vld [vmem:[%s8896_s0 + $0xd0] sm:$0xff] }
 0xb25   :  { %vm3107_vm13 = vcmp.gt.f32.partialorder %v8241_v8, 4.0 }
 0xb26   :  { %5475 = vpow2.f32 %v5000_v34 }
 0xb29   :  { %v3422_v60 = vpop.permute.xlu0 %3421 }
 0xb2a   :  { %v3432_v31 = vmul.f32 %v3422_v60, %v3285_v54 }
 0xb2c   :  { %v3754_v41 = vsel %vm3106_vm15, %v3432_v31, %v7896_v17  ;;  %v5476_v44 = vpop.eup %5475  ;;  %v3755_v17 = vsel %vm3107_vm13, %v3433_v32, %v7942_v58 }
 0xb2d   :  { %5010 = vmatmul.msk.f32.gmra.mxu0 %vm117_vm0, %v3754_v41  ;;  %5014 = vmatmul.msk.f32.gmra.mxu1 %vm117_vm0, %v3754_v41  ;;  %v3226_v33 = vadd.f32 1.0, %v5476_v44 }
 0xb2f   :  { %5477 = vrcp.f32 %v3226_v33  ;;  %v3343_v12 = vand.u32 2147483648, %v3226_v33  ;;  %vm3337_vm11 = vweird.f32 %v3226_v33  ;;  %v3341_v58 = vand.u32 2147483647, %v3226_v33 }
 0xb31   :  { %v3344_v2 = vor.u32 1.1754944e-38, %v3343_v12  ;;  %vm3342_vm12 = vcmp.eq.f32.partialorder %v3341_v58, 8.507059e+37  ;;  %v8996_v58 = vld [vmem:[#allocation7_spill] sm:$0xff] }
 0xb35   :  { %5011 = vmatmul.msk.f32.gmra.mxu0 %vm117_vm0, %v3755_v17  ;;  %5015 = vmatmul.msk.f32.gmra.mxu1 %vm117_vm0, %v3755_v17  ;;  %v5478_v52 = vpop.eup %5477 }
 0xb36   :  { %v3333_v11 = vmul.f32 %v5478_v52, %v3226_v33  ;;  %vm3338_vm5 = vweird.f32 %v5478_v52 }
 0xb37   :  { %vm3339_vm10 = vmor %vm3337_vm11, %vm3338_vm5 }
 0xb38   :  { %v3334_v57 = vsub.f32 1.0, %v3333_v11 }
 0xb3a   :  { %v3335_v19 = vmul.f32 %v5478_v52, %v3334_v57 }
 0xb3c   :  { %v3336_v14 = vadd.f32 %v5478_v52, %v3335_v19 }
 0xb3e   :  { %v3340_v20 = vsel %vm3339_vm10, %v5478_v52, %v3336_v14 }
 0xb3f   :  { %v3345_v30 = vsel %vm3342_vm12, %v3344_v2, %v3340_v20 }
 0xb43   :  { %v3442_v23 = vpop.permute.xlu1 %3441 }
 0xb44   :  { %v3452_v62 = vsel %vm117_vm0, %v3432_v31, %v3442_v23 }
 0xb45   :  { %3474 = vmatmul.f32.gmra.mxu2 %v3452_v62  ;;  %3503 = vmatmul.f32.gmra.mxu3 %v3452_v62 }
 0xb5c   :  { %v3426_v16 = vpop.permute.xlu1 %3425 }
 0xb5d   :  { %v3434_v10 = vmul.f32 %v3426_v16, %v3345_v30 }
 0xb5f   :  { %v3756_v51 = vsel %vm3108_vm14, %v3434_v10, %v7958_v45 }
 0xb60   :  { %5012 = vmatmul.msk.f32.gmra.mxu0 %vm117_vm0, %v3756_v51  ;;  %5016 = vmatmul.msk.f32.gmra.mxu1 %vm117_vm0, %v3756_v51 }
 0xb6d   :  { %v3444_v3 = vpop.permute.xlu0 %3443 }
 0xb6e   :  { %v3453_v40 = vsel %vm117_vm0, %v3433_v32, %v3444_v3 }
 0xb6f   :  { %3477 = vmatmul.f32.gmra.mxu2 %v3453_v40  ;;  %3506 = vmatmul.f32.gmra.mxu3 %v3453_v40 }
 0xb75   :  { %v3090_v11 = vpop.permute.xlu0 %3089 }
 0xb76   :  { %v3446_v49 = vpop.permute.xlu2 %3445  ;;  %v8302_v12 = vsel %vm2409_vm7, %v3090_v11, %v8002_v43 }
 0xb77   :  { %v3454_v9 = vsel %vm117_vm0, %v3434_v10, %v3446_v49 }
 0xb78   :  { %3480 = vmatmul.f32.gmra.mxu2 %v3454_v9  ;;  %3509 = vmatmul.f32.gmra.mxu3 %v3454_v9 }
 0xb89   :  { %v3863_v44 = vpop.f32.mrf.mxu1 }
 0xb8a   :  { %v3876_v20 = vadd.f32 %v3863_v44, %v8996_v58 }
 0xb8c   :  { %v8310_v30 = vadd.f32 %v3876_v20, %v8961_v25 }
 0xb95   :  { %v3501_v54 = vpop.f32.mrf.mxu3  ;;  %v3472_v27 = vpop.f32.mrf.mxu2 }
 0xb96   :  { %v8264_v60 = vadd.f32 %v3501_v54, %v6427_v13  ;;  %v3473_v41 = vadd.f32 %v3472_v27, %v6449_v59 }
 0xb98   :  { %5479 = vtanh.f32 %v8264_v60  ;;  %v5001_v5 = vmul.f32 -1.442695, %v3473_v41 }
 0xb9e   :  { %v5480_v45 = vpop.eup %5479 }
 0xb9f   :  { %3693 = vrot.lane.b32.xlu1 %v5480_v45, %s5786_s17 }
 0xba7   :  { %3093 = vrot.lane.b32.xlu1 %v8142_v53, %s5786_s17  ;;  %v3092_v53 = vpop.permute.xlu2 %3091 }
 0xba8   :  { %v8283_v42 = vsel %vm2410_vm2, %v3092_v53, %v7984_v55 }
 0xbaa   :  { %v3866_v33 = vpop.f32.mrf.mxu1 }
 0xbab   :  { %v3878_v55 = vadd.f32 %v3866_v33, %v8995_v4 }
 0xbad   :  { %v8294_v57 = vadd.f32 %v3878_v55, %v8961_v25 }
 0xbb2   :  { %v3869_v4 = vpop.f32.mrf.mxu1 }
 0xbc8   :  { %v3504_v34 = vpop.f32.mrf.mxu3 }
 0xbc9   :  { %v8271_v21 = vadd.f32 %v3504_v34, %v6427_v13  ;;  %v3475_v34 = vpop.f32.mrf.mxu2 }
 0xbcb   :  { %5481 = vtanh.f32 %v8271_v21 }
 0xbcc   :  { %5483 = vpow2.f32 %v5001_v5 }
 0xbd1   :  { %v5482_v31 = vpop.eup %5481 }
 0xbd2   :  { %3695 = vrot.lane.b32.xlu0 %v5482_v31, %s5786_s17  ;;  %v5484_v35 = vpop.eup %5483  ;;  %v3476_v31 = vadd.f32 %v3475_v34, %v6449_v59 }
 0xbd3   :  { %v3537_v32 = vadd.f32 1.0, %v5484_v35 }
 0xbd4   :  { %v5003_v41 = vmul.f32 -1.442695, %v3476_v31 }
 0xbd5   :  { %5485 = vrcp.f32 %v3537_v32  ;;  %v3556_v43 = vand.u32 2147483648, %v3537_v32  ;;  %vm3550_vm7 = vweird.f32 %v3537_v32  ;;  %v3554_v51 = vand.u32 2147483647, %v3537_v32 }
 0xbd7   :  { %v3557_v40 = vor.u32 1.1754944e-38, %v3556_v43  ;;  %vm3555_vm9 = vcmp.eq.f32.partialorder %v3554_v51, 8.507059e+37 }
 0xbda   :  { %3095 = vrot.lane.b32.xlu0 %v8157_v29, %s5786_s17 }
 0xbdd   :  { %v3872_v31 = vpop.f32.mrf.mxu1 }
 0xbe2   :  { %3761 = vrot.lane.b32.xlu0 %v8152_v56, %s5786_s17  ;;  %v5486_v56 = vpop.eup %5485 }
 0xbe3   :  { %v3546_v23 = vmul.f32 %v5486_v56, %v3537_v32  ;;  %vm3551_vm2 = vweird.f32 %v5486_v56 }
 0xbe4   :  { %vm3552_vm4 = vmor %vm3550_vm7, %vm3551_vm2 }
 0xbe5   :  { %v3547_v14 = vsub.f32 1.0, %v3546_v23 }
 0xbe7   :  { %v3548_v2 = vmul.f32 %v5486_v56, %v3547_v14  ;;  %v8997_v14 = vld [vmem:[#allocation15_spill] sm:$0xff] }
 0xbe8   :  { %v3880_v58 = vadd.f32 %v3869_v4, %v8997_v14 }
 0xbe9   :  { %v3549_v10 = vadd.f32 %v5486_v56, %v3548_v2 }
 0xbea   :  { %3675 = vrot.lane.b32.xlu0 %v8283_v42, %s5786_s17 }
 0xbeb   :  { %v3553_v3 = vsel %vm3552_vm4, %v5486_v56, %v3549_v10 }
 0xbec   :  { %v8315_v54 = vsel %vm3555_vm9, %v3557_v40, %v3553_v3 }
 0xbf2   :  { %v3507_v17 = vpop.f32.mrf.mxu3  ;;  %v3478_v53 = vpop.f32.mrf.mxu2 }
 0xbf3   :  { %v8288_v29 = vadd.f32 %v3507_v17, %v6427_v13  ;;  %v3479_v35 = vadd.f32 %v3478_v53, %v6449_v59 }
 0xbf5   :  { %5487 = vtanh.f32 %v8288_v29  ;;  %v5005_v44 = vmul.f32 -1.442695, %v3479_v35 }
 0xbfb   :  { %v5488_v52 = vpop.eup %5487  ;;  %v3510_v62 = vpop.f32.mrf.mxu3 }
 0xbfc   :  { %3697 = vrot.lane.b32.xlu2 %v5488_v52, %s5786_s17  ;;  %v8297_v19 = vadd.f32 %v3510_v62, %v6427_v13 }
 0xbfe   :  { %5489 = vtanh.f32 %v8297_v19 }
 0xbff   :  { %5491 = vtanh.f32 %v8294_v57 }
 0xc00   :  { %5493 = vtanh.f32 %v8310_v30 }
 0xc01   :  { %5495 = vpow2.f32 %v5003_v41 }
 0xc02   :  { %5497 = vpow2.f32 %v5005_v44 }
 0xc04   :  { %3673 = vrot.lane.b32.xlu2 %v8302_v12, %s5786_s17  ;;  %v5490_v16 = vpop.eup %5489 }
 0xc05   :  { %3699 = vrot.lane.b32.xlu1 %v5490_v16, %s5786_s17  ;;  %v5492_v50 = vpop.eup %5491  ;;  %v3481_v16 = vpop.f32.mrf.mxu2 }
 0xc06   :  { %v5494_v49 = vpop.eup %5493  ;;  %v3482_v3 = vadd.f32 %v3481_v16, %v6449_v59 }
 0xc07   :  { %v5496_v32 = vpop.eup %5495 }
 0xc08   :  { %v5498_v17 = vpop.eup %5497 }
 0xc09   :  { %v3541_v56 = vadd.f32 1.0, %v5498_v17 }
 0xc0b   :  { %v3616_v53 = vand.u32 2147483648, %v3541_v56  ;;  %vm3610_vm12 = vweird.f32 %v3541_v56  ;;  %v3614_v35 = vand.u32 2147483647, %v3541_v56 }
 0xc0c   :  { %4073 = vrot.lane.b32.xlu2 %v5492_v50, %s5786_s17  ;;  %v8335_v50 = vadd.f32 %v3880_v58, %v8961_v25 }
 0xc0d   :  { %4071 = vrot.lane.b32.xlu1 %v5494_v49, %s5786_s17  ;;  %v3617_v4 = vor.u32 1.1754944e-38, %v3616_v53  ;;  %vm3615_vm7 = vcmp.eq.f32.partialorder %v3614_v35, 8.507059e+37 }
 0xc11   :  { %v3694_v9 = vpop.permute.xlu1 %3693 }
 0xc12   :  { %v3705_v45 = vmul.f32 %v3694_v9, %v8315_v54  ;;  %v3834_v9 = vpop.f32.mrf.mxu0 }
 0xc14   :  { %3713 = vrot.lane.b32.xlu2 %v3705_v45, %s5786_s17  ;;  %v8998_v45 = vld [vmem:[#allocation18_spill] sm:$0xff] }
 0xc15   :  { %3763 = vrot.lane.b32.xlu1 %v8163_v24, %s5786_s17  ;;  %v3539_v24 = vadd.f32 1.0, %v5496_v32  ;;  %v3875_v34 = vadd.f32 %v3834_v9, %v8998_v45  ;;  %v8999_v32 = vld [vmem:[#allocation14_spill] sm:$0xff] }
 0xc16   :  { %v3882_v44 = vadd.f32 %v3872_v31, %v8999_v32 }
 0xc17   :  { %5499 = vrcp.f32 %v3539_v24  ;;  %v3586_v11 = vand.u32 2147483648, %v3539_v24  ;;  %vm3580_vm1 = vweird.f32 %v3539_v24  ;;  %v3584_v62 = vand.u32 2147483647, %v3539_v24 }
 0xc18   :  { %5501 = vrcp.f32 %v3541_v56  ;;  %v3883_v17 = vadd.f32 %v3875_v34, %v8966_v39 }
 0xc19   :  { %v3094_v27 = vpop.permute.xlu1 %3093  ;;  %v3587_v10 = vor.u32 1.1754944e-38, %v3586_v11  ;;  %vm3585_vm11 = vcmp.eq.f32.partialorder %v3584_v62, 8.507059e+37  ;;  %5503 = vtanh.f32 %v8335_v50 }
 0xc1a   :  { %v8328_v5 = vsel %vm2411_vm8, %v3094_v27, %v8039_v63  ;;  %v5007_v27 = vmul.f32 -1.442695, %v3482_v3  ;;  %v5017_v11 = vmul.f32 -1.442695, %v3883_v17 }
 0xc1c   :  { %3765 = vrot.lane.b32.xlu2 %v8175_v26, %s5786_s17  ;;  %5505 = vpow2.f32 %v5007_v27 }
 0xc1d   :  { %3677 = vrot.lane.b32.xlu1 %v8328_v5, %s5786_s17  ;;  %v5500_v26 = vpop.eup %5499 }
 0xc1e   :  { %v3576_v33 = vmul.f32 %v5500_v26, %v3539_v24  ;;  %v5502_v52 = vpop.eup %5501  ;;  %vm3581_vm8 = vweird.f32 %v5500_v26 }
 0xc1f   :  { %v3606_v23 = vmul.f32 %v5502_v52, %v3541_v56  ;;  %vm3582_vm5 = vmor %vm3580_vm1, %vm3581_vm8  ;;  %vm3611_vm10 = vweird.f32 %v5502_v52  ;;  %v8355_v56 = vadd.f32 %v3882_v44, %v8961_v25 }
 0xc20   :  { %v3577_v36 = vsub.f32 1.0, %v3576_v33  ;;  %vm3612_vm2 = vmor %vm3610_vm12, %vm3611_vm10 }
 0xc21   :  { %v3607_v2 = vsub.f32 1.0, %v3606_v23  ;;  %5507 = vtanh.f32 %v8355_v56 }
 0xc22   :  { %v3578_v63 = vmul.f32 %v5500_v26, %v3577_v36  ;;  %v5504_v36 = vpop.eup %5503  ;;  %5509 = vpow2.f32 %v5017_v11 }
 0xc23   :  { %v3608_v49 = vmul.f32 %v5502_v52, %v3607_v2  ;;  %v5506_v62 = vpop.eup %5505 }
 0xc24   :  { %v3579_v55 = vadd.f32 %v5500_v26, %v3578_v63  ;;  %v3837_v63 = vpop.f32.mrf.mxu0  ;;  %v3543_v58 = vadd.f32 1.0, %v5506_v62 }
 0xc25   :  { %v3609_v41 = vadd.f32 %v5502_v52, %v3608_v49 }
 0xc26   :  { %v3583_v20 = vsel %vm3582_vm5, %v5500_v26, %v3579_v55  ;;  %5511 = vrcp.f32 %v3543_v58  ;;  %v3646_v17 = vand.u32 2147483648, %v3543_v58  ;;  %vm3640_vm4 = vweird.f32 %v3543_v58 }
 0xc27   :  { %v8337_v51 = vsel %vm3585_vm11, %v3587_v10, %v3583_v20  ;;  %v3613_v33 = vsel %vm3612_vm2, %v5502_v52, %v3609_v41  ;;  %v5508_v2 = vpop.eup %5507 }
 0xc28   :  { %v8357_v55 = vsel %vm3615_vm7, %v3617_v4, %v3613_v33  ;;  %v5510_v16 = vpop.eup %5509 }
 0xc44   :  { %v3696_v43 = vpop.permute.xlu0 %3695 }
 0xc45   :  { %v3706_v40 = vmul.f32 %v3696_v43, %v8337_v51  ;;  %v3915_v43 = vadd.f32 1.0, %v5510_v16 }
 0xc47   :  { %3715 = vrot.lane.b32.xlu0 %v3706_v40, %s5786_s17  ;;  %v5512_v40 = vpop.eup %5511  ;;  %vm3928_vm5 = vweird.f32 %v3915_v43 }
 0xc48   :  { %v3636_v9 = vmul.f32 %v5512_v40, %v3543_v58 }
 0xc4a   :  { %v3637_v31 = vsub.f32 1.0, %v3636_v9 }
 0xc4c   :  { %v3096_v24 = vpop.permute.xlu0 %3095  ;;  %v3638_v35 = vmul.f32 %v5512_v40, %v3637_v31 }
 0xc4d   :  { %v8349_v26 = vsel %vm2412_vm6, %v3096_v24, %v8046_v18  ;;  %v3877_v18 = vadd.f32 %v3837_v63, %v9000_v46  ;;  %vm3641_vm6 = vweird.f32 %v5512_v40 }
 0xc4e   :  { %3679 = vrot.lane.b32.xlu2 %v8349_v26, %s5786_s17  ;;  %v3639_v32 = vadd.f32 %v5512_v40, %v3638_v35  ;;  %vm3642_vm9 = vmor %vm3640_vm4, %vm3641_vm6 }
 0xc4f   :  { %4075 = vrot.lane.b32.xlu0 %v5504_v36, %s5786_s17  ;;  %v3885_v14 = vadd.f32 %v3877_v18, %v8966_v39  ;;  %v3644_v36 = vand.u32 2147483647, %v3543_v58  ;;  %v3932_v58 = vand.u32 2147483647, %v3915_v43 }
 0xc50   :  { %v3643_v63 = vsel %vm3642_vm9, %v5512_v40, %v3639_v32 }
 0xc51   :  { %v5019_v20 = vmul.f32 -1.442695, %v3885_v14  ;;  %vm3645_vm8 = vcmp.eq.f32.partialorder %v3644_v36, 8.507059e+37  ;;  %v3934_v14 = vand.u32 2147483648, %v3915_v43  ;;  %vm3933_vm10 = vcmp.eq.f32.partialorder %v3932_v58, 8.507059e+37 }
 0xc52   :  { %v5002_v58 = vmul.f32 -1.442695, %v8264_v60 }
 0xc53   :  { %5513 = vpow2.f32 %v5019_v20 }
 0xc54   :  { %v3762_v10 = vpop.permute.xlu0 %3761  ;;  %5515 = vrcp.f32 %v3915_v43 }
 0xc55   :  { %v3773_v3 = vsel %vm3105_vm3, %v3762_v10, %v8058_v48 }
 0xc56   :  { %v3698_v23 = vpop.permute.xlu2 %3697 }
 0xc57   :  { %v3707_v52 = vmul.f32 %v3698_v23, %v8357_v55  ;;  %3767 = vrot.lane.b32.xlu0 %v8189_v15, %s5786_s17  ;;  %v3647_v23 = vor.u32 1.1754944e-38, %v3646_v17 }
 0xc59   :  { %3717 = vrot.lane.b32.xlu1 %v3707_v52, %s5786_s17  ;;  %v5514_v15 = vpop.eup %5513  ;;  %v8376_v46 = vsel %vm3645_vm8, %v3647_v23, %v3643_v63 }
 0xc5a   :  { %v3917_v45 = vadd.f32 1.0, %v5514_v15  ;;  %v5516_v27 = vpop.eup %5515 }
 0xc5b   :  { %v3924_v48 = vmul.f32 %v5516_v27, %v3915_v43  ;;  %vm3929_vm1 = vweird.f32 %v5516_v27 }
 0xc5c   :  { %5517 = vrcp.f32 %v3917_v45  ;;  %vm3930_vm11 = vmor %vm3928_vm5, %vm3929_vm1  ;;  %v3964_v15 = vand.u32 2147483648, %v3917_v45  ;;  %vm3958_vm2 = vweird.f32 %v3917_v45  ;;  %v3962_v9 = vand.u32 2147483647, %v3917_v45 }
 0xc5d   :  { %v3925_v44 = vsub.f32 1.0, %v3924_v48  ;;  %v3840_v48 = vpop.f32.mrf.mxu0 }
 0xc5e   :  { %v3674_v25 = vpop.permute.xlu2 %3673  ;;  %v3965_v43 = vor.u32 1.1754944e-38, %v3964_v15  ;;  %vm3963_vm6 = vcmp.eq.f32.partialorder %v3962_v9, 8.507059e+37 }
 0xc5f   :  { %4051 = vrot.lane.b32.xlu0 %v3773_v3, %s5786_s17  ;;  %v3685_v34 = vmul.f32 %v3674_v25, %v8315_v54  ;;  %v3926_v4 = vmul.f32 %v5516_v27, %v3925_v44 }
 0xc61   :  { %4077 = vrot.lane.b32.xlu1 %v5508_v2, %s5786_s17  ;;  %v3927_v62 = vadd.f32 %v5516_v27, %v3926_v4  ;;  %v3935_v2 = vor.u32 1.1754944e-38, %v3934_v14 }
 0xc62   :  { %v5518_v24 = vpop.eup %5517 }
 0xc63   :  { %v3954_v54 = vmul.f32 %v5518_v24, %v3917_v45  ;;  %v3931_v20 = vsel %vm3930_vm11, %v5516_v27, %v3927_v62  ;;  %vm3959_vm12 = vweird.f32 %v5518_v24  ;;  %v9001_v45 = vld [vmem:[#allocation9_spill] sm:$0xff]  ;;  %v3676_v62 = vpop.permute.xlu0 %3675 }
 0xc64   :  { %v8380_v16 = vsel %vm3933_vm10, %v3935_v2, %v3931_v20  ;;  %vm3960_vm7 = vmor %vm3958_vm2, %vm3959_vm12  ;;  %v3879_v32 = vadd.f32 %v3840_v48, %v9001_v45  ;;  %v3686_v2 = vmul.f32 %v3676_v62, %v8337_v51 }
 0xc65   :  { %v3955_v18 = vsub.f32 1.0, %v3954_v54 }
 0xc66   :  { %v4074_v49 = vpop.permute.xlu2 %4073  ;;  %v3887_v17 = vadd.f32 %v3879_v32, %v8966_v39 }
 0xc67   :  { %v3956_v25 = vmul.f32 %v5518_v24, %v3955_v18 }
 0xc69   :  { %v3957_v3 = vadd.f32 %v5518_v24, %v3956_v25 }
 0xc6e   :  { %v3714_v41 = vpop.permute.xlu2 %3713 }
 0xc6f   :  { %v8372_v53 = vadd.f32 %v3714_v41, %v3685_v34  ;;  %v3961_v34 = vsel %vm3960_vm7, %v5518_v24, %v3957_v3 }
 0xc70   :  { %v8384_v31 = vsel %vm3963_vm6, %v3965_v43, %v3961_v34 }
 0xc71   :  { %5519 = vtanh.f32 %v8372_v53  ;;  %v4084_v41 = vmul.f32 %v4074_v49, %v8384_v31  ;;  %v5021_v49 = vmul.f32 -1.442695, %v3887_v17 }
 0xc73   :  { %5521 = vpow2.f32 %v5021_v49 }
 0xc76   :  { %v3766_v44 = vpop.permute.xlu2 %3765 }
 0xc77   :  { %v5520_v33 = vpop.eup %5519  ;;  %v3700_v11 = vpop.permute.xlu1 %3699  ;;  %v3775_v24 = vsel %vm3107_vm13, %v3766_v44, %v8119_v0 }
 0xc78   :  { %3737 = vrot.lane.b32.xlu0 %v5520_v33, %s5786_s17  ;;  %v3708_v52 = vmul.f32 %v3700_v11, %v8376_v46  ;;  %v3843_v33 = vpop.f32.mrf.mxu0 }
 0xc79   :  { %v5522_v63 = vpop.eup %5521 }
 0xc7a   :  { %3719 = vrot.lane.b32.xlu2 %v3708_v52, %s5786_s17  ;;  %v3919_v23 = vadd.f32 1.0, %v5522_v63 }
 0xc7c   :  { %v3994_v15 = vand.u32 2147483648, %v3919_v23  ;;  %vm3988_vm9 = vweird.f32 %v3919_v23  ;;  %v3992_v9 = vand.u32 2147483647, %v3919_v23 }
 0xc7e   :  { %vm3993_vm1 = vcmp.eq.f32.partialorder %v3992_v9, 8.507059e+37 }
 0xc7f   :  { %v4072_v10 = vpop.permute.xlu1 %4071 }
 0xc80   :  { %v4083_v40 = vmul.f32 %v4072_v10, %v8380_v16 }
 0xc82   :  { %4091 = vrot.lane.b32.xlu1 %v4083_v40, %s5786_s17 }
 0xc87   :  { %v3764_v27 = vpop.permute.xlu1 %3763 }
 0xc88   :  { %v3774_v35 = vsel %vm3106_vm15, %v3764_v27, %v8110_v37  ;;  %v9002_v37 = vld [vmem:[#allocation10_spill] sm:$0xff] }
 0xc89   :  { %4053 = vrot.lane.b32.xlu2 %v3774_v35, %s5786_s17  ;;  %v3881_v36 = vadd.f32 %v3843_v33, %v9002_v37 }
 0xc8a   :  { %4093 = vrot.lane.b32.xlu1 %v4084_v41, %s5786_s17  ;;  %v3995_v41 = vor.u32 1.1754944e-38, %v3994_v15 }
 0xc8b   :  { %v3889_v54 = vadd.f32 %v3881_v36, %v8966_v39 }
 0xc8d   :  { %v5023_v4 = vmul.f32 -1.442695, %v3889_v54 }
 0xc8f   :  { %5523 = vpow2.f32 %v5023_v4  ;;  %v3678_v34 = vpop.permute.xlu1 %3677 }
 0xc90   :  { %5525 = vrcp.f32 %v3919_v23 }
 0xc91   :  { %4055 = vrot.lane.b32.xlu2 %v3775_v24, %s5786_s17  ;;  %v3687_v24 = vmul.f32 %v3678_v34, %v8357_v55 }
 0xc95   :  { %v5524_v11 = vpop.eup %5523 }
 0xc96   :  { %v5526_v18 = vpop.eup %5525  ;;  %v3921_v52 = vadd.f32 1.0, %v5524_v11 }
 0xc97   :  { %v3984_v0 = vmul.f32 %v5526_v18, %v3919_v23  ;;  %vm3989_vm4 = vweird.f32 %v5526_v18 }
 0xc98   :  { %5527 = vrcp.f32 %v3921_v52  ;;  %vm3990_vm8 = vmor %vm3988_vm9, %vm3989_vm4  ;;  %v4024_v37 = vand.u32 2147483648, %v3921_v52  ;;  %vm4018_vm11 = vweird.f32 %v3921_v52  ;;  %v4022_v36 = vand.u32 2147483647, %v3921_v52 }
 0xc99   :  { %v3985_v14 = vsub.f32 1.0, %v3984_v0  ;;  %5529 = vpow2.f32 %v5002_v58 }
 0xc9a   :  { %v4025_v23 = vor.u32 1.1754944e-38, %v4024_v37  ;;  %vm4023_vm12 = vcmp.eq.f32.partialorder %v4022_v36, 8.507059e+37 }
 0xc9b   :  { %v3986_v25 = vmul.f32 %v5526_v18, %v3985_v14 }
 0xc9d   :  { %v3987_v3 = vadd.f32 %v5526_v18, %v3986_v25 }
 0xc9e   :  { %v5528_v20 = vpop.eup %5527 }
 0xc9f   :  { %v4014_v40 = vmul.f32 %v5528_v20, %v3921_v52  ;;  %v3991_v43 = vsel %vm3990_vm8, %v5526_v18, %v3987_v3  ;;  %v5530_v27 = vpop.eup %5529  ;;  %vm4019_vm5 = vweird.f32 %v5528_v20 }
 0xca0   :  { %v8405_v51 = vsel %vm3993_vm1, %v3995_v41, %v3991_v43  ;;  %v3538_v44 = vadd.f32 1.0, %v5530_v27  ;;  %vm4020_vm10 = vmor %vm4018_vm11, %vm4019_vm5 }
 0xca1   :  { %v4015_v60 = vsub.f32 1.0, %v4014_v40 }
 0xca2   :  { %v3571_v15 = vand.u32 2147483648, %v3538_v44  ;;  %vm3565_vm7 = vweird.f32 %v3538_v44  ;;  %v3569_v9 = vand.u32 2147483647, %v3538_v44 }
 0xca3   :  { %v4016_v32 = vmul.f32 %v5528_v20, %v4015_v60 }
 0xca4   :  { %v3572_v43 = vor.u32 1.1754944e-38, %v3571_v15  ;;  %vm3570_vm4 = vcmp.eq.f32.partialorder %v3569_v9, 8.507059e+37 }
 0xca5   :  { %v4017_v33 = vadd.f32 %v5528_v20, %v4016_v32 }
 0xca7   :  { %v4021_v55 = vsel %vm4020_vm10, %v5528_v20, %v4017_v33 }
 0xca8   :  { %v3680_v4 = vpop.permute.xlu2 %3679  ;;  %v8418_v18 = vsel %vm4023_vm12, %v4025_v23, %v4021_v55 }
 0xcb9   :  { %v3716_v39 = vpop.permute.xlu0 %3715 }
 0xcba   :  { %v8402_v10 = vadd.f32 %v3716_v39, %v3686_v2 }
 0xcbc   :  { %5531 = vtanh.f32 %v8402_v10 }
 0xcbd   :  { %5533 = vrcp.f32 %v3538_v44 }
 0xcc1   :  { %v4076_v35 = vpop.permute.xlu0 %4075 }
 0xcc2   :  { %v5532_v48 = vpop.eup %5531  ;;  %v4085_v45 = vmul.f32 %v4076_v35, %v8405_v51 }
 0xcc3   :  { %3739 = vrot.lane.b32.xlu0 %v5532_v48, %s5786_s17  ;;  %v5534_v11 = vpop.eup %5533 }
 0xcc4   :  { %4095 = vrot.lane.b32.xlu1 %v4085_v45, %s5786_s17  ;;  %v3561_v52 = vmul.f32 %v5534_v11, %v3538_v44  ;;  %vm3566_vm2 = vweird.f32 %v5534_v11 }
 0xcc5   :  { %vm3567_vm6 = vmor %vm3565_vm7, %vm3566_vm2 }
 0xcc6   :  { %v3562_v20 = vsub.f32 1.0, %v3561_v52 }
 0xcc8   :  { %v3563_v2 = vmul.f32 %v5534_v11, %v3562_v20 }
 0xcc9   :  { %v3768_v54 = vpop.permute.xlu0 %3767 }
 0xcca   :  { %v3776_v63 = vsel %vm3108_vm14, %v3768_v54, %v8137_v22  ;;  %v3688_v22 = vmul.f32 %v3680_v4, %v8376_v46  ;;  %v3564_v40 = vadd.f32 %v5534_v11, %v3563_v2  ;;  %v5006_v54 = vmul.f32 -1.442695, %v8288_v29 }
 0xccb   :  { %v3718_v17 = vpop.permute.xlu1 %3717  ;;  %4057 = vrot.lane.b32.xlu2 %v3776_v63, %s5786_s17  ;;  %v5008_v63 = vmul.f32 -1.442695, %v8297_v19 }
 0xccc   :  { %v8411_v49 = vadd.f32 %v3718_v17, %v3687_v24  ;;  %v3568_v34 = vsel %vm3567_vm6, %v5534_v11, %v3564_v40 }
 0xccd   :  { %v3573_v46 = vsel %vm3570_vm4, %v3572_v43, %v3568_v34 }
 0xcce   :  { %5535 = vtanh.f32 %v8411_v49 }
 0xcd1   :  { %v4052_v3 = vpop.permute.xlu0 %4051 }
 0xcd2   :  { %v4063_v35 = vmul.f32 %v4052_v3, %v8380_v16 }
 0xcd3   :  { %v4078_v0 = vpop.permute.xlu1 %4077 }
 0xcd4   :  { %v5536_v62 = vpop.eup %5535  ;;  %v4086_v14 = vmul.f32 %v4078_v0, %v8418_v18  ;;  %v3720_v58 = vpop.permute.xlu2 %3719 }
 0xcd5   :  { %3741 = vrot.lane.b32.xlu0 %v5536_v62, %s5786_s17  ;;  %v8424_v25 = vadd.f32 %v3720_v58, %v3688_v22 }
 0xcd6   :  { %4097 = vrot.lane.b32.xlu1 %v4086_v14, %s5786_s17 }
 0xcd7   :  { %5537 = vtanh.f32 %v8424_v25 }
 0xcdd   :  { %v5538_v39 = vpop.eup %5537 }
 0xcde   :  { %3743 = vrot.lane.b32.xlu2 %v5538_v39, %s5786_s17 }
 0xce3   :  { %v4054_v32 = vpop.permute.xlu2 %4053 }
 0xce4   :  { %v4064_v44 = vmul.f32 %v4054_v32, %v8384_v31 }
 0xcea   :  { %v3738_v60 = vpop.permute.xlu0 %3737 }
 0xceb   :  { %v3749_v27 = vmul.f32 %v3738_v60, %v3573_v46  ;;  %v4056_v20 = vpop.permute.xlu2 %4055 }
 0xcec   :  { %v4065_v9 = vmul.f32 %v4056_v20, %v8405_v51 }
 0xced   :  { %v8431_v41 = vsel %vm3105_vm3, %v3749_v27, %v8169_v61  ;;  %v5004_v61 = vmul.f32 -1.442695, %v8271_v21 }
 0xcee   :  { %4135 = vrot.lane.b32.xlu1 %v8431_v41, %s5786_s17 }
 0xcf4   :  { %v4092_v48 = vpop.permute.xlu1 %4091 }
 0xcf5   :  { %v4103_v45 = vadd.f32 %v4092_v48, %v4063_v35 }
 0xcf7   :  { %5539 = vtanh.f32 %v4103_v45 }
 0xcfc   :  { %v4094_v24 = vpop.permute.xlu1 %4093 }
 0xcfd   :  { %v5540_v17 = vpop.eup %5539  ;;  %v4104_v33 = vadd.f32 %v4094_v24, %v4064_v44 }
 0xcfe   :  { %4115 = vrot.lane.b32.xlu0 %v5540_v17, %s5786_s17 }
 0xcff   :  { %5541 = vtanh.f32 %v4104_v33 }
 0xd00   :  { %5543 = vpow2.f32 %v5004_v61 }
 0xd05   :  { %v5542_v37 = vpop.eup %5541 }
 0xd06   :  { %4117 = vrot.lane.b32.xlu2 %v5542_v37, %s5786_s17  ;;  %v5544_v36 = vpop.eup %5543 }
 0xd07   :  { %v3540_v16 = vadd.f32 1.0, %v5544_v36 }
 0xd09   :  { %5545 = vrcp.f32 %v3540_v16  ;;  %v3601_v58 = vand.u32 2147483648, %v3540_v16  ;;  %vm3595_vm8 = vweird.f32 %v3540_v16  ;;  %v3599_v2 = vand.u32 2147483647, %v3540_v16 }
 0xd0a   :  { %5547 = vpow2.f32 %v5006_v54 }
 0xd0b   :  { %5549 = vpow2.f32 %v5008_v63  ;;  %v3602_v40 = vor.u32 1.1754944e-38, %v3601_v58  ;;  %vm3600_vm5 = vcmp.eq.f32.partialorder %v3599_v2, 8.507059e+37 }
 0xd0f   :  { %v5546_v31 = vpop.eup %5545 }
 0xd10   :  { %v5548_v55 = vpop.eup %5547  ;;  %v3591_v0 = vmul.f32 %v5546_v31, %v3540_v16  ;;  %vm3596_vm9 = vweird.f32 %v5546_v31 }
 0xd11   :  { %v5550_v4 = vpop.eup %5549  ;;  %v3542_v23 = vadd.f32 1.0, %v5548_v55  ;;  %vm3597_vm1 = vmor %vm3595_vm8, %vm3596_vm9 }
 0xd12   :  { %v3544_v11 = vadd.f32 1.0, %v5550_v4  ;;  %v3592_v62 = vsub.f32 1.0, %v3591_v0 }
 0xd13   :  { %5551 = vrcp.f32 %v3542_v23  ;;  %v3631_v24 = vand.u32 2147483648, %v3542_v23  ;;  %vm3625_vm12 = vweird.f32 %v3542_v23  ;;  %v3629_v33 = vand.u32 2147483647, %v3542_v23 }
 0xd14   :  { %5553 = vrcp.f32 %v3544_v11  ;;  %v3593_v21 = vmul.f32 %v5546_v31, %v3592_v62  ;;  %v3661_v17 = vand.u32 2147483648, %v3544_v11  ;;  %vm3655_vm2 = vweird.f32 %v3544_v11 }
 0xd15   :  { %v3659_v37 = vand.u32 2147483647, %v3544_v11  ;;  %v3632_v16 = vor.u32 1.1754944e-38, %v3631_v24  ;;  %vm3630_vm4 = vcmp.eq.f32.partialorder %v3629_v33, 8.507059e+37 }
 0xd16   :  { %v3594_v22 = vadd.f32 %v5546_v31, %v3593_v21  ;;  %v3662_v54 = vor.u32 1.1754944e-38, %v3661_v17 }
 0xd17   :  { %vm3660_vm9 = vcmp.eq.f32.partialorder %v3659_v37, 8.507059e+37 }
 0xd18   :  { %v3598_v39 = vsel %vm3597_vm1, %v5546_v31, %v3594_v22 }
 0xd19   :  { %v5552_v14 = vpop.eup %5551  ;;  %v3603_v34 = vsel %vm3600_vm5, %v3602_v40, %v3598_v39 }
 0xd1a   :  { %v5554_v52 = vpop.eup %5553  ;;  %v3621_v29 = vmul.f32 %v5552_v14, %v3542_v23  ;;  %vm3626_vm11 = vweird.f32 %v5552_v14  ;;  %v5018_v23 = vmul.f32 -1.442695, %v8310_v30 }
 0xd1b   :  { %v3651_v19 = vmul.f32 %v5554_v52, %v3544_v11  ;;  %vm3656_vm10 = vweird.f32 %v5554_v52  ;;  %vm3627_vm7 = vmor %vm3625_vm12, %vm3626_vm11 }
 0xd1c   :  { %v3622_v3 = vsub.f32 1.0, %v3621_v29  ;;  %vm3657_vm6 = vmor %vm3655_vm2, %vm3656_vm10 }
 0xd1d   :  { %v3652_v15 = vsub.f32 1.0, %v3651_v19 }
 0xd1e   :  { %v3623_v27 = vmul.f32 %v5552_v14, %v3622_v3 }
 0xd1f   :  { %v3653_v48 = vmul.f32 %v5554_v52, %v3652_v15 }
 0xd20   :  { %v3624_v44 = vadd.f32 %v5552_v14, %v3623_v27 }
 0xd21   :  { %v3654_v51 = vadd.f32 %v5554_v52, %v3653_v48 }
 0xd22   :  { %v3628_v61 = vsel %vm3627_vm7, %v5552_v14, %v3624_v44 }
 0xd23   :  { %v3633_v55 = vsel %vm3630_vm4, %v3632_v16, %v3628_v61 }
 0xd25   :  { %v4058_v45 = vpop.permute.xlu2 %4057 }
 0xd26   :  { %v4066_v31 = vmul.f32 %v4058_v45, %v8418_v18 }
 0xd35   :  { %v3740_v43 = vpop.permute.xlu0 %3739 }
 0xd36   :  { %v3750_v46 = vmul.f32 %v3740_v43, %v3603_v34  ;;  %v4096_v60 = vpop.permute.xlu1 %4095  ;;  %v5022_v43 = vmul.f32 -1.442695, %v8335_v50 }
 0xd37   :  { %v4105_v35 = vadd.f32 %v4096_v60, %v4065_v9 }
 0xd38   :  { %v8446_v32 = vsel %vm3106_vm15, %v3750_v46, %v8183_v38  ;;  %v3658_v38 = vsel %vm3657_vm6, %v5554_v52, %v3654_v51  ;;  %v3744_v63 = vpop.permute.xlu2 %3743 }
 0xd39   :  { %5555 = vtanh.f32 %v4105_v35  ;;  %4137 = vrot.lane.b32.xlu0 %v8446_v32, %s5786_s17  ;;  %v3663_v0 = vsel %vm3660_vm9, %v3662_v54, %v3658_v38  ;;  %v5024_v35 = vmul.f32 -1.442695, %v8355_v56 }
 0xd3a   :  { %v3752_v21 = vmul.f32 %v3744_v63, %v3663_v0 }
 0xd3c   :  { %v8463_v18 = vsel %vm3108_vm14, %v3752_v21, %v8220_v1 }
 0xd3f   :  { %v5556_v36 = vpop.eup %5555 }
 0xd40   :  { %4119 = vrot.lane.b32.xlu1 %v5556_v36, %s5786_s17 }
 0xd47   :  { %v3742_v4 = vpop.permute.xlu0 %3741 }
 0xd48   :  { %v3751_v11 = vmul.f32 %v3742_v4, %v3633_v55  ;;  %v4098_v62 = vpop.permute.xlu1 %4097  ;;  %4141 = vrot.lane.b32.xlu1 %v8463_v18, %s5786_s17 }
 0xd49   :  { %v4106_v14 = vadd.f32 %v4098_v62, %v4066_v31 }
 0xd4a   :  { %v8456_v52 = vsel %vm3107_vm13, %v3751_v11, %v8197_v47 }
 0xd4b   :  { %5557 = vtanh.f32 %v4106_v14  ;;  %4139 = vrot.lane.b32.xlu2 %v8456_v52, %s5786_s17 }
 0xd4c   :  { %5559 = vpow2.f32 %v5018_v23 }
 0xd50   :  { %3789 = vrot.lane.b32.xlu1 %v8411_v49, %s5786_s17 }
 0xd51   :  { %v5558_v30 = vpop.eup %5557 }
 0xd52   :  { %v5560_v22 = vpop.eup %5559  ;;  %4121 = vrot.lane.b32.xlu0 %v5558_v30, %s5786_s17 }
 0xd53   :  { %3791 = vrot.lane.b32.xlu2 %v8424_v25, %s5786_s17  ;;  %v3916_v47 = vadd.f32 1.0, %v5560_v22 }
 0xd55   :  { %5561 = vrcp.f32 %v3916_v47  ;;  %v3949_v2 = vand.u32 2147483648, %v3916_v47  ;;  %vm3943_vm1 = vweird.f32 %v3916_v47  ;;  %v3947_v39 = vand.u32 2147483647, %v3916_v47 }
 0xd57   :  { %v3950_v25 = vor.u32 1.1754944e-38, %v3949_v2  ;;  %vm3948_vm11 = vcmp.eq.f32.partialorder %v3947_v39, 8.507059e+37 }
 0xd5a   :  { %3787 = vrot.lane.b32.xlu0 %v8402_v10, %s5786_s17  ;;  %v5020_v10 = vmul.f32 -1.442695, %v8294_v57 }
 0xd5b   :  { %v5562_v1 = vpop.eup %5561 }
 0xd5c   :  { %v3939_v29 = vmul.f32 %v5562_v1, %v3916_v47  ;;  %vm3944_vm8 = vweird.f32 %v5562_v1  ;;  %5563 = vpow2.f32 %v5020_v10 }
 0xd5d   :  { %vm3945_vm5 = vmor %vm3943_vm1, %vm3944_vm8  ;;  %5565 = vpow2.f32 %v5022_v43 }
 0xd5e   :  { %v3940_v58 = vsub.f32 1.0, %v3939_v29 }
 0xd60   :  { %v3941_v19 = vmul.f32 %v5562_v1, %v3940_v58  ;;  %v4136_v9 = vpop.permute.xlu1 %4135  ;;  %v4118_v54 = vpop.permute.xlu2 %4117 }
 0xd62   :  { %v3942_v20 = vadd.f32 %v5562_v1, %v3941_v19  ;;  %v5564_v46 = vpop.eup %5563 }
 0xd63   :  { %v3918_v60 = vadd.f32 1.0, %v5564_v46  ;;  %v5566_v27 = vpop.eup %5565 }
 0xd64   :  { %v3946_v3 = vsel %vm3945_vm5, %v5562_v1, %v3942_v20  ;;  %v3920_v48 = vadd.f32 1.0, %v5566_v27 }
 0xd65   :  { %v3951_v40 = vsel %vm3948_vm11, %v3950_v25, %v3946_v3  ;;  %5567 = vrcp.f32 %v3918_v60  ;;  %v3979_v61 = vand.u32 2147483648, %v3918_v60  ;;  %vm3973_vm12 = vweird.f32 %v3918_v60 }
 0xd66   :  { %5569 = vpow2.f32 %v5024_v35  ;;  %v3977_v38 = vand.u32 2147483647, %v3918_v60  ;;  %v4009_v21 = vand.u32 2147483648, %v3920_v48  ;;  %vm4003_vm4 = vweird.f32 %v3920_v48 }
 0xd67   :  { %5571 = vrcp.f32 %v3920_v48  ;;  %v3980_v16 = vor.u32 1.1754944e-38, %v3979_v61  ;;  %v4007_v14 = vand.u32 2147483647, %v3920_v48 }
 0xd68   :  { %vm3978_vm7 = vcmp.eq.f32.partialorder %v3977_v38, 8.507059e+37  ;;  %v4010_v47 = vor.u32 1.1754944e-38, %v4009_v21 }
 0xd69   :  { %vm4008_vm8 = vcmp.eq.f32.partialorder %v4007_v14, 8.507059e+37 }
 0xd6b   :  { %v5568_v45 = vpop.eup %5567 }
 0xd6c   :  { %v3969_v44 = vmul.f32 %v5568_v45, %v3918_v60  ;;  %v5570_v24 = vpop.eup %5569  ;;  %vm3974_vm10 = vweird.f32 %v5568_v45 }
 0xd6d   :  { %v5572_v17 = vpop.eup %5571  ;;  %v3922_v33 = vadd.f32 1.0, %v5570_v24  ;;  %vm3975_vm2 = vmor %vm3973_vm12, %vm3974_vm10 }
 0xd6e   :  { %v3970_v51 = vsub.f32 1.0, %v3969_v44  ;;  %v3999_v37 = vmul.f32 %v5572_v17, %v3920_v48  ;;  %vm4004_vm6 = vweird.f32 %v5572_v17 }
 0xd6f   :  { %5573 = vrcp.f32 %v3922_v33  ;;  %vm4005_vm9 = vmor %vm4003_vm4, %vm4004_vm6  ;;  %v4039_v3 = vand.u32 2147483648, %v3922_v33  ;;  %vm4033_vm5 = vweird.f32 %v3922_v33  ;;  %v4037_v25 = vand.u32 2147483647, %v3922_v33 }
 0xd70   :  { %v4116_v15 = vpop.permute.xlu0 %4115  ;;  %v3971_v57 = vmul.f32 %v5568_v45, %v3970_v51  ;;  %v4000_v36 = vsub.f32 1.0, %v3999_v37 }
 0xd71   :  { %v4127_v49 = vmul.f32 %v4116_v15, %v3951_v40  ;;  %v4040_v15 = vor.u32 1.1754944e-38, %v4039_v3  ;;  %vm4038_vm10 = vcmp.eq.f32.partialorder %v4037_v25, 8.507059e+37 }
 0xd72   :  { %v3972_v50 = vadd.f32 %v5568_v45, %v3971_v57  ;;  %v4001_v63 = vmul.f32 %v5572_v17, %v4000_v36 }
 0xd73   :  { %v4147_v34 = vsel %vm117_vm0, %v4127_v49, %v4136_v9 }
 0xd74   :  { %4167 = vmatmul.f32.vlgmr.msra.gmra.mxu2 %v4147_v34  ;;  %4196 = vmatmul.f32.vlgmr.msra.gmra.mxu3 %v4147_v34  ;;  %v3976_v56 = vsel %vm3975_vm2, %v5568_v45, %v3972_v50  ;;  %v4002_v0 = vadd.f32 %v5572_v17, %v4001_v63 }
 0xd75   :  { %v5574_v31 = vpop.eup %5573  ;;  %v3981_v55 = vsel %vm3978_vm7, %v3980_v16, %v3976_v56 }
 0xd76   :  { %v4128_v4 = vmul.f32 %v4118_v54, %v3981_v55  ;;  %v4029_v11 = vmul.f32 %v5574_v31, %v3922_v33  ;;  %v4006_v30 = vsel %vm4005_vm9, %v5572_v17, %v4002_v0  ;;  %vm4034_vm1 = vweird.f32 %v5574_v31 }
 0xd77   :  { %v4011_v1 = vsel %vm4008_vm8, %v4010_v47, %v4006_v30  ;;  %vm4035_vm11 = vmor %vm4033_vm5, %vm4034_vm1 }
 0xd78   :  { %v4030_v22 = vsub.f32 1.0, %v4029_v11 }
 0xd7a   :  { %v4031_v19 = vmul.f32 %v5574_v31, %v4030_v22 }
 0xd7c   :  { %v4032_v39 = vadd.f32 %v5574_v31, %v4031_v19 }
 0xd7e   :  { %v4036_v40 = vsel %vm4035_vm11, %v5574_v31, %v4032_v39 }
 0xd7f   :  { %v4041_v49 = vsel %vm4038_vm10, %v4040_v15, %v4036_v40 }
 0xda5   :  { %v4140_v20 = vpop.permute.xlu2 %4139 }
 0xdab   :  { %v4138_v23 = vpop.permute.xlu0 %4137 }
 0xdac   :  { %v4148_v62 = vsel %vm117_vm0, %v4128_v4, %v4138_v23 }
 0xdad   :  { %4170 = vmatmul.f32.gmra.mxu2 %v4148_v62  ;;  %4199 = vmatmul.f32.gmra.mxu3 %v4148_v62  ;;  %v3792_v44 = vpop.permute.xlu2 %3791 }
 0xdae   :  { %v3800_v51 = vsel %vm3108_vm14, %v3792_v44, %v8349_v26 }
 0xdb2   :  { %v4120_v29 = vpop.permute.xlu1 %4119 }
 0xdb3   :  { %v4129_v58 = vmul.f32 %v4120_v29, %v4011_v1 }
 0xdb5   :  { %v4149_v2 = vsel %vm117_vm0, %v4129_v58, %v4140_v20 }
 0xdb6   :  { %4173 = vmatmul.f32.gmra.mxu2 %v4149_v2  ;;  %4202 = vmatmul.f32.gmra.mxu3 %v4149_v2 }
 0xdba   :  { %v4142_v10 = vpop.permute.xlu1 %4141 }
 0xdc2   :  { %v3790_v50 = vpop.permute.xlu1 %3789 }
 0xdc3   :  { %v3799_v61 = vsel %vm3107_vm13, %v3790_v50, %v8328_v5 }
 0xdc4   :  { %v4122_v9 = vpop.permute.xlu0 %4121 }
 0xdc5   :  { %v4130_v34 = vmul.f32 %v4122_v9, %v4041_v49 }
 0xdc7   :  { %v4150_v43 = vsel %vm117_vm0, %v4130_v34, %v4142_v10 }
 0xdc8   :  { %4176 = vmatmul.f32.gmra.mxu2 %v4150_v43  ;;  %4205 = vmatmul.f32.gmra.mxu3 %v4150_v43 }
 0xdcc   :  { %v3788_v33 = vpop.permute.xlu0 %3787 }
 0xdcd   :  { %v3798_v37 = vsel %vm3106_vm15, %v3788_v33, %v8283_v42 }
 0xdf7   :  { %v4197_v46 = vpop.f32.mrf.mxu3  ;;  %v4168_v42 = vpop.f32.mrf.mxu2 }
 0xdf8   :  { %v8506_v7 = vadd.f32 %v4197_v46, %v6427_v13  ;;  %v4169_v22 = vadd.f32 %v4168_v42, %v6449_v59 }
 0xdfa   :  { %v5025_v19 = vmul.f32 -1.442695, %v4169_v22 }
 0xe30   :  { %v4200_v60 = vpop.f32.mrf.mxu3 }
 0xe31   :  { %v8482_v27 = vadd.f32 %v4200_v60, %v6427_v13 }
 0xe33   :  { %5575 = vtanh.f32 %v8482_v27 }
 0xe39   :  { %v5576_v35 = vpop.eup %5575  ;;  %v4203_v48 = vpop.f32.mrf.mxu3 }
 0xe3a   :  { %v8486_v45 = vadd.f32 %v4203_v48, %v6427_v13  ;;  %4391 = vrot.lane.b32.xlu1 %v5576_v35, %s5786_s17 }
 0xe3c   :  { %5577 = vtanh.f32 %v8486_v45 }
 0xe42   :  { %v5578_v24 = vpop.eup %5577  ;;  %4375 = vrot.lane.b32.xlu1 %v3800_v51, %s5786_s17 }
 0xe43   :  { %4393 = vrot.lane.b32.xlu2 %v5578_v24, %s5786_s17 }
 0xe4a   :  { %4371 = vrot.lane.b32.xlu1 %v3798_v37, %s5786_s17 }
 0xe4b   :  { %v4206_v17 = vpop.f32.mrf.mxu3  ;;  %3785 = vrot.lane.b32.xlu2 %v8372_v53, %s5786_s17  ;;  %v4171_v53 = vpop.f32.mrf.mxu2 }
 0xe4c   :  { %v8496_v57 = vadd.f32 %v4206_v17, %v6427_v13  ;;  %v4172_v16 = vadd.f32 %v4171_v53, %v6449_v59 }
 0xe4e   :  { %5579 = vtanh.f32 %v8496_v57  ;;  %v5027_v63 = vmul.f32 -1.442695, %v4172_v16 }
 0xe4f   :  { %5581 = vtanh.f32 %v8506_v7 }
 0xe53   :  { %4373 = vrot.lane.b32.xlu2 %v3799_v61, %s5786_s17  ;;  %v4174_v36 = vpop.f32.mrf.mxu2 }
 0xe54   :  { %v5580_v26 = vpop.eup %5579  ;;  %v4175_v13 = vadd.f32 %v4174_v36, %v6449_v59 }
 0xe55   :  { %4395 = vrot.lane.b32.xlu0 %v5580_v26, %s5786_s17  ;;  %v5582_v28 = vpop.eup %5581 }
 0xe56   :  { %v5029_v38 = vmul.f32 -1.442695, %v4175_v13 }
 0xe58   :  { %5583 = vpow2.f32 %v5029_v38 }
 0xe5b   :  { %v4177_v4 = vpop.f32.mrf.mxu2 }
 0xe5c   :  { %v4178_v0 = vadd.f32 %v4177_v4, %v6449_v59 }
 0xe5d   :  { %4389 = vrot.lane.b32.xlu0 %v5582_v28, %s5786_s17 }
 0xe5e   :  { %v5584_v56 = vpop.eup %5583  ;;  %v5031_v62 = vmul.f32 -1.442695, %v4178_v0 }
 0xe5f   :  { %v4237_v54 = vadd.f32 1.0, %v5584_v56 }
 0xe61   :  { %5585 = vrcp.f32 %v4237_v54  ;;  %v4312_v30 = vand.u32 2147483648, %v4237_v54  ;;  %vm4306_vm13 = vweird.f32 %v4237_v54  ;;  %v4310_v47 = vand.u32 2147483647, %v4237_v54 }
 0xe62   :  { %5587 = vpow2.f32 %v5027_v63 }
 0xe63   :  { %v4313_v58 = vor.u32 1.1754944e-38, %v4312_v30  ;;  %vm4311_vm12 = vcmp.eq.f32.partialorder %v4310_v47, 8.507059e+37 }
 0xe67   :  { %v5586_v8 = vpop.eup %5585 }
 0xe68   :  { %v5588_v5 = vpop.eup %5587  ;;  %v4302_v31 = vmul.f32 %v5586_v8, %v4237_v54  ;;  %vm4307_vm15 = vweird.f32 %v5586_v8 }
 0xe69   :  { %v4235_v55 = vadd.f32 1.0, %v5588_v5  ;;  %vm4308_vm14 = vmor %vm4306_vm13, %vm4307_vm15 }
 0xe6a   :  { %v4303_v23 = vsub.f32 1.0, %v4302_v31 }
 0xe6b   :  { %5589 = vrcp.f32 %v4235_v55  ;;  %v4282_v9 = vand.u32 2147483648, %v4235_v55  ;;  %vm4276_vm7 = vweird.f32 %v4235_v55  ;;  %v4280_v34 = vand.u32 2147483647, %v4235_v55 }
 0xe6c   :  { %v4304_v11 = vmul.f32 %v5586_v8, %v4303_v23  ;;  %5591 = vpow2.f32 %v5031_v62 }
 0xe6d   :  { %5593 = vpow2.f32 %v5025_v19  ;;  %v4283_v46 = vor.u32 1.1754944e-38, %v4282_v9  ;;  %vm4281_vm4 = vcmp.eq.f32.partialorder %v4280_v34, 8.507059e+37  ;;  %v5028_v9 = vmul.f32 -1.442695, %v8482_v27 }
 0xe6e   :  { %v4305_v14 = vadd.f32 %v5586_v8, %v4304_v11  ;;  %v5026_v34 = vmul.f32 -1.442695, %v8506_v7 }
 0xe70   :  { %v4309_v29 = vsel %vm4308_vm14, %v5586_v8, %v4305_v14 }
 0xe71   :  { %v5590_v21 = vpop.eup %5589  ;;  %v8519_v20 = vsel %vm4311_vm12, %v4313_v58, %v4309_v29 }
 0xe72   :  { %v4272_v1 = vmul.f32 %v5590_v21, %v4235_v55  ;;  %v5592_v3 = vpop.eup %5591  ;;  %vm4277_vm2 = vweird.f32 %v5590_v21 }
 0xe73   :  { %v4239_v59 = vadd.f32 1.0, %v5592_v3  ;;  %v5594_v49 = vpop.eup %5593  ;;  %vm4278_vm6 = vmor %vm4276_vm7, %vm4277_vm2 }
 0xe74   :  { %v4273_v39 = vsub.f32 1.0, %v4272_v1  ;;  %v4233_v10 = vadd.f32 1.0, %v5594_v49  ;;  %v5032_v49 = vmul.f32 -1.442695, %v8496_v57 }
 0xe75   :  { %5595 = vrcp.f32 %v4239_v59  ;;  %v4342_v61 = vand.u32 2147483648, %v4239_v59  ;;  %vm4336_vm8 = vweird.f32 %v4239_v59  ;;  %v4340_v28 = vand.u32 2147483647, %v4239_v59 }
 0xe76   :  { %v4274_v40 = vmul.f32 %v5590_v21, %v4273_v39  ;;  %5597 = vrcp.f32 %v4233_v10  ;;  %v4252_v54 = vand.u32 2147483648, %v4233_v10  ;;  %vm4246_vm10 = vweird.f32 %v4233_v10 }
 0xe77   :  { %v4343_v36 = vor.u32 1.1754944e-38, %v4342_v61  ;;  %vm4341_vm5 = vcmp.eq.f32.partialorder %v4340_v28, 8.507059e+37  ;;  %v4250_v63 = vand.u32 2147483647, %v4233_v10 }
 0xe78   :  { %v4275_v15 = vadd.f32 %v5590_v21, %v4274_v40  ;;  %v4253_v5 = vor.u32 1.1754944e-38, %v4252_v54  ;;  %v4497_v54 = vld [vmem:[%s8900_s4 + $0x80] sm:$0xff] }
 0xe79   :  { %vm4251_vm13 = vcmp.eq.f32.partialorder %v4250_v63, 8.507059e+37 }
 0xe7a   :  { %v4279_v43 = vsel %vm4278_vm6, %v5590_v21, %v4275_v15  ;;  %v5030_v15 = vmul.f32 -1.442695, %v8486_v45 }
 0xe7b   :  { %v5596_v60 = vpop.eup %5595  ;;  %v4284_v48 = vsel %vm4281_vm4, %v4283_v46, %v4279_v43 }
 0xe7c   :  { %v4332_v51 = vmul.f32 %v5596_v60, %v4239_v59  ;;  %v5598_v17 = vpop.eup %5597  ;;  %vm4337_vm9 = vweird.f32 %v5596_v60 }
 0xe7d   :  { %v4242_v37 = vmul.f32 %v5598_v17, %v4233_v10  ;;  %vm4338_vm1 = vmor %vm4336_vm8, %vm4337_vm9  ;;  %vm4247_vm11 = vweird.f32 %v5598_v17 }
 0xe7e   :  { %v4333_v24 = vsub.f32 1.0, %v4332_v51  ;;  %vm4248_vm15 = vmor %vm4246_vm10, %vm4247_vm11 }
 0xe7f   :  { %v4243_v50 = vsub.f32 1.0, %v4242_v37 }
 0xe80   :  { %v4334_v33 = vmul.f32 %v5596_v60, %v4333_v24 }
 0xe81   :  { %v4244_v53 = vmul.f32 %v5598_v17, %v4243_v50 }
 0xe82   :  { %v4335_v26 = vadd.f32 %v5596_v60, %v4334_v33 }
 0xe83   :  { %v4245_v16 = vadd.f32 %v5598_v17, %v4244_v53 }
 0xe84   :  { %v4339_v42 = vsel %vm4338_vm1, %v5596_v60, %v4335_v26 }
 0xe85   :  { %v4344_v13 = vsel %vm4341_vm5, %v4343_v36, %v4339_v42  ;;  %v4249_v8 = vsel %vm4248_vm15, %v5598_v17, %v4245_v16 }
 0xe86   :  { %v4254_v55 = vsel %vm4251_vm13, %v4253_v5, %v4249_v8 }
 0xe9d   :  { %v4394_v2 = vpop.permute.xlu2 %4393 }
 0xe9e   :  { %v4403_v25 = vmul.f32 %v4394_v2, %v8519_v20 }
 0xea0   :  { %4413 = vrot.lane.b32.xlu2 %v4403_v25, %s5786_s17 }
 0xea5   :  { %v3786_v31 = vpop.permute.xlu2 %3785 }
 0xea6   :  { %v3797_v0 = vsel %vm3105_vm3, %v3786_v31, %v8302_v12 }
 0xeac   :  { %v4392_v35 = vpop.permute.xlu1 %4391 }
 0xead   :  { %v4402_v44 = vmul.f32 %v4392_v35, %v4284_v48  ;;  %v4374_v11 = vpop.permute.xlu2 %4373 }
 0xeae   :  { %v4383_v62 = vmul.f32 %v4374_v11, %v8519_v20 }
 0xeaf   :  { %4411 = vrot.lane.b32.xlu1 %v4402_v44, %s5786_s17 }
 0xeb4   :  { %v4376_v22 = vpop.permute.xlu1 %4375 }
 0xeb5   :  { %v4384_v12 = vmul.f32 %v4376_v22, %v4344_v13 }
 0xebc   :  { %v4372_v47 = vpop.permute.xlu1 %4371 }
 0xebd   :  { %v4382_v1 = vmul.f32 %v4372_v47, %v4284_v48 }
 0xec7   :  { %v4396_v38 = vpop.permute.xlu0 %4395 }
 0xec8   :  { %v4404_v56 = vmul.f32 %v4396_v38, %v4344_v13 }
 0xeca   :  { %4415 = vrot.lane.b32.xlu0 %v4404_v56, %s5786_s17 }
 0xecf   :  { %v4390_v4 = vpop.permute.xlu0 %4389 }
 0xed0   :  { %v4401_v23 = vmul.f32 %v4390_v4, %v4254_v55 }
 0xed2   :  { %4409 = vrot.lane.b32.xlu2 %v4401_v23, %s5786_s17  ;;  %4369 = vrot.lane.b32.xlu0 %v3797_v0, %s5786_s17 }
 0xefa   :  { %v4414_v21 = vpop.permute.xlu2 %4413 }
 0xefb   :  { %v4423_v14 = vadd.f32 %v4414_v21, %v4383_v62  ;;  %v4484_v21 = vld [vmem:[%s8900_s4 + $0x18] sm:$0xff] }
 0xefd   :  { %5599 = vtanh.f32 %v4423_v14 }
 0xf03   :  { %v5600_v30 = vpop.eup %5599 }
 0xf04   :  { %4437 = vrot.lane.b32.xlu1 %v5600_v30, %s5786_s17 }
 0xf21   :  { %v4412_v29 = vpop.permute.xlu1 %4411 }
 0xf22   :  { %v4422_v58 = vadd.f32 %v4412_v29, %v4382_v1 }
 0xf24   :  { %5601 = vtanh.f32 %v4422_v58 }
 0xf2a   :  { %v5602_v6 = vpop.eup %5601 }
 0xf2b   :  { %4435 = vrot.lane.b32.xlu2 %v5602_v6, %s5786_s17 }
 0xf2c   :  { %v4410_v25 = vpop.permute.xlu2 %4409 }
 0xf3c   :  { %v4416_v19 = vpop.permute.xlu0 %4415 }
 0xf3d   :  { %v4424_v2 = vadd.f32 %v4416_v19, %v4384_v12  ;;  %v5755_v12 = vld [vmem:[%s8896_s0 + $0xd8] sm:$0xff] }
 0xf3e   :  { %vm3804_vm11 = vcmp.gt.f32.partialorder %v5755_v12, 5.0  ;;  %v4628_v12 = vld [vmem:[%s8900_s4 + $0x1c8] sm:$0xff] }
 0xf3f   :  { %5603 = vtanh.f32 %v4424_v2 }
 0xf44   :  { %v4370_v20 = vpop.permute.xlu0 %4369 }
 0xf45   :  { %v5604_v39 = vpop.eup %5603  ;;  %v4381_v3 = vmul.f32 %v4370_v20, %v4254_v55  ;;  %v4487_v55 = vld [vmem:[%s8900_s4 + $0x30] sm:$0xff] }
 0xf46   :  { %4439 = vrot.lane.b32.xlu0 %v5604_v39, %s5786_s17  ;;  %v5756_v39 = vld [vmem:[%s8896_s0 + $0xd0] sm:$0xff] }
 0xf47   :  { %v4421_v59 = vadd.f32 %v4410_v25, %v4381_v3  ;;  %vm3803_vm15 = vcmp.gt.f32.partialorder %v5756_v39, 5.0 }
 0xf49   :  { %5605 = vtanh.f32 %v4421_v59 }
 0xf4a   :  { %5607 = vpow2.f32 %v5030_v15 }
 0xf4b   :  { %5609 = vpow2.f32 %v5032_v49 }
 0xf4c   :  { %5611 = vpow2.f32 %v5028_v9 }
 0xf4d   :  { %5613 = vpow2.f32 %v5026_v34 }
 0xf4f   :  { %v5606_v40 = vpop.eup %5605 }
 0xf50   :  { %4433 = vrot.lane.b32.xlu0 %v5606_v40, %s5786_s17  ;;  %v5608_v10 = vpop.eup %5607  ;;  %v5757_v40 = vld [vmem:[%s8896_s0 + $0xc8] sm:$0xff] }
 0xf51   :  { %v5610_v43 = vpop.eup %5609  ;;  %v4238_v60 = vadd.f32 1.0, %v5608_v10 }
 0xf52   :  { %v5612_v46 = vpop.eup %5611  ;;  %v4240_v35 = vadd.f32 1.0, %v5610_v43 }
 0xf53   :  { %v4236_v48 = vadd.f32 1.0, %v5612_v46  ;;  %5615 = vrcp.f32 %v4238_v60  ;;  %v5614_v44 = vpop.eup %5613  ;;  %vm4321_vm12 = vweird.f32 %v4238_v60  ;;  %v4327_v56 = vand.u32 2147483648, %v4238_v60 }
 0xf54   :  { %5617 = vrcp.f32 %v4240_v35  ;;  %v8539_v45 = vadd.f32 1.0, %v5614_v44  ;;  %v4357_v16 = vand.u32 2147483648, %v4240_v35  ;;  %v4325_v63 = vand.u32 2147483647, %v4238_v60  ;;  %v4597_v44 = vld [vmem:[%s8900_s4 + $0x180] sm:$0xff] }
 0xf55   :  { %5619 = vrcp.f32 %v4236_v48  ;;  %vm4351_vm6 = vweird.f32 %v4240_v35  ;;  %v4355_v5 = vand.u32 2147483647, %v4240_v35  ;;  %v4297_v31 = vand.u32 2147483648, %v4236_v48 }
 0xf56   :  { %5621 = vrcp.f32 %v8539_v45  ;;  %vm4291_vm9 = vweird.f32 %v4236_v48  ;;  %v4295_v23 = vand.u32 2147483647, %v4236_v48  ;;  %v4328_v11 = vor.u32 1.1754944e-38, %v4327_v56  ;;  %v4591_v56 = vld [vmem:[%s8900_s4 + $0x150] sm:$0xff] }
 0xf57   :  { %v4358_v14 = vor.u32 1.1754944e-38, %v4357_v16  ;;  %vm4326_vm1 = vcmp.eq.f32.partialorder %v4325_v63, 8.507059e+37  ;;  %vm4356_vm5 = vcmp.eq.f32.partialorder %v4355_v5, 8.507059e+37  ;;  %v4298_v1 = vor.u32 1.1754944e-38, %v4297_v31  ;;  %v4489_v16 = vld [vmem:[%s8900_s4 + $0x40] sm:$0xff]  ;;  %v4590_v63 = vld [vmem:[%s8900_s4 + $0x148] sm:$0xff] }
 0xf58   :  { %vm4296_vm10 = vcmp.eq.f32.partialorder %v4295_v23, 8.507059e+37  ;;  %v4267_v15 = vand.u32 2147483648, %v8539_v45  ;;  %v4265_v9 = vand.u32 2147483647, %v8539_v45  ;;  %v4629_v5 = vld [vmem:[%s8900_s4 + $0x1d0] sm:$0xff]  ;;  %v4589_v31 = vld [vmem:[%s8900_s4 + $0x140] sm:$0xff] }
 0xf59   :  { %v5616_v57 = vpop.eup %5615  ;;  %v4486_v23 = vld [vmem:[%s8900_s4 + $0x28] sm:$0xff] }
 0xf5a   :  { %v5618_v27 = vpop.eup %5617  ;;  %v4317_v24 = vmul.f32 %v5616_v57, %v4238_v60  ;;  %vm4322_vm3 = vweird.f32 %v5616_v57  ;;  %v4268_v10 = vor.u32 1.1754944e-38, %v4267_v15  ;;  %v5758_v60 = vld [vmem:[%s8896_s0 + $0xc0] sm:$0xff]  ;;  %v4557_v15 = vld [vmem:[%s8900_s4 + $0xf8] sm:$0xff] }
 0xf5b   :  { %v5620_v51 = vpop.eup %5619  ;;  %v4347_v7 = vmul.f32 %v5618_v27, %v4240_v35  ;;  %vm4352_vm14 = vweird.f32 %v5618_v27  ;;  %vm8546_vm7 = vmor %vm4321_vm12, %vm4322_vm3  ;;  %vm3802_vm3 = vcmp.gt.f32.partialorder %v5757_v40, 5.0  ;;  %v4598_v35 = vld [vmem:[%s8900_s4 + $0x188] sm:$0xff]  ;;  %v4558_v40 = vld [vmem:[%s8900_s4 + $0x100] sm:$0xff] }
 0xf5c   :  { %v4287_v17 = vmul.f32 %v5620_v51, %v4236_v48  ;;  %v4318_v33 = vsub.f32 1.0, %v4317_v24  ;;  %v8542_v26 = vpop.eup %5621  ;;  %vm4292_vm2 = vweird.f32 %v5620_v51  ;;  %vm8550_vm4 = vmor %vm4351_vm6, %vm4352_vm14  ;;  %vm4261_vm14 = vweird.f32 %v8539_v45  ;;  %v4503_v24 = vld [vmem:[%s8900_s4 + $0xb0] sm:$0xff]  ;;  %4571 = vmatpush.msrb.mxu3 %v4558_v40  ;;  %v4735_v40 = vld [vmem:[%s8900_s4 + $0x288] sm:$0xff] }
 0xf5d   :  { %v4348_v37 = vsub.f32 1.0, %v4347_v7  ;;  %v4257_v42 = vmul.f32 %v8542_v26, %v8539_v45  ;;  %vm8559_vm8 = vmor %vm4291_vm9, %vm4292_vm2  ;;  %vm4262_vm13 = vweird.f32 %v8542_v26  ;;  %vm4266_vm2 = vcmp.eq.f32.partialorder %v4265_v9, 8.507059e+37  ;;  %v4496_v45 = vld [vmem:[%s8900_s4 + $0x78] sm:$0xff]  ;;  %v4502_v7 = vld [vmem:[%s8900_s4 + $0xa8] sm:$0xff] }
 0xf5e   :  { %v4288_v50 = vsub.f32 1.0, %v4287_v17  ;;  %v4319_v61 = vmul.f32 %v5616_v57, %v4318_v33  ;;  %vm4263_vm12 = vmor %vm4261_vm14, %vm4262_vm13  ;;  %vm4454_vm6 = vcmask 261120   ;;  %4528 = vmatpush.msrb.mxu2 %v4496_v45  ;;  %v4595_v17 = vld [vmem:[%s8900_s4 + $0x170] sm:$0xff]  ;;  %v4493_v33 = vld [vmem:[%s8900_s4 + $0x60] sm:$0xff]  ;;  %4572 = vmatpush.msrb.mxu3 %v4557_v15 }
 0xf5f   :  { %v4349_v28 = vmul.f32 %v5618_v27, %v4348_v37  ;;  %v4258_v38 = vsub.f32 1.0, %v4257_v42  ;;  %v4501_v37 = vld [vmem:[%s8900_s4 + $0xa0] sm:$0xff]  ;;  %v4491_v42 = vld [vmem:[%s8900_s4 + $0x50] sm:$0xff]  ;;  %v4555_v9 = vld [vmem:[%s8900_s4 + $0xe8] sm:$0xff] }
 0xf60   :  { %v4289_v53 = vmul.f32 %v5620_v51, %v4288_v50  ;;  %v4320_v36 = vadd.f32 %v5616_v57, %v4319_v61  ;;  %v4492_v50 = vld [vmem:[%s8900_s4 + $0x58] sm:$0xff]  ;;  %v4719_v15 = vld [vmem:[%s8900_s4 + $0x208] sm:$0xff] }
 0xf61   :  { %v4350_v13 = vadd.f32 %v5618_v27, %v4349_v28  ;;  %v4259_v22 = vmul.f32 %v8542_v26, %v4258_v38  ;;  %v4500_v61 = vld [vmem:[%s8900_s4 + $0x98] sm:$0xff]  ;;  %v4593_v28 = vld [vmem:[%s8900_s4 + $0x160] sm:$0xff]  ;;  %v4498_v38 = vld [vmem:[%s8900_s4 + $0x88] sm:$0xff] }
 0xf62   :  { %v4290_v8 = vadd.f32 %v5620_v51, %v4289_v53  ;;  %v4324_v4 = vsel %vm8546_vm7, %v5616_v57, %v4320_v36  ;;  %vm3801_vm7 = vcmp.gt.f32.partialorder %v5758_v60, 5.0  ;;  %v4495_v57 = vld [vmem:[%s8900_s4 + $0x70] sm:$0xff]  ;;  %v4592_v36 = vld [vmem:[%s8900_s4 + $0x158] sm:$0xff] }
 0xf63   :  { %v4354_v0 = vsel %vm8550_vm4, %v5618_v27, %v4350_v13  ;;  %v4329_v47 = vsel %vm4326_vm1, %v4328_v11, %v4324_v4  ;;  %v4260_v59 = vadd.f32 %v8542_v26, %v4259_v22  ;;  %v4596_v27 = vld [vmem:[%s8900_s4 + $0x178] sm:$0xff]  ;;  %4529 = vmatpush.msrb.mxu2 %v4495_v57  ;;  %v4499_v53 = vld [vmem:[%s8900_s4 + $0x90] sm:$0xff]  ;;  %v4490_v13 = vld [vmem:[%s8900_s4 + $0x48] sm:$0xff]  ;;  %vm4656_vm4 = vcmask 2048  }
 0xf64   :  { %v4294_v30 = vsel %vm8559_vm8, %v5620_v51, %v4290_v8  ;;  %v4359_v58 = vsel %vm4356_vm5, %v4358_v14, %v4354_v0  ;;  %v4494_v51 = vld [vmem:[%s8900_s4 + $0x68] sm:$0xff]  ;;  %v4488_v8 = vld [vmem:[%s8900_s4 + $0x38] sm:$0xff]  ;;  %v4587_v0 = vld [vmem:[%s8900_s4 + $0x130] sm:$0xff] }
 0xf65   :  { %v4299_v20 = vsel %vm4296_vm10, %v4298_v1, %v4294_v30  ;;  %v4264_v34 = vsel %vm4263_vm12, %v8542_v26, %v4260_v59  ;;  %4530 = vmatpush.msrb.mxu2 %v4494_v51  ;;  %v4594_v26 = vld [vmem:[%s8900_s4 + $0x168] sm:$0xff]  ;;  %v4588_v4 = vld [vmem:[%s8900_s4 + $0x138] sm:$0xff]  ;;  %v4485_v11 = vld [vmem:[%s8900_s4 + $0x20] sm:$0xff]  ;;  %vm4706_vm10 = vcmask 518144  }
 0xf66   :  { %v4269_v43 = vsel %vm4266_vm2, %v4268_v10, %v4264_v34  ;;  %v4585_v14 = vld [vmem:[%s8900_s4 + $0x120] sm:$0xff]  ;;  %v4483_v30 = vld [vmem:[%s8900_s4 + $0x10] sm:$0xff]  ;;  %v4584_v22 = vld [vmem:[%s8900_s4 + $0x118] sm:$0xff] }
 0xf67   :  { %4531 = vmatpush.msrb.mxu2 %v4493_v33  ;;  %v4583_v1 = vld [vmem:[%s8900_s4 + $0x110] sm:$0xff]  ;;  %v4622_v59 = vld [vmem:[%s8900_s4 + $0x198] sm:$0xff] }
 0xf68   :  { %v4553_v60 = vld [vmem:[%s8900_s4 + $0xd8] sm:$0xff] }
 0xf69   :  { %4532 = vmatpush.msrb.mxu2 %v4492_v50  ;;  %v5787_v50 = vmov 0  }
 0xf6a   :  { %5043 = vset.pattern.permute.xlu1 %v5787_v50  ;;  %5044 = vset.pattern.permute.xlu0 %v5787_v50 }
 0xf6b   :  { %4533 = vmatpush.msrb.mxu2 %v4491_v42 }
 0xf6d   :  { %4534 = vmatpush.msrb.mxu2 %v4490_v13 }
 0xf6f   :  { %4535 = vmatpush.msrb.mxu2 %v4489_v16 }
 0xf71   :  { %4536 = vmatpush.msrb.mxu2 %v4488_v8 }
 0xf73   :  { %4537 = vmatpush.msrb.mxu2 %v4487_v55 }
 0xf75   :  { %4538 = vmatpush.msrb.mxu2 %v4486_v23 }
 0xf76   :  { %v4438_v62 = vpop.permute.xlu1 %4437 }
 0xf77   :  { %v4447_v19 = vmul.f32 %v4438_v62, %v4329_v47  ;;  %v4586_v62 = vld [vmem:[%s8900_s4 + $0x128] sm:$0xff]  ;;  %4539 = vmatpush.msrb.mxu2 %v4485_v11 }
 0xf78   :  { %v4482_v47 = vld [vmem:[%s8900_s4 + $0x8] sm:$0xff] }
 0xf79   :  { %v4451_v49 = vsel %vm3803_vm15, %v4447_v19, %v8456_v52  ;;  %4540 = vmatpush.msrb.mxu2 %v4484_v21  ;;  %v4627_v19 = vld [vmem:[%s8900_s4 + $0x1c0] sm:$0xff]  ;;  %vm4819_vm15 = vcmask 1040384  }
 0xf7b   :  { %4541 = vmatpush.msrb.mxu2 %v4483_v30 }
 0xf7d   :  { %4542 = vmatpush.msrb.mxu2 %v4482_v47  ;;  %v4729_v47 = vld [vmem:[%s8900_s4 + $0x258] sm:$0xff] }
 0xf85   :  { %v4436_v29 = vpop.permute.xlu2 %4435 }
 0xf86   :  { %v4446_v3 = vmul.f32 %v4436_v29, %v4299_v20  ;;  %v4481_v29 = vld [vmem:[%s8900_s4] sm:$0xff]  ;;  %v4625_v20 = vld [vmem:[%s8900_s4 + $0x1b0] sm:$0xff] }
 0xf87   :  { %4543 = vmatpush.msrb.mxu2 %v4481_v29  ;;  %v4727_v29 = vld [vmem:[%s8900_s4 + $0x248] sm:$0xff] }
 0xfb8   :  { %v4440_v6 = vpop.permute.xlu0 %4439 }
 0xfb9   :  { %v4448_v2 = vmul.f32 %v4440_v6, %v4359_v58  ;;  %v4480_v58 = vld [vmem:[%s8899_s3 + $0x10] sm:$0x7]  ;;  %v4478_v6 = vld [vmem:[%s8899_s3] sm:$0x1] }
 0xfba   :  { %4544 = vmatmul.f32.vlgmr.msrb.gmra.mxu2 %v4478_v6  ;;  %v4725_v6 = vld [vmem:[%s8900_s4 + $0x238] sm:$0xff] }
 0xfbb   :  { %v4452_v25 = vsel %vm3804_vm11, %v4448_v2, %v8463_v18  ;;  %v4450_v18 = vsel %vm3802_vm3, %v4446_v3, %v8446_v32  ;;  %v4453_v32 = vld [vmem:[%s8897_s1] sm:$0xf]  ;;  %v4626_v2 = vld [vmem:[%s8900_s4 + $0x1b8] sm:$0xff]  ;;  %v4624_v3 = vld [vmem:[%s8900_s4 + $0x1a8] sm:$0xff]  ;;  %vm4695_vm11 = vcmask 1042432  }
 0xfbc   :  { %4470 = vmatpush.msra.mxu0 %v4452_v25  ;;  %v4623_v25 = vld [vmem:[%s8900_s4 + $0x1a0] sm:$0xff] }
 0xfbe   :  { %4471 = vmatpush.msra.mxu0 %v4451_v49  ;;  %v4556_v49 = vld [vmem:[%s8900_s4 + $0xf0] sm:$0xff] }
 0xfbf   :  { %4573 = vmatpush.msrb.mxu3 %v4556_v49  ;;  %v4734_v49 = vld [vmem:[%s8900_s4 + $0x280] sm:$0xff] }
 0xfc0   :  { %4472 = vmatpush.msra.mxu0 %v4450_v18  ;;  %v5045_v18 = vld [vmem:[%s8900_s4 + $0x190] ss:$0 sm:$0xff] }
 0xfc1   :  { %4574 = vmatpush.msrb.mxu3 %v4555_v9  ;;  %v4718_v9 = vld [vmem:[%s8900_s4 + $0x200] sm:$0xff] }
 0xfc2   :  { %v4434_v46 = vpop.permute.xlu0 %4433 }
 0xfc3   :  { %v4445_v52 = vmul.f32 %v4434_v46, %v4269_v43  ;;  %v4554_v46 = vld [vmem:[%s8900_s4 + $0xe0] sm:$0xff] }
 0xfc4   :  { %4575 = vmatpush.msrb.mxu3 %v4554_v46  ;;  %v4789_v46 = vld [vmem:[%s8900_s4 + $0x2d0] sm:$0xff] }
 0xfc5   :  { %v4449_v48 = vsel %vm3801_vm7, %v4445_v52, %v8431_v41  ;;  %v4504_v41 = vld [vmem:[%s8900_s4 + $0xb8] sm:$0xff]  ;;  %v4552_v52 = vld [vmem:[%s8900_s4 + $0xd0] sm:$0xff] }
 0xfc6   :  { %4473 = vmatpush.msra.mxu0 %v4449_v48  ;;  %4516 = vmatpush.msra.mxu1 %v4504_v41 }
 0xfc7   :  { %5033 = vmatmul.msk.f32.vlgmr.msra.gmra.mxu0 %vm4454_vm6, %v4453_v32  ;;  %4576 = vmatpush.msrb.mxu3 %v4553_v60  ;;  %v4732_v60 = vld [vmem:[%s8900_s4 + $0x270] sm:$0xff] }
 0xfc8   :  { %4601 = vmatpush.msrb.mxu0 %v4598_v35  ;;  %4517 = vmatpush.msra.mxu1 %v4503_v24  ;;  %v4551_v35 = vld [vmem:[%s8900_s4 + $0xc8] sm:$0xff] }
 0xfc9   :  { %4577 = vmatpush.msrb.mxu3 %v4552_v52  ;;  %v4716_v52 = vld [vmem:[%s8900_s4 + $0x1f0] sm:$0xff] }
 0xfca   :  { %4602 = vmatpush.msrb.mxu0 %v4597_v44  ;;  %4518 = vmatpush.msra.mxu1 %v4502_v7  ;;  %v4548_v44 = vld [vmem:[%s8900_s4 + $0xc0] sm:$0x1] }
 0xfcb   :  { %4578 = vmatpush.msrb.mxu3 %v4551_v35  ;;  %v4788_v35 = vld [vmem:[%s8900_s4 + $0x2c8] sm:$0xff] }
 0xfcc   :  { %4603 = vmatpush.msrb.mxu0 %v4596_v27  ;;  %4519 = vmatpush.msra.mxu1 %v4501_v37  ;;  %v5046_v27 = vld [vmem:[%s8900_s4 + $0x1d8] ss:$0 sm:$0xff] }
 0xfcd   :  { %4761 = vmatpush.msra.mxu3 %v4729_v47 }
 0xfce   :  { %4604 = vmatpush.msrb.mxu0 %v4595_v17  ;;  %4520 = vmatpush.msra.mxu1 %v4500_v61 }
 0xfd0   :  { %4605 = vmatpush.msrb.mxu0 %v4594_v26  ;;  %4521 = vmatpush.msra.mxu1 %v4499_v53 }
 0xfd2   :  { %4606 = vmatpush.msrb.mxu0 %v4593_v28  ;;  %4522 = vmatpush.msra.mxu1 %v4498_v38 }
 0xfd4   :  { %4607 = vmatpush.msrb.mxu0 %v4592_v36  ;;  %4523 = vmatpush.msra.mxu1 %v4497_v54 }
 0xfd6   :  { %4608 = vmatpush.msrb.mxu0 %v4591_v56  ;;  %4643 = vmatpush.msrb.mxu1 %v4629_v5 }
 0xfd8   :  { %4609 = vmatpush.msrb.mxu0 %v4590_v63  ;;  %4644 = vmatpush.msrb.mxu1 %v4628_v12  ;;  %v4724_v12 = vld [vmem:[%s8900_s4 + $0x230] sm:$0xff] }
 0xfda   :  { %4610 = vmatpush.msrb.mxu0 %v4589_v31  ;;  %4645 = vmatpush.msrb.mxu1 %v4627_v19  ;;  %v4723_v19 = vld [vmem:[%s8900_s4 + $0x228] sm:$0xff] }
 0xfdc   :  { %4611 = vmatpush.msrb.mxu0 %v4588_v4  ;;  %4646 = vmatpush.msrb.mxu1 %v4626_v2  ;;  %v4722_v2 = vld [vmem:[%s8900_s4 + $0x220] sm:$0xff] }
 0xfde   :  { %4612 = vmatpush.msrb.mxu0 %v4587_v0  ;;  %4647 = vmatpush.msrb.mxu1 %v4625_v20  ;;  %v4737_v20 = vld [vmem:[%s8900_s4 + $0x298] sm:$0xff] }
 0xfdf   :  { %4749 = vmatpush.msra.mxu2 %v4737_v20 }
 0xfe0   :  { %4613 = vmatpush.msrb.mxu0 %v4586_v62  ;;  %4648 = vmatpush.msrb.mxu1 %v4624_v3  ;;  %v4721_v3 = vld [vmem:[%s8900_s4 + $0x218] sm:$0xff] }
 0xfe2   :  { %4614 = vmatpush.msrb.mxu0 %v4585_v14  ;;  %4649 = vmatpush.msrb.mxu1 %v4623_v25  ;;  %v4736_v25 = vld [vmem:[%s8900_s4 + $0x290] sm:$0xff] }
 0xfe3   :  { %4750 = vmatpush.msra.mxu2 %v4736_v25 }
 0xfe4   :  { %4615 = vmatpush.msrb.mxu0 %v4584_v22  ;;  %4650 = vmatpush.msrb.mxu1 %v4622_v59  ;;  %v4720_v59 = vld [vmem:[%s8900_s4 + $0x210] sm:$0xff] }
 0xfe5   :  { %4751 = vmatpush.msra.mxu2 %v4735_v40 }
 0xfe6   :  { %4616 = vmatpush.msrb.mxu0 %v4583_v1  ;;  %v4728_v1 = vld [vmem:[%s8900_s4 + $0x250] sm:$0xff] }
 0xfe7   :  { %4617 = vmatmul.f32.vlgmr.msrb.gmra.mxu0 %v4480_v58  ;;  %4762 = vmatpush.msra.mxu3 %v4728_v1  ;;  %v4726_v58 = vld [vmem:[%s8900_s4 + $0x240] sm:$0xff] }
 0xfe8   :  { %4752 = vmatpush.msra.mxu2 %v4734_v49 }
 0xfe9   :  { %4763 = vmatpush.msra.mxu3 %v4727_v29 }
 0xfeb   :  { %4764 = vmatpush.msra.mxu3 %v4726_v58 }
 0xfed   :  { %4765 = vmatpush.msra.mxu3 %v4725_v6 }
 0xfef   :  { %4766 = vmatpush.msra.mxu3 %v4724_v12 }
 0xff1   :  { %4767 = vmatpush.msra.mxu3 %v4723_v19 }
 0xff3   :  { %4768 = vmatpush.msra.mxu3 %v4722_v2 }
 0xff5   :  { %4769 = vmatpush.msra.mxu3 %v4721_v3 }
 0xff7   :  { %4770 = vmatpush.msra.mxu3 %v4720_v59 }
 0xff9   :  { %4771 = vmatpush.msra.mxu3 %v4719_v15 }
 0xffb   :  { %4772 = vmatpush.msra.mxu3 %v4718_v9 }
0x103d   :  { %v4545_v48 = vpop.f32.mrf.mxu2 }
0x1044   :  { %v8732_v39 = vpop.f32.mrf.mxu0 }
0x1045   :  { %5034 = vmatmul.msk.f32.vlgmr.msra.gmra.mxu1 %vm117_vm0, %v8732_v39 }
0x1064   :  { %v4618_v34 = vpop.f32.mrf.mxu0 }
0x1065   :  { %v4619_v10 = vadd.f32 %v5045_v18, %v4618_v34  ;;  %v4791_v18 = vld [vmem:[%s8900_s4 + $0x2e0] sm:$0xff]  ;;  %v4790_v34 = vld [vmem:[%s8900_s4 + $0x2d8] sm:$0xff] }
0x1066   :  { %4804 = vmatpush.msra.mxu1 %v4791_v18 }
0x1067   :  { %v4621_v43 = vmax.f32 %v4619_v10, 0.0  ;;  %v4733_v10 = vld [vmem:[%s8900_s4 + $0x278] sm:$0xff] }
0x1068   :  { %4805 = vmatpush.msra.mxu1 %v4790_v34  ;;  %4753 = vmatpush.msra.mxu2 %v4733_v10 }
0x1069   :  { %5036 = vmatmul.msk.f32.vlgmr.msrb.gmra.mxu1 %vm117_vm0, %v4621_v43  ;;  %v4717_v43 = vld [vmem:[%s8900_s4 + $0x1f8] sm:$0xff] }
0x106a   :  { %4773 = vmatpush.msra.mxu3 %v4717_v43  ;;  %4806 = vmatpush.msra.mxu1 %v4789_v46 }
0x106b   :  { %4754 = vmatpush.msra.mxu2 %v4732_v60 }
0x106c   :  { %4774 = vmatpush.msra.mxu3 %v4716_v52  ;;  %4807 = vmatpush.msra.mxu1 %v4788_v35 }
0x10c2   :  { %v4525_v32 = vpop.f32.mrf.mxu1 }
0x10c3   :  { %v4546_v45 = vadd.f32 %v4545_v48, %v4525_v32  ;;  %v4731_v48 = vld [vmem:[%s8900_s4 + $0x268] sm:$0xff] }
0x10c4   :  { %v4715_v32 = vld [vmem:[%s8900_s4 + $0x1e8] sm:$0xff]  ;;  %4755 = vmatpush.msra.mxu2 %v4731_v48 }
0x10c5   :  { %v4549_v57 = vadd.f32 %v4548_v44, %v4546_v45  ;;  %v4730_v44 = vld [vmem:[%s8900_s4 + $0x260] sm:$0xff]  ;;  %4775 = vmatpush.msra.mxu3 %v4715_v32 }
0x10c6   :  { %v4714_v45 = vld [vmem:[%s8900_s4 + $0x1e0] sm:$0xff]  ;;  %4756 = vmatpush.msra.mxu2 %v4730_v44 }
0x10c7   :  { %v4550_v41 = vmax.f32 %v4549_v57, 0.0  ;;  %4776 = vmatpush.msra.mxu3 %v4714_v45  ;;  %v4479_v57 = vld [vmem:[%s8899_s3 + $0x8] sm:$0x7] }
0x10c9   :  { %5035 = vmatmul.msk.f32.vlgmr.msrb.gmra.mxu3 %vm117_vm0, %v4550_v41  ;;  %v4703_v41 = vrot.slane %v8732_v39, 1  ;;  %v4787_v39 = vld [vmem:[%s8900_s4 + $0x2c0] sm:$0xff] }
0x10ca   :  { %4808 = vmatpush.msra.mxu1 %v4787_v39 }
0x10e6   :  { %v4652_v51 = vpop.f32.mrf.mxu1 }
0x10e7   :  { %v4653_v24 = vadd.f32 %v5046_v27, %v4652_v51 }
0x10e9   :  { %v4655_v7 = vmul.f32 10.0, %v4653_v24 }
0x10eb   :  { %v4657_v17 = vsel %vm4656_vm4, %v4655_v7, -inf }
0x10ec   :  { %v4658_v33 = vrot.slane %v4657_v17, 4 }
0x10ee   :  { %v4659_v37 = vmax.f32 %v4657_v17, %v4658_v33 }
0x10f0   :  { %v4660_v26 = vrot.slane %v4659_v37, 2 }
0x10f2   :  { %v4661_v61 = vmax.f32 %v4659_v37, %v4660_v26 }
0x10f4   :  { %v4662_v28 = vrot.slane %v4661_v61, 1 }
0x10f6   :  { %v4663_v42 = vmax.f32 %v4661_v61, %v4662_v28 }
0x10f8   :  { %v4664_v53 = vsub.f32 %v4655_v7, %v4663_v42 }
0x10fa   :  { %v4665_v36 = vmul.f32 1.442695, %v4664_v53 }
0x10fc   :  { %5623 = vpow2.f32 %v4665_v36 }
0x1102   :  { %v5624_v13 = vpop.eup %5623 }
0x1103   :  { %v4667_v38 = vsel %vm4656_vm4, %v5624_v13, 0.0 }
0x1104   :  { %v4668_v56 = vrot.slane %v4667_v38, 4 }
0x1106   :  { %v4669_v16 = vadd.f32 %v4668_v56, %v4667_v38 }
0x1108   :  { %v4670_v54 = vrot.slane %v4669_v16, 2 }
0x110a   :  { %v4671_v63 = vadd.f32 %v4670_v54, %v4669_v16  ;;  %v4786_v16 = vld [vmem:[%s8900_s4 + $0x2b8] sm:$0xff]  ;;  %v4785_v54 = vld [vmem:[%s8900_s4 + $0x2b0] sm:$0xff] }
0x110b   :  { %4809 = vmatpush.msra.mxu1 %v4786_v16 }
0x110c   :  { %v4672_v8 = vrot.slane %v4671_v63, 1 }
0x110d   :  { %4810 = vmatpush.msra.mxu1 %v4785_v54 }
0x110e   :  { %v4673_v5 = vadd.f32 %v4672_v8, %v4671_v63  ;;  %v4784_v63 = vld [vmem:[%s8900_s4 + $0x2a8] sm:$0xff] }
0x110f   :  { %4811 = vmatpush.msra.mxu1 %v4784_v63 }
0x1110   :  { %5625 = vrcp.f32 %v4673_v5  ;;  %v4685_v23 = vand.u32 2147483648, %v4673_v5  ;;  %v4683_v11 = vand.u32 2147483647, %v4673_v5  ;;  %vm4679_vm8 = vweird.f32 %v4673_v5 }
0x1112   :  { %v4686_v21 = vor.u32 1.1754944e-38, %v4685_v23  ;;  %vm4684_vm5 = vcmp.eq.f32.partialorder %v4683_v11, 8.507059e+37  ;;  %v4792_v11 = vld [vmem:[%s8900_s4 + $0x2e8] sm:$0x1] }
0x1116   :  { %v5626_v31 = vpop.eup %5625 }
0x1117   :  { %v4675_v55 = vmul.f32 %v5626_v31, %v4673_v5  ;;  %vm4680_vm9 = vweird.f32 %v5626_v31 }
0x1118   :  { %vm4681_vm1 = vmor %vm4679_vm8, %vm4680_vm9 }
0x1119   :  { %v4676_v4 = vsub.f32 1.0, %v4675_v55  ;;  %v4781_v55 = vld [vmem:[%s8900_s4 + $0x2a0] sm:$0x1] }
0x111b   :  { %v4677_v0 = vmul.f32 %v5626_v31, %v4676_v4 }
0x111d   :  { %v4678_v62 = vadd.f32 %v5626_v31, %v4677_v0 }
0x111f   :  { %v4682_v14 = vsel %vm4681_vm1, %v5626_v31, %v4678_v62  ;;  %v4559_v62 = vld [vmem:[%s8900_s4 + $0x108] sm:$0x1] }
0x1120   :  { %v4687_v30 = vsel %vm4684_vm5, %v4686_v21, %v4682_v14 }
0x1121   :  { %v4688_v22 = vmul.f32 %v5624_v13, %v4687_v30 }
0x1123   :  { %4691 = vperm.xlu1 %5043, %v4688_v22  }
0x114c   :  { %v4580_v8 = vpop.f32.mrf.mxu3 }
0x114d   :  { %v4581_v30 = vadd.f32 %v4580_v8, %v4559_v62 }
0x1195   :  { %v4692_v27 = vpop.permute.xlu1 %4691 }
0x1196   :  { %v4694_v51 = vmul.f32 %v4692_v27, %v4479_v57  ;;  %v4705_v24 = vmul.f32 %v4703_v41, %v4692_v27 }
0x1198   :  { %v4696_v7 = vsel %vm4695_vm11, %v4694_v51, 0.0  ;;  %v4707_v17 = vsel %vm4706_vm10, %v4705_v24, 0.0 }
0x1199   :  { %v4697_v33 = vrot.slane %v4696_v7, 4  ;;  %v4708_v37 = vrot.slane %v4707_v17, 4 }
0x119b   :  { %v4698_v26 = vadd.f32 %v4697_v33, %v4696_v7  ;;  %v4709_v50 = vadd.f32 %v4708_v37, %v4707_v17 }
0x119d   :  { %v4699_v61 = vrot.slane %v4698_v26, 2  ;;  %v4710_v28 = vrot.slane %v4709_v50, 2 }
0x119f   :  { %v4700_v42 = vadd.f32 %v4699_v61, %v4698_v26  ;;  %v4711_v53 = vadd.f32 %v4710_v28, %v4709_v50 }
0x11a1   :  { %v4701_v36 = vrot.slane %v4700_v42, 1  ;;  %v4712_v13 = vrot.slane %v4711_v53, 1 }
0x11a3   :  { %v4702_v38 = vadd.f32 %v4701_v36, %v4700_v42  ;;  %v4713_v56 = vadd.f32 %v4712_v13, %v4711_v53 }
0x11a5   :  { %5037 = vmatmul.msk.f32.vlgmr.msra.gmra.mxu2 %vm117_vm0, %v4713_v56  ;;  %4777 = vmatmul.f32.vlgmr.msra.gmra.mxu3 %v4702_v38 }
0x1228   :  { %v4758_v5 = vpop.f32.mrf.mxu2  ;;  %v4778_v31 = vpop.f32.mrf.mxu3 }
0x1229   :  { %v4779_v4 = vadd.f32 %v4778_v31, %v4758_v5 }
0x122b   :  { %v4782_v23 = vadd.f32 %v4781_v55, %v4779_v4 }
0x122d   :  { %v4783_v0 = vmax.f32 %v4782_v23, 0.0 }
0x122f   :  { %5038 = vmatmul.msk.f32.vlgmr.msra.gmra.mxu1 %vm117_vm0, %v4783_v0  ;;  %vm4821_vm0 = vcmask 517120  }
0x12ac   :  { %v4813_v21 = vpop.f32.mrf.mxu1 }
0x12ad   :  { %v4814_v14 = vadd.f32 %v4813_v21, %v4792_v11 }
0x12af   :  { %v4817_v22 = vrot.slane %v4814_v14, 7 }
0x12b1   :  { %v4820_v47 = vsel %vm4819_vm15, %v4581_v30, %v4817_v22 }
0x12b2   :  { %4822 = vst.msk [vmem:[#allocation2] sm:$0x3] %vm4821_vm0, %v4820_v47 }
0x12b3   :  { %4833 = dma.vmem_to_hbm [thread:$0]  %s4829_s9, 32, %s4831_s12, [#allocation3]  }
0x12b4   :  { %5783 = dma.done.wait [#allocation3], 32  }
0x12b5   :  { %5784 = vsyncadd [#allocation3], 4294967264 }
0x12b6   :  { %4838 = vsyncpa [#allocation3], 1 }

</bundles_post_ra>
